<compile_context>
chip_gen: v7x
topology: tpu7x:2x2x1
jax: 0.10.0
libtpu: 0.0.40
codegen_flags: <defaults>
</compile_context>

<pallas_src>
import functools
import math

import numpy as np
import jax
import jax.numpy as jnp
from jax.experimental import pallas as pl
from jax.experimental.pallas import tpu as pltpu

LEAKY_SLOPE = 0.01
BN_EPS = 1e-5
MASK_VAL = 1e8


# --------------------------------------------------------------------------
# In-kernel helper bodies (traced inside the single fused kernel)
# --------------------------------------------------------------------------
def _leaky(h):
    return jnp.where(h > 0, h, LEAKY_SLOPE * h)


def _bn_train_lrelu(h, gamma, beta):
    # BatchNorm2d training-mode (biased) stats over all rows, two-pass centered
    # variance, then a fused scale/shift and LeakyReLU.
    mu = jnp.mean(h, axis=0, keepdims=True)
    xc = h - mu
    var = jnp.mean(xc * xc, axis=0, keepdims=True)
    scale = gamma * jax.lax.rsqrt(var + BN_EPS)
    return _leaky(xc * scale + beta)


# --------------------------------------------------------------------------
# Single fused kernel: full GNN forward, everything VMEM-resident
# --------------------------------------------------------------------------
def _gnn_fused_kernel(x_ref, prm_ref, out_ref, *, num_layer, layout):
    # `layout` is static: per-parameter (row_offset, rows, cols) into prm_ref.
    def load(idx):
        off, r, c = layout[idx]
        return prm_ref[off:off + r, :c]

    x = x_ref[...]
    B, N, F0 = x.shape

    # Layer-invariant (N, N) identity / diagonal-mask tiles, built once.
    ii = jax.lax.broadcasted_iota(jnp.int32, (N, N), 0)
    jj = jax.lax.broadcasted_iota(jnp.int32, (N, N), 1)
    eye = (ii == jj).astype(jnp.float32)
    diag_mask = eye * jnp.float32(MASK_VAL)

    A = jnp.broadcast_to(eye[None, :, :], (B, N, N))        # A_init = I
    gc = x                                                   # (B, N, Ftot)
    # Cached pairwise |x_i - x_j| slab, flattened channel-last.
    d_slab = jnp.abs(x[:, :, None, :] - x[:, None, :, :]).reshape(B * N * N, F0)

    h_gcn = None
    for layer in range(num_layer):
        base = 20 * layer
        is_last = layer == num_layer - 1

        # ---- distance_func: 4 x (1x1 conv -> BN(train) -> LeakyReLU) ------
        h = d_slab
        for li in range(4):
            w = load(base + 4 * li + 0)                      # (d_in, d_out)
            b = load(base + 4 * li + 1)                      # (1, d_out)
            g = load(base + 4 * li + 2)                      # (1, d_out)
            be = load(base + 4 * li + 3)                     # (1, d_out)
            h = jnp.dot(h, w, preferred_element_type=jnp.float32) + b
            h = _bn_train_lrelu(h, g, be)

        # Final 1x1 conv to one channel -> similarity matrix (B, N, N).
        w_last = load(base + 16)                             # (1, c_last)
        b_last = load(base + 17)                             # (1, 1)
        c_last = h.shape[-1]
        h4 = h.reshape(B, N, N, c_last)
        s = jnp.sum(h4 * w_last.reshape(1, 1, 1, c_last), axis=-1) + b_last

        # ---- Adj_update: -1e8 on diag, softmax over dim 2, A -= softmax ---
        s = s - diag_mask[None, :, :]
        s = s - jnp.max(s, axis=-1, keepdims=True)
        e = jnp.exp(s)
        A = A - e / jnp.sum(e, axis=-1, keepdims=True)

        # ---- GCN: h = bmm(A, Gc) @ W + b == bmm(A, Gc @ W) + b ------------
        wg = load(base + 18)                                 # (Ftot, d_out)
        bg = load(base + 19)                                 # (1, d_out)
        ftot = gc.shape[-1]
        d_out = wg.shape[-1]
        xw = jnp.dot(gc.reshape(B * N, ftot), wg,
                     preferred_element_type=jnp.float32).reshape(B, N, d_out)
        h_gcn = jnp.einsum("bij,bjd->bid", A, xw,
                           preferred_element_type=jnp.float32) + bg

        if not is_last:
            h_gcn = _leaky(h_gcn)
            # Feature concat [h_new, Gc] and its cached pair slab.
            gc = jnp.concatenate([h_gcn, gc], axis=-1)
            d_new = jnp.abs(h_gcn[:, :, None, :] - h_gcn[:, None, :, :]
                            ).reshape(B * N * N, d_out)
            d_slab = jnp.concatenate([d_new, d_slab], axis=-1)

    out_ref[...] = h_gcn[:, 0, :]                            # only node 0 leaves VMEM


# --------------------------------------------------------------------------
# Host-side parameter packing: one contiguous (rows, cmax) buffer, 8-row
# aligned per parameter so all in-kernel static slices start on a sublane tile.
# --------------------------------------------------------------------------
def _pack_params(params, num_layer):
    flat = []
    for i in range(num_layer - 1):
        flat.extend(params["adj"][i])        # 18 arrays per distance block
        flat.extend(params["gcn"][i])        # W, b
    flat.extend(params["adj_final"])
    flat.extend(params["gcn_final"])

    cmax = max(int(p.shape[1]) for p in flat)
    layout = []
    rows = 0
    for p in flat:
        r, c = int(p.shape[0]), int(p.shape[1])
        layout.append((rows, r, c))
        rows += ((r + 7) // 8) * 8           # 8-row (sublane) alignment
    buf = np.zeros((rows, cmax), np.float32)
    for p, (off, r, c) in zip(flat, layout):
        buf[off:off + r, :c] = np.asarray(p)
    return jnp.asarray(buf), tuple(layout)


def gnn_forward(x, params, num_layer):
    B, N, _ = x.shape
    n_way = params["gcn_final"][0].shape[1]
    prm_buf, layout = _pack_params(params, num_layer)
    return pl.pallas_call(
        functools.partial(_gnn_fused_kernel, num_layer=num_layer, layout=layout),
        out_shape=jax.ShapeDtypeStruct((B, n_way), jnp.float32),
        in_specs=[pl.BlockSpec(memory_space=pltpu.MemorySpace.VMEM),
                  pl.BlockSpec(memory_space=pltpu.MemorySpace.VMEM)],
        out_specs=pl.BlockSpec(memory_space=pltpu.MemorySpace.VMEM),
    )(x, prm_buf)


# --------------------------------------------------------------------------
# Deterministic parameter initialization (shapes follow the module __init__)
# --------------------------------------------------------------------------
def _init_distance_params(key, d_in, nf_adj):
    # conv channel progression for ratio=[2,2,1,1]: d_in -> 2nf -> 2nf -> nf -> nf -> 1
    dims = [d_in, 2 * nf_adj, 2 * nf_adj, nf_adj, nf_adj]
    prm = []
    for i in range(4):
        key, kw, kb, kg, kbe = jax.random.split(key, 5)
        prm.append(jax.random.normal(kw, (dims[i], dims[i + 1]), jnp.float32)
                   * (1.0 / math.sqrt(dims[i])))                                  # conv W (in,out)
        prm.append(0.1 * jax.random.normal(kb, (1, dims[i + 1]), jnp.float32))    # conv bias
        prm.append(1.0 + 0.1 * jax.random.normal(kg, (1, dims[i + 1]), jnp.float32))  # BN gamma
        prm.append(0.1 * jax.random.normal(kbe, (1, dims[i + 1]), jnp.float32))   # BN beta
    key, kw, kb = jax.random.split(key, 3)
    prm.append(jax.random.normal(kw, (1, dims[-1]), jnp.float32)
               * (1.0 / math.sqrt(dims[-1])))                                     # final conv W (1,C)
    prm.append(0.1 * jax.random.normal(kb, (1, 1), jnp.float32))                  # final conv bias
    return prm


def _init_linear_params(key, d_in, d_out):
    kw, kb = jax.random.split(key)
    w = jax.random.normal(kw, (d_in, d_out), jnp.float32) * (1.0 / math.sqrt(d_in))
    b = 0.1 * jax.random.normal(kb, (1, d_out), jnp.float32)
    return w, b


def init_gnn_params(key, input_dimens, nf_gc, nf_adj, n_way, num_layer):
    adj_params, gcn_params = [], []
    for i in range(num_layer - 1):
        d = input_dimens + nf_gc * i
        key, k1, k2 = jax.random.split(key, 3)
        adj_params.append(_init_distance_params(k1, d, nf_adj))
        gcn_params.append(_init_linear_params(k2, d, nf_gc))
    d = input_dimens + nf_gc * (num_layer - 1)
    key, k1, k2 = jax.random.split(key, 3)
    adj_final = _init_distance_params(k1, d, nf_adj)
    gcn_final = _init_linear_params(k2, d, n_way)
    return dict(adj=adj_params, gcn=gcn_params, adj_final=adj_final, gcn_final=gcn_final)


if __name__ == "__main__":
    # shapes consistent with the module: n_way=5, embedding_size=27,
    # nf_gc=16, nf_adj=8, num_layer_gc=3, batch=2, N=8 graph nodes.
    B, N = 2, 8
    n_way, embedding_size = 5, 27
    nf_gc, nf_adj, num_layer = 16, 8, 3
    F0 = embedding_size + n_way                      # 32 input features per node

    key = jax.random.PRNGKey(0)
    key, kx, kp = jax.random.split(key, 3)
    x = jax.random.normal(kx, (B, N, F0), jnp.float32)
    params = init_gnn_params(kp, F0, nf_gc, nf_adj, n_way, num_layer)

    out = gnn_forward(x, params, num_layer)
    out = jax.block_until_ready(out)
    assert out.shape == (B, n_way), out.shape
    assert bool(jnp.all(jnp.isfinite(out)))
    print("KERNEL_OK")
</pallas_src>

<mosaic_0001>
module attributes {stable_mosaic.version = 11 : i64} {
  func.func @_gnn_fused_kernel(%arg0: memref<2x8x32xf32, #tpu.memory_space<vmem>>, %arg1: memref<768x16xf32, #tpu.memory_space<vmem>>, %arg2: memref<2x5xf32, #tpu.memory_space<vmem>>) attributes {dimension_semantics = [], scalar_prefetch = 0 : i64, scratch_operands = 0 : i64, tpu.core_type = #tpu.core_type<tc>} {
    %c0 = arith.constant 0 : index
    %c0_0 = arith.constant 0 : index
    %c0_1 = arith.constant 0 : index
    %0 = vector.load %arg0[%c0, %c0_0, %c0_1] : memref<2x8x32xf32, #tpu.memory_space<vmem>>, vector<2x8x32xf32>
    %1 = tpu.iota {dimensions = array<i32: 0>} : vector<8x8xi32>
    %2 = tpu.iota {dimensions = array<i32: 1>} : vector<8x8xi32>
    %3 = arith.cmpi eq, %1, %2 : vector<8x8xi32>
    %4 = arith.extui %3 : vector<8x8xi1> to vector<8x8xi32>
    %5 = arith.sitofp %4 : vector<8x8xi32> to vector<8x8xf32>
    %cst = arith.constant 1.000000e+08 : f32
    %6 = vector.broadcast %cst : f32 to vector<8x8xf32>
    %7 = arith.mulf %5, %6 : vector<8x8xf32>
    %8 = vector.shape_cast %5 : vector<8x8xf32> to vector<1x8x8xf32>
    %9 = vector.shape_cast %8 : vector<1x8x8xf32> to vector<1x8x8xf32>
    %10 = vector.broadcast %9 : vector<1x8x8xf32> to vector<2x8x8xf32>
    %11 = vector.shape_cast %0 : vector<2x8x32xf32> to vector<2x8x1x32xf32>
    %12 = vector.shape_cast %0 : vector<2x8x32xf32> to vector<2x1x8x32xf32>
    %13 = vector.broadcast %11 : vector<2x8x1x32xf32> to vector<2x8x8x32xf32>
    %14 = vector.broadcast %12 : vector<2x1x8x32xf32> to vector<2x8x8x32xf32>
    %15 = arith.subf %13, %14 : vector<2x8x8x32xf32>
    %16 = math.absf %15 : vector<2x8x8x32xf32>
    %17 = vector.shape_cast %16 : vector<2x8x8x32xf32> to vector<128x32xf32>
    %c0_2 = arith.constant 0 : index
    %c0_3 = arith.constant 0 : index
    %18 = vector.load %arg1[%c0_2, %c0_3] : memref<768x16xf32, #tpu.memory_space<vmem>>, vector<32x16xf32>
    %c32 = arith.constant 32 : index
    %c0_4 = arith.constant 0 : index
    %19 = vector.load %arg1[%c32, %c0_4] : memref<768x16xf32, #tpu.memory_space<vmem>>, vector<1x16xf32>
    %c40 = arith.constant 40 : index
    %c0_5 = arith.constant 0 : index
    %20 = vector.load %arg1[%c40, %c0_5] : memref<768x16xf32, #tpu.memory_space<vmem>>, vector<1x16xf32>
    %c48 = arith.constant 48 : index
    %c0_6 = arith.constant 0 : index
    %21 = vector.load %arg1[%c48, %c0_6] : memref<768x16xf32, #tpu.memory_space<vmem>>, vector<1x16xf32>
    %cst_7 = arith.constant dense<0.000000e+00> : vector<128x16xf32>
    %22 = tpu.matmul %17, %18, %cst_7 {dimension_numbers = #tpu.dot_dimension_numbers<[1], [0], [0], [1], [0, 0, 1, 1], [], []>} : vector<128x32xf32>, vector<32x16xf32>, vector<128x16xf32> -> vector<128x16xf32>
    %23 = vector.broadcast %19 : vector<1x16xf32> to vector<128x16xf32>
    %24 = arith.addf %22, %23 : vector<128x16xf32>
    %cst_8 = arith.constant dense<0.000000e+00> : vector<16xf32>
    %25 = vector.multi_reduction <add>, %24, %cst_8 [0] : vector<128x16xf32> to vector<16xf32>
    %26 = vector.shape_cast %25 : vector<16xf32> to vector<1x16xf32>
    %cst_9 = arith.constant 1.280000e+02 : f32
    %27 = vector.broadcast %cst_9 : f32 to vector<1x16xf32>
    %28 = arith.divf %26, %27 : vector<1x16xf32>
    %29 = vector.broadcast %28 : vector<1x16xf32> to vector<128x16xf32>
    %30 = arith.subf %24, %29 : vector<128x16xf32>
    %31 = arith.mulf %30, %30 : vector<128x16xf32>
    %cst_10 = arith.constant dense<0.000000e+00> : vector<16xf32>
    %32 = vector.multi_reduction <add>, %31, %cst_10 [0] : vector<128x16xf32> to vector<16xf32>
    %33 = vector.shape_cast %32 : vector<16xf32> to vector<1x16xf32>
    %cst_11 = arith.constant 1.280000e+02 : f32
    %34 = vector.broadcast %cst_11 : f32 to vector<1x16xf32>
    %35 = arith.divf %33, %34 : vector<1x16xf32>
    %cst_12 = arith.constant 9.99999974E-6 : f32
    %36 = vector.broadcast %cst_12 : f32 to vector<1x16xf32>
    %37 = arith.addf %35, %36 : vector<1x16xf32>
    %38 = math.rsqrt %37 : vector<1x16xf32>
    %39 = arith.mulf %20, %38 : vector<1x16xf32>
    %40 = vector.broadcast %39 : vector<1x16xf32> to vector<128x16xf32>
    %41 = arith.mulf %30, %40 : vector<128x16xf32>
    %42 = vector.broadcast %21 : vector<1x16xf32> to vector<128x16xf32>
    %43 = arith.addf %41, %42 : vector<128x16xf32>
    %cst_13 = arith.constant 0.000000e+00 : f32
    %44 = vector.broadcast %cst_13 : f32 to vector<128x16xf32>
    %45 = arith.cmpf ogt, %43, %44 : vector<128x16xf32>
    %cst_14 = arith.constant 0.00999999977 : f32
    %46 = vector.broadcast %cst_14 : f32 to vector<128x16xf32>
    %47 = arith.mulf %46, %43 : vector<128x16xf32>
    %48 = arith.select %45, %43, %47 : vector<128x16xi1>, vector<128x16xf32>
    %c56 = arith.constant 56 : index
    %c0_15 = arith.constant 0 : index
    %49 = vector.load %arg1[%c56, %c0_15] : memref<768x16xf32, #tpu.memory_space<vmem>>, vector<16x16xf32>
    %c72 = arith.constant 72 : index
    %c0_16 = arith.constant 0 : index
    %50 = vector.load %arg1[%c72, %c0_16] : memref<768x16xf32, #tpu.memory_space<vmem>>, vector<1x16xf32>
    %c80 = arith.constant 80 : index
    %c0_17 = arith.constant 0 : index
    %51 = vector.load %arg1[%c80, %c0_17] : memref<768x16xf32, #tpu.memory_space<vmem>>, vector<1x16xf32>
    %c88 = arith.constant 88 : index
    %c0_18 = arith.constant 0 : index
    %52 = vector.load %arg1[%c88, %c0_18] : memref<768x16xf32, #tpu.memory_space<vmem>>, vector<1x16xf32>
    %cst_19 = arith.constant dense<0.000000e+00> : vector<128x16xf32>
    %53 = tpu.matmul %48, %49, %cst_19 {dimension_numbers = #tpu.dot_dimension_numbers<[1], [0], [0], [1], [0, 0, 1, 1], [], []>} : vector<128x16xf32>, vector<16x16xf32>, vector<128x16xf32> -> vector<128x16xf32>
    %54 = vector.broadcast %50 : vector<1x16xf32> to vector<128x16xf32>
    %55 = arith.addf %53, %54 : vector<128x16xf32>
    %cst_20 = arith.constant dense<0.000000e+00> : vector<16xf32>
    %56 = vector.multi_reduction <add>, %55, %cst_20 [0] : vector<128x16xf32> to vector<16xf32>
    %57 = vector.shape_cast %56 : vector<16xf32> to vector<1x16xf32>
    %cst_21 = arith.constant 1.280000e+02 : f32
    %58 = vector.broadcast %cst_21 : f32 to vector<1x16xf32>
    %59 = arith.divf %57, %58 : vector<1x16xf32>
    %60 = vector.broadcast %59 : vector<1x16xf32> to vector<128x16xf32>
    %61 = arith.subf %55, %60 : vector<128x16xf32>
    %62 = arith.mulf %61, %61 : vector<128x16xf32>
    %cst_22 = arith.constant dense<0.000000e+00> : vector<16xf32>
    %63 = vector.multi_reduction <add>, %62, %cst_22 [0] : vector<128x16xf32> to vector<16xf32>
    %64 = vector.shape_cast %63 : vector<16xf32> to vector<1x16xf32>
    %cst_23 = arith.constant 1.280000e+02 : f32
    %65 = vector.broadcast %cst_23 : f32 to vector<1x16xf32>
    %66 = arith.divf %64, %65 : vector<1x16xf32>
    %cst_24 = arith.constant 9.99999974E-6 : f32
    %67 = vector.broadcast %cst_24 : f32 to vector<1x16xf32>
    %68 = arith.addf %66, %67 : vector<1x16xf32>
    %69 = math.rsqrt %68 : vector<1x16xf32>
    %70 = arith.mulf %51, %69 : vector<1x16xf32>
    %71 = vector.broadcast %70 : vector<1x16xf32> to vector<128x16xf32>
    %72 = arith.mulf %61, %71 : vector<128x16xf32>
    %73 = vector.broadcast %52 : vector<1x16xf32> to vector<128x16xf32>
    %74 = arith.addf %72, %73 : vector<128x16xf32>
    %cst_25 = arith.constant 0.000000e+00 : f32
    %75 = vector.broadcast %cst_25 : f32 to vector<128x16xf32>
    %76 = arith.cmpf ogt, %74, %75 : vector<128x16xf32>
    %cst_26 = arith.constant 0.00999999977 : f32
    %77 = vector.broadcast %cst_26 : f32 to vector<128x16xf32>
    %78 = arith.mulf %77, %74 : vector<128x16xf32>
    %79 = arith.select %76, %74, %78 : vector<128x16xi1>, vector<128x16xf32>
    %c96 = arith.constant 96 : index
    %c0_27 = arith.constant 0 : index
    %80 = vector.load %arg1[%c96, %c0_27] : memref<768x16xf32, #tpu.memory_space<vmem>>, vector<16x8xf32>
    %c112 = arith.constant 112 : index
    %c0_28 = arith.constant 0 : index
    %81 = vector.load %arg1[%c112, %c0_28] : memref<768x16xf32, #tpu.memory_space<vmem>>, vector<1x8xf32>
    %c120 = arith.constant 120 : index
    %c0_29 = arith.constant 0 : index
    %82 = vector.load %arg1[%c120, %c0_29] : memref<768x16xf32, #tpu.memory_space<vmem>>, vector<1x8xf32>
    %c128 = arith.constant 128 : index
    %c0_30 = arith.constant 0 : index
    %83 = vector.load %arg1[%c128, %c0_30] : memref<768x16xf32, #tpu.memory_space<vmem>>, vector<1x8xf32>
    %cst_31 = arith.constant dense<0.000000e+00> : vector<128x8xf32>
    %84 = tpu.matmul %79, %80, %cst_31 {dimension_numbers = #tpu.dot_dimension_numbers<[1], [0], [0], [1], [0, 0, 1, 1], [], []>} : vector<128x16xf32>, vector<16x8xf32>, vector<128x8xf32> -> vector<128x8xf32>
    %85 = vector.broadcast %81 : vector<1x8xf32> to vector<128x8xf32>
    %86 = arith.addf %84, %85 : vector<128x8xf32>
    %cst_32 = arith.constant dense<0.000000e+00> : vector<8xf32>
    %87 = vector.multi_reduction <add>, %86, %cst_32 [0] : vector<128x8xf32> to vector<8xf32>
    %88 = vector.shape_cast %87 : vector<8xf32> to vector<1x8xf32>
    %cst_33 = arith.constant 1.280000e+02 : f32
    %89 = vector.broadcast %cst_33 : f32 to vector<1x8xf32>
    %90 = arith.divf %88, %89 : vector<1x8xf32>
    %91 = vector.broadcast %90 : vector<1x8xf32> to vector<128x8xf32>
    %92 = arith.subf %86, %91 : vector<128x8xf32>
    %93 = arith.mulf %92, %92 : vector<128x8xf32>
    %cst_34 = arith.constant dense<0.000000e+00> : vector<8xf32>
    %94 = vector.multi_reduction <add>, %93, %cst_34 [0] : vector<128x8xf32> to vector<8xf32>
    %95 = vector.shape_cast %94 : vector<8xf32> to vector<1x8xf32>
    %cst_35 = arith.constant 1.280000e+02 : f32
    %96 = vector.broadcast %cst_35 : f32 to vector<1x8xf32>
    %97 = arith.divf %95, %96 : vector<1x8xf32>
    %cst_36 = arith.constant 9.99999974E-6 : f32
    %98 = vector.broadcast %cst_36 : f32 to vector<1x8xf32>
    %99 = arith.addf %97, %98 : vector<1x8xf32>
    %100 = math.rsqrt %99 : vector<1x8xf32>
    %101 = arith.mulf %82, %100 : vector<1x8xf32>
    %102 = vector.broadcast %101 : vector<1x8xf32> to vector<128x8xf32>
    %103 = arith.mulf %92, %102 : vector<128x8xf32>
    %104 = vector.broadcast %83 : vector<1x8xf32> to vector<128x8xf32>
    %105 = arith.addf %103, %104 : vector<128x8xf32>
    %cst_37 = arith.constant 0.000000e+00 : f32
    %106 = vector.broadcast %cst_37 : f32 to vector<128x8xf32>
    %107 = arith.cmpf ogt, %105, %106 : vector<128x8xf32>
    %cst_38 = arith.constant 0.00999999977 : f32
    %108 = vector.broadcast %cst_38 : f32 to vector<128x8xf32>
    %109 = arith.mulf %108, %105 : vector<128x8xf32>
    %110 = arith.select %107, %105, %109 : vector<128x8xi1>, vector<128x8xf32>
    %c136 = arith.constant 136 : index
    %c0_39 = arith.constant 0 : index
    %111 = vector.load %arg1[%c136, %c0_39] : memref<768x16xf32, #tpu.memory_space<vmem>>, vector<8x8xf32>
    %c144 = arith.constant 144 : index
    %c0_40 = arith.constant 0 : index
    %112 = vector.load %arg1[%c144, %c0_40] : memref<768x16xf32, #tpu.memory_space<vmem>>, vector<1x8xf32>
    %c152 = arith.constant 152 : index
    %c0_41 = arith.constant 0 : index
    %113 = vector.load %arg1[%c152, %c0_41] : memref<768x16xf32, #tpu.memory_space<vmem>>, vector<1x8xf32>
    %c160 = arith.constant 160 : index
    %c0_42 = arith.constant 0 : index
    %114 = vector.load %arg1[%c160, %c0_42] : memref<768x16xf32, #tpu.memory_space<vmem>>, vector<1x8xf32>
    %cst_43 = arith.constant dense<0.000000e+00> : vector<128x8xf32>
    %115 = tpu.matmul %110, %111, %cst_43 {dimension_numbers = #tpu.dot_dimension_numbers<[1], [0], [0], [1], [0, 0, 1, 1], [], []>} : vector<128x8xf32>, vector<8x8xf32>, vector<128x8xf32> -> vector<128x8xf32>
    %116 = vector.broadcast %112 : vector<1x8xf32> to vector<128x8xf32>
    %117 = arith.addf %115, %116 : vector<128x8xf32>
    %cst_44 = arith.constant dense<0.000000e+00> : vector<8xf32>
    %118 = vector.multi_reduction <add>, %117, %cst_44 [0] : vector<128x8xf32> to vector<8xf32>
    %119 = vector.shape_cast %118 : vector<8xf32> to vector<1x8xf32>
    %cst_45 = arith.constant 1.280000e+02 : f32
    %120 = vector.broadcast %cst_45 : f32 to vector<1x8xf32>
    %121 = arith.divf %119, %120 : vector<1x8xf32>
    %122 = vector.broadcast %121 : vector<1x8xf32> to vector<128x8xf32>
    %123 = arith.subf %117, %122 : vector<128x8xf32>
    %124 = arith.mulf %123, %123 : vector<128x8xf32>
    %cst_46 = arith.constant dense<0.000000e+00> : vector<8xf32>
    %125 = vector.multi_reduction <add>, %124, %cst_46 [0] : vector<128x8xf32> to vector<8xf32>
    %126 = vector.shape_cast %125 : vector<8xf32> to vector<1x8xf32>
    %cst_47 = arith.constant 1.280000e+02 : f32
    %127 = vector.broadcast %cst_47 : f32 to vector<1x8xf32>
    %128 = arith.divf %126, %127 : vector<1x8xf32>
    %cst_48 = arith.constant 9.99999974E-6 : f32
    %129 = vector.broadcast %cst_48 : f32 to vector<1x8xf32>
    %130 = arith.addf %128, %129 : vector<1x8xf32>
    %131 = math.rsqrt %130 : vector<1x8xf32>
    %132 = arith.mulf %113, %131 : vector<1x8xf32>
    %133 = vector.broadcast %132 : vector<1x8xf32> to vector<128x8xf32>
    %134 = arith.mulf %123, %133 : vector<128x8xf32>
    %135 = vector.broadcast %114 : vector<1x8xf32> to vector<128x8xf32>
    %136 = arith.addf %134, %135 : vector<128x8xf32>
    %cst_49 = arith.constant 0.000000e+00 : f32
    %137 = vector.broadcast %cst_49 : f32 to vector<128x8xf32>
    %138 = arith.cmpf ogt, %136, %137 : vector<128x8xf32>
    %cst_50 = arith.constant 0.00999999977 : f32
    %139 = vector.broadcast %cst_50 : f32 to vector<128x8xf32>
    %140 = arith.mulf %139, %136 : vector<128x8xf32>
    %141 = arith.select %138, %136, %140 : vector<128x8xi1>, vector<128x8xf32>
    %c168 = arith.constant 168 : index
    %c0_51 = arith.constant 0 : index
    %142 = vector.load %arg1[%c168, %c0_51] : memref<768x16xf32, #tpu.memory_space<vmem>>, vector<1x8xf32>
    %c176 = arith.constant 176 : index
    %c0_52 = arith.constant 0 : index
    %143 = vector.load %arg1[%c176, %c0_52] : memref<768x16xf32, #tpu.memory_space<vmem>>, vector<1x1xf32>
    %144 = vector.shape_cast %141 : vector<128x8xf32> to vector<2x8x8x8xf32>
    %145 = vector.shape_cast %142 : vector<1x8xf32> to vector<1x1x1x8xf32>
    %146 = vector.broadcast %145 : vector<1x1x1x8xf32> to vector<2x8x8x8xf32>
    %147 = arith.mulf %144, %146 : vector<2x8x8x8xf32>
    %cst_53 = arith.constant dense<0.000000e+00> : vector<2x8x8xf32>
    %148 = vector.multi_reduction <add>, %147, %cst_53 [3] : vector<2x8x8x8xf32> to vector<2x8x8xf32>
    %149 = vector.shape_cast %143 : vector<1x1xf32> to vector<1x1x1xf32>
    %150 = vector.broadcast %149 : vector<1x1x1xf32> to vector<2x8x8xf32>
    %151 = arith.addf %148, %150 : vector<2x8x8xf32>
    %152 = vector.shape_cast %7 : vector<8x8xf32> to vector<1x8x8xf32>
    %153 = vector.broadcast %152 : vector<1x8x8xf32> to vector<2x8x8xf32>
    %154 = arith.subf %151, %153 : vector<2x8x8xf32>
    %cst_54 = arith.constant dense<0xFF800000> : vector<2x8xf32>
    %155 = vector.multi_reduction <maximumf>, %154, %cst_54 [2] : vector<2x8x8xf32> to vector<2x8xf32>
    %156 = vector.shape_cast %155 : vector<2x8xf32> to vector<2x8x1xf32>
    %157 = vector.broadcast %156 : vector<2x8x1xf32> to vector<2x8x8xf32>
    %158 = arith.subf %154, %157 : vector<2x8x8xf32>
    %159 = math.exp %158 : vector<2x8x8xf32>
    %cst_55 = arith.constant dense<0.000000e+00> : vector<2x8xf32>
    %160 = vector.multi_reduction <add>, %159, %cst_55 [2] : vector<2x8x8xf32> to vector<2x8xf32>
    %161 = vector.shape_cast %160 : vector<2x8xf32> to vector<2x8x1xf32>
    %162 = vector.broadcast %161 : vector<2x8x1xf32> to vector<2x8x8xf32>
    %163 = arith.divf %159, %162 : vector<2x8x8xf32>
    %164 = arith.subf %10, %163 : vector<2x8x8xf32>
    %c184 = arith.constant 184 : index
    %c0_56 = arith.constant 0 : index
    %165 = vector.load %arg1[%c184, %c0_56] : memref<768x16xf32, #tpu.memory_space<vmem>>, vector<32x16xf32>
    %c216 = arith.constant 216 : index
    %c0_57 = arith.constant 0 : index
    %166 = vector.load %arg1[%c216, %c0_57] : memref<768x16xf32, #tpu.memory_space<vmem>>, vector<1x16xf32>
    %167 = vector.shape_cast %0 : vector<2x8x32xf32> to vector<16x32xf32>
    %cst_58 = arith.constant dense<0.000000e+00> : vector<16x16xf32>
    %168 = tpu.matmul %167, %165, %cst_58 {dimension_numbers = #tpu.dot_dimension_numbers<[1], [0], [0], [1], [0, 0, 1, 1], [], []>} : vector<16x32xf32>, vector<32x16xf32>, vector<16x16xf32> -> vector<16x16xf32>
    %169 = vector.shape_cast %168 : vector<16x16xf32> to vector<2x8x16xf32>
    "tpu.trace_start"() <{level = 10 : i32, message = "bij,bjd->bid"}> : () -> ()
    %cst_59 = arith.constant dense<0.000000e+00> : vector<2x8x16xf32>
    %170 = tpu.matmul %164, %169, %cst_59 {dimension_numbers = #tpu.dot_dimension_numbers<[2], [1], [1], [2], [0, 0, 0, 1, 1, 2], [0], [0]>} : vector<2x8x8xf32>, vector<2x8x16xf32>, vector<2x8x16xf32> -> vector<2x8x16xf32>
    "tpu.trace_stop"() : () -> ()
    %171 = vector.shape_cast %166 : vector<1x16xf32> to vector<1x1x16xf32>
    %172 = vector.broadcast %171 : vector<1x1x16xf32> to vector<2x8x16xf32>
    %173 = arith.addf %170, %172 : vector<2x8x16xf32>
    %cst_60 = arith.constant 0.000000e+00 : f32
    %174 = vector.broadcast %cst_60 : f32 to vector<2x8x16xf32>
    %175 = arith.cmpf ogt, %173, %174 : vector<2x8x16xf32>
    %cst_61 = arith.constant 0.00999999977 : f32
    %176 = vector.broadcast %cst_61 : f32 to vector<2x8x16xf32>
    %177 = arith.mulf %176, %173 : vector<2x8x16xf32>
    %178 = arith.select %175, %173, %177 : vector<2x8x16xi1>, vector<2x8x16xf32>
    %179 = tpu.concatenate %178, %0 in 2 : vector<2x8x16xf32>, vector<2x8x32xf32> -> vector<2x8x48xf32>
    %180 = vector.shape_cast %178 : vector<2x8x16xf32> to vector<2x8x1x16xf32>
    %181 = vector.shape_cast %178 : vector<2x8x16xf32> to vector<2x1x8x16xf32>
    %182 = vector.broadcast %180 : vector<2x8x1x16xf32> to vector<2x8x8x16xf32>
    %183 = vector.broadcast %181 : vector<2x1x8x16xf32> to vector<2x8x8x16xf32>
    %184 = arith.subf %182, %183 : vector<2x8x8x16xf32>
    %185 = math.absf %184 : vector<2x8x8x16xf32>
    %186 = vector.shape_cast %185 : vector<2x8x8x16xf32> to vector<128x16xf32>
    %187 = tpu.concatenate %186, %17 in 1 : vector<128x16xf32>, vector<128x32xf32> -> vector<128x48xf32>
    %c224 = arith.constant 224 : index
    %c0_62 = arith.constant 0 : index
    %188 = vector.load %arg1[%c224, %c0_62] : memref<768x16xf32, #tpu.memory_space<vmem>>, vector<48x16xf32>
    %c272 = arith.constant 272 : index
    %c0_63 = arith.constant 0 : index
    %189 = vector.load %arg1[%c272, %c0_63] : memref<768x16xf32, #tpu.memory_space<vmem>>, vector<1x16xf32>
    %c280 = arith.constant 280 : index
    %c0_64 = arith.constant 0 : index
    %190 = vector.load %arg1[%c280, %c0_64] : memref<768x16xf32, #tpu.memory_space<vmem>>, vector<1x16xf32>
    %c288 = arith.constant 288 : index
    %c0_65 = arith.constant 0 : index
    %191 = vector.load %arg1[%c288, %c0_65] : memref<768x16xf32, #tpu.memory_space<vmem>>, vector<1x16xf32>
    %cst_66 = arith.constant dense<0.000000e+00> : vector<128x16xf32>
    %192 = tpu.matmul %187, %188, %cst_66 {dimension_numbers = #tpu.dot_dimension_numbers<[1], [0], [0], [1], [0, 0, 1, 1], [], []>} : vector<128x48xf32>, vector<48x16xf32>, vector<128x16xf32> -> vector<128x16xf32>
    %193 = vector.broadcast %189 : vector<1x16xf32> to vector<128x16xf32>
    %194 = arith.addf %192, %193 : vector<128x16xf32>
    %cst_67 = arith.constant dense<0.000000e+00> : vector<16xf32>
    %195 = vector.multi_reduction <add>, %194, %cst_67 [0] : vector<128x16xf32> to vector<16xf32>
    %196 = vector.shape_cast %195 : vector<16xf32> to vector<1x16xf32>
    %cst_68 = arith.constant 1.280000e+02 : f32
    %197 = vector.broadcast %cst_68 : f32 to vector<1x16xf32>
    %198 = arith.divf %196, %197 : vector<1x16xf32>
    %199 = vector.broadcast %198 : vector<1x16xf32> to vector<128x16xf32>
    %200 = arith.subf %194, %199 : vector<128x16xf32>
    %201 = arith.mulf %200, %200 : vector<128x16xf32>
    %cst_69 = arith.constant dense<0.000000e+00> : vector<16xf32>
    %202 = vector.multi_reduction <add>, %201, %cst_69 [0] : vector<128x16xf32> to vector<16xf32>
    %203 = vector.shape_cast %202 : vector<16xf32> to vector<1x16xf32>
    %cst_70 = arith.constant 1.280000e+02 : f32
    %204 = vector.broadcast %cst_70 : f32 to vector<1x16xf32>
    %205 = arith.divf %203, %204 : vector<1x16xf32>
    %cst_71 = arith.constant 9.99999974E-6 : f32
    %206 = vector.broadcast %cst_71 : f32 to vector<1x16xf32>
    %207 = arith.addf %205, %206 : vector<1x16xf32>
    %208 = math.rsqrt %207 : vector<1x16xf32>
    %209 = arith.mulf %190, %208 : vector<1x16xf32>
    %210 = vector.broadcast %209 : vector<1x16xf32> to vector<128x16xf32>
    %211 = arith.mulf %200, %210 : vector<128x16xf32>
    %212 = vector.broadcast %191 : vector<1x16xf32> to vector<128x16xf32>
    %213 = arith.addf %211, %212 : vector<128x16xf32>
    %cst_72 = arith.constant 0.000000e+00 : f32
    %214 = vector.broadcast %cst_72 : f32 to vector<128x16xf32>
    %215 = arith.cmpf ogt, %213, %214 : vector<128x16xf32>
    %cst_73 = arith.constant 0.00999999977 : f32
    %216 = vector.broadcast %cst_73 : f32 to vector<128x16xf32>
    %217 = arith.mulf %216, %213 : vector<128x16xf32>
    %218 = arith.select %215, %213, %217 : vector<128x16xi1>, vector<128x16xf32>
    %c296 = arith.constant 296 : index
    %c0_74 = arith.constant 0 : index
    %219 = vector.load %arg1[%c296, %c0_74] : memref<768x16xf32, #tpu.memory_space<vmem>>, vector<16x16xf32>
    %c312 = arith.constant 312 : index
    %c0_75 = arith.constant 0 : index
    %220 = vector.load %arg1[%c312, %c0_75] : memref<768x16xf32, #tpu.memory_space<vmem>>, vector<1x16xf32>
    %c320 = arith.constant 320 : index
    %c0_76 = arith.constant 0 : index
    %221 = vector.load %arg1[%c320, %c0_76] : memref<768x16xf32, #tpu.memory_space<vmem>>, vector<1x16xf32>
    %c328 = arith.constant 328 : index
    %c0_77 = arith.constant 0 : index
    %222 = vector.load %arg1[%c328, %c0_77] : memref<768x16xf32, #tpu.memory_space<vmem>>, vector<1x16xf32>
    %cst_78 = arith.constant dense<0.000000e+00> : vector<128x16xf32>
    %223 = tpu.matmul %218, %219, %cst_78 {dimension_numbers = #tpu.dot_dimension_numbers<[1], [0], [0], [1], [0, 0, 1, 1], [], []>} : vector<128x16xf32>, vector<16x16xf32>, vector<128x16xf32> -> vector<128x16xf32>
    %224 = vector.broadcast %220 : vector<1x16xf32> to vector<128x16xf32>
    %225 = arith.addf %223, %224 : vector<128x16xf32>
    %cst_79 = arith.constant dense<0.000000e+00> : vector<16xf32>
    %226 = vector.multi_reduction <add>, %225, %cst_79 [0] : vector<128x16xf32> to vector<16xf32>
    %227 = vector.shape_cast %226 : vector<16xf32> to vector<1x16xf32>
    %cst_80 = arith.constant 1.280000e+02 : f32
    %228 = vector.broadcast %cst_80 : f32 to vector<1x16xf32>
    %229 = arith.divf %227, %228 : vector<1x16xf32>
    %230 = vector.broadcast %229 : vector<1x16xf32> to vector<128x16xf32>
    %231 = arith.subf %225, %230 : vector<128x16xf32>
    %232 = arith.mulf %231, %231 : vector<128x16xf32>
    %cst_81 = arith.constant dense<0.000000e+00> : vector<16xf32>
    %233 = vector.multi_reduction <add>, %232, %cst_81 [0] : vector<128x16xf32> to vector<16xf32>
    %234 = vector.shape_cast %233 : vector<16xf32> to vector<1x16xf32>
    %cst_82 = arith.constant 1.280000e+02 : f32
    %235 = vector.broadcast %cst_82 : f32 to vector<1x16xf32>
    %236 = arith.divf %234, %235 : vector<1x16xf32>
    %cst_83 = arith.constant 9.99999974E-6 : f32
    %237 = vector.broadcast %cst_83 : f32 to vector<1x16xf32>
    %238 = arith.addf %236, %237 : vector<1x16xf32>
    %239 = math.rsqrt %238 : vector<1x16xf32>
    %240 = arith.mulf %221, %239 : vector<1x16xf32>
    %241 = vector.broadcast %240 : vector<1x16xf32> to vector<128x16xf32>
    %242 = arith.mulf %231, %241 : vector<128x16xf32>
    %243 = vector.broadcast %222 : vector<1x16xf32> to vector<128x16xf32>
    %244 = arith.addf %242, %243 : vector<128x16xf32>
    %cst_84 = arith.constant 0.000000e+00 : f32
    %245 = vector.broadcast %cst_84 : f32 to vector<128x16xf32>
    %246 = arith.cmpf ogt, %244, %245 : vector<128x16xf32>
    %cst_85 = arith.constant 0.00999999977 : f32
    %247 = vector.broadcast %cst_85 : f32 to vector<128x16xf32>
    %248 = arith.mulf %247, %244 : vector<128x16xf32>
    %249 = arith.select %246, %244, %248 : vector<128x16xi1>, vector<128x16xf32>
    %c336 = arith.constant 336 : index
    %c0_86 = arith.constant 0 : index
    %250 = vector.load %arg1[%c336, %c0_86] : memref<768x16xf32, #tpu.memory_space<vmem>>, vector<16x8xf32>
    %c352 = arith.constant 352 : index
    %c0_87 = arith.constant 0 : index
    %251 = vector.load %arg1[%c352, %c0_87] : memref<768x16xf32, #tpu.memory_space<vmem>>, vector<1x8xf32>
    %c360 = arith.constant 360 : index
    %c0_88 = arith.constant 0 : index
    %252 = vector.load %arg1[%c360, %c0_88] : memref<768x16xf32, #tpu.memory_space<vmem>>, vector<1x8xf32>
    %c368 = arith.constant 368 : index
    %c0_89 = arith.constant 0 : index
    %253 = vector.load %arg1[%c368, %c0_89] : memref<768x16xf32, #tpu.memory_space<vmem>>, vector<1x8xf32>
    %cst_90 = arith.constant dense<0.000000e+00> : vector<128x8xf32>
    %254 = tpu.matmul %249, %250, %cst_90 {dimension_numbers = #tpu.dot_dimension_numbers<[1], [0], [0], [1], [0, 0, 1, 1], [], []>} : vector<128x16xf32>, vector<16x8xf32>, vector<128x8xf32> -> vector<128x8xf32>
    %255 = vector.broadcast %251 : vector<1x8xf32> to vector<128x8xf32>
    %256 = arith.addf %254, %255 : vector<128x8xf32>
    %cst_91 = arith.constant dense<0.000000e+00> : vector<8xf32>
    %257 = vector.multi_reduction <add>, %256, %cst_91 [0] : vector<128x8xf32> to vector<8xf32>
    %258 = vector.shape_cast %257 : vector<8xf32> to vector<1x8xf32>
    %cst_92 = arith.constant 1.280000e+02 : f32
    %259 = vector.broadcast %cst_92 : f32 to vector<1x8xf32>
    %260 = arith.divf %258, %259 : vector<1x8xf32>
    %261 = vector.broadcast %260 : vector<1x8xf32> to vector<128x8xf32>
    %262 = arith.subf %256, %261 : vector<128x8xf32>
    %263 = arith.mulf %262, %262 : vector<128x8xf32>
    %cst_93 = arith.constant dense<0.000000e+00> : vector<8xf32>
    %264 = vector.multi_reduction <add>, %263, %cst_93 [0] : vector<128x8xf32> to vector<8xf32>
    %265 = vector.shape_cast %264 : vector<8xf32> to vector<1x8xf32>
    %cst_94 = arith.constant 1.280000e+02 : f32
    %266 = vector.broadcast %cst_94 : f32 to vector<1x8xf32>
    %267 = arith.divf %265, %266 : vector<1x8xf32>
    %cst_95 = arith.constant 9.99999974E-6 : f32
    %268 = vector.broadcast %cst_95 : f32 to vector<1x8xf32>
    %269 = arith.addf %267, %268 : vector<1x8xf32>
    %270 = math.rsqrt %269 : vector<1x8xf32>
    %271 = arith.mulf %252, %270 : vector<1x8xf32>
    %272 = vector.broadcast %271 : vector<1x8xf32> to vector<128x8xf32>
    %273 = arith.mulf %262, %272 : vector<128x8xf32>
    %274 = vector.broadcast %253 : vector<1x8xf32> to vector<128x8xf32>
    %275 = arith.addf %273, %274 : vector<128x8xf32>
    %cst_96 = arith.constant 0.000000e+00 : f32
    %276 = vector.broadcast %cst_96 : f32 to vector<128x8xf32>
    %277 = arith.cmpf ogt, %275, %276 : vector<128x8xf32>
    %cst_97 = arith.constant 0.00999999977 : f32
    %278 = vector.broadcast %cst_97 : f32 to vector<128x8xf32>
    %279 = arith.mulf %278, %275 : vector<128x8xf32>
    %280 = arith.select %277, %275, %279 : vector<128x8xi1>, vector<128x8xf32>
    %c376 = arith.constant 376 : index
    %c0_98 = arith.constant 0 : index
    %281 = vector.load %arg1[%c376, %c0_98] : memref<768x16xf32, #tpu.memory_space<vmem>>, vector<8x8xf32>
    %c384 = arith.constant 384 : index
    %c0_99 = arith.constant 0 : index
    %282 = vector.load %arg1[%c384, %c0_99] : memref<768x16xf32, #tpu.memory_space<vmem>>, vector<1x8xf32>
    %c392 = arith.constant 392 : index
    %c0_100 = arith.constant 0 : index
    %283 = vector.load %arg1[%c392, %c0_100] : memref<768x16xf32, #tpu.memory_space<vmem>>, vector<1x8xf32>
    %c400 = arith.constant 400 : index
    %c0_101 = arith.constant 0 : index
    %284 = vector.load %arg1[%c400, %c0_101] : memref<768x16xf32, #tpu.memory_space<vmem>>, vector<1x8xf32>
    %cst_102 = arith.constant dense<0.000000e+00> : vector<128x8xf32>
    %285 = tpu.matmul %280, %281, %cst_102 {dimension_numbers = #tpu.dot_dimension_numbers<[1], [0], [0], [1], [0, 0, 1, 1], [], []>} : vector<128x8xf32>, vector<8x8xf32>, vector<128x8xf32> -> vector<128x8xf32>
    %286 = vector.broadcast %282 : vector<1x8xf32> to vector<128x8xf32>
    %287 = arith.addf %285, %286 : vector<128x8xf32>
    %cst_103 = arith.constant dense<0.000000e+00> : vector<8xf32>
    %288 = vector.multi_reduction <add>, %287, %cst_103 [0] : vector<128x8xf32> to vector<8xf32>
    %289 = vector.shape_cast %288 : vector<8xf32> to vector<1x8xf32>
    %cst_104 = arith.constant 1.280000e+02 : f32
    %290 = vector.broadcast %cst_104 : f32 to vector<1x8xf32>
    %291 = arith.divf %289, %290 : vector<1x8xf32>
    %292 = vector.broadcast %291 : vector<1x8xf32> to vector<128x8xf32>
    %293 = arith.subf %287, %292 : vector<128x8xf32>
    %294 = arith.mulf %293, %293 : vector<128x8xf32>
    %cst_105 = arith.constant dense<0.000000e+00> : vector<8xf32>
    %295 = vector.multi_reduction <add>, %294, %cst_105 [0] : vector<128x8xf32> to vector<8xf32>
    %296 = vector.shape_cast %295 : vector<8xf32> to vector<1x8xf32>
    %cst_106 = arith.constant 1.280000e+02 : f32
    %297 = vector.broadcast %cst_106 : f32 to vector<1x8xf32>
    %298 = arith.divf %296, %297 : vector<1x8xf32>
    %cst_107 = arith.constant 9.99999974E-6 : f32
    %299 = vector.broadcast %cst_107 : f32 to vector<1x8xf32>
    %300 = arith.addf %298, %299 : vector<1x8xf32>
    %301 = math.rsqrt %300 : vector<1x8xf32>
    %302 = arith.mulf %283, %301 : vector<1x8xf32>
    %303 = vector.broadcast %302 : vector<1x8xf32> to vector<128x8xf32>
    %304 = arith.mulf %293, %303 : vector<128x8xf32>
    %305 = vector.broadcast %284 : vector<1x8xf32> to vector<128x8xf32>
    %306 = arith.addf %304, %305 : vector<128x8xf32>
    %cst_108 = arith.constant 0.000000e+00 : f32
    %307 = vector.broadcast %cst_108 : f32 to vector<128x8xf32>
    %308 = arith.cmpf ogt, %306, %307 : vector<128x8xf32>
    %cst_109 = arith.constant 0.00999999977 : f32
    %309 = vector.broadcast %cst_109 : f32 to vector<128x8xf32>
    %310 = arith.mulf %309, %306 : vector<128x8xf32>
    %311 = arith.select %308, %306, %310 : vector<128x8xi1>, vector<128x8xf32>
    %c408 = arith.constant 408 : index
    %c0_110 = arith.constant 0 : index
    %312 = vector.load %arg1[%c408, %c0_110] : memref<768x16xf32, #tpu.memory_space<vmem>>, vector<1x8xf32>
    %c416 = arith.constant 416 : index
    %c0_111 = arith.constant 0 : index
    %313 = vector.load %arg1[%c416, %c0_111] : memref<768x16xf32, #tpu.memory_space<vmem>>, vector<1x1xf32>
    %314 = vector.shape_cast %311 : vector<128x8xf32> to vector<2x8x8x8xf32>
    %315 = vector.shape_cast %312 : vector<1x8xf32> to vector<1x1x1x8xf32>
    %316 = vector.broadcast %315 : vector<1x1x1x8xf32> to vector<2x8x8x8xf32>
    %317 = arith.mulf %314, %316 : vector<2x8x8x8xf32>
    %cst_112 = arith.constant dense<0.000000e+00> : vector<2x8x8xf32>
    %318 = vector.multi_reduction <add>, %317, %cst_112 [3] : vector<2x8x8x8xf32> to vector<2x8x8xf32>
    %319 = vector.shape_cast %313 : vector<1x1xf32> to vector<1x1x1xf32>
    %320 = vector.broadcast %319 : vector<1x1x1xf32> to vector<2x8x8xf32>
    %321 = arith.addf %318, %320 : vector<2x8x8xf32>
    %322 = vector.shape_cast %7 : vector<8x8xf32> to vector<1x8x8xf32>
    %323 = vector.broadcast %322 : vector<1x8x8xf32> to vector<2x8x8xf32>
    %324 = arith.subf %321, %323 : vector<2x8x8xf32>
    %cst_113 = arith.constant dense<0xFF800000> : vector<2x8xf32>
    %325 = vector.multi_reduction <maximumf>, %324, %cst_113 [2] : vector<2x8x8xf32> to vector<2x8xf32>
    %326 = vector.shape_cast %325 : vector<2x8xf32> to vector<2x8x1xf32>
    %327 = vector.broadcast %326 : vector<2x8x1xf32> to vector<2x8x8xf32>
    %328 = arith.subf %324, %327 : vector<2x8x8xf32>
    %329 = math.exp %328 : vector<2x8x8xf32>
    %cst_114 = arith.constant dense<0.000000e+00> : vector<2x8xf32>
    %330 = vector.multi_reduction <add>, %329, %cst_114 [2] : vector<2x8x8xf32> to vector<2x8xf32>
    %331 = vector.shape_cast %330 : vector<2x8xf32> to vector<2x8x1xf32>
    %332 = vector.broadcast %331 : vector<2x8x1xf32> to vector<2x8x8xf32>
    %333 = arith.divf %329, %332 : vector<2x8x8xf32>
    %334 = arith.subf %164, %333 : vector<2x8x8xf32>
    %c424 = arith.constant 424 : index
    %c0_115 = arith.constant 0 : index
    %335 = vector.load %arg1[%c424, %c0_115] : memref<768x16xf32, #tpu.memory_space<vmem>>, vector<48x16xf32>
    %c472 = arith.constant 472 : index
    %c0_116 = arith.constant 0 : index
    %336 = vector.load %arg1[%c472, %c0_116] : memref<768x16xf32, #tpu.memory_space<vmem>>, vector<1x16xf32>
    %337 = vector.shape_cast %179 : vector<2x8x48xf32> to vector<16x48xf32>
    %cst_117 = arith.constant dense<0.000000e+00> : vector<16x16xf32>
    %338 = tpu.matmul %337, %335, %cst_117 {dimension_numbers = #tpu.dot_dimension_numbers<[1], [0], [0], [1], [0, 0, 1, 1], [], []>} : vector<16x48xf32>, vector<48x16xf32>, vector<16x16xf32> -> vector<16x16xf32>
    %339 = vector.shape_cast %338 : vector<16x16xf32> to vector<2x8x16xf32>
    "tpu.trace_start"() <{level = 10 : i32, message = "bij,bjd->bid"}> : () -> ()
    %cst_118 = arith.constant dense<0.000000e+00> : vector<2x8x16xf32>
    %340 = tpu.matmul %334, %339, %cst_118 {dimension_numbers = #tpu.dot_dimension_numbers<[2], [1], [1], [2], [0, 0, 0, 1, 1, 2], [0], [0]>} : vector<2x8x8xf32>, vector<2x8x16xf32>, vector<2x8x16xf32> -> vector<2x8x16xf32>
    "tpu.trace_stop"() : () -> ()
    %341 = vector.shape_cast %336 : vector<1x16xf32> to vector<1x1x16xf32>
    %342 = vector.broadcast %341 : vector<1x1x16xf32> to vector<2x8x16xf32>
    %343 = arith.addf %340, %342 : vector<2x8x16xf32>
    %cst_119 = arith.constant 0.000000e+00 : f32
    %344 = vector.broadcast %cst_119 : f32 to vector<2x8x16xf32>
    %345 = arith.cmpf ogt, %343, %344 : vector<2x8x16xf32>
    %cst_120 = arith.constant 0.00999999977 : f32
    %346 = vector.broadcast %cst_120 : f32 to vector<2x8x16xf32>
    %347 = arith.mulf %346, %343 : vector<2x8x16xf32>
    %348 = arith.select %345, %343, %347 : vector<2x8x16xi1>, vector<2x8x16xf32>
    %349 = tpu.concatenate %348, %179 in 2 : vector<2x8x16xf32>, vector<2x8x48xf32> -> vector<2x8x64xf32>
    %350 = vector.shape_cast %348 : vector<2x8x16xf32> to vector<2x8x1x16xf32>
    %351 = vector.shape_cast %348 : vector<2x8x16xf32> to vector<2x1x8x16xf32>
    %352 = vector.broadcast %350 : vector<2x8x1x16xf32> to vector<2x8x8x16xf32>
    %353 = vector.broadcast %351 : vector<2x1x8x16xf32> to vector<2x8x8x16xf32>
    %354 = arith.subf %352, %353 : vector<2x8x8x16xf32>
    %355 = math.absf %354 : vector<2x8x8x16xf32>
    %356 = vector.shape_cast %355 : vector<2x8x8x16xf32> to vector<128x16xf32>
    %357 = tpu.concatenate %356, %187 in 1 : vector<128x16xf32>, vector<128x48xf32> -> vector<128x64xf32>
    %c480 = arith.constant 480 : index
    %c0_121 = arith.constant 0 : index
    %358 = vector.load %arg1[%c480, %c0_121] : memref<768x16xf32, #tpu.memory_space<vmem>>, vector<64x16xf32>
    %c544 = arith.constant 544 : index
    %c0_122 = arith.constant 0 : index
    %359 = vector.load %arg1[%c544, %c0_122] : memref<768x16xf32, #tpu.memory_space<vmem>>, vector<1x16xf32>
    %c552 = arith.constant 552 : index
    %c0_123 = arith.constant 0 : index
    %360 = vector.load %arg1[%c552, %c0_123] : memref<768x16xf32, #tpu.memory_space<vmem>>, vector<1x16xf32>
    %c560 = arith.constant 560 : index
    %c0_124 = arith.constant 0 : index
    %361 = vector.load %arg1[%c560, %c0_124] : memref<768x16xf32, #tpu.memory_space<vmem>>, vector<1x16xf32>
    %cst_125 = arith.constant dense<0.000000e+00> : vector<128x16xf32>
    %362 = tpu.matmul %357, %358, %cst_125 {dimension_numbers = #tpu.dot_dimension_numbers<[1], [0], [0], [1], [0, 0, 1, 1], [], []>} : vector<128x64xf32>, vector<64x16xf32>, vector<128x16xf32> -> vector<128x16xf32>
    %363 = vector.broadcast %359 : vector<1x16xf32> to vector<128x16xf32>
    %364 = arith.addf %362, %363 : vector<128x16xf32>
    %cst_126 = arith.constant dense<0.000000e+00> : vector<16xf32>
    %365 = vector.multi_reduction <add>, %364, %cst_126 [0] : vector<128x16xf32> to vector<16xf32>
    %366 = vector.shape_cast %365 : vector<16xf32> to vector<1x16xf32>
    %cst_127 = arith.constant 1.280000e+02 : f32
    %367 = vector.broadcast %cst_127 : f32 to vector<1x16xf32>
    %368 = arith.divf %366, %367 : vector<1x16xf32>
    %369 = vector.broadcast %368 : vector<1x16xf32> to vector<128x16xf32>
    %370 = arith.subf %364, %369 : vector<128x16xf32>
    %371 = arith.mulf %370, %370 : vector<128x16xf32>
    %cst_128 = arith.constant dense<0.000000e+00> : vector<16xf32>
    %372 = vector.multi_reduction <add>, %371, %cst_128 [0] : vector<128x16xf32> to vector<16xf32>
    %373 = vector.shape_cast %372 : vector<16xf32> to vector<1x16xf32>
    %cst_129 = arith.constant 1.280000e+02 : f32
    %374 = vector.broadcast %cst_129 : f32 to vector<1x16xf32>
    %375 = arith.divf %373, %374 : vector<1x16xf32>
    %cst_130 = arith.constant 9.99999974E-6 : f32
    %376 = vector.broadcast %cst_130 : f32 to vector<1x16xf32>
    %377 = arith.addf %375, %376 : vector<1x16xf32>
    %378 = math.rsqrt %377 : vector<1x16xf32>
    %379 = arith.mulf %360, %378 : vector<1x16xf32>
    %380 = vector.broadcast %379 : vector<1x16xf32> to vector<128x16xf32>
    %381 = arith.mulf %370, %380 : vector<128x16xf32>
    %382 = vector.broadcast %361 : vector<1x16xf32> to vector<128x16xf32>
    %383 = arith.addf %381, %382 : vector<128x16xf32>
    %cst_131 = arith.constant 0.000000e+00 : f32
    %384 = vector.broadcast %cst_131 : f32 to vector<128x16xf32>
    %385 = arith.cmpf ogt, %383, %384 : vector<128x16xf32>
    %cst_132 = arith.constant 0.00999999977 : f32
    %386 = vector.broadcast %cst_132 : f32 to vector<128x16xf32>
    %387 = arith.mulf %386, %383 : vector<128x16xf32>
    %388 = arith.select %385, %383, %387 : vector<128x16xi1>, vector<128x16xf32>
    %c568 = arith.constant 568 : index
    %c0_133 = arith.constant 0 : index
    %389 = vector.load %arg1[%c568, %c0_133] : memref<768x16xf32, #tpu.memory_space<vmem>>, vector<16x16xf32>
    %c584 = arith.constant 584 : index
    %c0_134 = arith.constant 0 : index
    %390 = vector.load %arg1[%c584, %c0_134] : memref<768x16xf32, #tpu.memory_space<vmem>>, vector<1x16xf32>
    %c592 = arith.constant 592 : index
    %c0_135 = arith.constant 0 : index
    %391 = vector.load %arg1[%c592, %c0_135] : memref<768x16xf32, #tpu.memory_space<vmem>>, vector<1x16xf32>
    %c600 = arith.constant 600 : index
    %c0_136 = arith.constant 0 : index
    %392 = vector.load %arg1[%c600, %c0_136] : memref<768x16xf32, #tpu.memory_space<vmem>>, vector<1x16xf32>
    %cst_137 = arith.constant dense<0.000000e+00> : vector<128x16xf32>
    %393 = tpu.matmul %388, %389, %cst_137 {dimension_numbers = #tpu.dot_dimension_numbers<[1], [0], [0], [1], [0, 0, 1, 1], [], []>} : vector<128x16xf32>, vector<16x16xf32>, vector<128x16xf32> -> vector<128x16xf32>
    %394 = vector.broadcast %390 : vector<1x16xf32> to vector<128x16xf32>
    %395 = arith.addf %393, %394 : vector<128x16xf32>
    %cst_138 = arith.constant dense<0.000000e+00> : vector<16xf32>
    %396 = vector.multi_reduction <add>, %395, %cst_138 [0] : vector<128x16xf32> to vector<16xf32>
    %397 = vector.shape_cast %396 : vector<16xf32> to vector<1x16xf32>
    %cst_139 = arith.constant 1.280000e+02 : f32
    %398 = vector.broadcast %cst_139 : f32 to vector<1x16xf32>
    %399 = arith.divf %397, %398 : vector<1x16xf32>
    %400 = vector.broadcast %399 : vector<1x16xf32> to vector<128x16xf32>
    %401 = arith.subf %395, %400 : vector<128x16xf32>
    %402 = arith.mulf %401, %401 : vector<128x16xf32>
    %cst_140 = arith.constant dense<0.000000e+00> : vector<16xf32>
    %403 = vector.multi_reduction <add>, %402, %cst_140 [0] : vector<128x16xf32> to vector<16xf32>
    %404 = vector.shape_cast %403 : vector<16xf32> to vector<1x16xf32>
    %cst_141 = arith.constant 1.280000e+02 : f32
    %405 = vector.broadcast %cst_141 : f32 to vector<1x16xf32>
    %406 = arith.divf %404, %405 : vector<1x16xf32>
    %cst_142 = arith.constant 9.99999974E-6 : f32
    %407 = vector.broadcast %cst_142 : f32 to vector<1x16xf32>
    %408 = arith.addf %406, %407 : vector<1x16xf32>
    %409 = math.rsqrt %408 : vector<1x16xf32>
    %410 = arith.mulf %391, %409 : vector<1x16xf32>
    %411 = vector.broadcast %410 : vector<1x16xf32> to vector<128x16xf32>
    %412 = arith.mulf %401, %411 : vector<128x16xf32>
    %413 = vector.broadcast %392 : vector<1x16xf32> to vector<128x16xf32>
    %414 = arith.addf %412, %413 : vector<128x16xf32>
    %cst_143 = arith.constant 0.000000e+00 : f32
    %415 = vector.broadcast %cst_143 : f32 to vector<128x16xf32>
    %416 = arith.cmpf ogt, %414, %415 : vector<128x16xf32>
    %cst_144 = arith.constant 0.00999999977 : f32
    %417 = vector.broadcast %cst_144 : f32 to vector<128x16xf32>
    %418 = arith.mulf %417, %414 : vector<128x16xf32>
    %419 = arith.select %416, %414, %418 : vector<128x16xi1>, vector<128x16xf32>
    %c608 = arith.constant 608 : index
    %c0_145 = arith.constant 0 : index
    %420 = vector.load %arg1[%c608, %c0_145] : memref<768x16xf32, #tpu.memory_space<vmem>>, vector<16x8xf32>
    %c624 = arith.constant 624 : index
    %c0_146 = arith.constant 0 : index
    %421 = vector.load %arg1[%c624, %c0_146] : memref<768x16xf32, #tpu.memory_space<vmem>>, vector<1x8xf32>
    %c632 = arith.constant 632 : index
    %c0_147 = arith.constant 0 : index
    %422 = vector.load %arg1[%c632, %c0_147] : memref<768x16xf32, #tpu.memory_space<vmem>>, vector<1x8xf32>
    %c640 = arith.constant 640 : index
    %c0_148 = arith.constant 0 : index
    %423 = vector.load %arg1[%c640, %c0_148] : memref<768x16xf32, #tpu.memory_space<vmem>>, vector<1x8xf32>
    %cst_149 = arith.constant dense<0.000000e+00> : vector<128x8xf32>
    %424 = tpu.matmul %419, %420, %cst_149 {dimension_numbers = #tpu.dot_dimension_numbers<[1], [0], [0], [1], [0, 0, 1, 1], [], []>} : vector<128x16xf32>, vector<16x8xf32>, vector<128x8xf32> -> vector<128x8xf32>
    %425 = vector.broadcast %421 : vector<1x8xf32> to vector<128x8xf32>
    %426 = arith.addf %424, %425 : vector<128x8xf32>
    %cst_150 = arith.constant dense<0.000000e+00> : vector<8xf32>
    %427 = vector.multi_reduction <add>, %426, %cst_150 [0] : vector<128x8xf32> to vector<8xf32>
    %428 = vector.shape_cast %427 : vector<8xf32> to vector<1x8xf32>
    %cst_151 = arith.constant 1.280000e+02 : f32
    %429 = vector.broadcast %cst_151 : f32 to vector<1x8xf32>
    %430 = arith.divf %428, %429 : vector<1x8xf32>
    %431 = vector.broadcast %430 : vector<1x8xf32> to vector<128x8xf32>
    %432 = arith.subf %426, %431 : vector<128x8xf32>
    %433 = arith.mulf %432, %432 : vector<128x8xf32>
    %cst_152 = arith.constant dense<0.000000e+00> : vector<8xf32>
    %434 = vector.multi_reduction <add>, %433, %cst_152 [0] : vector<128x8xf32> to vector<8xf32>
    %435 = vector.shape_cast %434 : vector<8xf32> to vector<1x8xf32>
    %cst_153 = arith.constant 1.280000e+02 : f32
    %436 = vector.broadcast %cst_153 : f32 to vector<1x8xf32>
    %437 = arith.divf %435, %436 : vector<1x8xf32>
    %cst_154 = arith.constant 9.99999974E-6 : f32
    %438 = vector.broadcast %cst_154 : f32 to vector<1x8xf32>
    %439 = arith.addf %437, %438 : vector<1x8xf32>
    %440 = math.rsqrt %439 : vector<1x8xf32>
    %441 = arith.mulf %422, %440 : vector<1x8xf32>
    %442 = vector.broadcast %441 : vector<1x8xf32> to vector<128x8xf32>
    %443 = arith.mulf %432, %442 : vector<128x8xf32>
    %444 = vector.broadcast %423 : vector<1x8xf32> to vector<128x8xf32>
    %445 = arith.addf %443, %444 : vector<128x8xf32>
    %cst_155 = arith.constant 0.000000e+00 : f32
    %446 = vector.broadcast %cst_155 : f32 to vector<128x8xf32>
    %447 = arith.cmpf ogt, %445, %446 : vector<128x8xf32>
    %cst_156 = arith.constant 0.00999999977 : f32
    %448 = vector.broadcast %cst_156 : f32 to vector<128x8xf32>
    %449 = arith.mulf %448, %445 : vector<128x8xf32>
    %450 = arith.select %447, %445, %449 : vector<128x8xi1>, vector<128x8xf32>
    %c648 = arith.constant 648 : index
    %c0_157 = arith.constant 0 : index
    %451 = vector.load %arg1[%c648, %c0_157] : memref<768x16xf32, #tpu.memory_space<vmem>>, vector<8x8xf32>
    %c656 = arith.constant 656 : index
    %c0_158 = arith.constant 0 : index
    %452 = vector.load %arg1[%c656, %c0_158] : memref<768x16xf32, #tpu.memory_space<vmem>>, vector<1x8xf32>
    %c664 = arith.constant 664 : index
    %c0_159 = arith.constant 0 : index
    %453 = vector.load %arg1[%c664, %c0_159] : memref<768x16xf32, #tpu.memory_space<vmem>>, vector<1x8xf32>
    %c672 = arith.constant 672 : index
    %c0_160 = arith.constant 0 : index
    %454 = vector.load %arg1[%c672, %c0_160] : memref<768x16xf32, #tpu.memory_space<vmem>>, vector<1x8xf32>
    %cst_161 = arith.constant dense<0.000000e+00> : vector<128x8xf32>
    %455 = tpu.matmul %450, %451, %cst_161 {dimension_numbers = #tpu.dot_dimension_numbers<[1], [0], [0], [1], [0, 0, 1, 1], [], []>} : vector<128x8xf32>, vector<8x8xf32>, vector<128x8xf32> -> vector<128x8xf32>
    %456 = vector.broadcast %452 : vector<1x8xf32> to vector<128x8xf32>
    %457 = arith.addf %455, %456 : vector<128x8xf32>
    %cst_162 = arith.constant dense<0.000000e+00> : vector<8xf32>
    %458 = vector.multi_reduction <add>, %457, %cst_162 [0] : vector<128x8xf32> to vector<8xf32>
    %459 = vector.shape_cast %458 : vector<8xf32> to vector<1x8xf32>
    %cst_163 = arith.constant 1.280000e+02 : f32
    %460 = vector.broadcast %cst_163 : f32 to vector<1x8xf32>
    %461 = arith.divf %459, %460 : vector<1x8xf32>
    %462 = vector.broadcast %461 : vector<1x8xf32> to vector<128x8xf32>
    %463 = arith.subf %457, %462 : vector<128x8xf32>
    %464 = arith.mulf %463, %463 : vector<128x8xf32>
    %cst_164 = arith.constant dense<0.000000e+00> : vector<8xf32>
    %465 = vector.multi_reduction <add>, %464, %cst_164 [0] : vector<128x8xf32> to vector<8xf32>
    %466 = vector.shape_cast %465 : vector<8xf32> to vector<1x8xf32>
    %cst_165 = arith.constant 1.280000e+02 : f32
    %467 = vector.broadcast %cst_165 : f32 to vector<1x8xf32>
    %468 = arith.divf %466, %467 : vector<1x8xf32>
    %cst_166 = arith.constant 9.99999974E-6 : f32
    %469 = vector.broadcast %cst_166 : f32 to vector<1x8xf32>
    %470 = arith.addf %468, %469 : vector<1x8xf32>
    %471 = math.rsqrt %470 : vector<1x8xf32>
    %472 = arith.mulf %453, %471 : vector<1x8xf32>
    %473 = vector.broadcast %472 : vector<1x8xf32> to vector<128x8xf32>
    %474 = arith.mulf %463, %473 : vector<128x8xf32>
    %475 = vector.broadcast %454 : vector<1x8xf32> to vector<128x8xf32>
    %476 = arith.addf %474, %475 : vector<128x8xf32>
    %cst_167 = arith.constant 0.000000e+00 : f32
    %477 = vector.broadcast %cst_167 : f32 to vector<128x8xf32>
    %478 = arith.cmpf ogt, %476, %477 : vector<128x8xf32>
    %cst_168 = arith.constant 0.00999999977 : f32
    %479 = vector.broadcast %cst_168 : f32 to vector<128x8xf32>
    %480 = arith.mulf %479, %476 : vector<128x8xf32>
    %481 = arith.select %478, %476, %480 : vector<128x8xi1>, vector<128x8xf32>
    %c680 = arith.constant 680 : index
    %c0_169 = arith.constant 0 : index
    %482 = vector.load %arg1[%c680, %c0_169] : memref<768x16xf32, #tpu.memory_space<vmem>>, vector<1x8xf32>
    %c688 = arith.constant 688 : index
    %c0_170 = arith.constant 0 : index
    %483 = vector.load %arg1[%c688, %c0_170] : memref<768x16xf32, #tpu.memory_space<vmem>>, vector<1x1xf32>
    %484 = vector.shape_cast %481 : vector<128x8xf32> to vector<2x8x8x8xf32>
    %485 = vector.shape_cast %482 : vector<1x8xf32> to vector<1x1x1x8xf32>
    %486 = vector.broadcast %485 : vector<1x1x1x8xf32> to vector<2x8x8x8xf32>
    %487 = arith.mulf %484, %486 : vector<2x8x8x8xf32>
    %cst_171 = arith.constant dense<0.000000e+00> : vector<2x8x8xf32>
    %488 = vector.multi_reduction <add>, %487, %cst_171 [3] : vector<2x8x8x8xf32> to vector<2x8x8xf32>
    %489 = vector.shape_cast %483 : vector<1x1xf32> to vector<1x1x1xf32>
    %490 = vector.broadcast %489 : vector<1x1x1xf32> to vector<2x8x8xf32>
    %491 = arith.addf %488, %490 : vector<2x8x8xf32>
    %492 = vector.shape_cast %7 : vector<8x8xf32> to vector<1x8x8xf32>
    %493 = vector.broadcast %492 : vector<1x8x8xf32> to vector<2x8x8xf32>
    %494 = arith.subf %491, %493 : vector<2x8x8xf32>
    %cst_172 = arith.constant dense<0xFF800000> : vector<2x8xf32>
    %495 = vector.multi_reduction <maximumf>, %494, %cst_172 [2] : vector<2x8x8xf32> to vector<2x8xf32>
    %496 = vector.shape_cast %495 : vector<2x8xf32> to vector<2x8x1xf32>
    %497 = vector.broadcast %496 : vector<2x8x1xf32> to vector<2x8x8xf32>
    %498 = arith.subf %494, %497 : vector<2x8x8xf32>
    %499 = math.exp %498 : vector<2x8x8xf32>
    %cst_173 = arith.constant dense<0.000000e+00> : vector<2x8xf32>
    %500 = vector.multi_reduction <add>, %499, %cst_173 [2] : vector<2x8x8xf32> to vector<2x8xf32>
    %501 = vector.shape_cast %500 : vector<2x8xf32> to vector<2x8x1xf32>
    %502 = vector.broadcast %501 : vector<2x8x1xf32> to vector<2x8x8xf32>
    %503 = arith.divf %499, %502 : vector<2x8x8xf32>
    %504 = arith.subf %334, %503 : vector<2x8x8xf32>
    %c696 = arith.constant 696 : index
    %c0_174 = arith.constant 0 : index
    %505 = vector.load %arg1[%c696, %c0_174] : memref<768x16xf32, #tpu.memory_space<vmem>>, vector<64x5xf32>
    %c760 = arith.constant 760 : index
    %c0_175 = arith.constant 0 : index
    %506 = vector.load %arg1[%c760, %c0_175] : memref<768x16xf32, #tpu.memory_space<vmem>>, vector<1x5xf32>
    %507 = vector.shape_cast %349 : vector<2x8x64xf32> to vector<16x64xf32>
    %cst_176 = arith.constant dense<0.000000e+00> : vector<16x5xf32>
    %508 = tpu.matmul %507, %505, %cst_176 {dimension_numbers = #tpu.dot_dimension_numbers<[1], [0], [0], [1], [0, 0, 1, 1], [], []>} : vector<16x64xf32>, vector<64x5xf32>, vector<16x5xf32> -> vector<16x5xf32>
    %509 = vector.shape_cast %508 : vector<16x5xf32> to vector<2x8x5xf32>
    "tpu.trace_start"() <{level = 10 : i32, message = "bij,bjd->bid"}> : () -> ()
    %cst_177 = arith.constant dense<0.000000e+00> : vector<2x8x5xf32>
    %510 = tpu.matmul %504, %509, %cst_177 {dimension_numbers = #tpu.dot_dimension_numbers<[2], [1], [1], [2], [0, 0, 0, 1, 1, 2], [0], [0]>} : vector<2x8x8xf32>, vector<2x8x5xf32>, vector<2x8x5xf32> -> vector<2x8x5xf32>
    "tpu.trace_stop"() : () -> ()
    %511 = vector.shape_cast %506 : vector<1x5xf32> to vector<1x1x5xf32>
    %512 = vector.broadcast %511 : vector<1x1x5xf32> to vector<2x8x5xf32>
    %513 = arith.addf %510, %512 : vector<2x8x5xf32>
    %514 = vector.extract_strided_slice %513 {offsets = [0, 0, 0], sizes = [2, 1, 5], strides = [1, 1, 1]} : vector<2x8x5xf32> to vector<2x1x5xf32>
    %515 = vector.shape_cast %514 : vector<2x1x5xf32> to vector<2x5xf32>
    %c0_178 = arith.constant 0 : index
    %c0_179 = arith.constant 0 : index
    %516 = vector.load %arg2[%c0_178, %c0_179] : memref<2x5xf32, #tpu.memory_space<vmem>>, vector<2x5xf32>
    tpu.vector_store %arg2[%c0_178, %c0_179], %515 {strides = array<i32>} : memref<2x5xf32, #tpu.memory_space<vmem>>, vector<2x5xf32>,
    return
  }
}

</mosaic_0001>

<bundles_post_ra>
// kernel: tpu_custom_call.1
= control target key start
LH: loop header
LB: loop body
LE: loop exit
PB: predicated region body
PF: predicated region fallthrough
CT: control target
= control target key end

     0   :  { %v14_v3 = vlaneseq  ;;  %v10115_v6 = vmov 1966171168   ;;  %s14101_s0 = inlined_call_operand.vmem [shape: f32[2,8,32], index: 0, kind: input, shape index: {}]   ;;  %s14102_s1 = inlined_call_operand.vmem [shape: f32[768,16], index: 1, kind: input, shape index: {}]   ;;  %s14103_s2 = inlined_call_operand.hbm [shape: f32[2,5], index: 2, kind: output, shape index: {}]  }
   0x1   :  { %v234_v0 = vld [vmem:[%s14102_s1] sm:$0xff]  ;;  %v235_v1 = vld [vmem:[%s14102_s1 + $0x8] sm:$0xff]  ;;  %v236_v2 = vld [vmem:[%s14102_s1 + $0x10] sm:$0xff]  ;;  %v26_v7 = vunpack.c.l.s4 %v10115_v6 }
   0x2   :  { %v9759_v4 = vpack.c.bf16 %v235_v1, %v234_v0  ;;  %v237_v5 = vld [vmem:[%s14102_s1 + $0x18] sm:$0xff]  ;;  %v10151_v9 = vld [vmem:[%s14101_s0] sm:$0xff]  ;;  %v10154_v10 = vshrl.u32 %v14_v3, 7 }
   0x3   :  { %v9763_v8 = vpack.c.bf16 %v237_v5, %v236_v2 }
   0x4   :  { %7 = vsyncpa [#allocation3], 0  ;;  %9760 = vmatprep.subr.bf16.mxu0 %v9759_v4  ;;  %v27_v11 = vunpack.c.0.s8 %v26_v7  ;;  %v24_v12 = vcombine.high %v10151_v9, %v10151_v9  ;;  %v10164_v15 = vsub.s32 0, %v10154_v10  ;;  %v10170_v17 = vld [vmem:[%s14101_s0 + $0x8] sm:$0xff]  ;;  %vm245_vm0 = vcmask 261120   ;;  %s10119_s16 = smov 16  }
   0x5   :  { %9762 = vmatpush3.bf16.msra.mxu0 %v9759_v4  ;;  %v73_v36 = vcombine.high %v10170_v17, %v10170_v17  ;;  %vm439_vm1 = vcmask 130048   ;;  %s10120_s22 = smov [#allocation2]  }
   0x6   :  { %9764 = vmatprep.subr.bf16.mxu0 %v9763_v8  ;;  %v10159_v13 = vsub.s32 %v27_v11, %v10154_v10  ;;  %s8826_s23 = sshll.u32 %s10120_s22, 4  ;;  %s8827_s23 = int_to_ptr.vmem [resolvable:$true] %s8826_s23 }
   0x7   :  { %s10091_s24 = scalar_lea.vmem %s8827_s23, 32  ;;  %p10096_p1 = scmp.lt.s32.totalorder %s8827_s23, %s8827_s23 }
   0x8   :  { %14134 = vst [vmem:[#allocation5_spill] sm:$0xff] %v10159_v13  ;;  %v31_v14 = vrot.slane %v10151_v9, %v10159_v13  ;;  %v38_v16 = vrot.slane %v24_v12, %v10159_v13  ;;  %v80_v22 = vrot.slane %v10170_v17, %v10159_v13  ;;  %v87_v47 = vrot.slane %v73_v36, %v10159_v13  ;;  %p10092_p0 = scmp.ne.s32.totalorder %s8827_s23, %s10091_s24  ;;  %p10097_p2 = scmp.lt.s32.totalorder %s10091_s24, %s10091_s24 }
   0x9   :  { %9766 = vmatpush3.bf16.msra.mxu0 %v9763_v8 }
   0xa   :  { %v39_v18 = vcombine.high %v31_v14, %v31_v14  ;;  %v47_v19 = vrot.slane %v31_v14, %v10159_v13  ;;  %v54_v20 = vrot.slane %v38_v16, %v10159_v13  ;;  %v40_v21 = vcombine.high %v38_v16, %v38_v16  ;;  %p10098_p3 = por %p10097_p2, %p10096_p1 }
   0xb   :  { %v88_v35 = vcombine.high %v80_v22, %v80_v22  ;;  %v96_v43 = vrot.slane %v80_v22, %v10159_v13  ;;  %v89_v56 = vcombine.high %v87_v47, %v87_v47  ;;  %v103_v0 = vrot.slane %v87_v47, %v10159_v13 }
   0xc   :  { %v69_v23 = vcombine.high %v47_v19, %v47_v19  ;;  %v125_v24 = vrot.slane %v47_v19, %v10164_v15  ;;  %v61_v25 = vrot.slane %v39_v18, %v10159_v13  ;;  %v141_v26 = vrot.slane %v54_v20, %v10164_v15  ;;  %p10099_p4 = pnand %p10098_p3, %p10092_p0 }
   0xd   :  { %v68_v27 = vrot.slane %v40_v21, %v10159_v13  ;;  %v70_v28 = vcombine.high %v54_v20, %v54_v20  ;;  %v110_v51 = vrot.slane %v88_v35, %v10159_v13  ;;  %v157_v54 = vrot.slane %v96_v43, %v10164_v15 }
   0xe   :  { %v10181_v29 = vsub.f32 %v125_v24, %v10151_v9  ;;  %v129_v30 = vrot.slane %v61_v25, %v10164_v15  ;;  %v133_v31 = vrot.slane %v69_v23, %v10164_v15  ;;  %v71_v32 = vcombine.high %v61_v25, %v61_v25 }
   0xf   :  { %v145_v33 = vrot.slane %v68_v27, %v10164_v15  ;;  %v72_v34 = vcombine.high %v68_v27, %v68_v27  ;;  %v10195_v41 = vsub.f32 %v141_v26, %v10151_v9  ;;  %v149_v42 = vrot.slane %v70_v28, %v10164_v15 }
  0x10   :  { %v14111_v37 = vand.u32 2147483647, %v10181_v29  ;;  %v10190_v38 = vsub.f32 %v129_v30, %v10151_v9  ;;  %v204_v39 = vsub.f32 %v133_v31, %v10151_v9  ;;  %v137_v40 = vrot.slane %v71_v32, %v10164_v15  ;;  %v641_v31 = vld [vmem:[%s14102_s1 + $0x40] sm:$0xff] }
  0x11   :  { %v10213_v49 = vsub.f32 %v145_v33, %v10151_v9  ;;  %v153_v50 = vrot.slane %v72_v34, %v10164_v15  ;;  %v14109_v52 = vand.u32 2147483647, %v10195_v41  ;;  %v208_v53 = vsub.f32 %v149_v42, %v10151_v9  ;;  %v8835_v33 = vld [vmem:[%s14102_s1 + $0x20] ss:$0 sm:$0xff] }
  0x12   :  { %9338 = vmatprep.mubr.msk.f32.mxu0 %vm245_vm0, %v14111_v37  ;;  %v14110_v44 = vand.u32 2147483647, %v10190_v38  ;;  %v10203_v45 = vand.u32 2147483647, %v204_v39  ;;  %v205_v46 = vsub.f32 %v137_v40, %v10151_v9  ;;  %v118_v55 = vcombine.high %v96_v43, %v96_v43 }
  0x13   :  { %v14108_v57 = vand.u32 2147483647, %v10213_v49  ;;  %v209_v58 = vsub.f32 %v153_v50, %v10151_v9  ;;  %v161_v59 = vrot.slane %v110_v51, %v10164_v15  ;;  %v120_v60 = vcombine.high %v110_v51, %v110_v51 }
  0x14   :  { %9339 = vmatmul.mubr.msk.f32.vlgmr.msra.gmra.mrb[0].mxu0 %vm245_vm0, %v14110_v44  ;;  %v10210_v48 = vand.u32 2147483647, %v205_v46  ;;  %v10230_v61 = vand.u32 2147483647, %v208_v53  ;;  %v10233_v62 = vsub.f32 %v157_v54, %v10170_v17  ;;  %v165_v63 = vrot.slane %v118_v55, %v10164_v15 }
  0x15   :  { %9341 = vmatprep.mubr.msk.f32.mxu0 %vm245_vm0, %v10203_v45  ;;  %v10240_v1 = vand.u32 2147483647, %v209_v58  ;;  %v10243_v2 = vsub.f32 %v161_v59, %v10170_v17  ;;  %v169_v4 = vrot.slane %v120_v60, %v10164_v15  ;;  %v117_v5 = vrot.slane %v89_v56, %v10159_v13 }
  0x16   :  { %v14107_v6 = vand.u32 2147483647, %v10233_v62  ;;  %v212_v7 = vsub.f32 %v165_v63, %v10170_v17  ;;  %v173_v8 = vrot.slane %v103_v0, %v10164_v15  ;;  %v119_v9 = vcombine.high %v103_v0, %v103_v0 }
  0x17   :  { %v14106_v11 = vand.u32 2147483647, %v10243_v2  ;;  %v213_v12 = vsub.f32 %v169_v4, %v10170_v17  ;;  %v177_v14 = vrot.slane %v117_v5, %v10164_v15  ;;  %v121_v16 = vcombine.high %v117_v5, %v117_v5 }
  0x18   :  { %9342 = vmatmul.mubr.msk.f32.gmra.mrb[2].mxu0 %vm245_vm0, %v10210_v48  ;;  %v10260_v18 = vand.u32 2147483647, %v212_v7  ;;  %v10263_v19 = vsub.f32 %v173_v8, %v10170_v17  ;;  %v181_v20 = vrot.slane %v119_v9, %v10164_v15 }
  0x19   :  { %9344 = vmatprep.mubr.msk.f32.mxu0 %vm245_vm0, %v14109_v52  ;;  %v10269_v21 = vand.u32 2147483647, %v213_v12  ;;  %v10272_v22 = vsub.f32 %v177_v14, %v10170_v17  ;;  %v185_v23 = vrot.slane %v121_v16, %v10164_v15 }
  0x1a   :  { %v14105_v24 = vand.u32 2147483647, %v10263_v19  ;;  %v216_v25 = vsub.f32 %v181_v20, %v10170_v17 }
  0x1b   :  { %v14104_v26 = vand.u32 2147483647, %v10272_v22  ;;  %v217_v27 = vsub.f32 %v185_v23, %v10170_v17  ;;  %v640_v17 = vld [vmem:[%s14102_s1 + $0x38] sm:$0xff] }
  0x1c   :  { %9345 = vmatmul.mubr.msk.f32.gmra.mrb[4].mxu0 %vm245_vm0, %v14108_v57  ;;  %v10286_v28 = vand.u32 2147483647, %v216_v25  ;;  %v9767_v32 = vpack.c.bf16 %v641_v31, %v640_v17 }
  0x1d   :  { %9347 = vmatprep.mubr.msk.f32.mxu0 %vm245_vm0, %v10230_v61  ;;  %v10291_v30 = vand.u32 2147483647, %v217_v27 }
  0x1e   :  { %9768 = vmatprep.subr.bf16.mxu1 %v9767_v32 }
  0x1f   :  { %9770 = vmatpush3.bf16.msra.mxu1 %v9767_v32 }
  0x20   :  { %9348 = vmatmul.mubr.msk.f32.gmra.mrb[6].mxu0 %vm245_vm0, %v10240_v1 }
  0x21   :  { %9350 = vmatprep.mubr.msk.f32.mxu0 %vm245_vm0, %v14107_v6 }
  0x24   :  { %9351 = vmatmul.mubr.msk.f32.gmra.mrb[8].mxu0 %vm245_vm0, %v14106_v11 }
  0x25   :  { %9353 = vmatprep.mubr.msk.f32.mxu0 %vm245_vm0, %v10260_v18 }
  0x28   :  { %9354 = vmatmul.mubr.msk.f32.gmra.mrb[10].mxu0 %vm245_vm0, %v10269_v21 }
  0x29   :  { %9356 = vmatprep.mubr.msk.f32.mxu0 %vm245_vm0, %v14105_v24 }
  0x2c   :  { %9357 = vmatmul.mubr.msk.f32.gmra.mrb[12].mxu0 %vm245_vm0, %v14104_v26 }
  0x2d   :  { %9359 = vmatprep.mubr.msk.f32.mxu0 %vm245_vm0, %v10286_v28 }
  0x30   :  { %9360 = vmatmul.mubr.msk.f32.gmra.mrb[14].mxu0 %vm245_vm0, %v10291_v30 }
  0xe7   :  { %v9340_v34 = vpop.f32.mrb[0].mxu0 }
  0xe8   :  { %v10306_v35 = vadd.f32 %v9340_v34, %v8835_v33  ;;  %v360_v36 = vpop.f32.mrb[1].mxu0 }
  0xe9   :  { %v10308_v39 = vadd.f32 %v8835_v33, %v360_v36 }
  0xea   :  { %v441_v40 = vsel %vm439_vm1, %v10306_v35, 0.0 }
  0xeb   :  { %v440_v42 = vsel %vm439_vm1, %v10308_v39, 0.0  ;;  %v9343_v43 = vpop.f32.mrb[2].mxu0 }
  0xec   :  { %v442_v46 = vadd.f32 %v441_v40, %v440_v42  ;;  %v370_v47 = vpop.f32.mrb[3].mxu0  ;;  %v10314_v50 = vadd.f32 %v9343_v43, %v8835_v33 }
  0xed   :  { %v371_v51 = vadd.f32 %v8835_v33, %v370_v47 }
  0xee   :  { %v445_v58 = vsel %vm439_vm1, %v10314_v50, 0.0 }
  0xef   :  { %v443_v53 = vsel %vm439_vm1, %v371_v51, 0.0  ;;  %v9346_v54 = vpop.f32.mrb[4].mxu0 }
  0xf0   :  { %v444_v55 = vadd.f32 %v443_v53, %v442_v46  ;;  %v380_v56 = vpop.f32.mrb[5].mxu0  ;;  %v386_v59 = vadd.f32 %v9346_v54, %v8835_v33 }
  0xf1   :  { %v381_v60 = vadd.f32 %v8835_v33, %v380_v56 }
  0xf2   :  { %v446_v63 = vadd.f32 %v445_v58, %v444_v55  ;;  %v449_v8 = vsel %vm439_vm1, %v386_v59, 0.0 }
  0xf3   :  { %v447_v0 = vsel %vm439_vm1, %v381_v60, 0.0  ;;  %v9349_v4 = vpop.f32.mrb[6].mxu0 }
  0xf4   :  { %v448_v5 = vadd.f32 %v447_v0, %v446_v63  ;;  %v390_v7 = vpop.f32.mrb[7].mxu0  ;;  %v396_v9 = vadd.f32 %v9349_v4, %v8835_v33 }
  0xf5   :  { %v391_v12 = vadd.f32 %v8835_v33, %v390_v7 }
  0xf6   :  { %v450_v14 = vadd.f32 %v449_v8, %v448_v5  ;;  %v453_v27 = vsel %vm439_vm1, %v396_v9, 0.0 }
  0xf7   :  { %v451_v16 = vsel %vm439_vm1, %v391_v12, 0.0  ;;  %v9352_v20 = vpop.f32.mrb[8].mxu0 }
  0xf8   :  { %v452_v23 = vadd.f32 %v451_v16, %v450_v14  ;;  %v400_v25 = vpop.f32.mrb[9].mxu0  ;;  %v406_v17 = vadd.f32 %v9352_v20, %v8835_v33 }
  0xf9   :  { %v401_v31 = vadd.f32 %v8835_v33, %v400_v25 }
  0xfa   :  { %v454_v32 = vadd.f32 %v453_v27, %v452_v23  ;;  %v457_v43 = vsel %vm439_vm1, %v406_v17, 0.0 }
  0xfb   :  { %v455_v34 = vsel %vm439_vm1, %v401_v31, 0.0  ;;  %v9355_v36 = vpop.f32.mrb[10].mxu0 }
  0xfc   :  { %v456_v40 = vadd.f32 %v455_v34, %v454_v32  ;;  %v410_v42 = vpop.f32.mrb[11].mxu0  ;;  %v416_v46 = vadd.f32 %v9355_v36, %v8835_v33 }
  0xfd   :  { %v411_v47 = vadd.f32 %v8835_v33, %v410_v42 }
  0xfe   :  { %v458_v53 = vadd.f32 %v457_v43, %v456_v40  ;;  %v461_v63 = vsel %vm439_vm1, %v416_v46, 0.0 }
  0xff   :  { %v459_v54 = vsel %vm439_vm1, %v411_v47, 0.0  ;;  %v9358_v55 = vpop.f32.mrb[12].mxu0 }
 0x100   :  { %v460_v56 = vadd.f32 %v459_v54, %v458_v53  ;;  %v420_v58 = vpop.f32.mrb[13].mxu0  ;;  %v426_v0 = vadd.f32 %v9358_v55, %v8835_v33 }
 0x101   :  { %v421_v4 = vadd.f32 %v8835_v33, %v420_v58 }
 0x102   :  { %v462_v5 = vadd.f32 %v461_v63, %v460_v56  ;;  %v465_v20 = vsel %vm439_vm1, %v426_v0, 0.0 }
 0x103   :  { %v463_v7 = vsel %vm439_vm1, %v421_v4, 0.0  ;;  %v9361_v8 = vpop.f32.mrb[14].mxu0 }
 0x104   :  { %v464_v14 = vadd.f32 %v463_v7, %v462_v5  ;;  %v430_v16 = vpop.f32.mrb[15].mxu0  ;;  %v436_v23 = vadd.f32 %v9361_v8, %v8835_v33 }
 0x105   :  { %v431_v25 = vadd.f32 %v8835_v33, %v430_v16 }
 0x106   :  { %v466_v27 = vadd.f32 %v465_v20, %v464_v14  ;;  %v469_v36 = vsel %vm439_vm1, %v436_v23, 0.0 }
 0x107   :  { %v467_v32 = vsel %vm439_vm1, %v431_v25, 0.0 }
 0x108   :  { %v468_v34 = vadd.f32 %v467_v32, %v466_v27 }
 0x10a   :  { %v470_v40 = vadd.f32 %v469_v36, %v468_v34 }
 0x10c   :  { %v471_v42 = vrot.slane %v470_v40, 4 }
 0x10e   :  { %v472_v43 = vadd.f32 %v471_v42, %v470_v40 }
 0x110   :  { %v473_v53 = vrot.slane %v472_v43, 2 }
 0x112   :  { %v474_v54 = vadd.f32 %v473_v53, %v472_v43 }
 0x114   :  { %v475_v55 = vrot.slane %v474_v54, 1 }
 0x116   :  { %v476_v56 = vadd.f32 %v475_v55, %v474_v54 }
 0x118   :  { %v478_v58 = vmul.f32 0.0078125, %v476_v56 }
 0x11a   :  { %v10332_v63 = vsub.f32 %v10308_v39, %v478_v58  ;;  %v10335_v5 = vsub.f32 %v10306_v35, %v478_v58  ;;  %v10337_v33 = vsub.f32 %v371_v51, %v478_v58  ;;  %v10340_v7 = vsub.f32 %v10314_v50, %v478_v58 }
 0x11b   :  { %v10342_v8 = vsub.f32 %v381_v60, %v478_v58  ;;  %v10344_v14 = vsub.f32 %v386_v59, %v478_v58  ;;  %v10346_v16 = vsub.f32 %v391_v12, %v478_v58  ;;  %v10348_v20 = vsub.f32 %v396_v9, %v478_v58 }
 0x11c   :  { %v10350_v27 = vsub.f32 %v401_v31, %v478_v58  ;;  %v10352_v39 = vsub.f32 %v406_v17, %v478_v58  ;;  %v10354_v32 = vsub.f32 %v411_v47, %v478_v58  ;;  %v10356_v35 = vsub.f32 %v416_v46, %v478_v58 }
 0x11d   :  { %v10358_v51 = vsub.f32 %v421_v4, %v478_v58  ;;  %v10360_v50 = vsub.f32 %v426_v0, %v478_v58  ;;  %v10362_v60 = vsub.f32 %v431_v25, %v478_v58  ;;  %v10364_v59 = vsub.f32 %v436_v23, %v478_v58 }
 0x11e   :  { %v495_v9 = vmul.f32 %v10332_v63, %v10332_v63  ;;  %v496_v12 = vmul.f32 %v10335_v5, %v10335_v5  ;;  %v497_v17 = vmul.f32 %v10337_v33, %v10337_v33  ;;  %v498_v31 = vmul.f32 %v10340_v7, %v10340_v7 }
 0x11f   :  { %v499_v4 = vmul.f32 %v10342_v8, %v10342_v8  ;;  %v500_v34 = vmul.f32 %v10344_v14, %v10344_v14  ;;  %v501_v42 = vmul.f32 %v10346_v16, %v10346_v16  ;;  %v502_v54 = vmul.f32 %v10348_v20, %v10348_v20 }
 0x120   :  { %v511_v46 = vsel %vm439_vm1, %v495_v9, 0.0  ;;  %v512_v47 = vsel %vm439_vm1, %v496_v12, 0.0  ;;  %v514_v23 = vsel %vm439_vm1, %v497_v17, 0.0  ;;  %v516_v36 = vsel %vm439_vm1, %v498_v31, 0.0 }
 0x121   :  { %v513_v0 = vadd.f32 %v512_v47, %v511_v46  ;;  %v518_v43 = vsel %vm439_vm1, %v499_v4, 0.0  ;;  %v520_v55 = vsel %vm439_vm1, %v500_v34, 0.0  ;;  %v503_v58 = vmul.f32 %v10350_v27, %v10350_v27 }
 0x122   :  { %v522_v9 = vsel %vm439_vm1, %v501_v42, 0.0  ;;  %v504_v17 = vmul.f32 %v10352_v39, %v10352_v39  ;;  %v524_v31 = vsel %vm439_vm1, %v502_v54, 0.0  ;;  %v505_v47 = vmul.f32 %v10354_v32, %v10354_v32 }
 0x123   :  { %v515_v25 = vadd.f32 %v514_v23, %v513_v0  ;;  %v526_v0 = vsel %vm439_vm1, %v503_v58, 0.0  ;;  %v506_v23 = vmul.f32 %v10356_v35, %v10356_v35 }
 0x125   :  { %v517_v40 = vadd.f32 %v516_v36, %v515_v25  ;;  %v528_v25 = vsel %vm439_vm1, %v504_v17, 0.0  ;;  %v507_v36 = vmul.f32 %v10358_v51, %v10358_v51 }
 0x127   :  { %v519_v53 = vadd.f32 %v518_v43, %v517_v40  ;;  %v530_v40 = vsel %vm439_vm1, %v505_v47, 0.0  ;;  %v508_v43 = vmul.f32 %v10360_v50, %v10360_v50 }
 0x129   :  { %v521_v56 = vadd.f32 %v520_v55, %v519_v53  ;;  %v532_v53 = vsel %vm439_vm1, %v506_v23, 0.0  ;;  %v509_v55 = vmul.f32 %v10362_v60, %v10362_v60 }
 0x12b   :  { %v523_v12 = vadd.f32 %v522_v9, %v521_v56  ;;  %v534_v56 = vsel %vm439_vm1, %v507_v36, 0.0  ;;  %v510_v9 = vmul.f32 %v10364_v59, %v10364_v59 }
 0x12d   :  { %v525_v46 = vadd.f32 %v524_v31, %v523_v12  ;;  %v536_v12 = vsel %vm439_vm1, %v508_v43, 0.0  ;;  %v538_v31 = vsel %vm439_vm1, %v509_v55, 0.0  ;;  %v540_v47 = vsel %vm439_vm1, %v510_v9, 0.0  ;;  %v239_v43 = vld [vmem:[%s14102_s1 + $0x28] sm:$0x1] }
 0x12f   :  { %v527_v4 = vadd.f32 %v526_v0, %v525_v46 }
 0x131   :  { %v529_v34 = vadd.f32 %v528_v25, %v527_v4 }
 0x133   :  { %v531_v42 = vadd.f32 %v530_v40, %v529_v34 }
 0x135   :  { %v533_v54 = vadd.f32 %v532_v53, %v531_v42 }
 0x137   :  { %v535_v58 = vadd.f32 %v534_v56, %v533_v54 }
 0x139   :  { %v537_v17 = vadd.f32 %v536_v12, %v535_v58  ;;  %v10423_v58 = vld [vmem:[%s14102_s1 + $0x30] ss:$0 sm:$0xff] }
 0x13b   :  { %v539_v46 = vadd.f32 %v538_v31, %v537_v17 }
 0x13d   :  { %v541_v0 = vadd.f32 %v540_v47, %v539_v46 }
 0x13f   :  { %v542_v4 = vrot.slane %v541_v0, 4 }
 0x141   :  { %v543_v23 = vadd.f32 %v542_v4, %v541_v0 }
 0x143   :  { %v544_v25 = vrot.slane %v543_v23, 2 }
 0x145   :  { %v545_v34 = vadd.f32 %v544_v25, %v543_v23 }
 0x147   :  { %v546_v40 = vrot.slane %v545_v34, 1 }
 0x149   :  { %v547_v42 = vadd.f32 %v546_v40, %v545_v34 }
 0x14b   :  { %v548_v36 = vmul.f32 0.0078125, %v547_v42 }
 0x14d   :  { %v549_v53 = vadd.f32 1e-05, %v548_v36 }
 0x14f   :  { %9871 = vrsqrt.f32 %v549_v53 }
 0x159   :  { %v9872_v54 = vpop.eup %9871 }
 0x15a   :  { %v551_v56 = vmul.f32 %v9872_v54, %v239_v43 }
 0x15c   :  { %v10418_v55 = vrot.slane %v551_v56, %v10164_v15 }
 0x15e   :  { %v10427_v9 = vmul.f32 %v10418_v55, %v10362_v60  ;;  %v556_v12 = vmul.f32 %v10418_v55, %v10332_v63  ;;  %v557_v17 = vmul.f32 %v10418_v55, %v10335_v5  ;;  %v558_v31 = vmul.f32 %v10418_v55, %v10337_v33 }
 0x15f   :  { %v559_v46 = vmul.f32 %v10418_v55, %v10340_v7  ;;  %v560_v47 = vmul.f32 %v10418_v55, %v10342_v8  ;;  %v562_v0 = vmul.f32 %v10418_v55, %v10346_v16  ;;  %v561_v33 = vmul.f32 %v10418_v55, %v10344_v14 }
 0x160   :  { %v576_v60 = vadd.f32 %v10423_v58, %v556_v12  ;;  %v577_v4 = vadd.f32 %v10423_v58, %v557_v17  ;;  %v578_v63 = vadd.f32 %v10423_v58, %v558_v31  ;;  %v563_v43 = vmul.f32 %v10418_v55, %v10348_v20 }
 0x161   :  { %v579_v5 = vadd.f32 %v10423_v58, %v559_v46  ;;  %v580_v23 = vadd.f32 %v10423_v58, %v560_v47  ;;  %v581_v42 = vadd.f32 %v10423_v58, %v561_v33  ;;  %v582_v36 = vadd.f32 %v10423_v58, %v562_v0 }
 0x162   :  { %vm592_vm2 = vcmp.gt.f32.partialorder %v576_v60, 0.0  ;;  %v608_v7 = vmul.f32 0.01, %v576_v60  ;;  %vm593_vm3 = vcmp.gt.f32.partialorder %v577_v4, 0.0  ;;  %v609_v8 = vmul.f32 0.01, %v577_v4 }
 0x163   :  { %vm594_vm4 = vcmp.gt.f32.partialorder %v578_v63, 0.0  ;;  %v610_v25 = vmul.f32 0.01, %v578_v63  ;;  %v611_v40 = vmul.f32 0.01, %v579_v5  ;;  %vm595_vm5 = vcmp.gt.f32.partialorder %v579_v5, 0.0 }
 0x164   :  { %v624_v16 = vsel %vm592_vm2, %v576_v60, %v608_v7  ;;  %v625_v34 = vsel %vm593_vm3, %v577_v4, %v609_v8  ;;  %v612_v14 = vmul.f32 0.01, %v580_v23  ;;  %vm596_vm6 = vcmp.gt.f32.partialorder %v580_v23, 0.0 }
 0x165   :  { %9366 = vmatprep.mubr.msk.f32.mxu1 %vm439_vm1, %v624_v16  ;;  %v626_v53 = vsel %vm594_vm4, %v578_v63, %v610_v25  ;;  %v564_v54 = vmul.f32 %v10418_v55, %v10350_v27  ;;  %v566_v56 = vmul.f32 %v10418_v55, %v10354_v32  ;;  %v568_v12 = vmul.f32 %v10418_v55, %v10358_v51 }
 0x166   :  { %9367 = vmatmul.mubr.msk.f32.vlgmr.msra.gmra.mrb[0].mxu1 %vm439_vm1, %v625_v34  ;;  %v627_v17 = vsel %vm595_vm5, %v579_v5, %v611_v40  ;;  %v613_v31 = vmul.f32 0.01, %v581_v42  ;;  %v583_v46 = vadd.f32 %v10423_v58, %v563_v43  ;;  %v565_v47 = vmul.f32 %v10418_v55, %v10352_v39 }
 0x167   :  { %9369 = vmatprep.mubr.msk.f32.mxu1 %vm439_vm1, %v626_v53  ;;  %v628_v20 = vsel %vm596_vm6, %v580_v23, %v612_v14  ;;  %vm597_vm7 = vcmp.gt.f32.partialorder %v581_v42, 0.0  ;;  %v614_v0 = vmul.f32 0.01, %v582_v36  ;;  %v584_v27 = vadd.f32 %v10423_v58, %v564_v54 }
 0x168   :  { %vm598_vm8 = vcmp.gt.f32.partialorder %v582_v36, 0.0  ;;  %v629_v32 = vsel %vm597_vm7, %v581_v42, %v613_v31  ;;  %v615_v60 = vmul.f32 0.01, %v583_v46  ;;  %v585_v51 = vadd.f32 %v10423_v58, %v565_v47 }
 0x169   :  { %v567_v4 = vmul.f32 %v10418_v55, %v10356_v35  ;;  %v630_v39 = vsel %vm598_vm8, %v582_v36, %v614_v0  ;;  %vm599_vm9 = vcmp.gt.f32.partialorder %v583_v46, 0.0  ;;  %v616_v63 = vmul.f32 0.01, %v584_v27 }
 0x16a   :  { %9370 = vmatmul.mubr.msk.f32.gmra.mrb[2].mxu1 %vm439_vm1, %v627_v17  ;;  %v586_v5 = vadd.f32 %v10423_v58, %v566_v56  ;;  %vm600_vm10 = vcmp.gt.f32.partialorder %v584_v27, 0.0  ;;  %v631_v23 = vsel %vm599_vm9, %v583_v46, %v615_v60  ;;  %v617_v33 = vmul.f32 0.01, %v585_v51  ;;  %v1042_v46 = vld [vmem:[%s14102_s1 + $0x68] sm:$0xff] }
 0x16b   :  { %9372 = vmatprep.mubr.msk.f32.mxu1 %vm439_vm1, %v628_v20  ;;  %v587_v7 = vadd.f32 %v10423_v58, %v567_v4  ;;  %v569_v8 = vmul.f32 %v10418_v55, %v10360_v50  ;;  %v632_v35 = vsel %vm600_vm10, %v584_v27, %v616_v63  ;;  %vm601_vm11 = vcmp.gt.f32.partialorder %v585_v51, 0.0  ;;  %v8853_v20 = vld [vmem:[%s14102_s1 + $0x48] ss:$0 sm:$0xff] }
 0x16c   :  { %v618_v25 = vmul.f32 0.01, %v586_v5  ;;  %v588_v16 = vadd.f32 %v10423_v58, %v568_v12  ;;  %vm602_vm12 = vcmp.gt.f32.partialorder %v586_v5, 0.0  ;;  %v633_v34 = vsel %vm601_vm11, %v585_v51, %v617_v33 }
 0x16d   :  { %v619_v40 = vmul.f32 0.01, %v587_v7  ;;  %v589_v42 = vadd.f32 %v10423_v58, %v569_v8  ;;  %v571_v36 = vmul.f32 %v10418_v55, %v10364_v59  ;;  %v590_v50 = vadd.f32 %v10423_v58, %v10427_v9 }
 0x16e   :  { %9373 = vmatmul.mubr.msk.f32.gmra.mrb[4].mxu1 %vm439_vm1, %v629_v32  ;;  %v634_v53 = vsel %vm602_vm12, %v586_v5, %v618_v25  ;;  %vm603_vm13 = vcmp.gt.f32.partialorder %v587_v7, 0.0  ;;  %v620_v14 = vmul.f32 0.01, %v588_v16  ;;  %vm604_vm14 = vcmp.gt.f32.partialorder %v588_v16, 0.0 }
 0x16f   :  { %9375 = vmatprep.mubr.msk.f32.mxu1 %vm439_vm1, %v630_v39  ;;  %v635_v43 = vsel %vm603_vm13, %v587_v7, %v619_v40  ;;  %v621_v54 = vmul.f32 0.01, %v589_v42  ;;  %v591_v56 = vadd.f32 %v10423_v58, %v571_v36  ;;  %vm605_vm15 = vcmp.gt.f32.partialorder %v589_v42, 0.0  ;;  %v1041_v58 = vld [vmem:[%s14102_s1 + $0x60] sm:$0xff] }
 0x170   :  { %v636_v12 = vsel %vm604_vm14, %v588_v16, %v620_v14  ;;  %v622_v59 = vmul.f32 0.01, %v590_v50  ;;  %vm606_vm2 = vcmp.gt.f32.partialorder %v590_v50, 0.0  ;;  %v9771_v47 = vpack.c.bf16 %v1042_v46, %v1041_v58 }
 0x171   :  { %v637_v55 = vsel %vm605_vm15, %v589_v42, %v621_v54  ;;  %v623_v9 = vmul.f32 0.01, %v591_v56  ;;  %vm607_vm3 = vcmp.gt.f32.partialorder %v591_v56, 0.0 }
 0x172   :  { %9376 = vmatmul.mubr.msk.f32.gmra.mrb[6].mxu1 %vm439_vm1, %v631_v23  ;;  %v638_v17 = vsel %vm606_vm2, %v590_v50, %v622_v59  ;;  %9772 = vmatprep.subr.bf16.mxu1 %v9771_v47 }
 0x173   :  { %9378 = vmatprep.mubr.msk.f32.mxu1 %vm439_vm1, %v632_v35  ;;  %v639_v31 = vsel %vm607_vm3, %v591_v56, %v623_v9  ;;  %9774 = vmatpush3.bf16.msra.mxu1 %v9771_v47 }
 0x176   :  { %9379 = vmatmul.mubr.msk.f32.gmra.mrb[8].mxu1 %vm439_vm1, %v633_v34 }
 0x177   :  { %9381 = vmatprep.mubr.msk.f32.mxu1 %vm439_vm1, %v634_v53 }
 0x17a   :  { %9382 = vmatmul.mubr.msk.f32.gmra.mrb[10].mxu1 %vm439_vm1, %v635_v43 }
 0x17b   :  { %9384 = vmatprep.mubr.msk.f32.mxu1 %vm439_vm1, %v636_v12 }
 0x17e   :  { %9385 = vmatmul.mubr.msk.f32.gmra.mrb[12].mxu1 %vm439_vm1, %v637_v55 }
 0x17f   :  { %9387 = vmatprep.mubr.msk.f32.mxu1 %vm439_vm1, %v638_v17 }
 0x182   :  { %9388 = vmatmul.mubr.msk.f32.gmra.mrb[14].mxu1 %vm439_vm1, %v639_v31 }
 0x239   :  { %v9368_v0 = vpop.f32.mrb[0].mxu1 }
 0x23a   :  { %v10501_v27 = vadd.f32 %v9368_v0, %v8853_v20  ;;  %v763_v32 = vpop.f32.mrb[1].mxu1 }
 0x23b   :  { %v10503_v60 = vadd.f32 %v8853_v20, %v763_v32 }
 0x23c   :  { %v843_v51 = vsel %vm439_vm1, %v10501_v27, 0.0 }
 0x23d   :  { %v842_v4 = vsel %vm439_vm1, %v10503_v60, 0.0  ;;  %v9371_v39 = vpop.f32.mrb[2].mxu1 }
 0x23e   :  { %v844_v63 = vadd.f32 %v843_v51, %v842_v4  ;;  %v773_v5 = vpop.f32.mrb[3].mxu1  ;;  %v10509_v23 = vadd.f32 %v9371_v39, %v8853_v20 }
 0x23f   :  { %v774_v33 = vadd.f32 %v8853_v20, %v773_v5 }
 0x240   :  { %v847_v16 = vsel %vm439_vm1, %v10509_v23, 0.0 }
 0x241   :  { %v845_v7 = vsel %vm439_vm1, %v774_v33, 0.0  ;;  %v9374_v8 = vpop.f32.mrb[4].mxu1 }
 0x242   :  { %v846_v35 = vadd.f32 %v845_v7, %v844_v63  ;;  %v783_v25 = vpop.f32.mrb[5].mxu1  ;;  %v789_v34 = vadd.f32 %v9374_v8, %v8853_v20 }
 0x243   :  { %v784_v40 = vadd.f32 %v8853_v20, %v783_v25 }
 0x244   :  { %v848_v42 = vadd.f32 %v847_v16, %v846_v35  ;;  %v851_v43 = vsel %vm439_vm1, %v789_v34, 0.0 }
 0x245   :  { %v849_v36 = vsel %vm439_vm1, %v784_v40, 0.0  ;;  %v9377_v50 = vpop.f32.mrb[6].mxu1 }
 0x246   :  { %v850_v53 = vadd.f32 %v849_v36, %v848_v42  ;;  %v793_v14 = vpop.f32.mrb[7].mxu1  ;;  %v799_v54 = vadd.f32 %v9377_v50, %v8853_v20 }
 0x247   :  { %v794_v56 = vadd.f32 %v8853_v20, %v793_v14 }
 0x248   :  { %v852_v12 = vadd.f32 %v851_v43, %v850_v53  ;;  %v855_v31 = vsel %vm439_vm1, %v799_v54, 0.0 }
 0x249   :  { %v853_v59 = vsel %vm439_vm1, %v794_v56, 0.0  ;;  %v9380_v55 = vpop.f32.mrb[8].mxu1 }
 0x24a   :  { %v854_v9 = vadd.f32 %v853_v59, %v852_v12  ;;  %v803_v17 = vpop.f32.mrb[9].mxu1  ;;  %v809_v58 = vadd.f32 %v9380_v55, %v8853_v20 }
 0x24b   :  { %v804_v46 = vadd.f32 %v8853_v20, %v803_v17 }
 0x24c   :  { %v856_v47 = vadd.f32 %v855_v31, %v854_v9  ;;  %v859_v39 = vsel %vm439_vm1, %v809_v58, 0.0 }
 0x24d   :  { %v857_v0 = vsel %vm439_vm1, %v804_v46, 0.0  ;;  %v9383_v32 = vpop.f32.mrb[10].mxu1 }
 0x24e   :  { %v858_v51 = vadd.f32 %v857_v0, %v856_v47  ;;  %v813_v4 = vpop.f32.mrb[11].mxu1  ;;  %v819_v63 = vadd.f32 %v9383_v32, %v8853_v20 }
 0x24f   :  { %v814_v5 = vadd.f32 %v8853_v20, %v813_v4 }
 0x250   :  { %v860_v7 = vadd.f32 %v859_v39, %v858_v51  ;;  %v863_v42 = vsel %vm439_vm1, %v819_v63, 0.0 }
 0x251   :  { %v861_v8 = vsel %vm439_vm1, %v814_v5, 0.0  ;;  %v9386_v35 = vpop.f32.mrb[12].mxu1 }
 0x252   :  { %v862_v25 = vadd.f32 %v861_v8, %v860_v7  ;;  %v823_v16 = vpop.f32.mrb[13].mxu1  ;;  %v829_v36 = vadd.f32 %v9386_v35, %v8853_v20 }
 0x253   :  { %v824_v50 = vadd.f32 %v8853_v20, %v823_v16 }
 0x254   :  { %v864_v53 = vadd.f32 %v863_v42, %v862_v25  ;;  %v867_v55 = vsel %vm439_vm1, %v829_v36, 0.0 }
 0x255   :  { %v865_v14 = vsel %vm439_vm1, %v824_v50, 0.0  ;;  %v9389_v43 = vpop.f32.mrb[14].mxu1 }
 0x256   :  { %v866_v12 = vadd.f32 %v865_v14, %v864_v53  ;;  %v833_v59 = vpop.f32.mrb[15].mxu1  ;;  %v839_v9 = vadd.f32 %v9389_v43, %v8853_v20 }
 0x257   :  { %v834_v17 = vadd.f32 %v8853_v20, %v833_v59 }
 0x258   :  { %v868_v31 = vadd.f32 %v867_v55, %v866_v12  ;;  %v871_v32 = vsel %vm439_vm1, %v839_v9, 0.0 }
 0x259   :  { %v869_v47 = vsel %vm439_vm1, %v834_v17, 0.0 }
 0x25a   :  { %v870_v0 = vadd.f32 %v869_v47, %v868_v31 }
 0x25c   :  { %v872_v51 = vadd.f32 %v871_v32, %v870_v0 }
 0x25e   :  { %v873_v4 = vrot.slane %v872_v51, 4 }
 0x260   :  { %v874_v39 = vadd.f32 %v873_v4, %v872_v51 }
 0x262   :  { %v875_v7 = vrot.slane %v874_v39, 2 }
 0x264   :  { %v876_v8 = vadd.f32 %v875_v7, %v874_v39 }
 0x266   :  { %v877_v35 = vrot.slane %v876_v8, 1 }
 0x268   :  { %v878_v25 = vadd.f32 %v877_v35, %v876_v8 }
 0x26a   :  { %v879_v16 = vmul.f32 0.0078125, %v878_v25 }
 0x26c   :  { %v10527_v42 = vsub.f32 %v10503_v60, %v879_v16  ;;  %v10530_v53 = vsub.f32 %v10501_v27, %v879_v16  ;;  %v10532_v20 = vsub.f32 %v774_v33, %v879_v16  ;;  %v10535_v14 = vsub.f32 %v10509_v23, %v879_v16 }
 0x26d   :  { %v10537_v43 = vsub.f32 %v784_v40, %v879_v16  ;;  %v10539_v12 = vsub.f32 %v789_v34, %v879_v16  ;;  %v10541_v59 = vsub.f32 %v794_v56, %v879_v16  ;;  %v10543_v55 = vsub.f32 %v799_v54, %v879_v16 }
 0x26e   :  { %v10545_v31 = vsub.f32 %v804_v46, %v879_v16  ;;  %v10547_v60 = vsub.f32 %v809_v58, %v879_v16  ;;  %v10549_v47 = vsub.f32 %v814_v5, %v879_v16  ;;  %v10551_v27 = vsub.f32 %v819_v63, %v879_v16 }
 0x26f   :  { %v10553_v33 = vsub.f32 %v824_v50, %v879_v16  ;;  %v10555_v23 = vsub.f32 %v829_v36, %v879_v16  ;;  %v10557_v40 = vsub.f32 %v834_v17, %v879_v16  ;;  %v10559_v34 = vsub.f32 %v839_v9, %v879_v16 }
 0x270   :  { %v896_v54 = vmul.f32 %v10527_v42, %v10527_v42  ;;  %v897_v56 = vmul.f32 %v10530_v53, %v10530_v53  ;;  %v898_v58 = vmul.f32 %v10532_v20, %v10532_v20  ;;  %v899_v46 = vmul.f32 %v10535_v14, %v10535_v14 }
 0x271   :  { %v900_v50 = vmul.f32 %v10537_v43, %v10537_v43  ;;  %v901_v0 = vmul.f32 %v10539_v12, %v10539_v12  ;;  %v902_v4 = vmul.f32 %v10541_v59, %v10541_v59  ;;  %v903_v8 = vmul.f32 %v10543_v55, %v10543_v55 }
 0x272   :  { %v912_v63 = vsel %vm439_vm1, %v896_v54, 0.0  ;;  %v913_v5 = vsel %vm439_vm1, %v897_v56, 0.0  ;;  %v915_v9 = vsel %vm439_vm1, %v898_v58, 0.0  ;;  %v917_v32 = vsel %vm439_vm1, %v899_v46, 0.0 }
 0x273   :  { %v914_v36 = vadd.f32 %v913_v5, %v912_v63  ;;  %v919_v39 = vsel %vm439_vm1, %v900_v50, 0.0  ;;  %v921_v35 = vsel %vm439_vm1, %v901_v0, 0.0  ;;  %v904_v16 = vmul.f32 %v10545_v31, %v10545_v31 }
 0x274   :  { %v923_v54 = vsel %vm439_vm1, %v902_v4, 0.0  ;;  %v905_v58 = vmul.f32 %v10547_v60, %v10547_v60  ;;  %v925_v46 = vsel %vm439_vm1, %v903_v8, 0.0  ;;  %v906_v5 = vmul.f32 %v10549_v47, %v10549_v47 }
 0x275   :  { %v916_v17 = vadd.f32 %v915_v9, %v914_v36  ;;  %v927_v36 = vsel %vm439_vm1, %v904_v16, 0.0  ;;  %v907_v9 = vmul.f32 %v10551_v27, %v10551_v27 }
 0x277   :  { %v918_v51 = vadd.f32 %v917_v32, %v916_v17  ;;  %v929_v17 = vsel %vm439_vm1, %v905_v58, 0.0  ;;  %v908_v32 = vmul.f32 %v10553_v33, %v10553_v33 }
 0x279   :  { %v920_v7 = vadd.f32 %v919_v39, %v918_v51  ;;  %v931_v51 = vsel %vm439_vm1, %v906_v5, 0.0  ;;  %v909_v39 = vmul.f32 %v10555_v23, %v10555_v23 }
 0x27b   :  { %v922_v25 = vadd.f32 %v921_v35, %v920_v7  ;;  %v933_v7 = vsel %vm439_vm1, %v907_v9, 0.0  ;;  %v910_v35 = vmul.f32 %v10557_v40, %v10557_v40 }
 0x27d   :  { %v924_v56 = vadd.f32 %v923_v54, %v922_v25  ;;  %v935_v25 = vsel %vm439_vm1, %v908_v32, 0.0  ;;  %v911_v54 = vmul.f32 %v10559_v34, %v10559_v34 }
 0x27f   :  { %v926_v63 = vadd.f32 %v925_v46, %v924_v56  ;;  %v937_v56 = vsel %vm439_vm1, %v909_v39, 0.0  ;;  %v939_v46 = vsel %vm439_vm1, %v910_v35, 0.0  ;;  %v941_v5 = vsel %vm439_vm1, %v911_v54, 0.0  ;;  %v643_v39 = vld [vmem:[%s14102_s1 + $0x50] sm:$0x1] }
 0x281   :  { %v928_v50 = vadd.f32 %v927_v36, %v926_v63 }
 0x283   :  { %v930_v0 = vadd.f32 %v929_v17, %v928_v50 }
 0x285   :  { %v932_v4 = vadd.f32 %v931_v51, %v930_v0 }
 0x287   :  { %v934_v8 = vadd.f32 %v933_v7, %v932_v4 }
 0x289   :  { %v936_v16 = vadd.f32 %v935_v25, %v934_v8 }
 0x28b   :  { %v938_v58 = vadd.f32 %v937_v56, %v936_v16  ;;  %v10618_v16 = vld [vmem:[%s14102_s1 + $0x58] ss:$0 sm:$0xff] }
 0x28d   :  { %v940_v63 = vadd.f32 %v939_v46, %v938_v58 }
 0x28f   :  { %v942_v36 = vadd.f32 %v941_v5, %v940_v63 }
 0x291   :  { %v943_v50 = vrot.slane %v942_v36, 4 }
 0x293   :  { %v944_v9 = vadd.f32 %v943_v50, %v942_v36 }
 0x295   :  { %v945_v17 = vrot.slane %v944_v9, 2 }
 0x297   :  { %v946_v0 = vadd.f32 %v945_v17, %v944_v9 }
 0x299   :  { %v947_v51 = vrot.slane %v946_v0, 1 }
 0x29b   :  { %v948_v4 = vadd.f32 %v947_v51, %v946_v0 }
 0x29d   :  { %v949_v32 = vmul.f32 0.0078125, %v948_v4 }
 0x29f   :  { %v950_v7 = vadd.f32 1e-05, %v949_v32 }
 0x2a1   :  { %9873 = vrsqrt.f32 %v950_v7 }
 0x2ab   :  { %v9874_v8 = vpop.eup %9873 }
 0x2ac   :  { %v952_v25 = vmul.f32 %v9874_v8, %v643_v39 }
 0x2ae   :  { %v10613_v35 = vrot.slane %v952_v25, %v10164_v15 }
 0x2b0   :  { %v10622_v54 = vmul.f32 %v10613_v35, %v10557_v40  ;;  %v957_v56 = vmul.f32 %v10613_v35, %v10527_v42  ;;  %v958_v58 = vmul.f32 %v10613_v35, %v10530_v53  ;;  %v959_v46 = vmul.f32 %v10613_v35, %v10532_v20 }
 0x2b1   :  { %v960_v63 = vmul.f32 %v10613_v35, %v10535_v14  ;;  %v961_v5 = vmul.f32 %v10613_v35, %v10537_v43  ;;  %v963_v36 = vmul.f32 %v10613_v35, %v10541_v59  ;;  %v962_v20 = vmul.f32 %v10613_v35, %v10539_v12 }
 0x2b2   :  { %v977_v40 = vadd.f32 %v10618_v16, %v957_v56  ;;  %v978_v50 = vadd.f32 %v10618_v16, %v958_v58  ;;  %v979_v42 = vadd.f32 %v10618_v16, %v959_v46  ;;  %v964_v39 = vmul.f32 %v10613_v35, %v10543_v55 }
 0x2b3   :  { %v980_v53 = vadd.f32 %v10618_v16, %v960_v63  ;;  %v981_v9 = vadd.f32 %v10618_v16, %v961_v5  ;;  %v982_v4 = vadd.f32 %v10618_v16, %v962_v20  ;;  %v983_v32 = vadd.f32 %v10618_v16, %v963_v36 }
 0x2b4   :  { %vm993_vm4 = vcmp.gt.f32.partialorder %v977_v40, 0.0  ;;  %v1009_v14 = vmul.f32 0.01, %v977_v40  ;;  %vm994_vm5 = vcmp.gt.f32.partialorder %v978_v50, 0.0  ;;  %v1010_v43 = vmul.f32 0.01, %v978_v50 }
 0x2b5   :  { %vm995_vm6 = vcmp.gt.f32.partialorder %v979_v42, 0.0  ;;  %v1011_v17 = vmul.f32 0.01, %v979_v42  ;;  %v1012_v51 = vmul.f32 0.01, %v980_v53  ;;  %vm996_vm7 = vcmp.gt.f32.partialorder %v980_v53, 0.0 }
 0x2b6   :  { %v1025_v59 = vsel %vm993_vm4, %v977_v40, %v1009_v14  ;;  %v1026_v0 = vsel %vm994_vm5, %v978_v50, %v1010_v43  ;;  %v1013_v12 = vmul.f32 0.01, %v981_v9  ;;  %vm997_vm8 = vcmp.gt.f32.partialorder %v981_v9, 0.0 }
 0x2b7   :  { %9394 = vmatprep.mubr.msk.f32.mxu1 %vm439_vm1, %v1025_v59  ;;  %v1027_v7 = vsel %vm995_vm6, %v979_v42, %v1011_v17  ;;  %v965_v8 = vmul.f32 %v10613_v35, %v10545_v31  ;;  %v967_v25 = vmul.f32 %v10613_v35, %v10549_v47  ;;  %v969_v56 = vmul.f32 %v10613_v35, %v10553_v33 }
 0x2b8   :  { %9395 = vmatmul.mubr.msk.f32.vlgmr.msra.gmra.mrb[16].mxu1 %vm439_vm1, %v1026_v0  ;;  %v1028_v58 = vsel %vm996_vm7, %v980_v53, %v1012_v51  ;;  %v1014_v46 = vmul.f32 0.01, %v982_v4  ;;  %v984_v63 = vadd.f32 %v10618_v16, %v964_v39  ;;  %v966_v5 = vmul.f32 %v10613_v35, %v10547_v60 }
 0x2b9   :  { %9397 = vmatprep.mubr.msk.f32.mxu1 %vm439_vm1, %v1027_v7  ;;  %v1029_v55 = vsel %vm997_vm8, %v981_v9, %v1013_v12  ;;  %vm998_vm9 = vcmp.gt.f32.partialorder %v982_v4, 0.0  ;;  %v1015_v36 = vmul.f32 0.01, %v983_v32  ;;  %v985_v31 = vadd.f32 %v10618_v16, %v965_v8 }
 0x2ba   :  { %vm999_vm10 = vcmp.gt.f32.partialorder %v983_v32, 0.0  ;;  %v1030_v47 = vsel %vm998_vm9, %v982_v4, %v1014_v46  ;;  %v1016_v40 = vmul.f32 0.01, %v984_v63  ;;  %v986_v33 = vadd.f32 %v10618_v16, %v966_v5  ;;  %v8871_v5 = vld [vmem:[%s14102_s1 + $0x70] ss:$0 sm:$0xff] }
 0x2bb   :  { %v968_v50 = vmul.f32 %v10613_v35, %v10551_v27  ;;  %v1031_v60 = vsel %vm999_vm10, %v983_v32, %v1015_v36  ;;  %vm1000_vm11 = vcmp.gt.f32.partialorder %v984_v63, 0.0  ;;  %v1017_v42 = vmul.f32 0.01, %v985_v31 }
 0x2bc   :  { %9398 = vmatmul.mubr.msk.f32.gmra.mrb[18].mxu1 %vm439_vm1, %v1028_v58  ;;  %v987_v53 = vadd.f32 %v10618_v16, %v967_v25  ;;  %vm1001_vm12 = vcmp.gt.f32.partialorder %v985_v31, 0.0  ;;  %v1032_v9 = vsel %vm1000_vm11, %v984_v63, %v1016_v40  ;;  %v1018_v20 = vmul.f32 0.01, %v986_v33  ;;  %v1443_v63 = vld [vmem:[%s14102_s1 + $0x88] sm:$0xff] }
 0x2bd   :  { %9400 = vmatprep.mubr.msk.f32.mxu1 %vm439_vm1, %v1029_v55  ;;  %v988_v14 = vadd.f32 %v10618_v16, %v968_v50  ;;  %v970_v43 = vmul.f32 %v10613_v35, %v10555_v23  ;;  %v1033_v27 = vsel %vm1001_vm12, %v985_v31, %v1017_v42  ;;  %vm1002_vm13 = vcmp.gt.f32.partialorder %v986_v33, 0.0  ;;  %9418 = vmatprep.subr.mxu0 %v1443_v63 }
 0x2be   :  { %v1019_v17 = vmul.f32 0.01, %v987_v53  ;;  %v989_v59 = vadd.f32 %v10618_v16, %v969_v56  ;;  %vm1003_vm14 = vcmp.gt.f32.partialorder %v987_v53, 0.0  ;;  %v1034_v0 = vsel %vm1002_vm13, %v986_v33, %v1018_v20  ;;  %9419 = vmatpush3.msra.mxu0 %v1443_v63 }
 0x2bf   :  { %v1020_v51 = vmul.f32 0.01, %v988_v14  ;;  %v990_v4 = vadd.f32 %v10618_v16, %v970_v43  ;;  %v972_v32 = vmul.f32 %v10613_v35, %v10559_v34  ;;  %v991_v23 = vadd.f32 %v10618_v16, %v10622_v54 }
 0x2c0   :  { %9401 = vmatmul.mubr.msk.f32.gmra.mrb[20].mxu1 %vm439_vm1, %v1030_v47  ;;  %v1035_v7 = vsel %vm1003_vm14, %v987_v53, %v1019_v17  ;;  %vm1004_vm15 = vcmp.gt.f32.partialorder %v988_v14, 0.0  ;;  %v1021_v12 = vmul.f32 0.01, %v989_v59  ;;  %vm1005_vm2 = vcmp.gt.f32.partialorder %v989_v59, 0.0 }
 0x2c1   :  { %9403 = vmatprep.mubr.msk.f32.mxu1 %vm439_vm1, %v1031_v60  ;;  %v1036_v39 = vsel %vm1004_vm15, %v988_v14, %v1020_v51  ;;  %v1022_v8 = vmul.f32 0.01, %v990_v4  ;;  %v992_v25 = vadd.f32 %v10618_v16, %v972_v32  ;;  %vm1006_vm3 = vcmp.gt.f32.partialorder %v990_v4, 0.0  ;;  %v10087_v16 = vld [vmem:[%s14101_s0] sm:$0xff] }
 0x2c2   :  { %v1037_v56 = vsel %vm1005_vm2, %v989_v59, %v1021_v12  ;;  %v1023_v34 = vmul.f32 0.01, %v991_v23  ;;  %vm1007_vm4 = vcmp.gt.f32.partialorder %v991_v23, 0.0  ;;  %vm1243_vm6 = vcmask 64512  }
 0x2c3   :  { %v1038_v35 = vsel %vm1006_vm3, %v990_v4, %v1022_v8  ;;  %v1024_v54 = vmul.f32 0.01, %v992_v25  ;;  %vm1008_vm5 = vcmp.gt.f32.partialorder %v992_v25, 0.0 }
 0x2c4   :  { %9404 = vmatmul.mubr.msk.f32.gmra.mrb[22].mxu1 %vm439_vm1, %v1032_v9  ;;  %v1039_v58 = vsel %vm1007_vm4, %v991_v23, %v1023_v34 }
 0x2c5   :  { %9406 = vmatprep.mubr.msk.f32.mxu1 %vm439_vm1, %v1033_v27  ;;  %v1040_v46 = vsel %vm1008_vm5, %v992_v25, %v1024_v54 }
 0x2c8   :  { %9407 = vmatmul.mubr.msk.f32.gmra.mrb[24].mxu1 %vm439_vm1, %v1034_v0 }
 0x2c9   :  { %9409 = vmatprep.mubr.msk.f32.mxu1 %vm439_vm1, %v1035_v7 }
 0x2cc   :  { %9410 = vmatmul.mubr.msk.f32.gmra.mrb[26].mxu1 %vm439_vm1, %v1036_v39 }
 0x2cd   :  { %9412 = vmatprep.mubr.msk.f32.mxu1 %vm439_vm1, %v1037_v56 }
 0x2d0   :  { %9413 = vmatmul.mubr.msk.f32.gmra.mrb[28].mxu1 %vm439_vm1, %v1038_v35 }
 0x2d1   :  { %9415 = vmatprep.mubr.msk.f32.mxu1 %vm439_vm1, %v1039_v58 }
 0x2d4   :  { %9416 = vmatmul.mubr.msk.f32.gmra.mrb[30].mxu1 %vm439_vm1, %v1040_v46 }
 0x2d5   :  { %9452 = vmatprep.mubr.msk.f32.mxu1 %vm245_vm0, %v10087_v16 }
 0x38b   :  { %v9396_v55 = vpop.f32.mrb[16].mxu1 }
 0x38c   :  { %v10697_v36 = vadd.f32 %v9396_v55, %v8871_v5  ;;  %v1164_v31 = vpop.f32.mrb[17].mxu1 }
 0x38d   :  { %v10699_v47 = vadd.f32 %v8871_v5, %v1164_v31 }
 0x38e   :  { %v1245_v40 = vsel %vm1243_vm6, %v10697_v36, 0.0 }
 0x38f   :  { %v1244_v33 = vsel %vm1243_vm6, %v10699_v47, 0.0  ;;  %v9399_v50 = vpop.f32.mrb[18].mxu1 }
 0x390   :  { %v1246_v60 = vadd.f32 %v1245_v40, %v1244_v33  ;;  %v1174_v42 = vpop.f32.mrb[19].mxu1  ;;  %v10705_v53 = vadd.f32 %v9399_v50, %v8871_v5 }
 0x391   :  { %v1175_v9 = vadd.f32 %v8871_v5, %v1174_v42 }
 0x392   :  { %v1249_v17 = vsel %vm1243_vm6, %v10705_v53, 0.0 }
 0x393   :  { %v1247_v20 = vsel %vm1243_vm6, %v1175_v9, 0.0  ;;  %v9402_v14 = vpop.f32.mrb[20].mxu1 }
 0x394   :  { %v1248_v43 = vadd.f32 %v1247_v20, %v1246_v60  ;;  %v1184_v27 = vpop.f32.mrb[21].mxu1  ;;  %v1190_v59 = vadd.f32 %v9402_v14, %v8871_v5 }
 0x395   :  { %v1185_v0 = vadd.f32 %v8871_v5, %v1184_v27 }
 0x396   :  { %v1250_v51 = vadd.f32 %v1249_v17, %v1248_v43  ;;  %v1253_v12 = vsel %vm1243_vm6, %v1190_v59, 0.0 }
 0x397   :  { %v1251_v4 = vsel %vm1243_vm6, %v1185_v0, 0.0  ;;  %v9405_v32 = vpop.f32.mrb[22].mxu1 }
 0x398   :  { %v1252_v23 = vadd.f32 %v1251_v4, %v1250_v51  ;;  %v1194_v7 = vpop.f32.mrb[23].mxu1  ;;  %v1200_v39 = vadd.f32 %v9405_v32, %v8871_v5 }
 0x399   :  { %v1195_v8 = vadd.f32 %v8871_v5, %v1194_v7 }
 0x39a   :  { %v1254_v25 = vadd.f32 %v1253_v12, %v1252_v23  ;;  %v1257_v58 = vsel %vm1243_vm6, %v1200_v39, 0.0 }
 0x39b   :  { %v1255_v56 = vsel %vm1243_vm6, %v1195_v8, 0.0  ;;  %v9408_v34 = vpop.f32.mrb[24].mxu1 }
 0x39c   :  { %v1256_v35 = vadd.f32 %v1255_v56, %v1254_v25  ;;  %v1204_v54 = vpop.f32.mrb[25].mxu1  ;;  %v1210_v46 = vadd.f32 %v9408_v34, %v8871_v5 }
 0x39d   :  { %v1205_v16 = vadd.f32 %v8871_v5, %v1204_v54 }
 0x39e   :  { %v1258_v63 = vadd.f32 %v1257_v58, %v1256_v35  ;;  %v1261_v50 = vsel %vm1243_vm6, %v1210_v46, 0.0 }
 0x39f   :  { %v1259_v55 = vsel %vm1243_vm6, %v1205_v16, 0.0  ;;  %v9411_v31 = vpop.f32.mrb[26].mxu1 }
 0x3a0   :  { %v1260_v40 = vadd.f32 %v1259_v55, %v1258_v63  ;;  %v1214_v33 = vpop.f32.mrb[27].mxu1  ;;  %v1220_v60 = vadd.f32 %v9411_v31, %v8871_v5 }
 0x3a1   :  { %v1215_v42 = vadd.f32 %v8871_v5, %v1214_v33 }
 0x3a2   :  { %v1262_v20 = vadd.f32 %v1261_v50, %v1260_v40  ;;  %v1265_v51 = vsel %vm1243_vm6, %v1220_v60, 0.0 }
 0x3a3   :  { %v1263_v14 = vsel %vm1243_vm6, %v1215_v42, 0.0  ;;  %v9414_v43 = vpop.f32.mrb[28].mxu1 }
 0x3a4   :  { %v1264_v27 = vadd.f32 %v1263_v14, %v1262_v20  ;;  %v1224_v17 = vpop.f32.mrb[29].mxu1  ;;  %v1230_v4 = vadd.f32 %v9414_v43, %v8871_v5 }
 0x3a5   :  { %v1225_v32 = vadd.f32 %v8871_v5, %v1224_v17 }
 0x3a6   :  { %v1266_v23 = vadd.f32 %v1265_v51, %v1264_v27  ;;  %v1269_v34 = vsel %vm1243_vm6, %v1230_v4, 0.0 }
 0x3a7   :  { %v1267_v7 = vsel %vm1243_vm6, %v1225_v32, 0.0  ;;  %v9417_v12 = vpop.f32.mrb[30].mxu1 }
 0x3a8   :  { %v1268_v25 = vadd.f32 %v1267_v7, %v1266_v23  ;;  %v1234_v56 = vpop.f32.mrb[31].mxu1  ;;  %v1240_v35 = vadd.f32 %v9417_v12, %v8871_v5 }
 0x3a9   :  { %v1235_v54 = vadd.f32 %v8871_v5, %v1234_v56 }
 0x3aa   :  { %v1270_v58 = vadd.f32 %v1269_v34, %v1268_v25  ;;  %v1273_v31 = vsel %vm1243_vm6, %v1240_v35, 0.0 }
 0x3ab   :  { %v1271_v63 = vsel %vm1243_vm6, %v1235_v54, 0.0 }
 0x3ac   :  { %v1272_v55 = vadd.f32 %v1271_v63, %v1270_v58 }
 0x3ae   :  { %v1274_v40 = vadd.f32 %v1273_v31, %v1272_v55 }
 0x3b0   :  { %v1275_v33 = vrot.slane %v1274_v40, 4 }
 0x3b2   :  { %v1276_v50 = vadd.f32 %v1275_v33, %v1274_v40 }
 0x3b4   :  { %v1277_v20 = vrot.slane %v1276_v50, 2 }
 0x3b6   :  { %v1278_v14 = vadd.f32 %v1277_v20, %v1276_v50 }
 0x3b8   :  { %v1279_v43 = vrot.slane %v1278_v14, 1 }
 0x3ba   :  { %v1280_v27 = vadd.f32 %v1279_v43, %v1278_v14 }
 0x3bc   :  { %v1281_v17 = vmul.f32 0.0078125, %v1280_v27 }
 0x3be   :  { %v10723_v51 = vsub.f32 %v10699_v47, %v1281_v17  ;;  %v10726_v23 = vsub.f32 %v10697_v36, %v1281_v17  ;;  %v10728_v5 = vsub.f32 %v1175_v9, %v1281_v17  ;;  %v10731_v7 = vsub.f32 %v10705_v53, %v1281_v17 }
 0x3bf   :  { %v10733_v12 = vsub.f32 %v1185_v0, %v1281_v17  ;;  %v10735_v25 = vsub.f32 %v1190_v59, %v1281_v17  ;;  %v10737_v56 = vsub.f32 %v1195_v8, %v1281_v17  ;;  %v10739_v34 = vsub.f32 %v1200_v39, %v1281_v17 }
 0x3c0   :  { %v10741_v58 = vsub.f32 %v1205_v16, %v1281_v17  ;;  %v10743_v47 = vsub.f32 %v1210_v46, %v1281_v17  ;;  %v10745_v63 = vsub.f32 %v1215_v42, %v1281_v17  ;;  %v10747_v36 = vsub.f32 %v1220_v60, %v1281_v17 }
 0x3c1   :  { %v10749_v9 = vsub.f32 %v1225_v32, %v1281_v17  ;;  %v10751_v53 = vsub.f32 %v1230_v4, %v1281_v17  ;;  %v10753_v0 = vsub.f32 %v1235_v54, %v1281_v17  ;;  %v10755_v59 = vsub.f32 %v1240_v35, %v1281_v17 }
 0x3c2   :  { %v1298_v39 = vmul.f32 %v10723_v51, %v10723_v51  ;;  %v1299_v8 = vmul.f32 %v10726_v23, %v10726_v23  ;;  %v1300_v46 = vmul.f32 %v10728_v5, %v10728_v5  ;;  %v1301_v16 = vmul.f32 %v10731_v7, %v10731_v7 }
 0x3c3   :  { %v1302_v32 = vmul.f32 %v10733_v12, %v10733_v12  ;;  %v1303_v55 = vmul.f32 %v10735_v25, %v10735_v25  ;;  %v1304_v33 = vmul.f32 %v10737_v56, %v10737_v56  ;;  %v1305_v14 = vmul.f32 %v10739_v34, %v10739_v34 }
 0x3c4   :  { %v1314_v60 = vsel %vm1243_vm6, %v1298_v39, 0.0  ;;  %v1315_v42 = vsel %vm1243_vm6, %v1299_v8, 0.0  ;;  %v1317_v35 = vsel %vm1243_vm6, %v1300_v46, 0.0  ;;  %v1319_v31 = vsel %vm1243_vm6, %v1301_v16, 0.0 }
 0x3c5   :  { %v1316_v4 = vadd.f32 %v1315_v42, %v1314_v60  ;;  %v1321_v50 = vsel %vm1243_vm6, %v1302_v32, 0.0  ;;  %v1323_v43 = vsel %vm1243_vm6, %v1303_v55, 0.0  ;;  %v1306_v17 = vmul.f32 %v10741_v58, %v10741_v58 }
 0x3c6   :  { %v1325_v39 = vsel %vm1243_vm6, %v1304_v33, 0.0  ;;  %v1307_v46 = vmul.f32 %v10743_v47, %v10743_v47  ;;  %v1327_v16 = vsel %vm1243_vm6, %v1305_v14, 0.0  ;;  %v1308_v42 = vmul.f32 %v10745_v63, %v10745_v63 }
 0x3c7   :  { %v1318_v54 = vadd.f32 %v1317_v35, %v1316_v4  ;;  %v1329_v4 = vsel %vm1243_vm6, %v1306_v17, 0.0  ;;  %v1309_v35 = vmul.f32 %v10747_v36, %v10747_v36 }
 0x3c9   :  { %v1320_v40 = vadd.f32 %v1319_v31, %v1318_v54  ;;  %v1331_v54 = vsel %vm1243_vm6, %v1307_v46, 0.0  ;;  %v1310_v31 = vmul.f32 %v10749_v9, %v10749_v9 }
 0x3cb   :  { %v1322_v20 = vadd.f32 %v1321_v50, %v1320_v40  ;;  %v1333_v40 = vsel %vm1243_vm6, %v1308_v42, 0.0  ;;  %v1311_v50 = vmul.f32 %v10751_v53, %v10751_v53 }
 0x3cd   :  { %v1324_v27 = vadd.f32 %v1323_v43, %v1322_v20  ;;  %v1335_v20 = vsel %vm1243_vm6, %v1309_v35, 0.0  ;;  %v1312_v43 = vmul.f32 %v10753_v0, %v10753_v0 }
 0x3cf   :  { %v1326_v8 = vadd.f32 %v1325_v39, %v1324_v27  ;;  %v1337_v27 = vsel %vm1243_vm6, %v1310_v31, 0.0  ;;  %v1313_v39 = vmul.f32 %v10755_v59, %v10755_v59 }
 0x3d1   :  { %v1328_v60 = vadd.f32 %v1327_v16, %v1326_v8  ;;  %v1339_v8 = vsel %vm1243_vm6, %v1311_v50, 0.0  ;;  %v1341_v16 = vsel %vm1243_vm6, %v1312_v43, 0.0  ;;  %v1343_v42 = vsel %vm1243_vm6, %v1313_v39, 0.0  ;;  %v1044_v50 = vld [vmem:[%s14102_s1 + $0x78] sm:$0x1] }
 0x3d3   :  { %v1330_v32 = vadd.f32 %v1329_v4, %v1328_v60 }
 0x3d5   :  { %v1332_v55 = vadd.f32 %v1331_v54, %v1330_v32 }
 0x3d7   :  { %v1334_v33 = vadd.f32 %v1333_v40, %v1332_v55 }
 0x3d9   :  { %v1336_v14 = vadd.f32 %v1335_v20, %v1334_v33 }
 0x3db   :  { %v1338_v17 = vadd.f32 %v1337_v27, %v1336_v14 }
 0x3dd   :  { %v1340_v46 = vadd.f32 %v1339_v8, %v1338_v17  ;;  %v10814_v17 = vld [vmem:[%s14102_s1 + $0x80] ss:$0 sm:$0xff] }
 0x3df   :  { %v1342_v60 = vadd.f32 %v1341_v16, %v1340_v46 }
 0x3e1   :  { %v1344_v4 = vadd.f32 %v1343_v42, %v1342_v60 }
 0x3e3   :  { %v1345_v32 = vrot.slane %v1344_v4, 4 }
 0x3e5   :  { %v1346_v35 = vadd.f32 %v1345_v32, %v1344_v4 }
 0x3e7   :  { %v1347_v54 = vrot.slane %v1346_v35, 2 }
 0x3e9   :  { %v1348_v55 = vadd.f32 %v1347_v54, %v1346_v35 }
 0x3eb   :  { %v1349_v40 = vrot.slane %v1348_v55, 1 }
 0x3ed   :  { %v1350_v33 = vadd.f32 %v1349_v40, %v1348_v55 }
 0x3ef   :  { %v1351_v31 = vmul.f32 0.0078125, %v1350_v33 }
 0x3f1   :  { %v1352_v20 = vadd.f32 1e-05, %v1351_v31 }
 0x3f3   :  { %9875 = vrsqrt.f32 %v1352_v20 }
 0x3fd   :  { %v9876_v14 = vpop.eup %9875 }
 0x3fe   :  { %v1354_v27 = vmul.f32 %v9876_v14, %v1044_v50 }
 0x400   :  { %v10809_v43 = vrot.slane %v1354_v27, %v10164_v15 }
 0x402   :  { %v10818_v39 = vmul.f32 %v10809_v43, %v10753_v0  ;;  %v1359_v8 = vmul.f32 %v10809_v43, %v10723_v51  ;;  %v1360_v46 = vmul.f32 %v10809_v43, %v10726_v23  ;;  %v1361_v16 = vmul.f32 %v10809_v43, %v10728_v5 }
 0x403   :  { %v1362_v60 = vmul.f32 %v10809_v43, %v10731_v7  ;;  %v1363_v42 = vmul.f32 %v10809_v43, %v10733_v12  ;;  %v1365_v4 = vmul.f32 %v10809_v43, %v10737_v56  ;;  %v1364_v5 = vmul.f32 %v10809_v43, %v10735_v25 }
 0x404   :  { %v1379_v0 = vadd.f32 %v10814_v17, %v1359_v8  ;;  %v1380_v32 = vadd.f32 %v10814_v17, %v1360_v46  ;;  %v1381_v51 = vadd.f32 %v10814_v17, %v1361_v16  ;;  %v1366_v50 = vmul.f32 %v10809_v43, %v10739_v34 }
 0x405   :  { %v1382_v23 = vadd.f32 %v10814_v17, %v1362_v60  ;;  %v1383_v35 = vadd.f32 %v10814_v17, %v1363_v42  ;;  %v1384_v33 = vadd.f32 %v10814_v17, %v1364_v5  ;;  %v1385_v31 = vadd.f32 %v10814_v17, %v1365_v4 }
 0x406   :  { %vm1395_vm7 = vcmp.gt.f32.partialorder %v1379_v0, 0.0  ;;  %v1411_v7 = vmul.f32 0.01, %v1379_v0  ;;  %vm1396_vm8 = vcmp.gt.f32.partialorder %v1380_v32, 0.0  ;;  %v1412_v12 = vmul.f32 0.01, %v1380_v32 }
 0x407   :  { %vm1397_vm9 = vcmp.gt.f32.partialorder %v1381_v51, 0.0  ;;  %v1413_v54 = vmul.f32 0.01, %v1381_v51  ;;  %v1414_v40 = vmul.f32 0.01, %v1382_v23  ;;  %vm1398_vm10 = vcmp.gt.f32.partialorder %v1382_v23, 0.0 }
 0x408   :  { %v1427_v56 = vsel %vm1395_vm7, %v1379_v0, %v1411_v7  ;;  %v1428_v55 = vsel %vm1396_vm8, %v1380_v32, %v1412_v12  ;;  %v1415_v25 = vmul.f32 0.01, %v1383_v35  ;;  %vm1399_vm11 = vcmp.gt.f32.partialorder %v1383_v35, 0.0 }
 0x409   :  { %9420 = vmatprep.mubr.msk.f32.mxu0 %vm1243_vm6, %v1427_v56  ;;  %v1429_v20 = vsel %vm1397_vm9, %v1381_v51, %v1413_v54  ;;  %v1367_v14 = vmul.f32 %v10809_v43, %v10741_v58  ;;  %v1369_v27 = vmul.f32 %v10809_v43, %v10745_v63  ;;  %v1371_v8 = vmul.f32 %v10809_v43, %v10749_v9 }
 0x40a   :  { %9421 = vmatmul.mubr.msk.f32.vlgmr.msra.gmra.mrb[16].mxu0 %vm1243_vm6, %v1428_v55  ;;  %v1430_v46 = vsel %vm1398_vm10, %v1382_v23, %v1414_v40  ;;  %v1416_v16 = vmul.f32 0.01, %v1384_v33  ;;  %v1386_v60 = vadd.f32 %v10814_v17, %v1366_v50  ;;  %v1368_v42 = vmul.f32 %v10809_v43, %v10743_v47 }
 0x40b   :  { %9423 = vmatprep.mubr.msk.f32.mxu0 %vm1243_vm6, %v1429_v20  ;;  %v1431_v34 = vsel %vm1399_vm11, %v1383_v35, %v1415_v25  ;;  %vm1400_vm12 = vcmp.gt.f32.partialorder %v1384_v33, 0.0  ;;  %v1417_v4 = vmul.f32 0.01, %v1385_v31  ;;  %v1387_v58 = vadd.f32 %v10814_v17, %v1367_v14 }
 0x40c   :  { %vm1401_vm13 = vcmp.gt.f32.partialorder %v1385_v31, 0.0  ;;  %v1432_v63 = vsel %vm1400_vm12, %v1384_v33, %v1416_v16  ;;  %v1418_v0 = vmul.f32 0.01, %v1386_v60  ;;  %v1388_v9 = vadd.f32 %v10814_v17, %v1368_v42 }
 0x40d   :  { %v1370_v32 = vmul.f32 %v10809_v43, %v10747_v36  ;;  %v1433_v47 = vsel %vm1401_vm13, %v1385_v31, %v1417_v4  ;;  %vm1402_vm14 = vcmp.gt.f32.partialorder %v1386_v60, 0.0  ;;  %v1419_v51 = vmul.f32 0.01, %v1387_v58 }
 0x40e   :  { %9424 = vmatmul.mubr.msk.f32.gmra.mrb[18].mxu0 %vm1243_vm6, %v1430_v46  ;;  %v1389_v23 = vadd.f32 %v10814_v17, %v1369_v27  ;;  %vm1403_vm15 = vcmp.gt.f32.partialorder %v1387_v58, 0.0  ;;  %v1434_v35 = vsel %vm1402_vm14, %v1386_v60, %v1418_v0  ;;  %v1420_v5 = vmul.f32 0.01, %v1388_v9 }
 0x40f   :  { %9426 = vmatprep.mubr.msk.f32.mxu0 %vm1243_vm6, %v1431_v34  ;;  %v1390_v7 = vadd.f32 %v10814_v17, %v1370_v32  ;;  %v1372_v12 = vmul.f32 %v10809_v43, %v10751_v53  ;;  %v1435_v36 = vsel %vm1403_vm15, %v1387_v58, %v1419_v51  ;;  %vm1404_vm2 = vcmp.gt.f32.partialorder %v1388_v9, 0.0 }
 0x410   :  { %v1421_v54 = vmul.f32 0.01, %v1389_v23  ;;  %v1391_v56 = vadd.f32 %v10814_v17, %v1371_v8  ;;  %vm1405_vm3 = vcmp.gt.f32.partialorder %v1389_v23, 0.0  ;;  %v1436_v55 = vsel %vm1404_vm2, %v1388_v9, %v1420_v5  ;;  %v8889_v5 = vld [vmem:[%s14102_s1 + $0x90] ss:$0 sm:$0xff] }
 0x411   :  { %v1422_v40 = vmul.f32 0.01, %v1390_v7  ;;  %v1392_v33 = vadd.f32 %v10814_v17, %v1372_v12  ;;  %v1374_v31 = vmul.f32 %v10809_v43, %v10755_v59  ;;  %v1393_v53 = vadd.f32 %v10814_v17, %v10818_v39 }
 0x412   :  { %9427 = vmatmul.mubr.msk.f32.gmra.mrb[20].mxu0 %vm1243_vm6, %v1432_v63  ;;  %v1437_v20 = vsel %vm1405_vm3, %v1389_v23, %v1421_v54  ;;  %vm1406_vm4 = vcmp.gt.f32.partialorder %v1390_v7, 0.0  ;;  %v1423_v25 = vmul.f32 0.01, %v1391_v56  ;;  %vm1407_vm5 = vcmp.gt.f32.partialorder %v1391_v56, 0.0 }
 0x413   :  { %9429 = vmatprep.mubr.msk.f32.mxu0 %vm1243_vm6, %v1433_v47  ;;  %v1438_v50 = vsel %vm1406_vm4, %v1390_v7, %v1422_v40  ;;  %v1424_v14 = vmul.f32 0.01, %v1392_v33  ;;  %v1394_v27 = vadd.f32 %v10814_v17, %v1374_v31  ;;  %vm1408_vm7 = vcmp.gt.f32.partialorder %v1392_v33, 0.0 }
 0x414   :  { %v1439_v8 = vsel %vm1407_vm5, %v1391_v56, %v1423_v25  ;;  %v1425_v59 = vmul.f32 0.01, %v1393_v53  ;;  %vm1409_vm8 = vcmp.gt.f32.partialorder %v1393_v53, 0.0  ;;  %v10884_v17 = vand.u32 127, %v14_v3 }
 0x415   :  { %v1440_v43 = vsel %vm1408_vm7, %v1392_v33, %v1424_v14  ;;  %v1426_v39 = vmul.f32 0.01, %v1394_v27  ;;  %vm1410_vm9 = vcmp.gt.f32.partialorder %v1394_v27, 0.0  ;;  %v14112_v60 = vmov 0.0  }
 0x416   :  { %9430 = vmatmul.mubr.msk.f32.gmra.mrb[22].mxu0 %vm1243_vm6, %v1434_v35  ;;  %v1441_v46 = vsel %vm1409_vm8, %v1393_v53, %v1425_v59  ;;  %vm18_vm10 = vcmp.eq.s32.totalorder %v10154_v10, %v10884_v17  ;;  %9455 = vmatprep.subr.mxu0 %v14112_v60  ;;  %v10898_v58 = vsub.s32 1, %v10154_v10  ;;  %v10901_v3 = vsub.s32 2, %v10154_v10 }
 0x417   :  { %9432 = vmatprep.mubr.msk.f32.mxu0 %vm1243_vm6, %v1435_v36  ;;  %v1442_v16 = vsel %vm1410_vm9, %v1394_v27, %v1426_v39  ;;  %v10889_v42 = vsel %vm18_vm10, 1.0, %v14112_v60  ;;  %v10908_v9 = vsub.s32 3, %v10154_v10  ;;  %v10911_v32 = vsub.s32 4, %v10154_v10 }
 0x418   :  { %v10893_v34 = vmul.f32 1e+08, %v10889_v42  ;;  %v10918_v23 = vsub.s32 5, %v10154_v10 }
 0x41a   :  { %9433 = vmatmul.mubr.msk.f32.gmra.mrb[24].mxu0 %vm1243_vm6, %v1436_v55  ;;  %v1937_v4 = vrot.slane %v10893_v34, %v10164_v15  ;;  %v1944_v63 = vrot.slane %v10893_v34, %v10898_v58  ;;  %v1951_v0 = vrot.slane %v10893_v34, %v10901_v3  ;;  %v1958_v47 = vrot.slane %v10893_v34, %v10908_v9 }
 0x41b   :  { %9435 = vmatprep.mubr.msk.f32.mxu0 %vm1243_vm6, %v1437_v20  ;;  %v1965_v51 = vrot.slane %v10893_v34, %v10911_v32  ;;  %v1972_v35 = vrot.slane %v10893_v34, %v10918_v23 }
 0x41c   :  { %1939 = vbcast.lane.b32.xlu0 %v1937_v4, 256  ;;  %1946 = vbcast.lane.b32.xlu1 %v1944_v63, 256 }
 0x41e   :  { %9436 = vmatmul.mubr.msk.f32.gmra.mrb[26].mxu0 %vm1243_vm6, %v1438_v50 }
 0x41f   :  { %9438 = vmatprep.mubr.msk.f32.mxu0 %vm1243_vm6, %v1439_v8 }
 0x420   :  { %1953 = vbcast.lane.b32.xlu0 %v1951_v0, 256  ;;  %1960 = vbcast.lane.b32.xlu1 %v1958_v47, 256 }
 0x422   :  { %9439 = vmatmul.mubr.msk.f32.gmra.mrb[28].mxu0 %vm1243_vm6, %v1440_v43 }
 0x423   :  { %9441 = vmatprep.mubr.msk.f32.mxu0 %vm1243_vm6, %v1441_v46 }
 0x424   :  { %1967 = vbcast.lane.b32.xlu0 %v1965_v51, 256 }
 0x426   :  { %9442 = vmatmul.mubr.msk.f32.gmra.mrb[30].mxu0 %vm1243_vm6, %v1442_v16 }
 0x428   :  { %1974 = vbcast.lane.b32.xlu0 %v1972_v35, 256 }
 0x4dd   :  { %v9422_v7 = vpop.f32.mrb[16].mxu0 }
 0x4de   :  { %v10925_v12 = vadd.f32 %v9422_v7, %v8889_v5  ;;  %v1565_v36 = vpop.f32.mrb[17].mxu0 }
 0x4df   :  { %v10927_v54 = vadd.f32 %v8889_v5, %v1565_v36 }
 0x4e0   :  { %v1645_v56 = vsel %vm1243_vm6, %v10925_v12, 0.0 }
 0x4e1   :  { %v1644_v55 = vsel %vm1243_vm6, %v10927_v54, 0.0  ;;  %v9425_v40 = vpop.f32.mrb[18].mxu0 }
 0x4e2   :  { %v1646_v33 = vadd.f32 %v1645_v56, %v1644_v55  ;;  %v1575_v31 = vpop.f32.mrb[19].mxu0  ;;  %v10933_v53 = vadd.f32 %v9425_v40, %v8889_v5 }
 0x4e3   :  { %v1576_v20 = vadd.f32 %v8889_v5, %v1575_v31 }
 0x4e4   :  { %v1649_v8 = vsel %vm1243_vm6, %v10933_v53, 0.0 }
 0x4e5   :  { %v1647_v25 = vsel %vm1243_vm6, %v1576_v20, 0.0  ;;  %v9428_v50 = vpop.f32.mrb[20].mxu0 }
 0x4e6   :  { %v1648_v14 = vadd.f32 %v1647_v25, %v1646_v33  ;;  %v1585_v27 = vpop.f32.mrb[21].mxu0  ;;  %v1591_v59 = vadd.f32 %v9428_v50, %v8889_v5 }
 0x4e7   :  { %v1586_v43 = vadd.f32 %v8889_v5, %v1585_v27 }
 0x4e8   :  { %v1650_v39 = vadd.f32 %v1649_v8, %v1648_v14  ;;  %v1653_v0 = vsel %vm1243_vm6, %v1591_v59, 0.0 }
 0x4e9   :  { %v1651_v46 = vsel %vm1243_vm6, %v1586_v43, 0.0  ;;  %v9431_v16 = vpop.f32.mrb[22].mxu0 }
 0x4ea   :  { %v1652_v4 = vadd.f32 %v1651_v46, %v1650_v39  ;;  %v1595_v63 = vpop.f32.mrb[23].mxu0  ;;  %v1601_v47 = vadd.f32 %v9431_v16, %v8889_v5 }
 0x4eb   :  { %v1596_v51 = vadd.f32 %v8889_v5, %v1595_v63 }
 0x4ec   :  { %v1654_v35 = vadd.f32 %v1653_v0, %v1652_v4  ;;  %v1657_v40 = vsel %vm1243_vm6, %v1601_v47, 0.0 }
 0x4ed   :  { %v1655_v7 = vsel %vm1243_vm6, %v1596_v51, 0.0  ;;  %v9434_v36 = vpop.f32.mrb[24].mxu0 }
 0x4ee   :  { %v1656_v56 = vadd.f32 %v1655_v7, %v1654_v35  ;;  %v1605_v55 = vpop.f32.mrb[25].mxu0  ;;  %v1611_v33 = vadd.f32 %v9434_v36, %v8889_v5 }
 0x4ef   :  { %v1606_v31 = vadd.f32 %v8889_v5, %v1605_v55 }
 0x4f0   :  { %v1658_v25 = vadd.f32 %v1657_v40, %v1656_v56  ;;  %v1661_v39 = vsel %vm1243_vm6, %v1611_v33, 0.0 }
 0x4f1   :  { %v1659_v50 = vsel %vm1243_vm6, %v1606_v31, 0.0  ;;  %v9437_v14 = vpop.f32.mrb[26].mxu0 }
 0x4f2   :  { %v1660_v27 = vadd.f32 %v1659_v50, %v1658_v25  ;;  %v1615_v8 = vpop.f32.mrb[27].mxu0  ;;  %v1621_v46 = vadd.f32 %v9437_v14, %v8889_v5 }
 0x4f3   :  { %v1616_v16 = vadd.f32 %v8889_v5, %v1615_v8 }
 0x4f4   :  { %v1662_v4 = vadd.f32 %v1661_v39, %v1660_v27  ;;  %v1665_v26 = vsel %vm1243_vm6, %v1621_v46, 0.0 }
 0x4f5   :  { %v1663_v63 = vsel %vm1243_vm6, %v1616_v16, 0.0  ;;  %v9440_v0 = vpop.f32.mrb[28].mxu0 }
 0x4f6   :  { %v1664_v35 = vadd.f32 %v1663_v63, %v1662_v4  ;;  %v1625_v7 = vpop.f32.mrb[29].mxu0  ;;  %v1631_v36 = vadd.f32 %v9440_v0, %v8889_v5 }
 0x4f7   :  { %v1626_v55 = vadd.f32 %v8889_v5, %v1625_v7 }
 0x4f8   :  { %v1666_v56 = vadd.f32 %v1665_v26, %v1664_v35  ;;  %v1669_v11 = vsel %vm1243_vm6, %v1631_v36, 0.0 }
 0x4f9   :  { %v1667_v40 = vsel %vm1243_vm6, %v1626_v55, 0.0  ;;  %v9443_v24 = vpop.f32.mrb[30].mxu0 }
 0x4fa   :  { %v1668_v25 = vadd.f32 %v1667_v40, %v1666_v56  ;;  %v1635_v50 = vpop.f32.mrb[31].mxu0  ;;  %v1641_v14 = vadd.f32 %v9443_v24, %v8889_v5 }
 0x4fb   :  { %v1636_v8 = vadd.f32 %v8889_v5, %v1635_v50 }
 0x4fc   :  { %v1670_v27 = vadd.f32 %v1669_v11, %v1668_v25  ;;  %v1673_v4 = vsel %vm1243_vm6, %v1641_v14, 0.0 }
 0x4fd   :  { %v1671_v39 = vsel %vm1243_vm6, %v1636_v8, 0.0 }
 0x4fe   :  { %v1672_v6 = vadd.f32 %v1671_v39, %v1670_v27 }
 0x500   :  { %v1674_v63 = vadd.f32 %v1673_v4, %v1672_v6 }
 0x502   :  { %v1675_v57 = vrot.slane %v1674_v63, 4 }
 0x504   :  { %v1676_v0 = vadd.f32 %v1675_v57, %v1674_v63 }
 0x506   :  { %v1677_v7 = vrot.slane %v1676_v0, 2 }
 0x508   :  { %v1678_v26 = vadd.f32 %v1677_v7, %v1676_v0 }
 0x50a   :  { %v1679_v35 = vrot.slane %v1678_v26, 1 }
 0x50c   :  { %v1680_v52 = vadd.f32 %v1679_v35, %v1678_v26 }
 0x50e   :  { %v1681_v44 = vmul.f32 0.0078125, %v1680_v52 }
 0x510   :  { %v10951_v56 = vsub.f32 %v10927_v54, %v1681_v44  ;;  %v10954_v24 = vsub.f32 %v10925_v12, %v1681_v44  ;;  %v10956_v11 = vsub.f32 %v1576_v20, %v1681_v44  ;;  %v10959_v5 = vsub.f32 %v10933_v53, %v1681_v44 }
 0x511   :  { %v10961_v40 = vsub.f32 %v1586_v43, %v1681_v44  ;;  %v10963_v6 = vsub.f32 %v1591_v59, %v1681_v44  ;;  %v10965_v57 = vsub.f32 %v1596_v51, %v1681_v44  ;;  %v10967_v25 = vsub.f32 %v1601_v47, %v1681_v44 }
 0x512   :  { %v10969_v52 = vsub.f32 %v1606_v31, %v1681_v44  ;;  %v10971_v54 = vsub.f32 %v1611_v33, %v1681_v44  ;;  %v10973_v50 = vsub.f32 %v1616_v16, %v1681_v44  ;;  %v10975_v12 = vsub.f32 %v1621_v46, %v1681_v44  ;;  %v1844_v31 = vld [vmem:[%s14102_s1 + $0xb0] sm:$0x1] }
 0x513   :  { %v10977_v20 = vsub.f32 %v1626_v55, %v1681_v44  ;;  %v10979_v53 = vsub.f32 %v1631_v36, %v1681_v44  ;;  %v10981_v43 = vsub.f32 %v1636_v8, %v1681_v44  ;;  %v10983_v59 = vsub.f32 %v1641_v14, %v1681_v44  ;;  %9855 = vpush %v1844_v31 }
 0x514   :  { %v1698_v47 = vmul.f32 %v10951_v56, %v10951_v56  ;;  %v1699_v51 = vmul.f32 %v10954_v24, %v10954_v24  ;;  %v1700_v33 = vmul.f32 %v10956_v11, %v10956_v11  ;;  %v1701_v46 = vmul.f32 %v10959_v5, %v10959_v5 }
 0x515   :  { %v1702_v55 = vmul.f32 %v10961_v40, %v10961_v40  ;;  %v1703_v27 = vmul.f32 %v10963_v6, %v10963_v6  ;;  %v1704_v63 = vmul.f32 %v10965_v57, %v10965_v57  ;;  %v1705_v26 = vmul.f32 %v10967_v25, %v10967_v25 }
 0x516   :  { %v1714_v44 = vsel %vm1243_vm6, %v1698_v47, 0.0  ;;  %v1715_v16 = vsel %vm1243_vm6, %v1699_v51, 0.0  ;;  %v1717_v14 = vsel %vm1243_vm6, %v1700_v33, 0.0  ;;  %v1719_v39 = vsel %vm1243_vm6, %v1701_v46, 0.0 }
 0x517   :  { %v1716_v36 = vadd.f32 %v1715_v16, %v1714_v44  ;;  %v1721_v0 = vsel %vm1243_vm6, %v1702_v55, 0.0  ;;  %v1723_v35 = vsel %vm1243_vm6, %v1703_v27, 0.0  ;;  %v1706_v51 = vmul.f32 %v10969_v52, %v10969_v52 }
 0x518   :  { %v1725_v33 = vsel %vm1243_vm6, %v1704_v63, 0.0  ;;  %v1707_v46 = vmul.f32 %v10971_v54, %v10971_v54  ;;  %v1727_v44 = vsel %vm1243_vm6, %v1705_v26, 0.0 }
 0x519   :  { %v1718_v8 = vadd.f32 %v1717_v14, %v1716_v36  ;;  %v1708_v36 = vmul.f32 %v10973_v50, %v10973_v50  ;;  %v1729_v55 = vsel %vm1243_vm6, %v1706_v51, 0.0 }
 0x51a   :  { %v1731_v27 = vsel %vm1243_vm6, %v1707_v46, 0.0 }
 0x51b   :  { %v1720_v4 = vadd.f32 %v1719_v39, %v1718_v8  ;;  %v1709_v8 = vmul.f32 %v10975_v12, %v10975_v12  ;;  %v1733_v63 = vsel %vm1243_vm6, %v1708_v36, 0.0 }
 0x51d   :  { %v1722_v7 = vadd.f32 %v1721_v0, %v1720_v4  ;;  %v1710_v4 = vmul.f32 %v10977_v20, %v10977_v20  ;;  %v1735_v26 = vsel %vm1243_vm6, %v1709_v8, 0.0 }
 0x51f   :  { %v1724_v47 = vadd.f32 %v1723_v35, %v1722_v7  ;;  %v1711_v7 = vmul.f32 %v10979_v53, %v10979_v53  ;;  %v1737_v51 = vsel %vm1243_vm6, %v1710_v4, 0.0 }
 0x521   :  { %v1726_v31 = vadd.f32 %v1725_v33, %v1724_v47  ;;  %v1712_v47 = vmul.f32 %v10981_v43, %v10981_v43  ;;  %v1739_v46 = vsel %vm1243_vm6, %v1711_v7, 0.0  ;;  %v1445_v7 = vld [vmem:[%s14102_s1 + $0x98] sm:$0x1] }
 0x523   :  { %v1728_v16 = vadd.f32 %v1727_v44, %v1726_v31  ;;  %v1713_v31 = vmul.f32 %v10983_v59, %v10983_v59 }
 0x525   :  { %v1730_v14 = vadd.f32 %v1729_v55, %v1728_v16  ;;  %v1741_v16 = vsel %vm1243_vm6, %v1712_v47, 0.0  ;;  %v1743_v55 = vsel %vm1243_vm6, %v1713_v31, 0.0  ;;  %v11045_v31 = vld [vmem:[%s14102_s1 + $0xa0] ss:$0 sm:$0xff] }
 0x527   :  { %v1732_v39 = vadd.f32 %v1731_v27, %v1730_v14 }
 0x529   :  { %v1734_v0 = vadd.f32 %v1733_v63, %v1732_v39 }
 0x52b   :  { %v1736_v35 = vadd.f32 %v1735_v26, %v1734_v0 }
 0x52d   :  { %v1738_v33 = vadd.f32 %v1737_v51, %v1736_v35 }
 0x52f   :  { %v1740_v44 = vadd.f32 %v1739_v46, %v1738_v33 }
 0x531   :  { %v1742_v36 = vadd.f32 %v1741_v16, %v1740_v44 }
 0x533   :  { %v1744_v14 = vadd.f32 %v1743_v55, %v1742_v36 }
 0x535   :  { %v1745_v8 = vrot.slane %v1744_v14, 4 }
 0x537   :  { %v1746_v27 = vadd.f32 %v1745_v8, %v1744_v14 }
 0x539   :  { %v1747_v39 = vrot.slane %v1746_v27, 2 }
 0x53b   :  { %v1748_v63 = vadd.f32 %v1747_v39, %v1746_v27 }
 0x53d   :  { %v1749_v0 = vrot.slane %v1748_v63, 1 }
 0x53f   :  { %v1750_v26 = vadd.f32 %v1749_v0, %v1748_v63 }
 0x541   :  { %v1751_v4 = vmul.f32 0.0078125, %v1750_v26 }
 0x543   :  { %v1752_v35 = vadd.f32 1e-05, %v1751_v4 }
 0x544   :  { %s9856_s5 = spop %9855 }
 0x545   :  { %9877 = vrsqrt.f32 %v1752_v35 }
 0x54f   :  { %v9878_v51 = vpop.eup %9877 }
 0x550   :  { %v1754_v33 = vmul.f32 %v9878_v51, %v1445_v7 }
 0x552   :  { %v11040_v47 = vrot.slane %v1754_v33, %v10164_v15 }
 0x554   :  { %v11049_v46 = vmul.f32 %v11040_v47, %v10981_v43  ;;  %v1761_v44 = vmul.f32 %v11040_v47, %v10956_v11  ;;  %v1759_v16 = vmul.f32 %v11040_v47, %v10951_v56  ;;  %v1762_v36 = vmul.f32 %v11040_v47, %v10959_v5  ;;  %v11071_v5 = vld [vmem:[%s14102_s1 + $0xa8] ss:$0 sm:$0xff] }
 0x555   :  { %v1760_v55 = vmul.f32 %v11040_v47, %v10954_v24  ;;  %v1764_v14 = vmul.f32 %v11040_v47, %v10963_v6  ;;  %v1763_v8 = vmul.f32 %v11040_v47, %v10961_v40  ;;  %v1766_v43 = vmul.f32 %v11040_v47, %v10967_v25 }
 0x556   :  { %v1781_v11 = vadd.f32 %v11045_v31, %v1761_v44  ;;  %v1779_v27 = vadd.f32 %v11045_v31, %v1759_v16  ;;  %v1782_v56 = vadd.f32 %v11045_v31, %v1762_v36 }
 0x557   :  { %v1780_v24 = vadd.f32 %v11045_v31, %v1760_v55  ;;  %v1784_v6 = vadd.f32 %v11045_v31, %v1764_v14  ;;  %v1783_v40 = vadd.f32 %v11045_v31, %v1763_v8  ;;  %v1786_v39 = vadd.f32 %v11045_v31, %v1766_v43 }
 0x558   :  { %vm1797_vm11 = vcmp.gt.f32.partialorder %v1781_v11, 0.0  ;;  %v1813_v25 = vmul.f32 0.01, %v1781_v11  ;;  %vm1795_vm12 = vcmp.gt.f32.partialorder %v1779_v27, 0.0  ;;  %v1811_v63 = vmul.f32 0.01, %v1779_v27 }
 0x559   :  { %vm1798_vm13 = vcmp.gt.f32.partialorder %v1782_v56, 0.0  ;;  %v1814_v0 = vmul.f32 0.01, %v1782_v56  ;;  %vm1796_vm14 = vcmp.gt.f32.partialorder %v1780_v24, 0.0  ;;  %v1812_v26 = vmul.f32 0.01, %v1780_v24 }
 0x55a   :  { %v1829_v4 = vsel %vm1797_vm11, %v1781_v11, %v1813_v25  ;;  %v1827_v35 = vsel %vm1795_vm12, %v1779_v27, %v1811_v63  ;;  %vm1800_vm15 = vcmp.gt.f32.partialorder %v1784_v6, 0.0  ;;  %v1816_v7 = vmul.f32 0.01, %v1784_v6 }
 0x55b   :  { %v1851_v51 = vmul.f32 %v11071_v5, %v1829_v4  ;;  %v1849_v33 = vmul.f32 %v11071_v5, %v1827_v35  ;;  %v1830_v44 = vsel %vm1798_vm13, %v1782_v56, %v1814_v0  ;;  %v1828_v16 = vsel %vm1796_vm14, %v1780_v24, %v1812_v26 }
 0x55c   :  { %v1852_v36 = vmul.f32 %v11071_v5, %v1830_v44  ;;  %v1832_v55 = vsel %vm1800_vm15, %v1784_v6, %v1816_v7  ;;  %vm1799_vm2 = vcmp.gt.f32.partialorder %v1783_v40, 0.0  ;;  %v1850_v43 = vmul.f32 %v11071_v5, %v1828_v16 }
 0x55d   :  { %v1871_v14 = vsel %vm1243_vm6, %v1851_v51, 0.0  ;;  %v1865_v8 = vsel %vm1243_vm6, %v1849_v33, 0.0  ;;  %v1815_v11 = vmul.f32 0.01, %v1783_v40  ;;  %v1854_v27 = vmul.f32 %v11071_v5, %v1832_v55 }
 0x55e   :  { %1872 = vadd.xlane.f32.xlu1 %v1871_v14  ;;  %1866 = vadd.xlane.f32.xlu0 %v1865_v8  ;;  %vm1802_vm3 = vcmp.gt.f32.partialorder %v1786_v39, 0.0  ;;  %v1818_v25 = vmul.f32 0.01, %v1786_v39  ;;  %v1874_v56 = vsel %vm1243_vm6, %v1852_v36, 0.0  ;;  %v1765_v6 = vmul.f32 %v11040_v47, %v10965_v57 }
 0x55f   :  { %v1831_v24 = vsel %vm1799_vm2, %v1783_v40, %v1815_v11  ;;  %v1768_v63 = vmul.f32 %v11040_v47, %v10971_v54  ;;  %v1767_v4 = vmul.f32 %v11040_v47, %v10969_v52  ;;  %v1769_v35 = vmul.f32 %v11040_v47, %v10973_v50 }
 0x560   :  { %v1853_v0 = vmul.f32 %v11071_v5, %v1831_v24  ;;  %v1834_v26 = vsel %vm1802_vm3, %v1786_v39, %v1818_v25  ;;  %v1868_v7 = vsel %vm1243_vm6, %v1850_v43, 0.0  ;;  %v1785_v51 = vadd.f32 %v11045_v31, %v1765_v6 }
 0x561   :  { %v1788_v40 = vadd.f32 %v11045_v31, %v1768_v63  ;;  %v1770_v57 = vmul.f32 %v11040_v47, %v10975_v12  ;;  %v1880_v54 = vsel %vm1243_vm6, %v1854_v27, 0.0  ;;  %v1787_v39 = vadd.f32 %v11045_v31, %v1767_v4 }
 0x562   :  { %1875 = vadd.xlane.f32.xlu1 %v1874_v56  ;;  %1869 = vadd.xlane.f32.xlu0 %v1868_v7  ;;  %v1789_v52 = vadd.f32 %v11045_v31, %v1769_v35  ;;  %v1772_v50 = vmul.f32 %v11040_v47, %v10979_v53  ;;  %v1856_v33 = vmul.f32 %v11071_v5, %v1834_v26  ;;  %vm1801_vm4 = vcmp.gt.f32.partialorder %v1785_v51, 0.0 }
 0x563   :  { %v1817_v44 = vmul.f32 0.01, %v1785_v51  ;;  %vm1804_vm5 = vcmp.gt.f32.partialorder %v1788_v40, 0.0  ;;  %v1877_v16 = vsel %vm1243_vm6, %v1853_v0, 0.0  ;;  %v1820_v36 = vmul.f32 0.01, %v1788_v40 }
 0x564   :  { %vm1803_vm7 = vcmp.gt.f32.partialorder %v1787_v39, 0.0  ;;  %v1819_v12 = vmul.f32 0.01, %v1787_v39  ;;  %v1821_v14 = vmul.f32 0.01, %v1789_v52  ;;  %v1790_v8 = vadd.f32 %v11045_v31, %v1770_v57 }
 0x565   :  { %v1833_v55 = vsel %vm1801_vm4, %v1785_v51, %v1817_v44  ;;  %v1792_v43 = vadd.f32 %v11045_v31, %v1772_v50  ;;  %v1836_v11 = vsel %vm1804_vm5, %v1788_v40, %v1820_v36  ;;  %vm1805_vm8 = vcmp.gt.f32.partialorder %v1789_v52, 0.0 }
 0x566   :  { %1881 = vadd.xlane.f32.xlu1 %v1880_v54  ;;  %1878 = vadd.xlane.f32.xlu0 %v1877_v16  ;;  %v1855_v53 = vmul.f32 %v11071_v5, %v1833_v55  ;;  %v1835_v27 = vsel %vm1803_vm7, %v1787_v39, %v1819_v12  ;;  %vm1806_vm9 = vcmp.gt.f32.partialorder %v1790_v8, 0.0  ;;  %v1886_v25 = vsel %vm1243_vm6, %v1856_v33, 0.0 }
 0x567   :  { %v1858_v56 = vmul.f32 %v11071_v5, %v1836_v11  ;;  %v1822_v24 = vmul.f32 0.01, %v1790_v8  ;;  %v1857_v63 = vmul.f32 %v11071_v5, %v1835_v27  ;;  %v1837_v0 = vsel %vm1805_vm8, %v1789_v52, %v1821_v14 }
 0x568   :  { %v1883_v6 = vsel %vm1243_vm6, %v1855_v53, 0.0  ;;  %v1771_v26 = vmul.f32 %v11040_v47, %v10977_v20  ;;  %v1793_v4 = vadd.f32 %v11045_v31, %v11049_v46  ;;  %v1824_v7 = vmul.f32 0.01, %v1792_v43 }
 0x569   :  { %v1838_v35 = vsel %vm1806_vm9, %v1790_v8, %v1822_v24  ;;  %v1774_v51 = vmul.f32 %v11040_v47, %v10983_v59  ;;  %vm1808_vm10 = vcmp.gt.f32.partialorder %v1792_v43, 0.0  ;;  %v1892_v57 = vsel %vm1243_vm6, %v1858_v56, 0.0 }
 0x56a   :  { %1887 = vadd.xlane.f32.xlu1 %v1886_v25  ;;  %1884 = vadd.xlane.f32.xlu0 %v1883_v6  ;;  %v1791_v40 = vadd.f32 %v11045_v31, %v1771_v26  ;;  %v1859_v54 = vmul.f32 %v11071_v5, %v1837_v0  ;;  %v1889_v39 = vsel %vm1243_vm6, %v1857_v63, 0.0  ;;  %v1860_v20 = vmul.f32 %v11071_v5, %v1838_v35  ;;  %v11145_v0 = vpop.permute.xlu0 %1939 }
 0x56b   :  { %v1840_v52 = vsel %vm1808_vm10, %v1792_v43, %v1824_v7  ;;  %v1825_v50 = vmul.f32 0.01, %v1793_v4  ;;  %v1794_v33 = vadd.f32 %v11045_v31, %v1774_v51  ;;  %vm1809_vm12 = vcmp.gt.f32.partialorder %v1793_v4, 0.0 }
 0x56c   :  { %vm1807_vm11 = vcmp.gt.f32.partialorder %v1791_v40, 0.0  ;;  %v1823_v46 = vmul.f32 0.01, %v1791_v40  ;;  %v10117_v47 = vmov 0   ;;  %v1895_v44 = vsel %vm1243_vm6, %v1859_v54, 0.0 }
 0x56d   :  { %9867 = vset.pattern.permute.xlu1 %v10117_v47  ;;  %9868 = vset.pattern.permute.xlu0 %v10117_v47  ;;  %v1898_v16 = vsel %vm1243_vm6, %v1860_v20, 0.0  ;;  %v1862_v36 = vmul.f32 %v11071_v5, %v1840_v52  ;;  %v1841_v55 = vsel %vm1809_vm12, %v1793_v4, %v1825_v50  ;;  %v1826_v14 = vmul.f32 0.01, %v1794_v33  ;;  %v11151_v4 = vpop.permute.xlu1 %1946 }
 0x56e   :  { %1893 = vadd.xlane.f32.xlu1 %v1892_v57  ;;  %1890 = vadd.xlane.f32.xlu0 %v1889_v39  ;;  %v1839_v59 = vsel %vm1807_vm11, %v1791_v40, %v1823_v46  ;;  %vm1810_vm13 = vcmp.gt.f32.partialorder %v1794_v33, 0.0  ;;  %v1863_v43 = vmul.f32 %v11071_v5, %v1841_v55  ;;  %v11136_v56 = vsub.s32 6, %v10154_v10 }
 0x56f   :  { %v1861_v12 = vmul.f32 %v11071_v5, %v1839_v59  ;;  %v1904_v31 = vsel %vm1243_vm6, %v1862_v36, 0.0  ;;  %v1842_v53 = vsel %vm1810_vm13, %v1794_v33, %v1826_v14  ;;  %v11141_v6 = vsub.s32 7, %v10154_v10 }
 0x570   :  { %v1907_v11 = vsel %vm1243_vm6, %v1863_v43, 0.0  ;;  %v1864_v27 = vmul.f32 %v11071_v5, %v1842_v53  ;;  %v1979_v24 = vrot.slane %v10893_v34, %v11136_v56  ;;  %v11147_v5 = vpop.permute.xlu0 %1953  ;;  %v11157_v51 = vstv %s9856_s5 }
 0x571   :  { %v1901_v8 = vsel %vm1243_vm6, %v1861_v12, 0.0  ;;  %v1986_v63 = vrot.slane %v10893_v34, %v11141_v6  ;;  %v11155_v7 = vpop.permute.xlu1 %1960  ;;  %vm2142_vm14 = vcmask 1041409   ;;  %vm2144_vm15 = vcmask 1042434  }
 0x572   :  { %1896 = vadd.xlane.f32.xlu1 %v1895_v44  ;;  %1899 = vadd.xlane.f32.xlu0 %v1898_v16  ;;  %v1910_v25 = vsel %vm1243_vm6, %v1864_v27, 0.0  ;;  %vm2146_vm2 = vcmask 1043459   ;;  %vm2148_vm3 = vcmask 1044484   ;;  %vm2150_vm4 = vcmask 1045509  }
 0x573   :  { %vm2152_vm5 = vcmask 1046534   ;;  %vm2154_vm7 = vcmask 1047559   ;;  %vm3248_vm9 = vcmask 392192  }
 0x574   :  { %v11149_v26 = vpop.permute.xlu0 %1967 }
 0x575   :  { %14135 = vst [vmem:[#allocation6_spill] sm:$0xff] %v11149_v26 }
 0x576   :  { %1905 = vadd.xlane.f32.xlu1 %v1904_v31  ;;  %1902 = vadd.xlane.f32.xlu0 %v1901_v8 }
 0x578   :  { %v11153_v35 = vpop.permute.xlu0 %1974 }
 0x579   :  { %14136 = vst [vmem:[#allocation7_spill] sm:$0xff] %v11153_v35 }
 0x57a   :  { %1908 = vadd.xlane.f32.xlu0 %v1907_v11 }
 0x57e   :  { %1911 = vadd.xlane.f32.xlu0 %v1910_v25 }
 0x587   :  { %1981 = vbcast.lane.b32.xlu1 %v1979_v24, 256 }
 0x594   :  { %1988 = vbcast.lane.b32.xlu0 %v1986_v63, 256 }
 0x5eb   :  { %v1873_v40 = vpop.xlane.xlu1 %1872  ;;  %v1867_v57 = vpop.xlane.xlu0 %1866 }
 0x5ec   :  { %v1917_v34 = vadd.f32 %v11157_v51, %v1867_v57  ;;  %v1919_v52 = vadd.f32 %v11157_v51, %v1873_v40 }
 0x5ee   :  { %v11161_v54 = vsub.f32 %v1917_v34, %v11145_v0  ;;  %v11171_v47 = vsub.f32 %v1919_v52, %v11147_v5 }
 0x5ef   :  { %v1876_v39 = vpop.xlane.xlu1 %1875  ;;  %v1870_v20 = vpop.xlane.xlu0 %1869 }
 0x5f0   :  { %v1918_v46 = vadd.f32 %v11157_v51, %v1870_v20  ;;  %2031 = vperm.xlu1 %9867, %v11161_v54   ;;  %v1920_v44 = vadd.f32 %v11157_v51, %v1876_v39 }
 0x5f2   :  { %v11167_v50 = vsub.f32 %v1918_v46, %v11151_v4  ;;  %v11176_v12 = vsub.f32 %v1920_v44, %v11155_v7 }
 0x5f3   :  { %v1882_v33 = vpop.xlane.xlu1 %1881  ;;  %v1879_v59 = vpop.xlane.xlu0 %1878 }
 0x5f4   :  { %2034 = vperm.xlu1 %9867, %v11167_v50   ;;  %v1921_v55 = vadd.f32 %v11157_v51, %v1879_v59  ;;  %v1922_v8 = vadd.f32 %v11157_v51, %v1882_v33 }
 0x5f6   :  { %v11182_v43 = vsub.f32 %v1921_v55, %v11149_v26  ;;  %v11186_v27 = vsub.f32 %v1922_v8, %v11153_v35 }
 0x5f7   :  { %v1888_v16 = vpop.xlane.xlu1 %1887  ;;  %v1885_v36 = vpop.xlane.xlu0 %1884 }
 0x5f8   :  { %2037 = vperm.xlu1 %9867, %v11171_v47   ;;  %v1923_v63 = vadd.f32 %v11157_v51, %v1885_v36  ;;  %v1924_v33 = vadd.f32 %v11157_v51, %v1888_v16 }
 0x5fb   :  { %v1894_v14 = vpop.xlane.xlu1 %1893  ;;  %v1891_v31 = vpop.xlane.xlu0 %1890 }
 0x5fc   :  { %2040 = vperm.xlu1 %9867, %v11176_v12   ;;  %v1926_v34 = vadd.f32 %v11157_v51, %v1894_v14  ;;  %v1925_v44 = vadd.f32 %v11157_v51, %v1891_v31 }
 0x5fe   :  { %v11198_v46 = vsub.f32 %v1926_v34, %v11151_v4  ;;  %v11216_v16 = vsub.f32 %v1925_v44, %v11145_v0 }
 0x5ff   :  { %v1897_v53 = vpop.xlane.xlu1 %1896  ;;  %v1900_v11 = vpop.xlane.xlu0 %1899 }
 0x600   :  { %2043 = vperm.xlu1 %9867, %v11182_v43   ;;  %v1928_v52 = vadd.f32 %v11157_v51, %v1900_v11  ;;  %v1927_v8 = vadd.f32 %v11157_v51, %v1897_v53 }
 0x602   :  { %v11207_v36 = vsub.f32 %v1928_v52, %v11155_v7 }
 0x603   :  { %v1906_v25 = vpop.xlane.xlu1 %1905  ;;  %v1903_v24 = vpop.xlane.xlu0 %1902 }
 0x604   :  { %2046 = vperm.xlu1 %9867, %v11186_v27   ;;  %v1930_v55 = vadd.f32 %v11157_v51, %v1906_v25  ;;  %v11226_v25 = vsub.f32 %v1927_v8, %v11147_v5 }
 0x606   :  { %v11220_v11 = vsub.f32 %v1930_v55, %v11153_v35 }
 0x607   :  { %v11190_v40 = vpop.permute.xlu1 %1981  ;;  %v1909_v57 = vpop.xlane.xlu0 %1908 }
 0x608   :  { %14137 = vst [vmem:[#allocation8_spill] sm:$0xff] %v11190_v40  ;;  %v11194_v39 = vsub.f32 %v1923_v63, %v11190_v40  ;;  %v1929_v63 = vadd.f32 %v11157_v51, %v1903_v24 }
 0x60a   :  { %2049 = vperm.xlu0 %9868, %v11194_v39   ;;  %v11235_v53 = vsub.f32 %v1929_v63, %v11149_v26 }
 0x60b   :  { %v1912_v20 = vpop.xlane.xlu0 %1911 }
 0x60c   :  { %v1932_v31 = vadd.f32 %v11157_v51, %v1912_v20  ;;  %v1931_v20 = vadd.f32 %v11157_v51, %v1909_v57 }
 0x60e   :  { %2058 = vperm.xlu0 %9868, %v11198_v46   ;;  %v11240_v52 = vsub.f32 %v1931_v20, %v11190_v40 }
 0x60f   :  { %v11203_v59 = vpop.permute.xlu0 %1988 }
 0x610   :  { %14138 = vst [vmem:[#allocation9_spill] sm:$0xff] %v11203_v59  ;;  %v11211_v14 = vsub.f32 %v1924_v33, %v11203_v59  ;;  %v11230_v34 = vsub.f32 %v1932_v31, %v11203_v59  ;;  %v11245_v31 = vsub.s32 %v10884_v17, %v10154_v10 }
 0x612   :  { %2064 = vperm.xlu0 %9868, %v11207_v36   ;;  %2052 = vperm.xlu1 %9867, %v11211_v14  }
 0x616   :  { %2070 = vperm.xlu0 %9868, %v11220_v11   ;;  %2055 = vperm.xlu1 %9867, %v11216_v16  }
 0x61a   :  { %2076 = vperm.xlu0 %9868, %v11230_v34   ;;  %2061 = vperm.xlu1 %9867, %v11226_v25  }
 0x61e   :  { %2067 = vperm.xlu1 %9867, %v11235_v53  }
 0x622   :  { %2073 = vperm.xlu1 %9867, %v11240_v52  }
 0x66f   :  { %v2032_v24 = vpop.permute.xlu1 %2031 }
 0x670   :  { %v2081_v20 = vrot.slane %v2032_v24, %v11245_v31 }
 0x673   :  { %v2035_v33 = vpop.permute.xlu1 %2034 }
 0x674   :  { %v2085_v37 = vrot.slane %v2035_v33, %v11245_v31 }
 0x676   :  { %v2143_v40 = vsel %vm2142_vm14, %v2085_v37, %v2081_v20 }
 0x677   :  { %v2038_v44 = vpop.permute.xlu1 %2037 }
 0x678   :  { %v2089_v51 = vrot.slane %v2038_v44, %v11245_v31 }
 0x67a   :  { %v2145_v33 = vsel %vm2144_vm15, %v2089_v51, %v2143_v40 }
 0x67b   :  { %v2041_v55 = vpop.permute.xlu1 %2040 }
 0x67c   :  { %v2093_v60 = vrot.slane %v2041_v55, %v11245_v31 }
 0x67e   :  { %v2147_v44 = vsel %vm2146_vm2, %v2093_v60, %v2145_v33 }
 0x67f   :  { %v2044_v8 = vpop.permute.xlu1 %2043 }
 0x680   :  { %v2097_v59 = vrot.slane %v2044_v8, %v11245_v31 }
 0x682   :  { %v2149_v24 = vsel %vm2148_vm3, %v2097_v59, %v2147_v44 }
 0x683   :  { %v2047_v57 = vpop.permute.xlu1 %2046 }
 0x684   :  { %v2101_v10 = vrot.slane %v2047_v57, %v11245_v31 }
 0x686   :  { %v2151_v37 = vsel %vm2150_vm4, %v2101_v10, %v2149_v24 }
 0x689   :  { %v2050_v63 = vpop.permute.xlu0 %2049 }
 0x68a   :  { %v2105_v35 = vrot.slane %v2050_v63, %v11245_v31 }
 0x68c   :  { %v2153_v20 = vsel %vm2152_vm5, %v2105_v35, %v2151_v37 }
 0x68d   :  { %v2059_v17 = vpop.permute.xlu0 %2058 }
 0x68e   :  { %v2117_v51 = vrot.slane %v2059_v17, %v11245_v31 }
 0x691   :  { %v2053_v55 = vpop.permute.xlu1 %2052  ;;  %v2065_v57 = vpop.permute.xlu0 %2064 }
 0x692   :  { %v2109_v8 = vrot.slane %v2053_v55, %v11245_v31  ;;  %v2125_v35 = vrot.slane %v2065_v57, %v11245_v31 }
 0x694   :  { %v2155_v26 = vsel %vm2154_vm7, %v2109_v8, %v2153_v20 }
 0x695   :  { %v2056_v40 = vpop.permute.xlu1 %2055  ;;  %v2165_v63 = vsel %vm1243_vm6, %v2155_v26, -inf  ;;  %v2071_v33 = vpop.permute.xlu0 %2070 }
 0x696   :  { %2166 = vmax.xlane.f32.xlu1 %v2165_v63  ;;  %v2113_v60 = vrot.slane %v2056_v40, %v11245_v31  ;;  %v2133_v17 = vrot.slane %v2071_v33, %v11245_v31 }
 0x698   :  { %v2156_v55 = vsel %vm2142_vm14, %v2117_v51, %v2113_v60 }
 0x699   :  { %v2062_v59 = vpop.permute.xlu1 %2061  ;;  %v2077_v37 = vpop.permute.xlu0 %2076 }
 0x69a   :  { %v2121_v44 = vrot.slane %v2062_v59, %v11245_v31  ;;  %v2141_v59 = vrot.slane %v2077_v37, %v11245_v31 }
 0x69c   :  { %v2157_v10 = vsel %vm2144_vm15, %v2121_v44, %v2156_v55 }
 0x69d   :  { %v2068_v24 = vpop.permute.xlu1 %2067  ;;  %v2158_v26 = vsel %vm2146_vm2, %v2125_v35, %v2157_v10 }
 0x69e   :  { %v2129_v8 = vrot.slane %v2068_v24, %v11245_v31 }
 0x6a0   :  { %v2159_v20 = vsel %vm2148_vm3, %v2129_v8, %v2158_v26 }
 0x6a1   :  { %v2074_v40 = vpop.permute.xlu1 %2073  ;;  %v2160_v60 = vsel %vm2150_vm4, %v2133_v17, %v2159_v20 }
 0x6a2   :  { %v2137_v63 = vrot.slane %v2074_v40, %v11245_v31 }
 0x6a4   :  { %v2161_v51 = vsel %vm2152_vm5, %v2137_v63, %v2160_v60 }
 0x6a5   :  { %v2162_v57 = vsel %vm2154_vm7, %v2141_v59, %v2161_v51 }
 0x6a6   :  { %v2168_v44 = vsel %vm1243_vm6, %v2162_v57, -inf }
 0x6a7   :  { %2169 = vmax.xlane.f32.xlu0 %v2168_v44 }
 0x723   :  { %v2167_v55 = vpop.xlane.xlu1 %2166 }
 0x724   :  { %v2176_v10 = vrot.slane %v2167_v55, %v10164_v15  ;;  %v2180_v35 = vrot.slane %v2167_v55, %v10898_v58  ;;  %v2184_v33 = vrot.slane %v2167_v55, %v10901_v3  ;;  %v2188_v24 = vrot.slane %v2167_v55, %v10908_v9 }
 0x725   :  { %v2192_v8 = vrot.slane %v2167_v55, %v10911_v32  ;;  %v2196_v17 = vrot.slane %v2167_v55, %v10918_v23  ;;  %v2200_v63 = vrot.slane %v2167_v55, %v11136_v56  ;;  %v2204_v51 = vrot.slane %v2167_v55, %v11141_v6 }
 0x726   :  { %v2254_v26 = vsub.f32 %v11167_v50, %v2180_v35  ;;  %v2253_v37 = vsub.f32 %v11161_v54, %v2176_v10  ;;  %v2255_v20 = vsub.f32 %v11171_v47, %v2184_v33  ;;  %v2256_v40 = vsub.f32 %v11176_v12, %v2188_v24 }
 0x727   :  { %v2257_v44 = vsub.f32 %v11182_v43, %v2192_v8  ;;  %v2258_v54 = vsub.f32 %v11186_v27, %v2196_v17  ;;  %v2259_v47 = vsub.f32 %v11194_v39, %v2200_v63  ;;  %v2260_v12 = vsub.f32 %v11211_v14, %v2204_v51 }
 0x728   :  { %v2271_v59 = vmul.f32 1.442695, %v2254_v26  ;;  %v2269_v60 = vmul.f32 1.442695, %v2253_v37  ;;  %v2273_v57 = vmul.f32 1.442695, %v2255_v20 }
 0x729   :  { %v2275_v50 = vmul.f32 1.442695, %v2256_v40  ;;  %v2277_v10 = vmul.f32 1.442695, %v2257_v44  ;;  %v2279_v35 = vmul.f32 1.442695, %v2258_v54 }
 0x72a   :  { %9879 = vpow2.f32 %v2271_v59  ;;  %v2281_v33 = vmul.f32 1.442695, %v2259_v47  ;;  %v2283_v24 = vmul.f32 1.442695, %v2260_v12 }
 0x72b   :  { %9881 = vpow2.f32 %v2269_v60 }
 0x72c   :  { %9883 = vpow2.f32 %v2273_v57 }
 0x72d   :  { %9885 = vpow2.f32 %v2275_v50 }
 0x72e   :  { %9887 = vpow2.f32 %v2277_v10 }
 0x72f   :  { %9889 = vpow2.f32 %v2279_v35 }
 0x730   :  { %9891 = vpow2.f32 %v2281_v33 }
 0x731   :  { %9893 = vpow2.f32 %v2283_v24 }
 0x734   :  { %v11295_v55 = vpop.eup %9879  ;;  %v2170_v26 = vpop.xlane.xlu0 %2169 }
 0x735   :  { %v11297_v43 = vpop.eup %9881  ;;  %v2208_v27 = vrot.slane %v2170_v26, %v10164_v15  ;;  %v2212_v39 = vrot.slane %v2170_v26, %v10898_v58  ;;  %v2216_v8 = vrot.slane %v2170_v26, %v10901_v3  ;;  %v2220_v14 = vrot.slane %v2170_v26, %v10908_v9  ;;  %2321 = vperm.xlu1 %9867, %v11295_v55  }
 0x736   :  { %2318 = vperm.xlu0 %9868, %v11297_v43   ;;  %v2228_v37 = vrot.slane %v2170_v26, %v10918_v23  ;;  %v11309_v63 = vpop.eup %9883  ;;  %v2224_v59 = vrot.slane %v2170_v26, %v10911_v32  ;;  %v2232_v54 = vrot.slane %v2170_v26, %v11136_v56 }
 0x737   :  { %v2262_v20 = vsub.f32 %v11198_v46, %v2212_v39  ;;  %v2261_v17 = vsub.f32 %v11216_v16, %v2208_v27  ;;  %v2264_v40 = vsub.f32 %v11207_v36, %v2220_v14  ;;  %v2263_v60 = vsub.f32 %v11226_v25, %v2216_v8  ;;  %v11313_v51 = vpop.eup %9885 }
 0x738   :  { %v2236_v46 = vrot.slane %v2170_v26, %v11141_v6  ;;  %v2266_v36 = vsub.f32 %v11220_v11, %v2228_v37  ;;  %v11319_v50 = vpop.eup %9887  ;;  %v2265_v47 = vsub.f32 %v11235_v53, %v2224_v59  ;;  %v2267_v26 = vsub.f32 %v11240_v52, %v2232_v54  ;;  %v2712_v59 = vld [vmem:[%s14102_s1 + $0xc0] sm:$0xff] }
 0x739   :  { %2324 = vperm.xlu1 %9867, %v11309_v63   ;;  %v2287_v57 = vmul.f32 1.442695, %v2262_v20  ;;  %v2285_v44 = vmul.f32 1.442695, %v2261_v17  ;;  %v2291_v16 = vmul.f32 1.442695, %v2264_v40  ;;  %v11323_v10 = vpop.eup %9889 }
 0x73a   :  { %2327 = vperm.xlu0 %9868, %v11313_v51   ;;  %v2289_v25 = vmul.f32 1.442695, %v2263_v60  ;;  %v11326_v12 = vpop.eup %9891  ;;  %v2295_v35 = vmul.f32 1.442695, %v2266_v36  ;;  %v2268_v11 = vsub.f32 %v11230_v34, %v2236_v46  ;;  %v2293_v24 = vmul.f32 1.442695, %v2265_v47 }
 0x73b   :  { %9895 = vpow2.f32 %v2287_v57  ;;  %v11330_v33 = vpop.eup %9893  ;;  %v2297_v27 = vmul.f32 1.442695, %v2267_v26  ;;  %v2711_v40 = vld [vmem:[%s14102_s1 + $0xb8] sm:$0xff]  ;;  %v2713_v60 = vld [vmem:[%s14102_s1 + $0xc8] sm:$0xff] }
 0x73c   :  { %9897 = vpow2.f32 %v2285_v44  ;;  %v2299_v53 = vmul.f32 1.442695, %v2268_v11  ;;  %v9775_v57 = vpack.c.bf16 %v2712_v59, %v2711_v40  ;;  %v2714_v44 = vld [vmem:[%s14102_s1 + $0xd0] sm:$0xff]  ;;  %v10088_v36 = vld [vmem:[%s14101_s0 + $0x8] sm:$0xff] }
 0x73d   :  { %2330 = vperm.xlu1 %9867, %v11319_v50   ;;  %9899 = vpow2.f32 %v2291_v16  ;;  %v9779_v46 = vpack.c.bf16 %v2714_v44, %v2713_v60  ;;  %v14139_v16 = vmov 0.0  }
 0x73e   :  { %2333 = vperm.xlu0 %9868, %v11323_v10   ;;  %9901 = vpow2.f32 %v2289_v25  ;;  %9776 = vmatprep.subr.bf16.mxu1 %v9775_v57 }
 0x73f   :  { %9903 = vpow2.f32 %v2295_v35  ;;  %9778 = vmatpush3.bf16.msra.mxu1 %v9775_v57 }
 0x740   :  { %9905 = vpow2.f32 %v2293_v24  ;;  %9780 = vmatprep.subr.bf16.mxu1 %v9779_v46 }
 0x741   :  { %2336 = vperm.xlu1 %9867, %v11326_v12   ;;  %9907 = vpow2.f32 %v2299_v53 }
 0x742   :  { %2339 = vperm.xlu0 %9868, %v11330_v33   ;;  %9909 = vpow2.f32 %v2297_v27 }
 0x743   :  { %9782 = vmatpush3.bf16.msra.mxu1 %v9779_v46 }
 0x744   :  { %9460 = vmatprep.subr.mxu1 %v14139_v16 }
 0x745   :  { %v11335_v39 = vpop.eup %9895 }
 0x746   :  { %v11337_v8 = vpop.eup %9897  ;;  %2345 = vperm.xlu0 %9868, %v11335_v39   ;;  %9453 = vmatmul.mubr.msk.f32.vlgmr.msra.gmra.mrb[32].mxu1 %vm245_vm0, %v10088_v36  ;;  %vm14129_vm0 = vmmov 0  }
 0x747   :  { %2342 = vperm.xlu1 %9867, %v11337_v8   ;;  %v11341_v34 = vpop.eup %9899  ;;  %9457 = vmatprep.mubr.msk.f32.mxu0 %vm14129_vm0, %v14139_v16 }
 0x748   :  { %v11343_v52 = vpop.eup %9901  ;;  %9462 = vmatprep.mubr.msk.f32.mxu1 %vm14129_vm0, %v14139_v16 }
 0x749   :  { %v11347_v14 = vpop.eup %9903 }
 0x74a   :  { %2351 = vperm.xlu0 %9868, %v11341_v34   ;;  %v11349_v37 = vpop.eup %9905 }
 0x74b   :  { %2348 = vperm.xlu1 %9867, %v11343_v52   ;;  %v11353_v20 = vpop.eup %9907 }
 0x74c   :  { %v11355_v17 = vpop.eup %9909 }
 0x74e   :  { %2357 = vperm.xlu0 %9868, %v11347_v14  }
 0x74f   :  { %2354 = vperm.xlu1 %9867, %v11349_v37  }
 0x752   :  { %2363 = vperm.xlu0 %9868, %v11353_v20  }
 0x753   :  { %2360 = vperm.xlu1 %9867, %v11355_v17  }
 0x7b4   :  { %v2322_v54 = vpop.permute.xlu1 %2321 }
 0x7b5   :  { %v2319_v25 = vpop.permute.xlu0 %2318  ;;  %v2372_v47 = vrot.slane %v2322_v54, %v11245_v31 }
 0x7b6   :  { %v2368_v35 = vrot.slane %v2319_v25, %v11245_v31 }
 0x7b8   :  { %v2325_v11 = vpop.permute.xlu1 %2324  ;;  %v2429_v53 = vsel %vm2142_vm14, %v2372_v47, %v2368_v35 }
 0x7b9   :  { %v2376_v24 = vrot.slane %v2325_v11, %v11245_v31  ;;  %v2328_v26 = vpop.permute.xlu0 %2327 }
 0x7ba   :  { %v2380_v27 = vrot.slane %v2328_v26, %v11245_v31 }
 0x7bb   :  { %v2430_v40 = vsel %vm2144_vm15, %v2376_v24, %v2429_v53 }
 0x7bc   :  { %v2331_v59 = vpop.permute.xlu1 %2330  ;;  %v2431_v44 = vsel %vm2146_vm2, %v2380_v27, %v2430_v40 }
 0x7bd   :  { %v2384_v60 = vrot.slane %v2331_v59, %v11245_v31  ;;  %v2334_v57 = vpop.permute.xlu0 %2333 }
 0x7be   :  { %v2388_v46 = vrot.slane %v2334_v57, %v11245_v31 }
 0x7bf   :  { %v2432_v36 = vsel %vm2148_vm3, %v2384_v60, %v2431_v44 }
 0x7c0   :  { %v2337_v54 = vpop.permute.xlu1 %2336  ;;  %v2433_v35 = vsel %vm2150_vm4, %v2388_v46, %v2432_v36 }
 0x7c1   :  { %v2392_v25 = vrot.slane %v2337_v54, %v11245_v31  ;;  %v2340_v11 = vpop.permute.xlu0 %2339 }
 0x7c2   :  { %v2396_v47 = vrot.slane %v2340_v11, %v11245_v31 }
 0x7c3   :  { %v2434_v24 = vsel %vm2152_vm5, %v2392_v25, %v2433_v35 }
 0x7c4   :  { %v2435_v26 = vsel %vm2154_vm7, %v2396_v47, %v2434_v24 }
 0x7c5   :  { %v2346_v53 = vpop.permute.xlu0 %2345  ;;  %v2445_v59 = vsel %vm1243_vm6, %v2435_v26, 0.0 }
 0x7c6   :  { %v2343_v27 = vpop.permute.xlu1 %2342  ;;  %2446 = vadd.xlane.f32.xlu1 %v2445_v59  ;;  %v2404_v60 = vrot.slane %v2346_v53, %v11245_v31 }
 0x7c7   :  { %v2400_v40 = vrot.slane %v2343_v27, %v11245_v31 }
 0x7c9   :  { %v2352_v57 = vpop.permute.xlu0 %2351  ;;  %v2436_v11 = vsel %vm2142_vm14, %v2404_v60, %v2400_v40 }
 0x7ca   :  { %v2349_v44 = vpop.permute.xlu1 %2348  ;;  %v2412_v46 = vrot.slane %v2352_v57, %v11245_v31 }
 0x7cb   :  { %v2408_v54 = vrot.slane %v2349_v44, %v11245_v31 }
 0x7cd   :  { %v2437_v36 = vsel %vm2144_vm15, %v2408_v54, %v2436_v11  ;;  %v2358_v25 = vpop.permute.xlu0 %2357 }
 0x7ce   :  { %v2355_v47 = vpop.permute.xlu1 %2354  ;;  %v2438_v24 = vsel %vm2146_vm2, %v2412_v46, %v2437_v36  ;;  %v2420_v26 = vrot.slane %v2358_v25, %v11245_v31 }
 0x7cf   :  { %v2416_v35 = vrot.slane %v2355_v47, %v11245_v31 }
 0x7d1   :  { %v2439_v53 = vsel %vm2148_vm3, %v2416_v35, %v2438_v24  ;;  %v2364_v59 = vpop.permute.xlu0 %2363 }
 0x7d2   :  { %v2361_v27 = vpop.permute.xlu1 %2360  ;;  %v2428_v44 = vrot.slane %v2364_v59, %v11245_v31  ;;  %v2440_v60 = vsel %vm2150_vm4, %v2420_v26, %v2439_v53 }
 0x7d3   :  { %v2424_v40 = vrot.slane %v2361_v27, %v11245_v31 }
 0x7d5   :  { %v2441_v57 = vsel %vm2152_vm5, %v2424_v40, %v2440_v60 }
 0x7d6   :  { %v2442_v54 = vsel %vm2154_vm7, %v2428_v44, %v2441_v57 }
 0x7d7   :  { %v2448_v11 = vsel %vm1243_vm6, %v2442_v54, 0.0 }
 0x7d8   :  { %2449 = vadd.xlane.f32.xlu0 %v2448_v11 }
 0x819   :  { %v9454_v46 = vpop.f32.mrb[32].mxu1 }
 0x81a   :  { %v2786_v36 = vpop.f32.mrb[33].mxu1  ;;  %9461 = vmatpush3.msra.mxu1 %v9454_v46 }
 0x81b   :  { %9456 = vmatpush3.msra.mxu0 %v2786_v36 }
 0x853   :  { %v2447_v25 = vpop.xlane.xlu1 %2446 }
 0x854   :  { %v2460_v47 = vrot.slane %v2447_v25, %v10898_v58  ;;  %v2456_v35 = vrot.slane %v2447_v25, %v10164_v15  ;;  %v2464_v24 = vrot.slane %v2447_v25, %v10901_v3  ;;  %v2468_v26 = vrot.slane %v2447_v25, %v10908_v9 }
 0x855   :  { %v2472_v53 = vrot.slane %v2447_v25, %v10911_v32  ;;  %v2476_v59 = vrot.slane %v2447_v25, %v10918_v23  ;;  %v2480_v27 = vrot.slane %v2447_v25, %v11136_v56  ;;  %v2484_v44 = vrot.slane %v2447_v25, %v11141_v6 }
 0x856   :  { %9911 = vrcp.f32 %v2460_v47 }
 0x857   :  { %9913 = vrcp.f32 %v2456_v35 }
 0x858   :  { %9915 = vrcp.f32 %v2464_v24 }
 0x859   :  { %9917 = vrcp.f32 %v2468_v26 }
 0x85a   :  { %9919 = vrcp.f32 %v2472_v53 }
 0x85b   :  { %9921 = vrcp.f32 %v2476_v59 }
 0x85c   :  { %9923 = vrcp.f32 %v2480_v27 }
 0x85d   :  { %9925 = vrcp.f32 %v2484_v44 }
 0x860   :  { %v9912_v40 = vpop.eup %9911 }
 0x861   :  { %v9914_v60 = vpop.eup %9913  ;;  %v2536_v57 = vmul.f32 %v9912_v40, %v11295_v55 }
 0x862   :  { %v9916_v54 = vpop.eup %9915  ;;  %v2534_v11 = vmul.f32 %v9914_v60, %v11297_v43 }
 0x863   :  { %v9918_v46 = vpop.eup %9917  ;;  %2585 = vperm.xlu1 %9867, %v2536_v57   ;;  %v2538_v47 = vmul.f32 %v9916_v54, %v11309_v63 }
 0x864   :  { %2582 = vperm.xlu0 %9868, %v2534_v11   ;;  %v9920_v35 = vpop.eup %9919  ;;  %v2540_v24 = vmul.f32 %v9918_v46, %v11313_v51 }
 0x865   :  { %v2450_v36 = vpop.xlane.xlu0 %2449  ;;  %v9922_v55 = vpop.eup %9921  ;;  %v2542_v43 = vmul.f32 %v9920_v35, %v11319_v50 }
 0x866   :  { %v2492_v25 = vrot.slane %v2450_v36, %v10898_v58  ;;  %v2488_v26 = vrot.slane %v2450_v36, %v10164_v15  ;;  %v2500_v53 = vrot.slane %v2450_v36, %v10908_v9  ;;  %v2496_v59 = vrot.slane %v2450_v36, %v10901_v3  ;;  %v9924_v27 = vpop.eup %9923 }
 0x867   :  { %2588 = vperm.xlu1 %9867, %v2538_v47   ;;  %v2544_v63 = vmul.f32 %v9922_v55, %v11323_v10  ;;  %v2508_v51 = vrot.slane %v2450_v36, %v10918_v23  ;;  %v9926_v44 = vpop.eup %9925  ;;  %v2504_v40 = vrot.slane %v2450_v36, %v10911_v32  ;;  %v2546_v60 = vmul.f32 %v9924_v27, %v11326_v12 }
 0x868   :  { %2591 = vperm.xlu0 %9868, %v2540_v24   ;;  %9927 = vrcp.f32 %v2492_v25  ;;  %v2548_v57 = vmul.f32 %v9926_v44, %v11330_v33  ;;  %v2516_v50 = vrot.slane %v2450_v36, %v11141_v6  ;;  %v2512_v10 = vrot.slane %v2450_v36, %v11136_v56 }
 0x869   :  { %9929 = vrcp.f32 %v2488_v26  ;;  %v14140_v55 = vand.u32 2147483647, %v10181_v29  ;;  %v14144_v29 = vand.u32 2147483647, %v10233_v62 }
 0x86a   :  { %9931 = vrcp.f32 %v2500_v53 }
 0x86b   :  { %2594 = vperm.xlu1 %9867, %v2542_v43   ;;  %9933 = vrcp.f32 %v2496_v59 }
 0x86c   :  { %2597 = vperm.xlu0 %9868, %v2544_v63   ;;  %9935 = vrcp.f32 %v2508_v51 }
 0x86d   :  { %9937 = vrcp.f32 %v2504_v40 }
 0x86e   :  { %9939 = vrcp.f32 %v2516_v50 }
 0x86f   :  { %2600 = vperm.xlu1 %9867, %v2546_v60   ;;  %9941 = vrcp.f32 %v2512_v10 }
 0x870   :  { %2603 = vperm.xlu0 %9868, %v2548_v57  }
 0x872   :  { %v9928_v54 = vpop.eup %9927 }
 0x873   :  { %v9930_v11 = vpop.eup %9929  ;;  %v2552_v46 = vmul.f32 %v9928_v54, %v11335_v39 }
 0x874   :  { %v9932_v47 = vpop.eup %9931  ;;  %v2550_v35 = vmul.f32 %v9930_v11, %v11337_v8 }
 0x875   :  { %v9934_v12 = vpop.eup %9933  ;;  %2609 = vperm.xlu0 %9868, %v2552_v46   ;;  %v2556_v33 = vmul.f32 %v9932_v47, %v11341_v34 }
 0x876   :  { %2606 = vperm.xlu1 %9867, %v2550_v35   ;;  %v9936_v24 = vpop.eup %9935  ;;  %v2554_v25 = vmul.f32 %v9934_v12, %v11343_v52 }
 0x877   :  { %v9938_v26 = vpop.eup %9937  ;;  %v2560_v39 = vmul.f32 %v9936_v24, %v11347_v14  ;;  %v14141_v14 = vand.u32 2147483647, %v10190_v38  ;;  %v14145_v38 = vand.u32 2147483647, %v10243_v2 }
 0x878   :  { %v9940_v8 = vpop.eup %9939  ;;  %v2558_v36 = vmul.f32 %v9938_v26, %v11349_v37  ;;  %v14142_v37 = vand.u32 2147483647, %v10195_v41  ;;  %v14146_v41 = vand.u32 2147483647, %v10263_v19 }
 0x879   :  { %2615 = vperm.xlu0 %9868, %v2556_v33   ;;  %v9942_v53 = vpop.eup %9941  ;;  %v2564_v34 = vmul.f32 %v9940_v8, %v11353_v20  ;;  %v14143_v20 = vand.u32 2147483647, %v10213_v49 }
 0x87a   :  { %2612 = vperm.xlu1 %9867, %v2554_v25   ;;  %v2562_v52 = vmul.f32 %v9942_v53, %v11355_v17 }
 0x87d   :  { %2621 = vperm.xlu0 %9868, %v2560_v39  }
 0x87e   :  { %2618 = vperm.xlu1 %9867, %v2558_v36  }
 0x881   :  { %2627 = vperm.xlu0 %9868, %v2564_v34  }
 0x882   :  { %2624 = vperm.xlu1 %9867, %v2562_v52  }
 0x885   :  { %3173 = vrot.lane.b32.xlu0 %v14141_v14, %s10119_s16 }
 0x886   :  { %3171 = vrot.lane.b32.xlu1 %v14140_v55, %s10119_s16 }
 0x889   :  { %3177 = vrot.lane.b32.xlu0 %v10210_v48, %s10119_s16 }
 0x88a   :  { %3175 = vrot.lane.b32.xlu1 %v10203_v45, %s10119_s16  ;;  %v14147_v45 = vand.u32 2147483647, %v10272_v22 }
 0x88d   :  { %3181 = vrot.lane.b32.xlu0 %v14143_v20, %s10119_s16 }
 0x88e   :  { %3179 = vrot.lane.b32.xlu1 %v14142_v37, %s10119_s16 }
 0x891   :  { %3185 = vrot.lane.b32.xlu0 %v10240_v1, %s10119_s16 }
 0x892   :  { %3183 = vrot.lane.b32.xlu1 %v10230_v61, %s10119_s16 }
 0x895   :  { %3189 = vrot.lane.b32.xlu0 %v14145_v38, %s10119_s16 }
 0x896   :  { %3187 = vrot.lane.b32.xlu1 %v14144_v29, %s10119_s16 }
 0x899   :  { %3193 = vrot.lane.b32.xlu0 %v10269_v21, %s10119_s16 }
 0x89a   :  { %3191 = vrot.lane.b32.xlu1 %v10260_v18, %s10119_s16 }
 0x89d   :  { %3197 = vrot.lane.b32.xlu0 %v14147_v45, %s10119_s16 }
 0x89e   :  { %3195 = vrot.lane.b32.xlu1 %v14146_v41, %s10119_s16 }
 0x8a1   :  { %3201 = vrot.lane.b32.xlu0 %v10291_v30, %s10119_s16 }
 0x8a2   :  { %3199 = vrot.lane.b32.xlu1 %v10286_v28, %s10119_s16 }
 0x8e2   :  { %v2586_v48 = vpop.permute.xlu1 %2585 }
 0x8e3   :  { %v2583_v49 = vpop.permute.xlu0 %2582  ;;  %v2636_v61 = vrot.slane %v2586_v48, %v11245_v31  ;;  %v3235_v48 = vld [vmem:[%s14102_s1 + $0xe0] sm:$0xff] }
 0x8e4   :  { %v2632_v62 = vrot.slane %v2583_v49, %v11245_v31  ;;  %v3236_v49 = vld [vmem:[%s14102_s1 + $0xe8] sm:$0xff] }
 0x8e6   :  { %v2589_v1 = vpop.permute.xlu1 %2588  ;;  %v2693_v19 = vsel %vm2142_vm14, %v2636_v61, %v2632_v62  ;;  %v9783_v61 = vpack.c.bf16 %v3236_v49, %v3235_v48  ;;  %v3237_v62 = vld [vmem:[%s14102_s1 + $0xf0] sm:$0xff] }
 0x8e7   :  { %v2640_v2 = vrot.slane %v2589_v1, %v11245_v31  ;;  %v2592_v18 = vpop.permute.xlu0 %2591 }
 0x8e8   :  { %v2644_v21 = vrot.slane %v2592_v18, %v11245_v31  ;;  %9784 = vmatprep.subr.bf16.mxu0 %v9783_v61  ;;  %v3240_v18 = vld [vmem:[%s14102_s1 + $0x108] sm:$0xff] }
 0x8e9   :  { %v2694_v22 = vsel %vm2144_vm15, %v2640_v2, %v2693_v19  ;;  %v3239_v2 = vld [vmem:[%s14102_s1 + $0x100] sm:$0xff] }
 0x8ea   :  { %v2595_v28 = vpop.permute.xlu1 %2594  ;;  %v2695_v59 = vsel %vm2146_vm2, %v2644_v21, %v2694_v22  ;;  %v9791_v19 = vpack.c.bf16 %v3240_v18, %v3239_v2  ;;  %v8910_v21 = vld [vmem:[%s14102_s1 + $0xd8] ss:$0 sm:$0xff] }
 0x8eb   :  { %v2648_v17 = vrot.slane %v2595_v28, %v11245_v31  ;;  %v2598_v30 = vpop.permute.xlu0 %2597 }
 0x8ec   :  { %v2652_v43 = vrot.slane %v2598_v30, %v11245_v31 }
 0x8ed   :  { %v2696_v27 = vsel %vm2148_vm3, %v2648_v17, %v2695_v59 }
 0x8ee   :  { %v2601_v63 = vpop.permute.xlu1 %2600  ;;  %v2697_v40 = vsel %vm2150_vm4, %v2652_v43, %v2696_v27 }
 0x8ef   :  { %v2656_v51 = vrot.slane %v2601_v63, %v11245_v31  ;;  %v2604_v44 = vpop.permute.xlu0 %2603 }
 0x8f0   :  { %v2660_v60 = vrot.slane %v2604_v44, %v11245_v31 }
 0x8f1   :  { %v2698_v57 = vsel %vm2152_vm5, %v2656_v51, %v2697_v40 }
 0x8f2   :  { %v2699_v50 = vsel %vm2154_vm7, %v2660_v60, %v2698_v57 }
 0x8f3   :  { %v11500_v10 = vsub.f32 %v10889_v42, %v2699_v50 }
 0x8f4   :  { %v2610_v54 = vpop.permute.xlu0 %2609 }
 0x8f5   :  { %14148 = vst [vmem:[#allocation10_spill] sm:$0xff] %v11500_v10  ;;  %v2607_v11 = vpop.permute.xlu1 %2606  ;;  %9458 = vmatmul.mubr.msk.f32.vlgmr.msra.gmra.mrb[32].mxu0 %vm1243_vm6, %v11500_v10  ;;  %v2668_v47 = vrot.slane %v2610_v54, %v11245_v31 }
 0x8f6   :  { %v2664_v46 = vrot.slane %v2607_v11, %v11245_v31  ;;  %9786 = vmatpush3.bf16.msra.mxu0 %v9783_v61 }
 0x8f8   :  { %v2616_v35 = vpop.permute.xlu0 %2615  ;;  %v2700_v24 = vsel %vm2142_vm14, %v2668_v47, %v2664_v46 }
 0x8f9   :  { %v2613_v12 = vpop.permute.xlu1 %2612  ;;  %v2676_v25 = vrot.slane %v2616_v35, %v11245_v31 }
 0x8fa   :  { %v2672_v33 = vrot.slane %v2613_v12, %v11245_v31 }
 0x8fc   :  { %v2701_v26 = vsel %vm2144_vm15, %v2672_v33, %v2700_v24  ;;  %v2622_v39 = vpop.permute.xlu0 %2621 }
 0x8fd   :  { %v2619_v8 = vpop.permute.xlu1 %2618  ;;  %v2702_v53 = vsel %vm2146_vm2, %v2676_v25, %v2701_v26  ;;  %v2684_v34 = vrot.slane %v2622_v39, %v11245_v31 }
 0x8fe   :  { %v2680_v36 = vrot.slane %v2619_v8, %v11245_v31 }
 0x900   :  { %v2703_v52 = vsel %vm2148_vm3, %v2680_v36, %v2702_v53  ;;  %v2628_v55 = vpop.permute.xlu0 %2627 }
 0x901   :  { %v2625_v14 = vpop.permute.xlu1 %2624  ;;  %v2692_v37 = vrot.slane %v2628_v55, %v11245_v31  ;;  %v2704_v29 = vsel %vm2150_vm4, %v2684_v34, %v2703_v52 }
 0x902   :  { %v2688_v20 = vrot.slane %v2625_v14, %v11245_v31 }
 0x904   :  { %v2705_v38 = vsel %vm2152_vm5, %v2688_v20, %v2704_v29  ;;  %v3174_v43 = vpop.permute.xlu0 %3173 }
 0x905   :  { %v2706_v41 = vsel %vm2154_vm7, %v2692_v37, %v2705_v38  ;;  %v3172_v30 = vpop.permute.xlu1 %3171 }
 0x906   :  { %v11520_v45 = vsub.f32 %v10889_v42, %v2706_v41  ;;  %v3238_v42 = vld [vmem:[%s14102_s1 + $0xf8] sm:$0xff] }
 0x907   :  { %v9787_v1 = vpack.c.bf16 %v3238_v42, %v3237_v62 }
 0x908   :  { %14149 = vst [vmem:[#allocation11_spill] sm:$0xff] %v11520_v45  ;;  %9463 = vmatmul.mubr.msk.f32.vlgmr.msra.gmra.mrb[34].mxu1 %vm1243_vm6, %v11520_v45  ;;  %v3178_v46 = vpop.permute.xlu0 %3177 }
 0x909   :  { %9788 = vmatprep.subr.bf16.mxu0 %v9787_v1  ;;  %v3176_v44 = vpop.permute.xlu1 %3175 }
 0x90a   :  { %9790 = vmatpush3.bf16.msra.mxu0 %v9787_v1 }
 0x90b   :  { %9792 = vmatprep.subr.bf16.mxu0 %v9791_v19 }
 0x90c   :  { %v3182_v61 = vpop.permute.xlu0 %3181 }
 0x90d   :  { %v3180_v26 = vpop.permute.xlu1 %3179 }
 0x90e   :  { %9794 = vmatpush3.bf16.msra.mxu0 %v9791_v19 }
 0x9c8   :  { %v2868_v22 = vpop.f32.mrb[32].mxu0 }
 0x9c9   :  { %v2869_v28 = vadd.f32 %v8910_v21, %v2868_v22  ;;  %v9459_v17 = vpop.f32.mrb[33].mxu0 }
 0x9cb   :  { %vm2945_vm8 = vcmp.gt.f32.partialorder %v2869_v28, 0.0  ;;  %v2947_v59 = vmul.f32 0.01, %v2869_v28 }
 0x9cd   :  { %v11545_v27 = vsel %vm2945_vm8, %v2869_v28, %v2947_v59  ;;  %v3184_v28 = vpop.permute.xlu1 %3183 }
 0x9ce   :  { %v2968_v63 = vrot.slane %v11545_v27, %v10159_v13  ;;  %v2961_v51 = vcombine.high %v11545_v27, %v11545_v27 }
 0x9d0   :  { %v2984_v40 = vrot.slane %v2968_v63, %v10159_v13  ;;  %v2976_v60 = vcombine.high %v2968_v63, %v2968_v63  ;;  %v2975_v57 = vrot.slane %v2961_v51, %v10159_v13 }
 0x9d2   :  { %v3062_v50 = vrot.slane %v2984_v40, %v10164_v15  ;;  %v2998_v54 = vrot.slane %v2976_v60, %v10159_v13  ;;  %v3006_v11 = vcombine.high %v2984_v40, %v2984_v40  ;;  %v2991_v47 = vrot.slane %v2975_v57, %v10159_v13  ;;  %v3186_v40 = vpop.permute.xlu0 %3185 }
 0x9d3   :  { %v2977_v35 = vcombine.high %v2975_v57, %v2975_v57 }
 0x9d4   :  { %v3139_v12 = vsub.f32 %v3062_v50, %v11545_v27  ;;  %v3066_v33 = vrot.slane %v2998_v54, %v10164_v15  ;;  %v3070_v24 = vrot.slane %v3006_v11, %v10164_v15  ;;  %v3008_v25 = vcombine.high %v2998_v54, %v2998_v54  ;;  %v3188_v50 = vpop.permute.xlu1 %3187 }
 0x9d5   :  { %v3078_v39 = vrot.slane %v2991_v47, %v10164_v15  ;;  %v3005_v8 = vrot.slane %v2977_v35, %v10159_v13  ;;  %v3007_v36 = vcombine.high %v2991_v47, %v2991_v47 }
 0x9d6   :  { %v3155_v53 = vand.u32 2147483647, %v3139_v12  ;;  %v3140_v34 = vsub.f32 %v3066_v33, %v11545_v27  ;;  %v3141_v52 = vsub.f32 %v3070_v24, %v11545_v27  ;;  %v3074_v55 = vrot.slane %v3008_v25, %v10164_v15  ;;  %v3190_v25 = vpop.permute.xlu0 %3189 }
 0x9d7   :  { %v3143_v14 = vsub.f32 %v3078_v39, %v11545_v27  ;;  %v3082_v37 = vrot.slane %v3005_v8, %v10164_v15  ;;  %v3086_v20 = vrot.slane %v3007_v36, %v10164_v15  ;;  %v3009_v29 = vcombine.high %v3005_v8, %v3005_v8 }
 0x9d8   :  { %v11568_v38 = vsel %vm439_vm1, %v3155_v53, %v3172_v30  ;;  %v3156_v41 = vand.u32 2147483647, %v3140_v34  ;;  %v3157_v48 = vand.u32 2147483647, %v3141_v52  ;;  %v3142_v49 = vsub.f32 %v3074_v55, %v11545_v27 }
 0x9d9   :  { %9477 = vmatprep.mubr.msk.f32.mxu0 %vm3248_vm9, %v11568_v38  ;;  %v3144_v62 = vsub.f32 %v3082_v37, %v11545_v27  ;;  %v3090_v18 = vrot.slane %v3009_v29, %v10164_v15  ;;  %v3159_v19 = vand.u32 2147483647, %v3143_v14  ;;  %v3145_v17 = vsub.f32 %v3086_v20, %v11545_v27  ;;  %v3192_v14 = vpop.permute.xlu1 %3191 }
 0x9da   :  { %v11575_v42 = vsel %vm439_vm1, %v3156_v41, %v3174_v43  ;;  %v11578_v1 = vsel %vm439_vm1, %v3157_v48, %v3176_v44  ;;  %v3158_v2 = vand.u32 2147483647, %v3142_v49 }
 0x9db   :  { %v2941_v22 = vpop.f32.mrb[34].mxu1  ;;  %9478 = vmatmul.mubr.msk.f32.vlgmr.msra.gmra.mrb[34].mxu0 %vm3248_vm9, %v11575_v42  ;;  %v3160_v43 = vand.u32 2147483647, %v3144_v62  ;;  %v3146_v44 = vsub.f32 %v3090_v18, %v11545_v27  ;;  %v11591_v60 = vsel %vm439_vm1, %v3159_v19, %v3180_v26  ;;  %v3161_v57 = vand.u32 2147483647, %v3145_v17  ;;  %v3194_v18 = vpop.permute.xlu0 %3193 }
 0x9dc   :  { %v2942_v30 = vadd.f32 %v8910_v21, %v2941_v22  ;;  %v9464_v59 = vpop.f32.mrb[35].mxu1  ;;  %9480 = vmatprep.mubr.msk.f32.mxu0 %vm3248_vm9, %v11578_v1  ;;  %v11587_v63 = vsel %vm439_vm1, %v3158_v2, %v3178_v46 }
 0x9dd   :  { %v11604_v46 = vsel %vm439_vm1, %v3160_v43, %v3182_v61  ;;  %v3162_v47 = vand.u32 2147483647, %v3146_v44  ;;  %v11607_v35 = vsel %vm439_vm1, %v3161_v57, %v3184_v28 }
 0x9de   :  { %vm2946_vm10 = vcmp.gt.f32.partialorder %v2942_v30, 0.0  ;;  %v2948_v51 = vmul.f32 0.01, %v2942_v30 }
 0x9df   :  { %9481 = vmatmul.mubr.msk.f32.gmra.mrb[36].mxu0 %vm3248_vm9, %v11587_v63  ;;  %v11619_v53 = vsel %vm439_vm1, %v3162_v47, %v3186_v40 }
 0x9e0   :  { %v11595_v21 = vsel %vm2946_vm10, %v2942_v30, %v2948_v51  ;;  %9483 = vmatprep.mubr.msk.f32.mxu0 %vm3248_vm9, %v11591_v60 }
 0x9e1   :  { %v3017_v54 = vrot.slane %v11595_v21, %v10159_v13  ;;  %v3010_v11 = vcombine.high %v11595_v21, %v11595_v21 }
 0x9e3   :  { %v3033_v12 = vrot.slane %v3017_v54, %v10159_v13  ;;  %v3025_v33 = vcombine.high %v3017_v54, %v3017_v54  ;;  %9484 = vmatmul.mubr.msk.f32.gmra.mrb[38].mxu0 %vm3248_vm9, %v11604_v46  ;;  %v3024_v24 = vrot.slane %v3010_v11, %v10159_v13  ;;  %v3196_v11 = vpop.permute.xlu1 %3195 }
 0x9e4   :  { %9486 = vmatprep.mubr.msk.f32.mxu0 %vm3248_vm9, %v11607_v35 }
 0x9e5   :  { %v3094_v26 = vrot.slane %v3033_v12, %v10164_v15  ;;  %v3047_v39 = vrot.slane %v3025_v33, %v10159_v13  ;;  %v3055_v8 = vcombine.high %v3033_v12, %v3033_v12  ;;  %v3040_v36 = vrot.slane %v3024_v24, %v10159_v13  ;;  %v3198_v33 = vpop.permute.xlu0 %3197 }
 0x9e6   :  { %v3026_v34 = vcombine.high %v3024_v24, %v3024_v24 }
 0x9e7   :  { %v3147_v52 = vsub.f32 %v3094_v26, %v11595_v21  ;;  %v3098_v55 = vrot.slane %v3047_v39, %v10164_v15  ;;  %v3102_v37 = vrot.slane %v3055_v8, %v10164_v15  ;;  %v3057_v20 = vcombine.high %v3047_v39, %v3047_v39  ;;  %9487 = vmatmul.mubr.msk.f32.gmra.mrb[40].mxu0 %vm3248_vm9, %v11619_v53 }
 0x9e8   :  { %v3110_v29 = vrot.slane %v3040_v36, %v10164_v15  ;;  %v3054_v41 = vrot.slane %v3026_v34, %v10159_v13  ;;  %v3056_v48 = vcombine.high %v3040_v36, %v3040_v36  ;;  %v3200_v36 = vpop.permute.xlu1 %3199 }
 0x9e9   :  { %v3163_v49 = vand.u32 2147483647, %v3147_v52  ;;  %v3148_v61 = vsub.f32 %v3098_v55, %v11595_v21  ;;  %v3149_v62 = vsub.f32 %v3102_v37, %v11595_v21  ;;  %v3106_v2 = vrot.slane %v3057_v20, %v10164_v15  ;;  %v11682_v20 = vld [vmem:[%s14102_s1 + $0x110] ss:$0 sm:$0xff] }
 0x9ea   :  { %v3151_v19 = vsub.f32 %v3110_v29, %v11595_v21  ;;  %v3114_v22 = vrot.slane %v3054_v41, %v10164_v15  ;;  %v3118_v28 = vrot.slane %v3056_v48, %v10164_v15  ;;  %v3058_v17 = vcombine.high %v3054_v41, %v3054_v41  ;;  %v3641_v29 = vld [vmem:[%s14102_s1 + $0x128] sm:$0xff]  ;;  %v3642_v41 = vld [vmem:[%s14102_s1 + $0x130] sm:$0xff] }
 0x9eb   :  { %v11635_v30 = vsel %vm439_vm1, %v3163_v49, %v3188_v50  ;;  %v3164_v59 = vand.u32 2147483647, %v3148_v61  ;;  %v3165_v43 = vand.u32 2147483647, %v3149_v62  ;;  %v3150_v51 = vsub.f32 %v3106_v2, %v11595_v21 }
 0x9ec   :  { %9489 = vmatprep.mubr.msk.f32.mxu0 %vm3248_vm9, %v11635_v30  ;;  %v3152_v44 = vsub.f32 %v3114_v22, %v11595_v21  ;;  %v3122_v50 = vrot.slane %v3058_v17, %v10164_v15  ;;  %v3167_v47 = vand.u32 2147483647, %v3151_v19  ;;  %v3153_v12 = vsub.f32 %v3118_v28, %v11595_v21 }
 0x9ed   :  { %v11642_v40 = vsel %vm439_vm1, %v3164_v59, %v3190_v25  ;;  %v11645_v57 = vsel %vm439_vm1, %v3165_v43, %v3192_v14  ;;  %v3166_v54 = vand.u32 2147483647, %v3150_v51  ;;  %v3202_v14 = vpop.permute.xlu0 %3201  ;;  %v9795_v48 = vpack.c.bf16 %v3642_v41, %v3641_v29 }
 0x9ee   :  { %9490 = vmatmul.mubr.msk.f32.gmra.mrb[42].mxu0 %vm3248_vm9, %v11642_v40  ;;  %v3168_v25 = vand.u32 2147483647, %v3152_v44  ;;  %v3154_v26 = vsub.f32 %v3122_v50, %v11595_v21  ;;  %v11658_v39 = vsel %vm439_vm1, %v3167_v47, %v3196_v11  ;;  %v3169_v8 = vand.u32 2147483647, %v3153_v12 }
 0x9ef   :  { %9492 = vmatprep.mubr.msk.f32.mxu0 %vm3248_vm9, %v11645_v57  ;;  %v11654_v24 = vsel %vm439_vm1, %v3166_v54, %v3194_v18  ;;  %9796 = vmatprep.subr.bf16.mxu1 %v9795_v48 }
 0x9f0   :  { %v11665_v34 = vsel %vm439_vm1, %v3168_v25, %v3198_v33  ;;  %v3170_v52 = vand.u32 2147483647, %v3154_v26  ;;  %v11668_v55 = vsel %vm439_vm1, %v3169_v8, %v3200_v36  ;;  %9798 = vmatpush3.bf16.msra.mxu1 %v9795_v48 }
 0x9f1   :  { %14150 = vst [vmem:[#allocation12_spill] sm:$0xff] %v11665_v34  ;;  %14151 = vst [vmem:[#allocation13_spill] sm:$0xff] %v11668_v55 }
 0x9f2   :  { %9493 = vmatmul.mubr.msk.f32.gmra.mrb[44].mxu0 %vm3248_vm9, %v11654_v24  ;;  %v11675_v37 = vsel %vm439_vm1, %v3170_v52, %v3202_v14 }
 0x9f3   :  { %9495 = vmatprep.mubr.msk.f32.mxu0 %vm3248_vm9, %v11658_v39  ;;  %14152 = vst [vmem:[#allocation14_spill] sm:$0xff] %v11675_v37 }
 0x9f6   :  { %9496 = vmatmul.mubr.msk.f32.gmra.mrb[46].mxu0 %vm3248_vm9, %v11665_v34 }
 0x9f7   :  { %9498 = vmatprep.mubr.msk.f32.mxu0 %vm3248_vm9, %v11668_v55 }
 0x9fa   :  { %9499 = vmatmul.mubr.msk.f32.gmra.mrb[48].mxu0 %vm3248_vm9, %v11675_v37 }
 0xaae   :  { %v9479_v49 = vpop.f32.mrb[34].mxu0 }
 0xaaf   :  { %v11691_v61 = vadd.f32 %v9479_v49, %v11682_v20  ;;  %v3363_v62 = vpop.f32.mrb[35].mxu0 }
 0xab0   :  { %v11694_v2 = vadd.f32 %v11682_v20, %v3363_v62 }
 0xab1   :  { %v3443_v18 = vsel %vm439_vm1, %v11691_v61, 0.0 }
 0xab2   :  { %v3442_v19 = vsel %vm439_vm1, %v11694_v2, 0.0  ;;  %v9482_v22 = vpop.f32.mrb[36].mxu0 }
 0xab3   :  { %v3444_v28 = vadd.f32 %v3443_v18, %v3442_v19  ;;  %v3373_v17 = vpop.f32.mrb[37].mxu0  ;;  %v11701_v59 = vadd.f32 %v9482_v22, %v11682_v20 }
 0xab4   :  { %v3374_v43 = vadd.f32 %v11682_v20, %v3373_v17 }
 0xab5   :  { %v3447_v50 = vsel %vm439_vm1, %v11701_v59, 0.0 }
 0xab6   :  { %v3445_v51 = vsel %vm439_vm1, %v3374_v43, 0.0  ;;  %v9485_v44 = vpop.f32.mrb[38].mxu0 }
 0xab7   :  { %v3446_v54 = vadd.f32 %v3445_v51, %v3444_v28  ;;  %v3383_v11 = vpop.f32.mrb[39].mxu0  ;;  %v3389_v47 = vadd.f32 %v9485_v44, %v11682_v20 }
 0xab8   :  { %v3384_v12 = vadd.f32 %v11682_v20, %v3383_v11 }
 0xab9   :  { %v3448_v33 = vadd.f32 %v3447_v50, %v3446_v54  ;;  %v3451_v52 = vsel %vm439_vm1, %v3389_v47, 0.0 }
 0xaba   :  { %v3449_v25 = vsel %vm439_vm1, %v3384_v12, 0.0  ;;  %v9488_v26 = vpop.f32.mrb[40].mxu0 }
 0xabb   :  { %v3450_v8 = vadd.f32 %v3449_v25, %v3448_v33  ;;  %v3393_v36 = vpop.f32.mrb[41].mxu0  ;;  %v3399_v14 = vadd.f32 %v9488_v26, %v11682_v20 }
 0xabc   :  { %v3394_v29 = vadd.f32 %v11682_v20, %v3393_v36 }
 0xabd   :  { %v3452_v41 = vadd.f32 %v3451_v52, %v3450_v8  ;;  %v3455_v62 = vsel %vm439_vm1, %v3399_v14, 0.0 }
 0xabe   :  { %v3453_v48 = vsel %vm439_vm1, %v3394_v29, 0.0 }
 0xabf   :  { %v3454_v49 = vadd.f32 %v3453_v48, %v3452_v41 }
 0xac1   :  { %v9491_v18 = vpop.f32.mrb[42].mxu0  ;;  %v3456_v19 = vadd.f32 %v3455_v62, %v3454_v49 }
 0xac2   :  { %v3403_v22 = vpop.f32.mrb[43].mxu0  ;;  %v3409_v28 = vadd.f32 %v9491_v18, %v11682_v20 }
 0xac3   :  { %v3404_v17 = vadd.f32 %v11682_v20, %v3403_v22 }
 0xac4   :  { %v3459_v50 = vsel %vm439_vm1, %v3409_v28, 0.0 }
 0xac5   :  { %v3457_v51 = vsel %vm439_vm1, %v3404_v17, 0.0  ;;  %v9494_v44 = vpop.f32.mrb[44].mxu0 }
 0xac6   :  { %v3458_v54 = vadd.f32 %v3457_v51, %v3456_v19  ;;  %v3413_v11 = vpop.f32.mrb[45].mxu0  ;;  %v3419_v33 = vadd.f32 %v9494_v44, %v11682_v20 }
 0xac7   :  { %v3414_v25 = vadd.f32 %v11682_v20, %v3413_v11 }
 0xac8   :  { %v3460_v26 = vadd.f32 %v3459_v50, %v3458_v54  ;;  %v3463_v48 = vsel %vm439_vm1, %v3419_v33, 0.0 }
 0xac9   :  { %v3461_v8 = vsel %vm439_vm1, %v3414_v25, 0.0  ;;  %v9497_v36 = vpop.f32.mrb[46].mxu0 }
 0xaca   :  { %v3462_v52 = vadd.f32 %v3461_v8, %v3460_v26  ;;  %v3423_v41 = vpop.f32.mrb[47].mxu0  ;;  %v3429_v49 = vadd.f32 %v9497_v36, %v11682_v20 }
 0xacb   :  { %v3424_v62 = vadd.f32 %v11682_v20, %v3423_v41 }
 0xacc   :  { %v3464_v18 = vadd.f32 %v3463_v48, %v3462_v52  ;;  %v3467_v11 = vsel %vm439_vm1, %v3429_v49, 0.0 }
 0xacd   :  { %v3465_v19 = vsel %vm439_vm1, %v3424_v62, 0.0  ;;  %v9500_v22 = vpop.f32.mrb[48].mxu0 }
 0xace   :  { %v3466_v51 = vadd.f32 %v3465_v19, %v3464_v18  ;;  %v3433_v44 = vpop.f32.mrb[49].mxu0  ;;  %v3439_v54 = vadd.f32 %v9500_v22, %v11682_v20 }
 0xacf   :  { %v3434_v50 = vadd.f32 %v11682_v20, %v3433_v44 }
 0xad0   :  { %v3468_v26 = vadd.f32 %v3467_v11, %v3466_v51  ;;  %v3471_v36 = vsel %vm439_vm1, %v3439_v54, 0.0 }
 0xad1   :  { %v3469_v8 = vsel %vm439_vm1, %v3434_v50, 0.0 }
 0xad2   :  { %v3470_v13 = vadd.f32 %v3469_v8, %v3468_v26 }
 0xad4   :  { %v3472_v45 = vadd.f32 %v3471_v36, %v3470_v13 }
 0xad6   :  { %v3473_v41 = vrot.slane %v3472_v45, 4 }
 0xad8   :  { %v3474_v52 = vadd.f32 %v3473_v41, %v3472_v45 }
 0xada   :  { %v3475_v48 = vrot.slane %v3474_v52, 2 }
 0xadc   :  { %v3476_v10 = vadd.f32 %v3475_v48, %v3474_v52 }
 0xade   :  { %v3477_v37 = vrot.slane %v3476_v10, 1 }
 0xae0   :  { %v3478_v18 = vadd.f32 %v3477_v37, %v3476_v10 }
 0xae2   :  { %v3479_v19 = vmul.f32 0.0078125, %v3478_v18 }
 0xae4   :  { %v11732_v55 = vsub.f32 %v11694_v2, %v3479_v19  ;;  %v11735_v22 = vsub.f32 %v11691_v61, %v3479_v19  ;;  %v11737_v20 = vsub.f32 %v3374_v43, %v3479_v19  ;;  %v11740_v51 = vsub.f32 %v11701_v59, %v3479_v19 }
 0xae5   :  { %v11742_v44 = vsub.f32 %v3384_v12, %v3479_v19  ;;  %v11744_v13 = vsub.f32 %v3389_v47, %v3479_v19  ;;  %v11746_v45 = vsub.f32 %v3394_v29, %v3479_v19  ;;  %v11748_v11 = vsub.f32 %v3399_v14, %v3479_v19 }
 0xae6   :  { %v11750_v10 = vsub.f32 %v3404_v17, %v3479_v19  ;;  %v11752_v37 = vsub.f32 %v3409_v28, %v3479_v19  ;;  %v11754_v2 = vsub.f32 %v3414_v25, %v3479_v19  ;;  %v11756_v61 = vsub.f32 %v3419_v33, %v3479_v19 }
 0xae7   :  { %v11758_v43 = vsub.f32 %v3424_v62, %v3479_v19  ;;  %v11760_v59 = vsub.f32 %v3429_v49, %v3479_v19  ;;  %v11762_v12 = vsub.f32 %v3434_v50, %v3479_v19  ;;  %v11764_v47 = vsub.f32 %v3439_v54, %v3479_v19 }
 0xae8   :  { %v3496_v14 = vmul.f32 %v11732_v55, %v11732_v55  ;;  %v3497_v29 = vmul.f32 %v11735_v22, %v11735_v22  ;;  %v3498_v28 = vmul.f32 %v11737_v20, %v11737_v20  ;;  %v3499_v17 = vmul.f32 %v11740_v51, %v11740_v51 }
 0xae9   :  { %v3500_v62 = vmul.f32 %v11742_v44, %v11742_v44  ;;  %v3501_v26 = vmul.f32 %v11744_v13, %v11744_v13  ;;  %v3502_v41 = vmul.f32 %v11746_v45, %v11746_v45  ;;  %v3503_v18 = vmul.f32 %v11748_v11, %v11748_v11 }
 0xaea   :  { %v3512_v33 = vsel %vm439_vm1, %v3496_v14, 0.0  ;;  %v3513_v25 = vsel %vm439_vm1, %v3497_v29, 0.0  ;;  %v3515_v54 = vsel %vm439_vm1, %v3498_v28, 0.0  ;;  %v3517_v8 = vsel %vm439_vm1, %v3499_v17, 0.0 }
 0xaeb   :  { %v3514_v49 = vadd.f32 %v3513_v25, %v3512_v33  ;;  %v3519_v52 = vsel %vm439_vm1, %v3500_v62, 0.0  ;;  %v3521_v19 = vsel %vm439_vm1, %v3501_v26, 0.0  ;;  %v3504_v29 = vmul.f32 %v11750_v10, %v11750_v10 }
 0xaec   :  { %v3523_v28 = vsel %vm439_vm1, %v3502_v41, 0.0  ;;  %v3505_v17 = vmul.f32 %v11752_v37, %v11752_v37  ;;  %v3525_v25 = vsel %vm439_vm1, %v3503_v18, 0.0  ;;  %v3506_v62 = vmul.f32 %v11754_v2, %v11754_v2 }
 0xaed   :  { %v3516_v50 = vadd.f32 %v3515_v54, %v3514_v49  ;;  %v3527_v54 = vsel %vm439_vm1, %v3504_v29, 0.0  ;;  %v3507_v26 = vmul.f32 %v11756_v61, %v11756_v61  ;;  %v3508_v41 = vmul.f32 %v11758_v43, %v11758_v43 }
 0xaee   :  { %v3509_v18 = vmul.f32 %v11760_v59, %v11760_v59  ;;  %v3510_v29 = vmul.f32 %v11762_v12, %v11762_v12 }
 0xaef   :  { %v3518_v36 = vadd.f32 %v3517_v8, %v3516_v50  ;;  %v3529_v8 = vsel %vm439_vm1, %v3505_v17, 0.0  ;;  %v3511_v17 = vmul.f32 %v11764_v47, %v11764_v47 }
 0xaf1   :  { %v3520_v48 = vadd.f32 %v3519_v52, %v3518_v36  ;;  %v3531_v52 = vsel %vm439_vm1, %v3506_v62, 0.0  ;;  %v3539_v62 = vsel %vm439_vm1, %v3510_v29, 0.0 }
 0xaf3   :  { %v3522_v14 = vadd.f32 %v3521_v19, %v3520_v48  ;;  %v3533_v19 = vsel %vm439_vm1, %v3507_v26, 0.0 }
 0xaf5   :  { %v3524_v33 = vadd.f32 %v3523_v28, %v3522_v14  ;;  %v3535_v28 = vsel %vm439_vm1, %v3508_v41, 0.0 }
 0xaf7   :  { %v3526_v49 = vadd.f32 %v3525_v25, %v3524_v33  ;;  %v3537_v25 = vsel %vm439_vm1, %v3509_v18, 0.0  ;;  %v3242_v18 = vld [vmem:[%s14102_s1 + $0x118] sm:$0x1] }
 0xaf9   :  { %v3528_v50 = vadd.f32 %v3527_v54, %v3526_v49 }
 0xafb   :  { %v3530_v36 = vadd.f32 %v3529_v8, %v3528_v50  ;;  %v3541_v50 = vsel %vm439_vm1, %v3511_v17, 0.0  ;;  %v11823_v17 = vld [vmem:[%s14102_s1 + $0x120] ss:$0 sm:$0xff] }
 0xafd   :  { %v3532_v48 = vadd.f32 %v3531_v52, %v3530_v36 }
 0xaff   :  { %v3534_v14 = vadd.f32 %v3533_v19, %v3532_v48 }
 0xb01   :  { %v3536_v33 = vadd.f32 %v3535_v28, %v3534_v14 }
 0xb03   :  { %v3538_v49 = vadd.f32 %v3537_v25, %v3536_v33 }
 0xb05   :  { %v3540_v54 = vadd.f32 %v3539_v62, %v3538_v49 }
 0xb07   :  { %v3542_v8 = vadd.f32 %v3541_v50, %v3540_v54 }
 0xb09   :  { %v3543_v26 = vrot.slane %v3542_v8, 4 }
 0xb0b   :  { %v3544_v36 = vadd.f32 %v3543_v26, %v3542_v8 }
 0xb0d   :  { %v3545_v52 = vrot.slane %v3544_v36, 2 }
 0xb0f   :  { %v3546_v48 = vadd.f32 %v3545_v52, %v3544_v36 }
 0xb11   :  { %v3547_v19 = vrot.slane %v3546_v48, 1 }
 0xb13   :  { %v3548_v34 = vadd.f32 %v3547_v19, %v3546_v48 }
 0xb15   :  { %v3549_v41 = vmul.f32 0.0078125, %v3548_v34 }
 0xb17   :  { %v3550_v14 = vadd.f32 1e-05, %v3549_v41 }
 0xb19   :  { %9943 = vrsqrt.f32 %v3550_v14 }
 0xb23   :  { %v9944_v28 = vpop.eup %9943 }
 0xb24   :  { %v3552_v33 = vmul.f32 %v9944_v28, %v3242_v18 }
 0xb26   :  { %v11818_v29 = vrot.slane %v3552_v33, %v10164_v15 }
 0xb28   :  { %v11827_v25 = vmul.f32 %v11818_v29, %v11762_v12  ;;  %v3557_v34 = vmul.f32 %v11818_v29, %v11732_v55  ;;  %v3558_v49 = vmul.f32 %v11818_v29, %v11735_v22  ;;  %v3559_v62 = vmul.f32 %v11818_v29, %v11737_v20 }
 0xb29   :  { %v3560_v54 = vmul.f32 %v11818_v29, %v11740_v51  ;;  %v3561_v50 = vmul.f32 %v11818_v29, %v11742_v44  ;;  %v3563_v8 = vmul.f32 %v11818_v29, %v11746_v45  ;;  %v3562_v20 = vmul.f32 %v11818_v29, %v11744_v13 }
 0xb2a   :  { %v3577_v12 = vadd.f32 %v11823_v17, %v3557_v34  ;;  %v3578_v26 = vadd.f32 %v11823_v17, %v3558_v49  ;;  %v3579_v55 = vadd.f32 %v11823_v17, %v3559_v62  ;;  %v3564_v28 = vmul.f32 %v11818_v29, %v11748_v11 }
 0xb2b   :  { %v3580_v22 = vadd.f32 %v11823_v17, %v3560_v54  ;;  %v3581_v36 = vadd.f32 %v11823_v17, %v3561_v50  ;;  %v3582_v41 = vadd.f32 %v11823_v17, %v3562_v20  ;;  %v3583_v14 = vadd.f32 %v11823_v17, %v3563_v8 }
 0xb2c   :  { %vm3593_vm11 = vcmp.gt.f32.partialorder %v3577_v12, 0.0  ;;  %v3609_v51 = vmul.f32 0.01, %v3577_v12  ;;  %vm3594_vm12 = vcmp.gt.f32.partialorder %v3578_v26, 0.0  ;;  %v3610_v44 = vmul.f32 0.01, %v3578_v26 }
 0xb2d   :  { %vm3595_vm13 = vcmp.gt.f32.partialorder %v3579_v55, 0.0  ;;  %v3611_v52 = vmul.f32 0.01, %v3579_v55  ;;  %v3612_v19 = vmul.f32 0.01, %v3580_v22  ;;  %vm3596_vm8 = vcmp.gt.f32.partialorder %v3580_v22, 0.0 }
 0xb2e   :  { %v3625_v45 = vsel %vm3593_vm11, %v3577_v12, %v3609_v51  ;;  %v3626_v48 = vsel %vm3594_vm12, %v3578_v26, %v3610_v44  ;;  %v3613_v13 = vmul.f32 0.01, %v3581_v36  ;;  %vm3597_vm10 = vcmp.gt.f32.partialorder %v3581_v36, 0.0 }
 0xb2f   :  { %9505 = vmatprep.mubr.msk.f32.mxu1 %vm439_vm1, %v3625_v45  ;;  %v3627_v18 = vsel %vm3595_vm13, %v3579_v55, %v3611_v52  ;;  %v3565_v33 = vmul.f32 %v11818_v29, %v11750_v10  ;;  %v3567_v34 = vmul.f32 %v11818_v29, %v11754_v2  ;;  %v3569_v49 = vmul.f32 %v11818_v29, %v11758_v43 }
 0xb30   :  { %9506 = vmatmul.mubr.msk.f32.vlgmr.msra.gmra.mrb[36].mxu1 %vm439_vm1, %v3626_v48  ;;  %v3628_v62 = vsel %vm3596_vm8, %v3580_v22, %v3612_v19  ;;  %v3614_v54 = vmul.f32 0.01, %v3582_v41  ;;  %v3584_v50 = vadd.f32 %v11823_v17, %v3564_v28  ;;  %v3566_v8 = vmul.f32 %v11818_v29, %v11752_v37 }
 0xb31   :  { %9508 = vmatprep.mubr.msk.f32.mxu1 %vm439_vm1, %v3627_v18  ;;  %v3629_v11 = vsel %vm3597_vm10, %v3581_v36, %v3613_v13  ;;  %vm3598_vm11 = vcmp.gt.f32.partialorder %v3582_v41, 0.0  ;;  %v3615_v12 = vmul.f32 0.01, %v3583_v14  ;;  %v3585_v10 = vadd.f32 %v11823_v17, %v3565_v33 }
 0xb32   :  { %vm3599_vm12 = vcmp.gt.f32.partialorder %v3583_v14, 0.0  ;;  %v3630_v2 = vsel %vm3598_vm11, %v3582_v41, %v3614_v54  ;;  %v3616_v26 = vmul.f32 0.01, %v3584_v50  ;;  %v3586_v43 = vadd.f32 %v11823_v17, %v3566_v8  ;;  %v4043_v8 = vld [vmem:[%s14102_s1 + $0x158] sm:$0xff] }
 0xb33   :  { %v3568_v55 = vmul.f32 %v11818_v29, %v11756_v61  ;;  %v3631_v37 = vsel %vm3599_vm12, %v3583_v14, %v3615_v12  ;;  %vm3600_vm13 = vcmp.gt.f32.partialorder %v3584_v50, 0.0  ;;  %v3617_v22 = vmul.f32 0.01, %v3585_v10  ;;  %v8931_v12 = vld [vmem:[%s14102_s1 + $0x138] ss:$0 sm:$0xff] }
 0xb34   :  { %9509 = vmatmul.mubr.msk.f32.gmra.mrb[38].mxu1 %vm439_vm1, %v3628_v62  ;;  %v3587_v36 = vadd.f32 %v11823_v17, %v3567_v34  ;;  %vm3601_vm8 = vcmp.gt.f32.partialorder %v3585_v10, 0.0  ;;  %v3632_v20 = vsel %vm3600_vm13, %v3584_v50, %v3616_v26  ;;  %v3618_v51 = vmul.f32 0.01, %v3586_v43 }
 0xb35   :  { %9511 = vmatprep.mubr.msk.f32.mxu1 %vm439_vm1, %v3629_v11  ;;  %v3588_v44 = vadd.f32 %v11823_v17, %v3568_v55  ;;  %v3570_v52 = vmul.f32 %v11818_v29, %v11760_v59  ;;  %v3633_v61 = vsel %vm3601_vm8, %v3585_v10, %v3617_v22  ;;  %vm3602_vm10 = vcmp.gt.f32.partialorder %v3586_v43, 0.0 }
 0xb36   :  { %v3619_v45 = vmul.f32 0.01, %v3587_v36  ;;  %v3589_v48 = vadd.f32 %v11823_v17, %v3569_v49  ;;  %vm3603_vm11 = vcmp.gt.f32.partialorder %v3587_v36, 0.0  ;;  %v3634_v19 = vsel %vm3602_vm10, %v3586_v43, %v3618_v51 }
 0xb37   :  { %v3620_v41 = vmul.f32 0.01, %v3588_v44  ;;  %v3590_v14 = vadd.f32 %v11823_v17, %v3570_v52  ;;  %v3572_v18 = vmul.f32 %v11818_v29, %v11764_v47  ;;  %v3591_v59 = vadd.f32 %v11823_v17, %v11827_v25 }
 0xb38   :  { %9512 = vmatmul.mubr.msk.f32.gmra.mrb[40].mxu1 %vm439_vm1, %v3630_v2  ;;  %v3635_v13 = vsel %vm3603_vm11, %v3587_v36, %v3619_v45  ;;  %vm3604_vm12 = vcmp.gt.f32.partialorder %v3588_v44, 0.0  ;;  %v3621_v28 = vmul.f32 0.01, %v3589_v48  ;;  %vm3605_vm13 = vcmp.gt.f32.partialorder %v3589_v48, 0.0 }
 0xb39   :  { %9514 = vmatprep.mubr.msk.f32.mxu1 %vm439_vm1, %v3631_v37  ;;  %v3636_v33 = vsel %vm3604_vm12, %v3588_v44, %v3620_v41  ;;  %v3622_v34 = vmul.f32 0.01, %v3590_v14  ;;  %v3592_v49 = vadd.f32 %v11823_v17, %v3572_v18  ;;  %vm3606_vm8 = vcmp.gt.f32.partialorder %v3590_v14, 0.0  ;;  %v4042_v17 = vld [vmem:[%s14102_s1 + $0x150] sm:$0xff] }
 0xb3a   :  { %v3637_v62 = vsel %vm3605_vm13, %v3589_v48, %v3621_v28  ;;  %v3623_v47 = vmul.f32 0.01, %v3591_v59  ;;  %vm3607_vm10 = vcmp.gt.f32.partialorder %v3591_v59, 0.0  ;;  %v9799_v11 = vpack.c.bf16 %v4043_v8, %v4042_v17 }
 0xb3b   :  { %v3638_v29 = vsel %vm3606_vm8, %v3590_v14, %v3622_v34  ;;  %v3624_v25 = vmul.f32 0.01, %v3592_v49  ;;  %vm3608_vm11 = vcmp.gt.f32.partialorder %v3592_v49, 0.0 }
 0xb3c   :  { %9515 = vmatmul.mubr.msk.f32.gmra.mrb[42].mxu1 %vm439_vm1, %v3632_v20  ;;  %v3639_v54 = vsel %vm3607_vm10, %v3591_v59, %v3623_v47  ;;  %9800 = vmatprep.subr.bf16.mxu1 %v9799_v11 }
 0xb3d   :  { %9517 = vmatprep.mubr.msk.f32.mxu1 %vm439_vm1, %v3633_v61  ;;  %v3640_v50 = vsel %vm3608_vm11, %v3592_v49, %v3624_v25  ;;  %9802 = vmatpush3.bf16.msra.mxu1 %v9799_v11 }
 0xb40   :  { %9518 = vmatmul.mubr.msk.f32.gmra.mrb[44].mxu1 %vm439_vm1, %v3634_v19 }
 0xb41   :  { %9520 = vmatprep.mubr.msk.f32.mxu1 %vm439_vm1, %v3635_v13 }
 0xb44   :  { %9521 = vmatmul.mubr.msk.f32.gmra.mrb[46].mxu1 %vm439_vm1, %v3636_v33 }
 0xb45   :  { %9523 = vmatprep.mubr.msk.f32.mxu1 %vm439_vm1, %v3637_v62 }
 0xb48   :  { %9524 = vmatmul.mubr.msk.f32.gmra.mrb[48].mxu1 %vm439_vm1, %v3638_v29 }
 0xb49   :  { %9526 = vmatprep.mubr.msk.f32.mxu1 %vm439_vm1, %v3639_v54 }
 0xb4c   :  { %9527 = vmatmul.mubr.msk.f32.gmra.mrb[50].mxu1 %vm439_vm1, %v3640_v50 }
 0xc03   :  { %v9507_v10 = vpop.f32.mrb[36].mxu1 }
 0xc04   :  { %v11901_v2 = vadd.f32 %v9507_v10, %v8931_v12  ;;  %v3764_v26 = vpop.f32.mrb[37].mxu1 }
 0xc05   :  { %v11903_v43 = vadd.f32 %v8931_v12, %v3764_v26 }
 0xc06   :  { %v3844_v55 = vsel %vm439_vm1, %v11901_v2, 0.0 }
 0xc07   :  { %v3843_v37 = vsel %vm439_vm1, %v11903_v43, 0.0  ;;  %v9510_v22 = vpop.f32.mrb[38].mxu1 }
 0xc08   :  { %v3845_v36 = vadd.f32 %v3844_v55, %v3843_v37  ;;  %v3774_v20 = vpop.f32.mrb[39].mxu1  ;;  %v11909_v51 = vadd.f32 %v9510_v22, %v8931_v12 }
 0xc09   :  { %v3775_v44 = vadd.f32 %v8931_v12, %v3774_v20 }
 0xc0a   :  { %v3848_v19 = vsel %vm439_vm1, %v11909_v51, 0.0 }
 0xc0b   :  { %v3846_v52 = vsel %vm439_vm1, %v3775_v44, 0.0  ;;  %v9513_v61 = vpop.f32.mrb[40].mxu1 }
 0xc0c   :  { %v3847_v45 = vadd.f32 %v3846_v52, %v3845_v36  ;;  %v3784_v48 = vpop.f32.mrb[41].mxu1  ;;  %v3790_v41 = vadd.f32 %v9513_v61, %v8931_v12 }
 0xc0d   :  { %v3785_v14 = vadd.f32 %v8931_v12, %v3784_v48 }
 0xc0e   :  { %v3849_v18 = vadd.f32 %v3848_v19, %v3847_v45  ;;  %v3852_v34 = vsel %vm439_vm1, %v3790_v41, 0.0 }
 0xc0f   :  { %v3850_v59 = vsel %vm439_vm1, %v3785_v14, 0.0  ;;  %v9516_v13 = vpop.f32.mrb[42].mxu1 }
 0xc10   :  { %v3851_v28 = vadd.f32 %v3850_v59, %v3849_v18  ;;  %v3794_v33 = vpop.f32.mrb[43].mxu1  ;;  %v3800_v49 = vadd.f32 %v9516_v13, %v8931_v12 }
 0xc11   :  { %v3795_v62 = vadd.f32 %v8931_v12, %v3794_v33 }
 0xc12   :  { %v3853_v47 = vadd.f32 %v3852_v34, %v3851_v28  ;;  %v3856_v17 = vsel %vm439_vm1, %v3800_v49, 0.0 }
 0xc13   :  { %v3854_v29 = vsel %vm439_vm1, %v3795_v62, 0.0  ;;  %v9519_v25 = vpop.f32.mrb[44].mxu1 }
 0xc14   :  { %v3855_v54 = vadd.f32 %v3854_v29, %v3853_v47  ;;  %v3804_v50 = vpop.f32.mrb[45].mxu1  ;;  %v3810_v8 = vadd.f32 %v9519_v25, %v8931_v12 }
 0xc15   :  { %v3805_v11 = vadd.f32 %v8931_v12, %v3804_v50 }
 0xc16   :  { %v3857_v10 = vadd.f32 %v3856_v17, %v3855_v54  ;;  %v3860_v36 = vsel %vm439_vm1, %v3810_v8, 0.0 }
 0xc17   :  { %v3858_v26 = vsel %vm439_vm1, %v3805_v11, 0.0  ;;  %v9522_v55 = vpop.f32.mrb[46].mxu1 }
 0xc18   :  { %v3859_v37 = vadd.f32 %v3858_v26, %v3857_v10  ;;  %v3814_v22 = vpop.f32.mrb[47].mxu1  ;;  %v3820_v20 = vadd.f32 %v9522_v55, %v8931_v12 }
 0xc19   :  { %v3815_v52 = vadd.f32 %v8931_v12, %v3814_v22 }
 0xc1a   :  { %v3861_v61 = vadd.f32 %v3860_v36, %v3859_v37  ;;  %v3864_v59 = vsel %vm439_vm1, %v3820_v20, 0.0 }
 0xc1b   :  { %v3862_v45 = vsel %vm439_vm1, %v3815_v52, 0.0  ;;  %v9525_v48 = vpop.f32.mrb[48].mxu1 }
 0xc1c   :  { %v3863_v19 = vadd.f32 %v3862_v45, %v3861_v61  ;;  %v3824_v18 = vpop.f32.mrb[49].mxu1  ;;  %v3830_v13 = vadd.f32 %v9525_v48, %v8931_v12 }
 0xc1d   :  { %v3825_v28 = vadd.f32 %v8931_v12, %v3824_v18 }
 0xc1e   :  { %v3865_v33 = vadd.f32 %v3864_v59, %v3863_v19  ;;  %v3868_v54 = vsel %vm439_vm1, %v3830_v13, 0.0 }
 0xc1f   :  { %v3866_v34 = vsel %vm439_vm1, %v3825_v28, 0.0  ;;  %v9528_v47 = vpop.f32.mrb[50].mxu1 }
 0xc20   :  { %v3867_v29 = vadd.f32 %v3866_v34, %v3865_v33  ;;  %v3834_v25 = vpop.f32.mrb[51].mxu1  ;;  %v3840_v50 = vadd.f32 %v9528_v47, %v8931_v12 }
 0xc21   :  { %v3835_v17 = vadd.f32 %v8931_v12, %v3834_v25 }
 0xc22   :  { %v3869_v10 = vadd.f32 %v3868_v54, %v3867_v29  ;;  %v3872_v37 = vsel %vm439_vm1, %v3840_v50, 0.0 }
 0xc23   :  { %v3870_v26 = vsel %vm439_vm1, %v3835_v17, 0.0 }
 0xc24   :  { %v3871_v55 = vadd.f32 %v3870_v26, %v3869_v10 }
 0xc26   :  { %v3873_v22 = vadd.f32 %v3872_v37, %v3871_v55 }
 0xc28   :  { %v3874_v36 = vrot.slane %v3873_v22, 4 }
 0xc2a   :  { %v3875_v61 = vadd.f32 %v3874_v36, %v3873_v22 }
 0xc2c   :  { %v3876_v45 = vrot.slane %v3875_v61, 2 }
 0xc2e   :  { %v3877_v48 = vadd.f32 %v3876_v45, %v3875_v61 }
 0xc30   :  { %v3878_v19 = vrot.slane %v3877_v48, 1 }
 0xc32   :  { %v3879_v18 = vadd.f32 %v3878_v19, %v3877_v48 }
 0xc34   :  { %v3880_v59 = vmul.f32 0.0078125, %v3879_v18 }
 0xc36   :  { %v11927_v33 = vsub.f32 %v11903_v43, %v3880_v59  ;;  %v11930_v34 = vsub.f32 %v11901_v2, %v3880_v59  ;;  %v11932_v12 = vsub.f32 %v3775_v44, %v3880_v59  ;;  %v11935_v47 = vsub.f32 %v11909_v51, %v3880_v59 }
 0xc37   :  { %v11937_v29 = vsub.f32 %v3785_v14, %v3880_v59  ;;  %v11939_v25 = vsub.f32 %v3790_v41, %v3880_v59  ;;  %v11941_v54 = vsub.f32 %v3795_v62, %v3880_v59  ;;  %v11943_v10 = vsub.f32 %v3800_v49, %v3880_v59 }
 0xc38   :  { %v11945_v26 = vsub.f32 %v3805_v11, %v3880_v59  ;;  %v11947_v43 = vsub.f32 %v3810_v8, %v3880_v59  ;;  %v11949_v55 = vsub.f32 %v3815_v52, %v3880_v59  ;;  %v11951_v2 = vsub.f32 %v3820_v20, %v3880_v59 }
 0xc39   :  { %v11953_v44 = vsub.f32 %v3825_v28, %v3880_v59  ;;  %v11955_v51 = vsub.f32 %v3830_v13, %v3880_v59  ;;  %v11957_v14 = vsub.f32 %v3835_v17, %v3880_v59  ;;  %v11959_v41 = vsub.f32 %v3840_v50, %v3880_v59 }
 0xc3a   :  { %v3897_v49 = vmul.f32 %v11927_v33, %v11927_v33  ;;  %v3898_v62 = vmul.f32 %v11930_v34, %v11930_v34  ;;  %v3899_v8 = vmul.f32 %v11932_v12, %v11932_v12  ;;  %v3900_v11 = vmul.f32 %v11935_v47, %v11935_v47 }
 0xc3b   :  { %v3901_v28 = vmul.f32 %v11937_v29, %v11937_v29  ;;  %v3902_v37 = vmul.f32 %v11939_v25, %v11939_v25  ;;  %v3903_v61 = vmul.f32 %v11941_v54, %v11941_v54  ;;  %v3904_v19 = vmul.f32 %v11943_v10, %v11943_v10 }
 0xc3c   :  { %v3913_v20 = vsel %vm439_vm1, %v3897_v49, 0.0  ;;  %v3914_v52 = vsel %vm439_vm1, %v3898_v62, 0.0  ;;  %v3916_v50 = vsel %vm439_vm1, %v3899_v8, 0.0  ;;  %v3918_v22 = vsel %vm439_vm1, %v3900_v11, 0.0 }
 0xc3d   :  { %v3915_v13 = vadd.f32 %v3914_v52, %v3913_v20  ;;  %v3920_v45 = vsel %vm439_vm1, %v3901_v28, 0.0  ;;  %v3922_v18 = vsel %vm439_vm1, %v3902_v37, 0.0  ;;  %v3905_v49 = vmul.f32 %v11945_v26, %v11945_v26 }
 0xc3e   :  { %v3924_v62 = vsel %vm439_vm1, %v3903_v61, 0.0  ;;  %v3906_v11 = vmul.f32 %v11947_v43, %v11947_v43  ;;  %v3926_v20 = vsel %vm439_vm1, %v3904_v19, 0.0 }
 0xc3f   :  { %v3917_v17 = vadd.f32 %v3916_v50, %v3915_v13  ;;  %v3907_v13 = vmul.f32 %v11949_v55, %v11949_v55  ;;  %v3928_v28 = vsel %vm439_vm1, %v3905_v49, 0.0 }
 0xc40   :  { %v3930_v37 = vsel %vm439_vm1, %v3906_v11, 0.0 }
 0xc41   :  { %v3919_v36 = vadd.f32 %v3918_v22, %v3917_v17  ;;  %v3908_v17 = vmul.f32 %v11951_v2, %v11951_v2  ;;  %v3932_v61 = vsel %vm439_vm1, %v3907_v13, 0.0 }
 0xc43   :  { %v3921_v48 = vadd.f32 %v3920_v45, %v3919_v36  ;;  %v3909_v36 = vmul.f32 %v11953_v44, %v11953_v44  ;;  %v3934_v19 = vsel %vm439_vm1, %v3908_v17, 0.0 }
 0xc45   :  { %v3923_v59 = vadd.f32 %v3922_v18, %v3921_v48  ;;  %v3910_v48 = vmul.f32 %v11955_v51, %v11955_v51  ;;  %v3936_v49 = vsel %vm439_vm1, %v3909_v36, 0.0 }
 0xc47   :  { %v3925_v8 = vadd.f32 %v3924_v62, %v3923_v59  ;;  %v3911_v59 = vmul.f32 %v11957_v14, %v11957_v14  ;;  %v3938_v11 = vsel %vm439_vm1, %v3910_v48, 0.0  ;;  %v3644_v48 = vld [vmem:[%s14102_s1 + $0x140] sm:$0x1] }
 0xc49   :  { %v3927_v52 = vadd.f32 %v3926_v20, %v3925_v8  ;;  %v3912_v8 = vmul.f32 %v11959_v41, %v11959_v41 }
 0xc4b   :  { %v3929_v50 = vadd.f32 %v3928_v28, %v3927_v52  ;;  %v3940_v52 = vsel %vm439_vm1, %v3911_v59, 0.0  ;;  %v3942_v28 = vsel %vm439_vm1, %v3912_v8, 0.0  ;;  %v12018_v8 = vld [vmem:[%s14102_s1 + $0x148] ss:$0 sm:$0xff] }
 0xc4d   :  { %v3931_v22 = vadd.f32 %v3930_v37, %v3929_v50 }
 0xc4f   :  { %v3933_v45 = vadd.f32 %v3932_v61, %v3931_v22 }
 0xc51   :  { %v3935_v18 = vadd.f32 %v3934_v19, %v3933_v45 }
 0xc53   :  { %v3937_v62 = vadd.f32 %v3936_v49, %v3935_v18 }
 0xc55   :  { %v3939_v20 = vadd.f32 %v3938_v11, %v3937_v62 }
 0xc57   :  { %v3941_v13 = vadd.f32 %v3940_v52, %v3939_v20 }
 0xc59   :  { %v3943_v50 = vadd.f32 %v3942_v28, %v3941_v13 }
 0xc5b   :  { %v3944_v17 = vrot.slane %v3943_v50, 4 }
 0xc5d   :  { %v3945_v37 = vadd.f32 %v3944_v17, %v3943_v50 }
 0xc5f   :  { %v3946_v22 = vrot.slane %v3945_v37, 2 }
 0xc61   :  { %v3947_v61 = vadd.f32 %v3946_v22, %v3945_v37 }
 0xc63   :  { %v3948_v45 = vrot.slane %v3947_v61, 1 }
 0xc65   :  { %v3949_v19 = vadd.f32 %v3948_v45, %v3947_v61 }
 0xc67   :  { %v3950_v36 = vmul.f32 0.0078125, %v3949_v19 }
 0xc69   :  { %v3951_v18 = vadd.f32 1e-05, %v3950_v36 }
 0xc6b   :  { %9945 = vrsqrt.f32 %v3951_v18 }
 0xc75   :  { %v9946_v49 = vpop.eup %9945 }
 0xc76   :  { %v3953_v62 = vmul.f32 %v9946_v49, %v3644_v48 }
 0xc78   :  { %v12013_v59 = vrot.slane %v3953_v62, %v10164_v15 }
 0xc7a   :  { %v12022_v11 = vmul.f32 %v12013_v59, %v11957_v14  ;;  %v3958_v20 = vmul.f32 %v12013_v59, %v11927_v33  ;;  %v3959_v52 = vmul.f32 %v12013_v59, %v11930_v34  ;;  %v3960_v13 = vmul.f32 %v12013_v59, %v11932_v12 }
 0xc7b   :  { %v3961_v28 = vmul.f32 %v12013_v59, %v11935_v47  ;;  %v3962_v50 = vmul.f32 %v12013_v59, %v11937_v29  ;;  %v3964_v17 = vmul.f32 %v12013_v59, %v11941_v54  ;;  %v3963_v12 = vmul.f32 %v12013_v59, %v11939_v25 }
 0xc7c   :  { %v3978_v14 = vadd.f32 %v12018_v8, %v3958_v20  ;;  %v3979_v37 = vadd.f32 %v12018_v8, %v3959_v52  ;;  %v3980_v33 = vadd.f32 %v12018_v8, %v3960_v13  ;;  %v3965_v49 = vmul.f32 %v12013_v59, %v11943_v10 }
 0xc7d   :  { %v3981_v34 = vadd.f32 %v12018_v8, %v3961_v28  ;;  %v3982_v22 = vadd.f32 %v12018_v8, %v3962_v50  ;;  %v3983_v36 = vadd.f32 %v12018_v8, %v3963_v12  ;;  %v3984_v18 = vadd.f32 %v12018_v8, %v3964_v17 }
 0xc7e   :  { %vm3994_vm12 = vcmp.gt.f32.partialorder %v3978_v14, 0.0  ;;  %v4010_v47 = vmul.f32 0.01, %v3978_v14  ;;  %vm3995_vm13 = vcmp.gt.f32.partialorder %v3979_v37, 0.0  ;;  %v4011_v29 = vmul.f32 0.01, %v3979_v37 }
 0xc7f   :  { %vm3996_vm8 = vcmp.gt.f32.partialorder %v3980_v33, 0.0  ;;  %v4012_v61 = vmul.f32 0.01, %v3980_v33  ;;  %v4013_v19 = vmul.f32 0.01, %v3981_v34  ;;  %vm3997_vm10 = vcmp.gt.f32.partialorder %v3981_v34, 0.0 }
 0xc80   :  { %v4026_v54 = vsel %vm3994_vm12, %v3978_v14, %v4010_v47  ;;  %v4027_v45 = vsel %vm3995_vm13, %v3979_v37, %v4011_v29  ;;  %v4014_v25 = vmul.f32 0.01, %v3982_v22  ;;  %vm3998_vm11 = vcmp.gt.f32.partialorder %v3982_v22, 0.0 }
 0xc81   :  { %9533 = vmatprep.mubr.msk.f32.mxu1 %vm439_vm1, %v4026_v54  ;;  %v4028_v48 = vsel %vm3996_vm8, %v3980_v33, %v4012_v61  ;;  %v3966_v62 = vmul.f32 %v12013_v59, %v11945_v26  ;;  %v3968_v20 = vmul.f32 %v12013_v59, %v11949_v55  ;;  %v3970_v52 = vmul.f32 %v12013_v59, %v11953_v44 }
 0xc82   :  { %9534 = vmatmul.mubr.msk.f32.vlgmr.msra.gmra.mrb[52].mxu1 %vm439_vm1, %v4027_v45  ;;  %v4029_v13 = vsel %vm3997_vm10, %v3981_v34, %v4013_v19  ;;  %v4015_v28 = vmul.f32 0.01, %v3983_v36  ;;  %v3985_v50 = vadd.f32 %v12018_v8, %v3965_v49  ;;  %v3967_v17 = vmul.f32 %v12013_v59, %v11947_v43 }
 0xc83   :  { %9536 = vmatprep.mubr.msk.f32.mxu1 %vm439_vm1, %v4028_v48  ;;  %v4030_v10 = vsel %vm3998_vm11, %v3982_v22, %v4014_v25  ;;  %vm3999_vm12 = vcmp.gt.f32.partialorder %v3983_v36, 0.0  ;;  %v4016_v14 = vmul.f32 0.01, %v3984_v18  ;;  %v3986_v26 = vadd.f32 %v12018_v8, %v3966_v62 }
 0xc84   :  { %vm4000_vm13 = vcmp.gt.f32.partialorder %v3984_v18, 0.0  ;;  %v4031_v55 = vsel %vm3999_vm12, %v3983_v36, %v4015_v28  ;;  %v4017_v37 = vmul.f32 0.01, %v3985_v50  ;;  %v3987_v44 = vadd.f32 %v12018_v8, %v3967_v17  ;;  %v8949_v17 = vld [vmem:[%s14102_s1 + $0x160] ss:$0 sm:$0xff] }
 0xc85   :  { %v3969_v33 = vmul.f32 %v12013_v59, %v11951_v2  ;;  %v4032_v43 = vsel %vm4000_vm13, %v3984_v18, %v4016_v14  ;;  %vm4001_vm8 = vcmp.gt.f32.partialorder %v3985_v50, 0.0  ;;  %v4018_v34 = vmul.f32 0.01, %v3986_v26 }
 0xc86   :  { %9537 = vmatmul.mubr.msk.f32.gmra.mrb[54].mxu1 %vm439_vm1, %v4029_v13  ;;  %v3988_v22 = vadd.f32 %v12018_v8, %v3968_v20  ;;  %vm4002_vm10 = vcmp.gt.f32.partialorder %v3986_v26, 0.0  ;;  %v4033_v12 = vsel %vm4001_vm8, %v3985_v50, %v4017_v37  ;;  %v4019_v47 = vmul.f32 0.01, %v3987_v44 }
 0xc87   :  { %9539 = vmatprep.mubr.msk.f32.mxu1 %vm439_vm1, %v4030_v10  ;;  %v3989_v29 = vadd.f32 %v12018_v8, %v3969_v33  ;;  %v3971_v61 = vmul.f32 %v12013_v59, %v11955_v51  ;;  %v4034_v2 = vsel %vm4002_vm10, %v3986_v26, %v4018_v34  ;;  %vm4003_vm11 = vcmp.gt.f32.partialorder %v3987_v44, 0.0 }
 0xc88   :  { %v4020_v54 = vmul.f32 0.01, %v3988_v22  ;;  %v3990_v45 = vadd.f32 %v12018_v8, %v3970_v52  ;;  %vm4004_vm12 = vcmp.gt.f32.partialorder %v3988_v22, 0.0  ;;  %v4035_v19 = vsel %vm4003_vm11, %v3987_v44, %v4019_v47 }
 0xc89   :  { %v4021_v36 = vmul.f32 0.01, %v3989_v29  ;;  %v3991_v18 = vadd.f32 %v12018_v8, %v3971_v61  ;;  %v3973_v48 = vmul.f32 %v12013_v59, %v11959_v41  ;;  %v3992_v51 = vadd.f32 %v12018_v8, %v12022_v11 }
 0xc8a   :  { %9540 = vmatmul.mubr.msk.f32.gmra.mrb[56].mxu1 %vm439_vm1, %v4031_v55  ;;  %v4036_v25 = vsel %vm4004_vm12, %v3988_v22, %v4020_v54  ;;  %vm4005_vm13 = vcmp.gt.f32.partialorder %v3989_v29, 0.0  ;;  %v4022_v49 = vmul.f32 0.01, %v3990_v45  ;;  %vm4006_vm8 = vcmp.gt.f32.partialorder %v3990_v45, 0.0 }
 0xc8b   :  { %9542 = vmatprep.mubr.msk.f32.mxu1 %vm439_vm1, %v4032_v43  ;;  %v4037_v62 = vsel %vm4005_vm13, %v3989_v29, %v4021_v36  ;;  %v4023_v20 = vmul.f32 0.01, %v3991_v18  ;;  %v3993_v52 = vadd.f32 %v12018_v8, %v3973_v48  ;;  %vm4007_vm10 = vcmp.gt.f32.partialorder %v3991_v18, 0.0  ;;  %v4443_v8 = vld [vmem:[%s14102_s1 + $0x178] sm:$0xff] }
 0xc8c   :  { %v4038_v13 = vsel %vm4006_vm8, %v3990_v45, %v4022_v49  ;;  %v4024_v41 = vmul.f32 0.01, %v3992_v51  ;;  %vm4008_vm11 = vcmp.gt.f32.partialorder %v3992_v51, 0.0  ;;  %9557 = vmatprep.subr.mxu0 %v4443_v8 }
 0xc8d   :  { %v4039_v59 = vsel %vm4007_vm10, %v3991_v18, %v4023_v20  ;;  %v4025_v11 = vmul.f32 0.01, %v3993_v52  ;;  %vm4009_vm12 = vcmp.gt.f32.partialorder %v3993_v52, 0.0  ;;  %9558 = vmatpush3.msra.mxu0 %v4443_v8 }
 0xc8e   :  { %9543 = vmatmul.mubr.msk.f32.gmra.mrb[58].mxu1 %vm439_vm1, %v4033_v12  ;;  %v4040_v28 = vsel %vm4008_vm11, %v3992_v51, %v4024_v41  ;;  %9603 = vmatprep.subr.mxu0 %v14139_v16 }
 0xc8f   :  { %9545 = vmatprep.mubr.msk.f32.mxu1 %vm439_vm1, %v4034_v2  ;;  %v4041_v50 = vsel %vm4009_vm12, %v3993_v52, %v4025_v11 }
 0xc92   :  { %9546 = vmatmul.mubr.msk.f32.gmra.mrb[60].mxu1 %vm439_vm1, %v4035_v19 }
 0xc93   :  { %9548 = vmatprep.mubr.msk.f32.mxu1 %vm439_vm1, %v4036_v25 }
 0xc96   :  { %9549 = vmatmul.mubr.msk.f32.gmra.mrb[62].mxu1 %vm439_vm1, %v4037_v62 }
 0xc97   :  { %9551 = vmatprep.mubr.msk.f32.mxu1 %vm439_vm1, %v4038_v13 }
 0xc9a   :  { %9552 = vmatmul.mubr.msk.f32.gmra.mrb[64].mxu1 %vm439_vm1, %v4039_v59 }
 0xc9b   :  { %9554 = vmatprep.mubr.msk.f32.mxu1 %vm439_vm1, %v4040_v28 }
 0xc9e   :  { %9555 = vmatmul.mubr.msk.f32.gmra.mrb[66].mxu1 %vm439_vm1, %v4041_v50 }
 0xd55   :  { %v9535_v10 = vpop.f32.mrb[52].mxu1 }
 0xd56   :  { %v12094_v14 = vadd.f32 %v9535_v10, %v8949_v17  ;;  %v4165_v26 = vpop.f32.mrb[53].mxu1 }
 0xd57   :  { %v12096_v55 = vadd.f32 %v8949_v17, %v4165_v26 }
 0xd58   :  { %v4245_v37 = vsel %vm1243_vm6, %v12094_v14, 0.0 }
 0xd59   :  { %v4244_v44 = vsel %vm1243_vm6, %v12096_v55, 0.0  ;;  %v9538_v33 = vpop.f32.mrb[54].mxu1 }
 0xd5a   :  { %v4246_v43 = vadd.f32 %v4245_v37, %v4244_v44  ;;  %v4175_v34 = vpop.f32.mrb[55].mxu1  ;;  %v12102_v22 = vadd.f32 %v9538_v33, %v8949_v17 }
 0xd5b   :  { %v4176_v12 = vadd.f32 %v8949_v17, %v4175_v34 }
 0xd5c   :  { %v4249_v54 = vsel %vm1243_vm6, %v12102_v22, 0.0 }
 0xd5d   :  { %v4247_v47 = vsel %vm1243_vm6, %v4176_v12, 0.0  ;;  %v9541_v29 = vpop.f32.mrb[56].mxu1 }
 0xd5e   :  { %v4248_v61 = vadd.f32 %v4247_v47, %v4246_v43  ;;  %v4185_v2 = vpop.f32.mrb[57].mxu1  ;;  %v4191_v45 = vadd.f32 %v9541_v29, %v8949_v17 }
 0xd5f   :  { %v4186_v19 = vadd.f32 %v8949_v17, %v4185_v2 }
 0xd60   :  { %v4250_v36 = vadd.f32 %v4249_v54, %v4248_v61  ;;  %v4253_v49 = vsel %vm1243_vm6, %v4191_v45, 0.0 }
 0xd61   :  { %v4251_v18 = vsel %vm1243_vm6, %v4186_v19, 0.0  ;;  %v9544_v48 = vpop.f32.mrb[58].mxu1 }
 0xd62   :  { %v4252_v51 = vadd.f32 %v4251_v18, %v4250_v36  ;;  %v4195_v25 = vpop.f32.mrb[59].mxu1  ;;  %v4201_v62 = vadd.f32 %v9544_v48, %v8949_v17 }
 0xd63   :  { %v4196_v20 = vadd.f32 %v8949_v17, %v4195_v25 }
 0xd64   :  { %v4254_v52 = vadd.f32 %v4253_v49, %v4252_v51  ;;  %v4257_v28 = vsel %vm1243_vm6, %v4201_v62, 0.0 }
 0xd65   :  { %v4255_v13 = vsel %vm1243_vm6, %v4196_v20, 0.0  ;;  %v9547_v41 = vpop.f32.mrb[60].mxu1 }
 0xd66   :  { %v4256_v59 = vadd.f32 %v4255_v13, %v4254_v52  ;;  %v4205_v11 = vpop.f32.mrb[61].mxu1  ;;  %v4211_v50 = vadd.f32 %v9547_v41, %v8949_v17 }
 0xd67   :  { %v4206_v8 = vadd.f32 %v8949_v17, %v4205_v11 }
 0xd68   :  { %v4258_v10 = vadd.f32 %v4257_v28, %v4256_v59  ;;  %v4261_v43 = vsel %vm1243_vm6, %v4211_v50, 0.0 }
 0xd69   :  { %v4259_v26 = vsel %vm1243_vm6, %v4206_v8, 0.0  ;;  %v9550_v37 = vpop.f32.mrb[62].mxu1 }
 0xd6a   :  { %v4260_v44 = vadd.f32 %v4259_v26, %v4258_v10  ;;  %v4215_v33 = vpop.f32.mrb[63].mxu1  ;;  %v4221_v34 = vadd.f32 %v9550_v37, %v8949_v17 }
 0xd6b   :  { %v4216_v47 = vadd.f32 %v8949_v17, %v4215_v33 }
 0xd6c   :  { %v4262_v29 = vadd.f32 %v4261_v43, %v4260_v44  ;;  %v4265_v18 = vsel %vm1243_vm6, %v4221_v34, 0.0 }
 0xd6d   :  { %v4263_v61 = vsel %vm1243_vm6, %v4216_v47, 0.0  ;;  %v9553_v2 = vpop.f32.mrb[64].mxu1 }
 0xd6e   :  { %v4264_v54 = vadd.f32 %v4263_v61, %v4262_v29  ;;  %v4225_v36 = vpop.f32.mrb[65].mxu1  ;;  %v4231_v48 = vadd.f32 %v9553_v2, %v8949_v17 }
 0xd6f   :  { %v4226_v51 = vadd.f32 %v8949_v17, %v4225_v36 }
 0xd70   :  { %v4266_v25 = vadd.f32 %v4265_v18, %v4264_v54  ;;  %v4269_v59 = vsel %vm1243_vm6, %v4231_v48, 0.0 }
 0xd71   :  { %v4267_v49 = vsel %vm1243_vm6, %v4226_v51, 0.0  ;;  %v9556_v52 = vpop.f32.mrb[66].mxu1 }
 0xd72   :  { %v4268_v13 = vadd.f32 %v4267_v49, %v4266_v25  ;;  %v4235_v41 = vpop.f32.mrb[67].mxu1  ;;  %v4241_v11 = vadd.f32 %v9556_v52, %v8949_v17 }
 0xd73   :  { %v4236_v28 = vadd.f32 %v8949_v17, %v4235_v41 }
 0xd74   :  { %v4270_v10 = vadd.f32 %v4269_v59, %v4268_v13  ;;  %v4273_v44 = vsel %vm1243_vm6, %v4241_v11, 0.0 }
 0xd75   :  { %v4271_v26 = vsel %vm1243_vm6, %v4236_v28, 0.0 }
 0xd76   :  { %v4272_v37 = vadd.f32 %v4271_v26, %v4270_v10 }
 0xd78   :  { %v4274_v33 = vadd.f32 %v4273_v44, %v4272_v37 }
 0xd7a   :  { %v4275_v43 = vrot.slane %v4274_v33, 4 }
 0xd7c   :  { %v4276_v29 = vadd.f32 %v4275_v43, %v4274_v33 }
 0xd7e   :  { %v4277_v61 = vrot.slane %v4276_v29, 2 }
 0xd80   :  { %v4278_v2 = vadd.f32 %v4277_v61, %v4276_v29 }
 0xd82   :  { %v4279_v54 = vrot.slane %v4278_v2, 1 }
 0xd84   :  { %v4280_v36 = vadd.f32 %v4279_v54, %v4278_v2 }
 0xd86   :  { %v4281_v18 = vmul.f32 0.0078125, %v4280_v36 }
 0xd88   :  { %v12120_v25 = vsub.f32 %v12096_v55, %v4281_v18  ;;  %v12123_v49 = vsub.f32 %v12094_v14, %v4281_v18  ;;  %v12125_v17 = vsub.f32 %v4176_v12, %v4281_v18  ;;  %v12128_v52 = vsub.f32 %v12102_v22, %v4281_v18 }
 0xd89   :  { %v12130_v13 = vsub.f32 %v4186_v19, %v4281_v18  ;;  %v12132_v41 = vsub.f32 %v4191_v45, %v4281_v18  ;;  %v12134_v59 = vsub.f32 %v4196_v20, %v4281_v18  ;;  %v12136_v10 = vsub.f32 %v4201_v62, %v4281_v18 }
 0xd8a   :  { %v12138_v26 = vsub.f32 %v4206_v8, %v4281_v18  ;;  %v12140_v55 = vsub.f32 %v4211_v50, %v4281_v18  ;;  %v12142_v37 = vsub.f32 %v4216_v47, %v4281_v18  ;;  %v12144_v14 = vsub.f32 %v4221_v34, %v4281_v18 }
 0xd8b   :  { %v12146_v12 = vsub.f32 %v4226_v51, %v4281_v18  ;;  %v12148_v22 = vsub.f32 %v4231_v48, %v4281_v18  ;;  %v12150_v19 = vsub.f32 %v4236_v28, %v4281_v18  ;;  %v12152_v45 = vsub.f32 %v4241_v11, %v4281_v18 }
 0xd8c   :  { %v4298_v62 = vmul.f32 %v12120_v25, %v12120_v25  ;;  %v4299_v20 = vmul.f32 %v12123_v49, %v12123_v49  ;;  %v4300_v50 = vmul.f32 %v12125_v17, %v12125_v17  ;;  %v4301_v8 = vmul.f32 %v12128_v52, %v12128_v52 }
 0xd8d   :  { %v4302_v51 = vmul.f32 %v12130_v13, %v12130_v13  ;;  %v4303_v44 = vmul.f32 %v12132_v41, %v12132_v41  ;;  %v4304_v29 = vmul.f32 %v12134_v59, %v12134_v59  ;;  %v4305_v54 = vmul.f32 %v12136_v10, %v12136_v10 }
 0xd8e   :  { %v4314_v34 = vsel %vm1243_vm6, %v4298_v62, 0.0  ;;  %v4315_v47 = vsel %vm1243_vm6, %v4299_v20, 0.0  ;;  %v4317_v11 = vsel %vm1243_vm6, %v4300_v50, 0.0  ;;  %v4319_v33 = vsel %vm1243_vm6, %v4301_v8, 0.0 }
 0xd8f   :  { %v4316_v48 = vadd.f32 %v4315_v47, %v4314_v34  ;;  %v4321_v61 = vsel %vm1243_vm6, %v4302_v51, 0.0  ;;  %v4323_v36 = vsel %vm1243_vm6, %v4303_v44, 0.0  ;;  %v4306_v62 = vmul.f32 %v12138_v26, %v12138_v26 }
 0xd90   :  { %v4325_v20 = vsel %vm1243_vm6, %v4304_v29, 0.0  ;;  %v4307_v8 = vmul.f32 %v12140_v55, %v12140_v55  ;;  %v4327_v34 = vsel %vm1243_vm6, %v4305_v54, 0.0 }
 0xd91   :  { %v4318_v28 = vadd.f32 %v4317_v11, %v4316_v48  ;;  %v4308_v48 = vmul.f32 %v12142_v37, %v12142_v37  ;;  %v4329_v51 = vsel %vm1243_vm6, %v4306_v62, 0.0 }
 0xd92   :  { %v4331_v44 = vsel %vm1243_vm6, %v4307_v8, 0.0 }
 0xd93   :  { %v4320_v43 = vadd.f32 %v4319_v33, %v4318_v28  ;;  %v4309_v28 = vmul.f32 %v12144_v14, %v12144_v14  ;;  %v4333_v29 = vsel %vm1243_vm6, %v4308_v48, 0.0 }
 0xd95   :  { %v4322_v2 = vadd.f32 %v4321_v61, %v4320_v43  ;;  %v4310_v43 = vmul.f32 %v12146_v12, %v12146_v12  ;;  %v4335_v54 = vsel %vm1243_vm6, %v4309_v28, 0.0 }
 0xd97   :  { %v4324_v18 = vadd.f32 %v4323_v36, %v4322_v2  ;;  %v4311_v2 = vmul.f32 %v12148_v22, %v12148_v22  ;;  %v4337_v62 = vsel %vm1243_vm6, %v4310_v43, 0.0 }
 0xd99   :  { %v4326_v50 = vadd.f32 %v4325_v20, %v4324_v18  ;;  %v4312_v18 = vmul.f32 %v12150_v19, %v12150_v19  ;;  %v4339_v8 = vsel %vm1243_vm6, %v4311_v2, 0.0  ;;  %v4045_v2 = vld [vmem:[%s14102_s1 + $0x168] sm:$0x1] }
 0xd9b   :  { %v4328_v47 = vadd.f32 %v4327_v34, %v4326_v50  ;;  %v4313_v50 = vmul.f32 %v12152_v45, %v12152_v45 }
 0xd9d   :  { %v4330_v11 = vadd.f32 %v4329_v51, %v4328_v47  ;;  %v4341_v47 = vsel %vm1243_vm6, %v4312_v18, 0.0  ;;  %v4343_v51 = vsel %vm1243_vm6, %v4313_v50, 0.0  ;;  %v12211_v50 = vld [vmem:[%s14102_s1 + $0x170] ss:$0 sm:$0xff] }
 0xd9f   :  { %v4332_v33 = vadd.f32 %v4331_v44, %v4330_v11 }
 0xda1   :  { %v4334_v61 = vadd.f32 %v4333_v29, %v4332_v33 }
 0xda3   :  { %v4336_v36 = vadd.f32 %v4335_v54, %v4334_v61 }
 0xda5   :  { %v4338_v20 = vadd.f32 %v4337_v62, %v4336_v36 }
 0xda7   :  { %v4340_v34 = vadd.f32 %v4339_v8, %v4338_v20 }
 0xda9   :  { %v4342_v48 = vadd.f32 %v4341_v47, %v4340_v34 }
 0xdab   :  { %v4344_v11 = vadd.f32 %v4343_v51, %v4342_v48 }
 0xdad   :  { %v4345_v28 = vrot.slane %v4344_v11, 4 }
 0xdaf   :  { %v4346_v44 = vadd.f32 %v4345_v28, %v4344_v11 }
 0xdb1   :  { %v4347_v33 = vrot.slane %v4346_v44, 2 }
 0xdb3   :  { %v4348_v29 = vadd.f32 %v4347_v33, %v4346_v44 }
 0xdb5   :  { %v4349_v61 = vrot.slane %v4348_v29, 1 }
 0xdb7   :  { %v4350_v54 = vadd.f32 %v4349_v61, %v4348_v29 }
 0xdb9   :  { %v4351_v43 = vmul.f32 0.0078125, %v4350_v54 }
 0xdbb   :  { %v4352_v36 = vadd.f32 1e-05, %v4351_v43 }
 0xdbd   :  { %9947 = vrsqrt.f32 %v4352_v36 }
 0xdc7   :  { %v9948_v62 = vpop.eup %9947 }
 0xdc8   :  { %v4354_v20 = vmul.f32 %v9948_v62, %v4045_v2 }
 0xdca   :  { %v12206_v18 = vrot.slane %v4354_v20, %v10164_v15 }
 0xdcc   :  { %v12215_v8 = vmul.f32 %v12206_v18, %v12150_v19  ;;  %v4359_v34 = vmul.f32 %v12206_v18, %v12120_v25  ;;  %v4360_v47 = vmul.f32 %v12206_v18, %v12123_v49  ;;  %v4361_v48 = vmul.f32 %v12206_v18, %v12125_v17 }
 0xdcd   :  { %v4362_v51 = vmul.f32 %v12206_v18, %v12128_v52  ;;  %v4363_v11 = vmul.f32 %v12206_v18, %v12130_v13  ;;  %v4365_v28 = vmul.f32 %v12206_v18, %v12134_v59  ;;  %v4364_v17 = vmul.f32 %v12206_v18, %v12132_v41 }
 0xdce   :  { %v4379_v19 = vadd.f32 %v12211_v50, %v4359_v34  ;;  %v4380_v44 = vadd.f32 %v12211_v50, %v4360_v47  ;;  %v4381_v25 = vadd.f32 %v12211_v50, %v4361_v48  ;;  %v4366_v62 = vmul.f32 %v12206_v18, %v12136_v10 }
 0xdcf   :  { %v4382_v49 = vadd.f32 %v12211_v50, %v4362_v51  ;;  %v4383_v33 = vadd.f32 %v12211_v50, %v4363_v11  ;;  %v4384_v43 = vadd.f32 %v12211_v50, %v4364_v17  ;;  %v4385_v36 = vadd.f32 %v12211_v50, %v4365_v28 }
 0xdd0   :  { %vm4395_vm13 = vcmp.gt.f32.partialorder %v4379_v19, 0.0  ;;  %v4411_v52 = vmul.f32 0.01, %v4379_v19  ;;  %vm4396_vm8 = vcmp.gt.f32.partialorder %v4380_v44, 0.0  ;;  %v4412_v13 = vmul.f32 0.01, %v4380_v44 }
 0xdd1   :  { %vm4397_vm10 = vcmp.gt.f32.partialorder %v4381_v25, 0.0  ;;  %v4413_v29 = vmul.f32 0.01, %v4381_v25  ;;  %v4414_v54 = vmul.f32 0.01, %v4382_v49  ;;  %vm4398_vm11 = vcmp.gt.f32.partialorder %v4382_v49, 0.0 }
 0xdd2   :  { %v4427_v59 = vsel %vm4395_vm13, %v4379_v19, %v4411_v52  ;;  %v4428_v61 = vsel %vm4396_vm8, %v4380_v44, %v4412_v13  ;;  %v4415_v41 = vmul.f32 0.01, %v4383_v33  ;;  %vm4399_vm12 = vcmp.gt.f32.partialorder %v4383_v33, 0.0 }
 0xdd3   :  { %9559 = vmatprep.mubr.msk.f32.mxu0 %vm1243_vm6, %v4427_v59  ;;  %v4429_v2 = vsel %vm4397_vm10, %v4381_v25, %v4413_v29  ;;  %v4367_v20 = vmul.f32 %v12206_v18, %v12138_v26  ;;  %v4369_v34 = vmul.f32 %v12206_v18, %v12142_v37  ;;  %v4371_v47 = vmul.f32 %v12206_v18, %v12146_v12 }
 0xdd4   :  { %9560 = vmatmul.mubr.msk.f32.vlgmr.msra.gmra.mrb[50].mxu0 %vm1243_vm6, %v4428_v61  ;;  %v4430_v48 = vsel %vm4398_vm11, %v4382_v49, %v4414_v54  ;;  %v4416_v51 = vmul.f32 0.01, %v4384_v43  ;;  %v4386_v11 = vadd.f32 %v12211_v50, %v4366_v62  ;;  %v4368_v28 = vmul.f32 %v12206_v18, %v12140_v55 }
 0xdd5   :  { %9562 = vmatprep.mubr.msk.f32.mxu0 %vm1243_vm6, %v4429_v2  ;;  %v4431_v10 = vsel %vm4399_vm12, %v4383_v33, %v4415_v41  ;;  %vm4400_vm13 = vcmp.gt.f32.partialorder %v4384_v43, 0.0  ;;  %v4417_v19 = vmul.f32 0.01, %v4385_v36  ;;  %v4387_v26 = vadd.f32 %v12211_v50, %v4367_v20 }
 0xdd6   :  { %vm4401_vm8 = vcmp.gt.f32.partialorder %v4385_v36, 0.0  ;;  %v4432_v37 = vsel %vm4400_vm13, %v4384_v43, %v4416_v51  ;;  %v4418_v44 = vmul.f32 0.01, %v4386_v11  ;;  %v4388_v12 = vadd.f32 %v12211_v50, %v4368_v28 }
 0xdd7   :  { %v4370_v25 = vmul.f32 %v12206_v18, %v12144_v14  ;;  %v4433_v55 = vsel %vm4401_vm8, %v4385_v36, %v4417_v19  ;;  %vm4402_vm10 = vcmp.gt.f32.partialorder %v4386_v11, 0.0  ;;  %v4419_v49 = vmul.f32 0.01, %v4387_v26 }
 0xdd8   :  { %9563 = vmatmul.mubr.msk.f32.gmra.mrb[52].mxu0 %vm1243_vm6, %v4430_v48  ;;  %v4389_v33 = vadd.f32 %v12211_v50, %v4369_v34  ;;  %vm4403_vm11 = vcmp.gt.f32.partialorder %v4387_v26, 0.0  ;;  %v4434_v17 = vsel %vm4402_vm10, %v4386_v11, %v4418_v44  ;;  %v4420_v52 = vmul.f32 0.01, %v4388_v12 }
 0xdd9   :  { %9565 = vmatprep.mubr.msk.f32.mxu0 %vm1243_vm6, %v4431_v10  ;;  %v4390_v13 = vadd.f32 %v12211_v50, %v4370_v25  ;;  %v4372_v29 = vmul.f32 %v12206_v18, %v12148_v22  ;;  %v4435_v14 = vsel %vm4403_vm11, %v4387_v26, %v4419_v49  ;;  %vm4404_vm12 = vcmp.gt.f32.partialorder %v4388_v12, 0.0 }
 0xdda   :  { %v4421_v59 = vmul.f32 0.01, %v4389_v33  ;;  %v4391_v61 = vadd.f32 %v12211_v50, %v4371_v47  ;;  %vm4405_vm13 = vcmp.gt.f32.partialorder %v4389_v33, 0.0  ;;  %v4436_v54 = vsel %vm4404_vm12, %v4388_v12, %v4420_v52 }
 0xddb   :  { %v4422_v43 = vmul.f32 0.01, %v4390_v13  ;;  %v4392_v36 = vadd.f32 %v12211_v50, %v4372_v29  ;;  %v4374_v2 = vmul.f32 %v12206_v18, %v12152_v45  ;;  %v4393_v22 = vadd.f32 %v12211_v50, %v12215_v8 }
 0xddc   :  { %9566 = vmatmul.mubr.msk.f32.gmra.mrb[54].mxu0 %vm1243_vm6, %v4432_v37  ;;  %v4437_v41 = vsel %vm4405_vm13, %v4389_v33, %v4421_v59  ;;  %vm4406_vm8 = vcmp.gt.f32.partialorder %v4390_v13, 0.0  ;;  %v4423_v62 = vmul.f32 0.01, %v4391_v61  ;;  %vm4407_vm10 = vcmp.gt.f32.partialorder %v4391_v61, 0.0 }
 0xddd   :  { %9568 = vmatprep.mubr.msk.f32.mxu0 %vm1243_vm6, %v4433_v55  ;;  %v4438_v20 = vsel %vm4406_vm8, %v4390_v13, %v4422_v43  ;;  %v4424_v34 = vmul.f32 0.01, %v4392_v36  ;;  %v4394_v47 = vadd.f32 %v12211_v50, %v4374_v2  ;;  %vm4408_vm11 = vcmp.gt.f32.partialorder %v4392_v36, 0.0  ;;  %v8967_v50 = vld [vmem:[%s14102_s1 + $0x180] ss:$0 sm:$0xff] }
 0xdde   :  { %v4439_v48 = vsel %vm4407_vm10, %v4391_v61, %v4423_v62  ;;  %v4425_v45 = vmul.f32 0.01, %v4393_v22  ;;  %vm4409_vm12 = vcmp.gt.f32.partialorder %v4393_v22, 0.0 }
 0xddf   :  { %v4440_v18 = vsel %vm4408_vm11, %v4392_v36, %v4424_v34  ;;  %v4426_v8 = vmul.f32 0.01, %v4394_v47  ;;  %vm4410_vm13 = vcmp.gt.f32.partialorder %v4394_v47, 0.0 }
 0xde0   :  { %9569 = vmatmul.mubr.msk.f32.gmra.mrb[56].mxu0 %vm1243_vm6, %v4434_v17  ;;  %v4441_v51 = vsel %vm4409_vm12, %v4393_v22, %v4425_v45 }
 0xde1   :  { %9571 = vmatprep.mubr.msk.f32.mxu0 %vm1243_vm6, %v4435_v14  ;;  %v4442_v11 = vsel %vm4410_vm13, %v4394_v47, %v4426_v8 }
 0xde4   :  { %9572 = vmatmul.mubr.msk.f32.gmra.mrb[58].mxu0 %vm1243_vm6, %v4436_v54 }
 0xde5   :  { %9574 = vmatprep.mubr.msk.f32.mxu0 %vm1243_vm6, %v4437_v41 }
 0xde8   :  { %9575 = vmatmul.mubr.msk.f32.gmra.mrb[60].mxu0 %vm1243_vm6, %v4438_v20 }
 0xde9   :  { %9577 = vmatprep.mubr.msk.f32.mxu0 %vm1243_vm6, %v4439_v48 }
 0xdec   :  { %9578 = vmatmul.mubr.msk.f32.gmra.mrb[62].mxu0 %vm1243_vm6, %v4440_v18 }
 0xded   :  { %9580 = vmatprep.mubr.msk.f32.mxu0 %vm1243_vm6, %v4441_v51 }
 0xdf0   :  { %9581 = vmatmul.mubr.msk.f32.gmra.mrb[64].mxu0 %vm1243_vm6, %v4442_v11 }
 0xdf1   :  { %9605 = vmatprep.mubr.msk.f32.mxu0 %vm14129_vm0, %v14139_v16 }
 0xea7   :  { %v9561_v28 = vpop.f32.mrb[50].mxu0 }
 0xea8   :  { %v12285_v10 = vadd.f32 %v9561_v28, %v8967_v50  ;;  %v4565_v19 = vpop.f32.mrb[51].mxu0 }
 0xea9   :  { %v12287_v26 = vadd.f32 %v8967_v50, %v4565_v19 }
 0xeaa   :  { %v4645_v37 = vsel %vm1243_vm6, %v12285_v10, 0.0 }
 0xeab   :  { %v4644_v44 = vsel %vm1243_vm6, %v12287_v26, 0.0  ;;  %v9564_v12 = vpop.f32.mrb[52].mxu0 }
 0xeac   :  { %v4646_v25 = vadd.f32 %v4645_v37, %v4644_v44  ;;  %v4575_v55 = vpop.f32.mrb[53].mxu0  ;;  %v12293_v49 = vadd.f32 %v9564_v12, %v8967_v50 }
 0xead   :  { %v12295_v33 = vadd.f32 %v8967_v50, %v4575_v55 }
 0xeae   :  { %v4649_v14 = vsel %vm1243_vm6, %v12293_v49, 0.0 }
 0xeaf   :  { %v4647_v17 = vsel %vm1243_vm6, %v12295_v33, 0.0  ;;  %v9567_v52 = vpop.f32.mrb[54].mxu0 }
 0xeb0   :  { %v4648_v13 = vadd.f32 %v4647_v17, %v4646_v25  ;;  %v4585_v29 = vpop.f32.mrb[55].mxu0  ;;  %v4591_v59 = vadd.f32 %v9567_v52, %v8967_v50 }
 0xeb1   :  { %v4586_v61 = vadd.f32 %v8967_v50, %v4585_v29 }
 0xeb2   :  { %v4650_v54 = vadd.f32 %v4649_v14, %v4648_v13  ;;  %v4653_v41 = vsel %vm1243_vm6, %v4591_v59, 0.0 }
 0xeb3   :  { %v4651_v43 = vsel %vm1243_vm6, %v4586_v61, 0.0  ;;  %v9570_v36 = vpop.f32.mrb[56].mxu0 }
 0xeb4   :  { %v4652_v2 = vadd.f32 %v4651_v43, %v4650_v54  ;;  %v4595_v22 = vpop.f32.mrb[57].mxu0  ;;  %v4601_v62 = vadd.f32 %v9570_v36, %v8967_v50 }
 0xeb5   :  { %v4596_v20 = vadd.f32 %v8967_v50, %v4595_v22 }
 0xeb6   :  { %v4654_v34 = vadd.f32 %v4653_v41, %v4652_v2  ;;  %v4657_v8 = vsel %vm1243_vm6, %v4601_v62, 0.0 }
 0xeb7   :  { %v4655_v47 = vsel %vm1243_vm6, %v4596_v20, 0.0  ;;  %v9573_v48 = vpop.f32.mrb[58].mxu0 }
 0xeb8   :  { %v4656_v45 = vadd.f32 %v4655_v47, %v4654_v34  ;;  %v4605_v18 = vpop.f32.mrb[59].mxu0  ;;  %v4611_v51 = vadd.f32 %v9573_v48, %v8967_v50 }
 0xeb9   :  { %v4606_v11 = vadd.f32 %v8967_v50, %v4605_v18 }
 0xeba   :  { %v4658_v28 = vadd.f32 %v4657_v8, %v4656_v45  ;;  %v4661_v25 = vsel %vm1243_vm6, %v4611_v51, 0.0 }
 0xebb   :  { %v4659_v19 = vsel %vm1243_vm6, %v4606_v11, 0.0  ;;  %v9576_v37 = vpop.f32.mrb[60].mxu0 }
 0xebc   :  { %v4660_v44 = vadd.f32 %v4659_v19, %v4658_v28  ;;  %v4615_v12 = vpop.f32.mrb[61].mxu0  ;;  %v4621_v55 = vadd.f32 %v9576_v37, %v8967_v50 }
 0xebd   :  { %v4616_v17 = vadd.f32 %v8967_v50, %v4615_v12 }
 0xebe   :  { %v4662_v52 = vadd.f32 %v4661_v25, %v4660_v44  ;;  %v4665_v43 = vsel %vm1243_vm6, %v4621_v55, 0.0  ;;  %v4844_v25 = vld [vmem:[%s14102_s1 + $0x1a0] sm:$0x1] }
 0xebf   :  { %v4663_v13 = vsel %vm1243_vm6, %v4616_v17, 0.0  ;;  %v9579_v29 = vpop.f32.mrb[62].mxu0  ;;  %9857 = vpush %v4844_v25 }
 0xec0   :  { %v4664_v14 = vadd.f32 %v4663_v13, %v4662_v52  ;;  %v4625_v54 = vpop.f32.mrb[63].mxu0  ;;  %v4631_v36 = vadd.f32 %v9579_v29, %v8967_v50 }
 0xec1   :  { %v4626_v2 = vadd.f32 %v8967_v50, %v4625_v54 }
 0xec2   :  { %v4666_v22 = vadd.f32 %v4665_v43, %v4664_v14  ;;  %v4669_v45 = vsel %vm1243_vm6, %v4631_v36, 0.0 }
 0xec3   :  { %v4667_v41 = vsel %vm1243_vm6, %v4626_v2, 0.0  ;;  %v9582_v34 = vpop.f32.mrb[64].mxu0 }
 0xec4   :  { %v4668_v47 = vadd.f32 %v4667_v41, %v4666_v22  ;;  %v4635_v48 = vpop.f32.mrb[65].mxu0  ;;  %v4641_v18 = vadd.f32 %v9582_v34, %v8967_v50 }
 0xec5   :  { %v4636_v8 = vadd.f32 %v8967_v50, %v4635_v48 }
 0xec6   :  { %v4670_v28 = vadd.f32 %v4669_v45, %v4668_v47  ;;  %v4673_v44 = vsel %vm1243_vm6, %v4641_v18, 0.0 }
 0xec7   :  { %v4671_v19 = vsel %vm1243_vm6, %v4636_v8, 0.0 }
 0xec8   :  { %v4672_v37 = vadd.f32 %v4671_v19, %v4670_v28 }
 0xeca   :  { %v4674_v12 = vadd.f32 %v4673_v44, %v4672_v37 }
 0xecc   :  { %v4675_v52 = vrot.slane %v4674_v12, 4 }
 0xece   :  { %v4676_v13 = vadd.f32 %v4675_v52, %v4674_v12 }
 0xed0   :  { %v4677_v29 = vrot.slane %v4676_v13, 2 }
 0xed2   :  { %v4678_v14 = vadd.f32 %v4677_v29, %v4676_v13 }
 0xed4   :  { %v4679_v54 = vrot.slane %v4678_v14, 1 }
 0xed6   :  { %v4680_v43 = vadd.f32 %v4679_v54, %v4678_v14 }
 0xed8   :  { %v4681_v22 = vmul.f32 0.0078125, %v4680_v43 }
 0xeda   :  { %v12317_v50 = vsub.f32 %v12287_v26, %v4681_v22  ;;  %v12320_v41 = vsub.f32 %v12285_v10, %v4681_v22  ;;  %v12323_v34 = vsub.f32 %v12295_v33, %v4681_v22  ;;  %v12326_v47 = vsub.f32 %v12293_v49, %v4681_v22 }
 0xedb   :  { %v12328_v48 = vsub.f32 %v4586_v61, %v4681_v22  ;;  %v12330_v45 = vsub.f32 %v4591_v59, %v4681_v22  ;;  %v12332_v28 = vsub.f32 %v4596_v20, %v4681_v22  ;;  %v12334_v19 = vsub.f32 %v4601_v62, %v4681_v22 }
 0xedc   :  { %v12336_v37 = vsub.f32 %v4606_v11, %v4681_v22  ;;  %v12338_v26 = vsub.f32 %v4611_v51, %v4681_v22  ;;  %v12340_v10 = vsub.f32 %v4616_v17, %v4681_v22  ;;  %v12342_v44 = vsub.f32 %v4621_v55, %v4681_v22 }
 0xedd   :  { %v12344_v33 = vsub.f32 %v4626_v2, %v4681_v22  ;;  %v12346_v49 = vsub.f32 %v4631_v36, %v4681_v22  ;;  %v12348_v61 = vsub.f32 %v4636_v8, %v4681_v22  ;;  %v12350_v59 = vsub.f32 %v4641_v18, %v4681_v22 }
 0xede   :  { %v4698_v62 = vmul.f32 %v12317_v50, %v12317_v50  ;;  %v4699_v20 = vmul.f32 %v12320_v41, %v12320_v41  ;;  %v4700_v51 = vmul.f32 %v12323_v34, %v12323_v34  ;;  %v4701_v11 = vmul.f32 %v12326_v47, %v12326_v47 }
 0xedf   :  { %v4702_v2 = vmul.f32 %v12328_v48, %v12328_v48  ;;  %v4703_v12 = vmul.f32 %v12330_v45, %v12330_v45  ;;  %v4704_v13 = vmul.f32 %v12332_v28, %v12332_v28  ;;  %v4705_v54 = vmul.f32 %v12334_v19, %v12334_v19 }
 0xee0   :  { %v4714_v55 = vsel %vm1243_vm6, %v4698_v62, 0.0  ;;  %v4715_v17 = vsel %vm1243_vm6, %v4699_v20, 0.0  ;;  %v4717_v18 = vsel %vm1243_vm6, %v4700_v51, 0.0  ;;  %v4719_v25 = vsel %vm1243_vm6, %v4701_v11, 0.0 }
 0xee1   :  { %v4716_v36 = vadd.f32 %v4715_v17, %v4714_v55  ;;  %v4721_v29 = vsel %vm1243_vm6, %v4702_v2, 0.0  ;;  %v4723_v43 = vsel %vm1243_vm6, %v4703_v12, 0.0  ;;  %v4706_v62 = vmul.f32 %v12336_v37, %v12336_v37 }
 0xee2   :  { %v4725_v20 = vsel %vm1243_vm6, %v4704_v13, 0.0  ;;  %v4707_v11 = vmul.f32 %v12338_v26, %v12338_v26  ;;  %v4727_v55 = vsel %vm1243_vm6, %v4705_v54, 0.0 }
 0xee3   :  { %v4718_v8 = vadd.f32 %v4717_v18, %v4716_v36  ;;  %v4708_v36 = vmul.f32 %v12340_v10, %v12340_v10  ;;  %v4729_v2 = vsel %vm1243_vm6, %v4706_v62, 0.0 }
 0xee4   :  { %v4731_v12 = vsel %vm1243_vm6, %v4707_v11, 0.0 }
 0xee5   :  { %v4720_v52 = vadd.f32 %v4719_v25, %v4718_v8  ;;  %v4709_v8 = vmul.f32 %v12342_v44, %v12342_v44  ;;  %v4733_v13 = vsel %vm1243_vm6, %v4708_v36, 0.0 }
 0xee7   :  { %v4722_v14 = vadd.f32 %v4721_v29, %v4720_v52  ;;  %v4710_v52 = vmul.f32 %v12344_v33, %v12344_v33  ;;  %v4735_v54 = vsel %vm1243_vm6, %v4709_v8, 0.0 }
 0xee9   :  { %v4724_v22 = vadd.f32 %v4723_v43, %v4722_v14  ;;  %v4711_v14 = vmul.f32 %v12346_v49, %v12346_v49  ;;  %v4737_v62 = vsel %vm1243_vm6, %v4710_v52, 0.0 }
 0xeeb   :  { %v4726_v51 = vadd.f32 %v4725_v20, %v4724_v22  ;;  %v4712_v22 = vmul.f32 %v12348_v61, %v12348_v61  ;;  %v4739_v11 = vsel %vm1243_vm6, %v4711_v14, 0.0  ;;  %v4445_v14 = vld [vmem:[%s14102_s1 + $0x188] sm:$0x1] }
 0xeed   :  { %v4728_v17 = vadd.f32 %v4727_v55, %v4726_v51  ;;  %v4713_v51 = vmul.f32 %v12350_v59, %v12350_v59 }
 0xeef   :  { %v4730_v18 = vadd.f32 %v4729_v2, %v4728_v17  ;;  %v4741_v17 = vsel %vm1243_vm6, %v4712_v22, 0.0  ;;  %v4743_v2 = vsel %vm1243_vm6, %v4713_v51, 0.0  ;;  %v12409_v51 = vld [vmem:[%s14102_s1 + $0x190] ss:$0 sm:$0xff] }
 0xef0   :  { %s9858_s14 = spop %9857 }
 0xef1   :  { %v4732_v25 = vadd.f32 %v4731_v12, %v4730_v18 }
 0xef3   :  { %v4734_v29 = vadd.f32 %v4733_v13, %v4732_v25 }
 0xef5   :  { %v4736_v43 = vadd.f32 %v4735_v54, %v4734_v29 }
 0xef7   :  { %v4738_v20 = vadd.f32 %v4737_v62, %v4736_v43 }
 0xef9   :  { %v4740_v55 = vadd.f32 %v4739_v11, %v4738_v20 }
 0xefb   :  { %v4742_v36 = vadd.f32 %v4741_v17, %v4740_v55 }
 0xefd   :  { %v4744_v18 = vadd.f32 %v4743_v2, %v4742_v36 }
 0xeff   :  { %v4745_v8 = vrot.slane %v4744_v18, 4 }
 0xf01   :  { %v4746_v12 = vadd.f32 %v4745_v8, %v4744_v18 }
 0xf03   :  { %v4747_v25 = vrot.slane %v4746_v12, 2 }
 0xf05   :  { %v4748_v13 = vadd.f32 %v4747_v25, %v4746_v12 }
 0xf07   :  { %v4749_v29 = vrot.slane %v4748_v13, 1 }
 0xf09   :  { %v4750_v54 = vadd.f32 %v4749_v29, %v4748_v13 }
 0xf0b   :  { %v4751_v52 = vmul.f32 0.0078125, %v4750_v54 }
 0xf0d   :  { %v4752_v43 = vadd.f32 1e-05, %v4751_v52 }
 0xf0f   :  { %9949 = vrsqrt.f32 %v4752_v43 }
 0xf19   :  { %v9950_v62 = vpop.eup %9949 }
 0xf1a   :  { %v4754_v20 = vmul.f32 %v9950_v62, %v4445_v14 }
 0xf1c   :  { %v12404_v22 = vrot.slane %v4754_v20, %v10164_v15 }
 0xf1e   :  { %v4773_v11 = vmul.f32 %v12404_v22, %v12348_v61  ;;  %v4760_v55 = vmul.f32 %v12404_v22, %v12320_v41  ;;  %v4759_v17 = vmul.f32 %v12404_v22, %v12317_v50  ;;  %v4761_v36 = vmul.f32 %v12404_v22, %v12323_v34  ;;  %v12433_v34 = vld [vmem:[%s14102_s1 + $0x198] ss:$0 sm:$0xff] }
 0xf1f   :  { %v4763_v2 = vmul.f32 %v12404_v22, %v12328_v48  ;;  %v4762_v18 = vmul.f32 %v12404_v22, %v12326_v47  ;;  %v4765_v8 = vmul.f32 %v12404_v22, %v12332_v28  ;;  %v4764_v61 = vmul.f32 %v12404_v22, %v12330_v45 }
 0xf20   :  { %v4780_v41 = vadd.f32 %v12409_v51, %v4760_v55  ;;  %v4779_v12 = vadd.f32 %v12409_v51, %v4759_v17  ;;  %v4781_v50 = vadd.f32 %v12409_v51, %v4761_v36 }
 0xf21   :  { %v4783_v48 = vadd.f32 %v12409_v51, %v4763_v2  ;;  %v4782_v47 = vadd.f32 %v12409_v51, %v4762_v18  ;;  %v4785_v28 = vadd.f32 %v12409_v51, %v4765_v8  ;;  %v4784_v25 = vadd.f32 %v12409_v51, %v4764_v61 }
 0xf22   :  { %vm4796_vm8 = vcmp.gt.f32.partialorder %v4780_v41, 0.0  ;;  %v4812_v45 = vmul.f32 0.01, %v4780_v41  ;;  %vm4795_vm10 = vcmp.gt.f32.partialorder %v4779_v12, 0.0  ;;  %v4811_v13 = vmul.f32 0.01, %v4779_v12 }
 0xf23   :  { %vm4797_vm11 = vcmp.gt.f32.partialorder %v4781_v50, 0.0  ;;  %v4813_v29 = vmul.f32 0.01, %v4781_v50  ;;  %vm4799_vm12 = vcmp.gt.f32.partialorder %v4783_v48, 0.0  ;;  %v4815_v54 = vmul.f32 0.01, %v4783_v48 }
 0xf24   :  { %v4828_v52 = vsel %vm4796_vm8, %v4780_v41, %v4812_v45  ;;  %v4827_v43 = vsel %vm4795_vm10, %v4779_v12, %v4811_v13  ;;  %vm4798_vm13 = vcmp.gt.f32.partialorder %v4782_v47, 0.0  ;;  %v4814_v14 = vmul.f32 0.01, %v4782_v47 }
 0xf25   :  { %v4850_v62 = vmul.f32 %v12433_v34, %v4828_v52  ;;  %v4849_v20 = vmul.f32 %v12433_v34, %v4827_v43  ;;  %v4829_v55 = vsel %vm4797_vm11, %v4781_v50, %v4813_v29  ;;  %v4831_v17 = vsel %vm4799_vm12, %v4783_v48, %v4815_v54 }
 0xf26   :  { %v4851_v36 = vmul.f32 %v12433_v34, %v4829_v55  ;;  %v4830_v2 = vsel %vm4798_vm13, %v4782_v47, %v4814_v14  ;;  %vm4801_vm0 = vcmp.gt.f32.partialorder %v4785_v28, 0.0  ;;  %v4853_v61 = vmul.f32 %v12433_v34, %v4831_v17 }
 0xf27   :  { %v4868_v18 = vsel %vm1243_vm6, %v4850_v62, 0.0  ;;  %v4865_v8 = vsel %vm1243_vm6, %v4849_v20, 0.0  ;;  %v4817_v41 = vmul.f32 0.01, %v4785_v28  ;;  %v12446_v12 = vadd.f32 %v12409_v51, %v4773_v11 }
 0xf28   :  { %4869 = vadd.xlane.f32.xlu0 %v4868_v18  ;;  %4866 = vadd.xlane.f32.xlu1 %v4865_v8  ;;  %v4852_v45 = vmul.f32 %v12433_v34, %v4830_v2  ;;  %vm4800_vm8 = vcmp.gt.f32.partialorder %v4784_v25, 0.0  ;;  %v4816_v50 = vmul.f32 0.01, %v4784_v25  ;;  %v4871_v48 = vsel %vm1243_vm6, %v4851_v36, 0.0 }
 0xf29   :  { %v4833_v47 = vsel %vm4801_vm0, %v4785_v28, %v4817_v41  ;;  %v4767_v13 = vmul.f32 %v12404_v22, %v12336_v37  ;;  %v4766_v29 = vmul.f32 %v12404_v22, %v12334_v19  ;;  %v4769_v11 = vmul.f32 %v12404_v22, %v12340_v10 }
 0xf2a   :  { %v4855_v54 = vmul.f32 %v12433_v34, %v4833_v47  ;;  %v4832_v52 = vsel %vm4800_vm8, %v4784_v25, %v4816_v50  ;;  %v4768_v43 = vmul.f32 %v12404_v22, %v12338_v26  ;;  %v4877_v14 = vsel %vm1243_vm6, %v4853_v61, 0.0 }
 0xf2b   :  { %v4787_v62 = vadd.f32 %v12409_v51, %v4767_v13  ;;  %v4786_v28 = vadd.f32 %v12409_v51, %v4766_v29  ;;  %v4771_v37 = vmul.f32 %v12404_v22, %v12344_v33  ;;  %v4874_v19 = vsel %vm1243_vm6, %v4852_v45, 0.0 }
 0xf2c   :  { %4872 = vadd.xlane.f32.xlu0 %v4871_v48  ;;  %4878 = vadd.xlane.f32.xlu1 %v4877_v14  ;;  %v4789_v25 = vadd.f32 %v12409_v51, %v4769_v11  ;;  %v4788_v10 = vadd.f32 %v12409_v51, %v4768_v43  ;;  %v4770_v26 = vmul.f32 %v12404_v22, %v12342_v44  ;;  %v4883_v17 = vsel %vm1243_vm6, %v4855_v54, 0.0 }
 0xf2d   :  { %v4854_v20 = vmul.f32 %v12433_v34, %v4832_v52  ;;  %vm4803_vm0 = vcmp.gt.f32.partialorder %v4787_v62, 0.0  ;;  %v4819_v55 = vmul.f32 0.01, %v4787_v62  ;;  %vm4802_vm10 = vcmp.gt.f32.partialorder %v4786_v28, 0.0 }
 0xf2e   :  { %v4818_v36 = vmul.f32 0.01, %v4786_v28  ;;  %vm4805_vm11 = vcmp.gt.f32.partialorder %v4789_v25, 0.0  ;;  %v4821_v33 = vmul.f32 0.01, %v4789_v25  ;;  %v4791_v8 = vadd.f32 %v12409_v51, %v4771_v37 }
 0xf2f   :  { %v4835_v2 = vsel %vm4803_vm0, %v4787_v62, %v4819_v55  ;;  %v4820_v18 = vmul.f32 0.01, %v4788_v10  ;;  %v4790_v61 = vadd.f32 %v12409_v51, %v4770_v26  ;;  %vm4804_vm12 = vcmp.gt.f32.partialorder %v4788_v10, 0.0 }
 0xf30   :  { %4875 = vadd.xlane.f32.xlu0 %v4874_v19  ;;  %4884 = vadd.xlane.f32.xlu1 %v4883_v17  ;;  %v4857_v44 = vmul.f32 %v12433_v34, %v4835_v2  ;;  %v4834_v41 = vsel %vm4802_vm10, %v4786_v28, %v4818_v36  ;;  %v4837_v45 = vsel %vm4805_vm11, %v4789_v25, %v4821_v33  ;;  %vm4807_vm13 = vcmp.gt.f32.partialorder %v4791_v8, 0.0 }
 0xf31   :  { %v4880_v50 = vsel %vm1243_vm6, %v4854_v20, 0.0  ;;  %v4856_v48 = vmul.f32 %v12433_v34, %v4834_v41  ;;  %v4823_v47 = vmul.f32 0.01, %v4791_v8  ;;  %v4859_v29 = vmul.f32 %v12433_v34, %v4837_v45 }
 0xf32   :  { %v4889_v13 = vsel %vm1243_vm6, %v4857_v44, 0.0  ;;  %v4836_v54 = vsel %vm4804_vm12, %v4788_v10, %v4820_v18  ;;  %v4822_v52 = vmul.f32 0.01, %v4790_v61  ;;  %v4825_v43 = vmul.f32 0.01, %v12446_v12 }
 0xf33   :  { %v4839_v11 = vsel %vm4807_vm13, %v4791_v8, %v4823_v47  ;;  %v4772_v14 = vmul.f32 %v12404_v22, %v12346_v49  ;;  %v4774_v62 = vmul.f32 %v12404_v22, %v12350_v59  ;;  %vm4806_vm8 = vcmp.gt.f32.partialorder %v4790_v61, 0.0 }
 0xf34   :  { %4881 = vadd.xlane.f32.xlu0 %v4880_v50  ;;  %4890 = vadd.xlane.f32.xlu1 %v4889_v13  ;;  %vm4809_vm0 = vcmp.gt.f32.partialorder %v12446_v12, 0.0  ;;  %v4886_v37 = vsel %vm1243_vm6, %v4856_v48, 0.0  ;;  %v4895_v19 = vsel %vm1243_vm6, %v4859_v29, 0.0  ;;  %v4858_v25 = vmul.f32 %v12433_v34, %v4836_v54 }
 0xf35   :  { %v4792_v28 = vadd.f32 %v12409_v51, %v4772_v14  ;;  %v4861_v10 = vmul.f32 %v12433_v34, %v4839_v11  ;;  %v4838_v26 = vsel %vm4806_vm8, %v4790_v61, %v4822_v52  ;;  %v4841_v49 = vsel %vm4809_vm0, %v12446_v12, %v4825_v43 }
 0xf36   :  { %v4794_v59 = vadd.f32 %v12409_v51, %v4774_v62  ;;  %v4892_v22 = vsel %vm1243_vm6, %v4858_v25, 0.0  ;;  %v4860_v17 = vmul.f32 %v12433_v34, %v4838_v26  ;;  %v4863_v36 = vmul.f32 %v12433_v34, %v4841_v49  ;;  %v14153_v49 = vld [vmem:[#allocation6_spill] sm:$0xff] }
 0xf37   :  { %v4824_v20 = vmul.f32 0.01, %v4792_v28  ;;  %vm4808_vm10 = vcmp.gt.f32.partialorder %v4792_v28, 0.0  ;;  %v4901_v55 = vsel %vm1243_vm6, %v4861_v10, 0.0  ;;  %v4915_v45 = vstv %s9858_s14 }
 0xf38   :  { %4887 = vadd.xlane.f32.xlu0 %v4886_v37  ;;  %4896 = vadd.xlane.f32.xlu1 %v4895_v19  ;;  %v4826_v2 = vmul.f32 0.01, %v4794_v59  ;;  %vm4810_vm11 = vcmp.gt.f32.partialorder %v4794_v59, 0.0  ;;  %v4898_v18 = vsel %vm1243_vm6, %v4860_v17, 0.0  ;;  %v4907_v12 = vsel %vm1243_vm6, %v4863_v36, 0.0 }
 0xf39   :  { %v4840_v33 = vsel %vm4808_vm10, %v4792_v28, %v4824_v20  ;;  %vm14157_vm12 = vmmov 0   ;;  %vm14133_vm13 = vcmask 523264  }
 0xf3a   :  { %v4862_v51 = vmul.f32 %v12433_v34, %v4840_v33  ;;  %v4842_v8 = vsel %vm4810_vm11, %v4794_v59, %v4826_v2  ;;  %v14155_v2 = vld [vmem:[#allocation8_spill] sm:$0xff] }
 0xf3b   :  { %v4864_v44 = vmul.f32 %v12433_v34, %v4842_v8 }
 0xf3c   :  { %4893 = vadd.xlane.f32.xlu0 %v4892_v22  ;;  %4902 = vadd.xlane.f32.xlu1 %v4901_v55  ;;  %v4904_v61 = vsel %vm1243_vm6, %v4862_v51, 0.0  ;;  %v14154_v22 = vld [vmem:[#allocation7_spill] sm:$0xff]  ;;  %v14156_v51 = vld [vmem:[#allocation9_spill] sm:$0xff] }
 0xf3d   :  { %v4910_v41 = vsel %vm1243_vm6, %v4864_v44, 0.0 }
 0xf40   :  { %4899 = vadd.xlane.f32.xlu0 %v4898_v18  ;;  %4908 = vadd.xlane.f32.xlu1 %v4907_v12 }
 0xf44   :  { %4905 = vadd.xlane.f32.xlu0 %v4904_v61 }
 0xf48   :  { %4911 = vadd.xlane.f32.xlu0 %v4910_v41 }
 0xfb5   :  { %v4870_v50 = vpop.xlane.xlu0 %4869  ;;  %v4867_v48 = vpop.xlane.xlu1 %4866 }
 0xfb6   :  { %v4918_v47 = vadd.f32 %v4915_v45, %v4870_v50  ;;  %v4917_v13 = vadd.f32 %v4915_v45, %v4867_v48 }
 0xfb8   :  { %v12502_v29 = vsub.f32 %v4918_v47, %v11151_v4  ;;  %v12505_v54 = vsub.f32 %v4917_v13, %v11145_v0 }
 0xfb9   :  { %v4873_v52 = vpop.xlane.xlu0 %4872  ;;  %v4879_v11 = vpop.xlane.xlu1 %4878 }
 0xfba   :  { %v4919_v43 = vadd.f32 %v4915_v45, %v4873_v52  ;;  %4969 = vperm.xlu0 %9868, %v12502_v29   ;;  %4966 = vperm.xlu1 %9867, %v12505_v54   ;;  %v4921_v37 = vadd.f32 %v4915_v45, %v4879_v11 }
 0xfbc   :  { %v12510_v34 = vsub.f32 %v4919_v43, %v11147_v5  ;;  %v12518_v20 = vsub.f32 %v4921_v37, %v14153_v49 }
 0xfbd   :  { %v4876_v14 = vpop.xlane.xlu0 %4875  ;;  %v4885_v62 = vpop.xlane.xlu1 %4884 }
 0xfbe   :  { %v4920_v28 = vadd.f32 %v4915_v45, %v4876_v14  ;;  %4972 = vperm.xlu1 %9867, %v12510_v34   ;;  %v4923_v59 = vadd.f32 %v4915_v45, %v4885_v62 }
 0xfc0   :  { %v12514_v19 = vsub.f32 %v4920_v28, %v11155_v7  ;;  %v12526_v18 = vsub.f32 %v4923_v59, %v14155_v2 }
 0xfc1   :  { %v4882_v25 = vpop.xlane.xlu0 %4881  ;;  %v4891_v10 = vpop.xlane.xlu1 %4890 }
 0xfc2   :  { %v4922_v26 = vadd.f32 %v4915_v45, %v4882_v25  ;;  %4975 = vperm.xlu1 %9867, %v12514_v19   ;;  %v4925_v12 = vadd.f32 %v4915_v45, %v4891_v10 }
 0xfc4   :  { %v12521_v55 = vsub.f32 %v4922_v26, %v14154_v22  ;;  %v12534_v50 = vsub.f32 %v4925_v12, %v11145_v0 }
 0xfc5   :  { %v4888_v17 = vpop.xlane.xlu0 %4887  ;;  %v4897_v36 = vpop.xlane.xlu1 %4896 }
 0xfc6   :  { %v4924_v33 = vadd.f32 %v4915_v45, %v4888_v17  ;;  %4981 = vperm.xlu0 %9868, %v12521_v55   ;;  %4978 = vperm.xlu1 %9867, %v12518_v20   ;;  %v4927_v48 = vadd.f32 %v4915_v45, %v4897_v36 }
 0xfc8   :  { %v12529_v8 = vsub.f32 %v4924_v33, %v14156_v51  ;;  %v12542_v11 = vsub.f32 %v4927_v48, %v11147_v5 }
 0xfc9   :  { %v4894_v61 = vpop.xlane.xlu0 %4893  ;;  %v4903_v41 = vpop.xlane.xlu1 %4902 }
 0xfca   :  { %v4926_v44 = vadd.f32 %v4915_v45, %v4894_v61  ;;  %4987 = vperm.xlu0 %9868, %v12529_v8   ;;  %4984 = vperm.xlu1 %9867, %v12526_v18   ;;  %v4929_v43 = vadd.f32 %v4915_v45, %v4903_v41 }
 0xfcc   :  { %v12537_v47 = vsub.f32 %v4926_v44, %v11151_v4  ;;  %v12550_v25 = vsub.f32 %v4929_v43, %v14153_v49 }
 0xfcd   :  { %v4900_v13 = vpop.xlane.xlu0 %4899  ;;  %v4909_v62 = vpop.xlane.xlu1 %4908 }
 0xfce   :  { %v4928_v52 = vadd.f32 %v4915_v45, %v4900_v13  ;;  %4993 = vperm.xlu0 %9868, %v12537_v47   ;;  %4990 = vperm.xlu1 %9867, %v12534_v50   ;;  %v4931_v10 = vadd.f32 %v4915_v45, %v4909_v62 }
 0xfd0   :  { %v12545_v14 = vsub.f32 %v4928_v52, %v11155_v7  ;;  %v12558_v36 = vsub.f32 %v4931_v10, %v14155_v2 }
 0xfd1   :  { %v4906_v28 = vpop.xlane.xlu0 %4905 }
 0xfd2   :  { %v4930_v37 = vadd.f32 %v4915_v45, %v4906_v28  ;;  %4999 = vperm.xlu0 %9868, %v12545_v14   ;;  %4996 = vperm.xlu1 %9867, %v12542_v11  }
 0xfd4   :  { %v12553_v26 = vsub.f32 %v4930_v37, %v14154_v22 }
 0xfd5   :  { %v4912_v59 = vpop.xlane.xlu0 %4911 }
 0xfd6   :  { %v4932_v17 = vadd.f32 %v4915_v45, %v4912_v59  ;;  %5005 = vperm.xlu0 %9868, %v12553_v26   ;;  %5002 = vperm.xlu1 %9867, %v12550_v25  }
 0xfd8   :  { %v12561_v33 = vsub.f32 %v4932_v17, %v14156_v51 }
 0xfda   :  { %5011 = vperm.xlu0 %9868, %v12561_v33   ;;  %5008 = vperm.xlu1 %9867, %v12558_v36  }
0x1039   :  { %v4967_v12 = vpop.permute.xlu1 %4966  ;;  %v4970_v44 = vpop.permute.xlu0 %4969 }
0x103a   :  { %v5020_v41 = vrot.slane %v4970_v44, %v11245_v31  ;;  %v5016_v45 = vrot.slane %v4967_v12, %v11245_v31 }
0x103c   :  { %v5077_v43 = vsel %vm2142_vm14, %v5020_v41, %v5016_v45 }
0x103d   :  { %v4973_v61 = vpop.permute.xlu1 %4972 }
0x103e   :  { %v5024_v13 = vrot.slane %v4973_v61, %v11245_v31 }
0x1040   :  { %v5078_v37 = vsel %vm2144_vm15, %v5024_v13, %v5077_v43 }
0x1041   :  { %v4976_v48 = vpop.permute.xlu1 %4975 }
0x1042   :  { %v5028_v52 = vrot.slane %v4976_v48, %v11245_v31 }
0x1044   :  { %v5079_v59 = vsel %vm2146_vm2, %v5028_v52, %v5078_v37 }
0x1045   :  { %v4982_v62 = vpop.permute.xlu0 %4981  ;;  %v4979_v28 = vpop.permute.xlu1 %4978 }
0x1046   :  { %v5032_v10 = vrot.slane %v4979_v28, %v11245_v31  ;;  %v5036_v17 = vrot.slane %v4982_v62, %v11245_v31 }
0x1048   :  { %v5080_v44 = vsel %vm2148_vm3, %v5032_v10, %v5079_v59 }
0x1049   :  { %v4988_v12 = vpop.permute.xlu0 %4987  ;;  %v4985_v51 = vpop.permute.xlu1 %4984  ;;  %v5081_v41 = vsel %vm2150_vm4, %v5036_v17, %v5080_v44 }
0x104a   :  { %v5044_v61 = vrot.slane %v4988_v12, %v11245_v31  ;;  %v5040_v48 = vrot.slane %v4985_v51, %v11245_v31 }
0x104c   :  { %v5082_v45 = vsel %vm2152_vm5, %v5040_v48, %v5081_v41 }
0x104d   :  { %v4994_v2 = vpop.permute.xlu0 %4993  ;;  %v4991_v13 = vpop.permute.xlu1 %4990  ;;  %v5083_v43 = vsel %vm2154_vm7, %v5044_v61, %v5082_v45 }
0x104e   :  { %v5093_v52 = vsel %vm1243_vm6, %v5083_v43, -inf  ;;  %v5052_v62 = vrot.slane %v4994_v2, %v11245_v31  ;;  %v5048_v28 = vrot.slane %v4991_v13, %v11245_v31 }
0x104f   :  { %5094 = vmax.xlane.f32.xlu1 %v5093_v52 }
0x1050   :  { %v5084_v51 = vsel %vm2142_vm14, %v5052_v62, %v5048_v28 }
0x1051   :  { %v5000_v37 = vpop.permute.xlu0 %4999  ;;  %v4997_v10 = vpop.permute.xlu1 %4996 }
0x1052   :  { %v5056_v59 = vrot.slane %v4997_v10, %v11245_v31  ;;  %v5060_v17 = vrot.slane %v5000_v37, %v11245_v31 }
0x1054   :  { %v5085_v44 = vsel %vm2144_vm15, %v5056_v59, %v5084_v51  ;;  %v10089_v51 = vld [vmem:[%s14101_s0 + $0x8] sm:$0xff] }
0x1055   :  { %v5006_v12 = vpop.permute.xlu0 %5005  ;;  %v5003_v48 = vpop.permute.xlu1 %5002  ;;  %v5086_v2 = vsel %vm2146_vm2, %v5060_v17, %v5085_v44  ;;  %v5639_v17 = vld [vmem:[%s14102_s1 + $0x1a8] sm:$0xff]  ;;  %v5640_v44 = vld [vmem:[%s14102_s1 + $0x1b0] sm:$0xff] }
0x1056   :  { %v5064_v61 = vrot.slane %v5003_v48, %v11245_v31  ;;  %v5068_v41 = vrot.slane %v5006_v12, %v11245_v31  ;;  %v5641_v12 = vld [vmem:[%s14102_s1 + $0x1b8] sm:$0xff]  ;;  %v9803_v48 = vpack.c.bf16 %v5640_v44, %v5639_v17 }
0x1058   :  { %v5087_v45 = vsel %vm2148_vm3, %v5064_v61, %v5086_v2  ;;  %v5642_v61 = vld [vmem:[%s14102_s1 + $0x1c0] sm:$0xff]  ;;  %9804 = vmatprep.subr.bf16.mxu1 %v9803_v48 }
0x1059   :  { %v5012_v13 = vpop.permute.xlu0 %5011  ;;  %v5009_v43 = vpop.permute.xlu1 %5008  ;;  %v5088_v28 = vsel %vm2150_vm4, %v5068_v41, %v5087_v45  ;;  %v9807_v41 = vpack.c.bf16 %v5642_v61, %v5641_v12  ;;  %9806 = vmatpush3.bf16.msra.mxu1 %v9803_v48  ;;  %v10090_v2 = vld [vmem:[%s14101_s0] sm:$0xff]  ;;  %v5643_v45 = vld [vmem:[%s14102_s1 + $0x1c8] sm:$0xff] }
0x105a   :  { %v5076_v52 = vrot.slane %v5012_v13, %v11245_v31  ;;  %v5072_v62 = vrot.slane %v5009_v43, %v11245_v31  ;;  %v5644_v13 = vld [vmem:[%s14102_s1 + $0x1d0] sm:$0xff] }
0x105b   :  { %9808 = vmatprep.subr.bf16.mxu1 %v9807_v41  ;;  %v9811_v43 = vpack.c.bf16 %v5644_v13, %v5643_v45 }
0x105c   :  { %v5089_v37 = vsel %vm2152_vm5, %v5072_v62, %v5088_v28 }
0x105d   :  { %v5090_v10 = vsel %vm2154_vm7, %v5076_v52, %v5089_v37  ;;  %9810 = vmatpush3.bf16.msra.mxu1 %v9807_v41 }
0x105e   :  { %v5096_v59 = vsel %vm1243_vm6, %v5090_v10, -inf  ;;  %9812 = vmatprep.subr.bf16.mxu1 %v9811_v43 }
0x105f   :  { %5097 = vmax.xlane.f32.xlu0 %v5096_v59 }
0x1060   :  { %2953 = vrot.lane.b32.xlu1 %v10089_v51, %s10119_s16 }
0x1061   :  { %9814 = vmatpush3.bf16.msra.mxu1 %v9811_v43 }
0x1062   :  { %9598 = vmatprep.subr.mxu1 %v14139_v16 }
0x1075   :  { %2951 = vrot.lane.b32.xlu0 %v10090_v2, %s10119_s16 }
0x10dc   :  { %v5095_v52 = vpop.xlane.xlu1 %5094 }
0x10dd   :  { %v5104_v62 = vrot.slane %v5095_v52, %v10164_v15  ;;  %v5108_v28 = vrot.slane %v5095_v52, %v10898_v58  ;;  %v5112_v37 = vrot.slane %v5095_v52, %v10901_v3  ;;  %v5116_v10 = vrot.slane %v5095_v52, %v10908_v9 }
0x10de   :  { %v5120_v59 = vrot.slane %v5095_v52, %v10911_v32  ;;  %v5124_v12 = vrot.slane %v5095_v52, %v10918_v23  ;;  %v5128_v2 = vrot.slane %v5095_v52, %v11136_v56  ;;  %v5132_v43 = vrot.slane %v5095_v52, %v11141_v6 }
0x10df   :  { %v5181_v51 = vsub.f32 %v12505_v54, %v5104_v62  ;;  %v5182_v17 = vsub.f32 %v12502_v29, %v5108_v28  ;;  %v5183_v44 = vsub.f32 %v12510_v34, %v5112_v37  ;;  %v5184_v48 = vsub.f32 %v12514_v19, %v5116_v10 }
0x10e0   :  { %v5185_v45 = vsub.f32 %v12518_v20, %v5120_v59  ;;  %v5186_v54 = vsub.f32 %v12521_v55, %v5124_v12  ;;  %v5187_v34 = vsub.f32 %v12526_v18, %v5128_v2  ;;  %v5188_v19 = vsub.f32 %v12529_v8, %v5132_v43  ;;  %v2954_v8 = vpop.permute.xlu1 %2953 }
0x10e1   :  { %v5197_v61 = vmul.f32 1.442695, %v5181_v51  ;;  %v5199_v41 = vmul.f32 1.442695, %v5182_v17  ;;  %v5201_v13 = vmul.f32 1.442695, %v5183_v44 }
0x10e2   :  { %v5203_v29 = vmul.f32 1.442695, %v5184_v48  ;;  %v5205_v62 = vmul.f32 1.442695, %v5185_v45  ;;  %v5207_v28 = vmul.f32 1.442695, %v5186_v54 }
0x10e3   :  { %9951 = vpow2.f32 %v5197_v61  ;;  %v5209_v37 = vmul.f32 1.442695, %v5187_v34  ;;  %v5211_v20 = vmul.f32 1.442695, %v5188_v19 }
0x10e4   :  { %9953 = vpow2.f32 %v5199_v41 }
0x10e5   :  { %9955 = vpow2.f32 %v5201_v13 }
0x10e6   :  { %9957 = vpow2.f32 %v5203_v29 }
0x10e7   :  { %9959 = vpow2.f32 %v5205_v62 }
0x10e8   :  { %9961 = vpow2.f32 %v5207_v28 }
0x10e9   :  { %9963 = vpow2.f32 %v5209_v37 }
0x10ea   :  { %9965 = vpow2.f32 %v5211_v20 }
0x10ec   :  { %v5098_v10 = vpop.xlane.xlu0 %5097 }
0x10ed   :  { %v12640_v59 = vpop.eup %9951  ;;  %v5136_v52 = vrot.slane %v5098_v10, %v10164_v15  ;;  %v5140_v55 = vrot.slane %v5098_v10, %v10898_v58  ;;  %v5144_v51 = vrot.slane %v5098_v10, %v10901_v3  ;;  %v5148_v18 = vrot.slane %v5098_v10, %v10908_v9 }
0x10ee   :  { %v12646_v17 = vpop.eup %9953  ;;  %5246 = vperm.xlu1 %9867, %v12640_v59   ;;  %v5152_v44 = vrot.slane %v5098_v10, %v10911_v32  ;;  %v5156_v41 = vrot.slane %v5098_v10, %v10918_v23 }
0x10ef   :  { %v5189_v12 = vsub.f32 %v12534_v50, %v5136_v52  ;;  %v5190_v48 = vsub.f32 %v12537_v47, %v5140_v55  ;;  %v5191_v61 = vsub.f32 %v12542_v11, %v5144_v51  ;;  %5249 = vperm.xlu0 %9868, %v12646_v17   ;;  %v5192_v2 = vsub.f32 %v12545_v14, %v5148_v18  ;;  %v12656_v13 = vpop.eup %9955 }
0x10f0   :  { %v2952_v45 = vpop.permute.xlu0 %2951  ;;  %v12662_v50 = vpop.eup %9957  ;;  %v12666_v47 = vsel %vm439_vm1, %v11595_v21, %v2954_v8  ;;  %v5160_v11 = vrot.slane %v5098_v10, %v11136_v56  ;;  %v5193_v14 = vsub.f32 %v12550_v25, %v5152_v44  ;;  %v5194_v21 = vsub.f32 %v12553_v26, %v5156_v41 }
0x10f1   :  { %v5213_v43 = vmul.f32 1.442695, %v5189_v12  ;;  %v5215_v54 = vmul.f32 1.442695, %v5190_v48  ;;  %v12660_v29 = vsel %vm439_vm1, %v11545_v27, %v2952_v45  ;;  %v5217_v34 = vmul.f32 1.442695, %v5191_v61  ;;  %v12680_v19 = vpop.eup %9959 }
0x10f2   :  { %9595 = vmatprep.mubr.msk.f32.mxu1 %vm3248_vm9, %v12660_v29  ;;  %5252 = vperm.xlu1 %9867, %v12656_v13   ;;  %v5164_v27 = vrot.slane %v5098_v10, %v11141_v6  ;;  %v5219_v62 = vmul.f32 1.442695, %v5192_v2  ;;  %v12682_v28 = vpop.eup %9961  ;;  %v5195_v25 = vsub.f32 %v12558_v36, %v5160_v11  ;;  %v5221_v37 = vmul.f32 1.442695, %v5193_v14 }
0x10f3   :  { %9967 = vpow2.f32 %v5213_v43  ;;  %5255 = vperm.xlu0 %9868, %v12662_v50   ;;  %9596 = vmatmul.mubr.msk.f32.vlgmr.msra.gmra.mrb[68].mxu1 %vm3248_vm9, %v12666_v47  ;;  %v12687_v20 = vpop.eup %9963  ;;  %v5223_v10 = vmul.f32 1.442695, %v5194_v21 }
0x10f4   :  { %9969 = vpow2.f32 %v5215_v54  ;;  %9600 = vmatprep.mubr.msk.f32.mxu1 %vm14157_vm12, %v14139_v16  ;;  %v5196_v26 = vsub.f32 %v12561_v33, %v5164_v27  ;;  %v12690_v52 = vpop.eup %9965  ;;  %v5225_v55 = vmul.f32 1.442695, %v5195_v25 }
0x10f5   :  { %9971 = vpow2.f32 %v5217_v34 }
0x10f6   :  { %5258 = vperm.xlu1 %9867, %v12680_v19   ;;  %9973 = vpow2.f32 %v5219_v62  ;;  %v5227_v36 = vmul.f32 1.442695, %v5196_v26 }
0x10f7   :  { %5261 = vperm.xlu0 %9868, %v12682_v28   ;;  %9975 = vpow2.f32 %v5221_v37 }
0x10f8   :  { %9977 = vpow2.f32 %v5223_v10 }
0x10f9   :  { %9979 = vpow2.f32 %v5225_v55 }
0x10fa   :  { %5264 = vperm.xlu1 %9867, %v12687_v20   ;;  %9981 = vpow2.f32 %v5227_v36 }
0x10fb   :  { %5267 = vperm.xlu0 %9868, %v12690_v52  }
0x10fd   :  { %v12694_v51 = vpop.eup %9967 }
0x10fe   :  { %v12696_v18 = vpop.eup %9969  ;;  %5270 = vperm.xlu1 %9867, %v12694_v51  }
0x10ff   :  { %5273 = vperm.xlu0 %9868, %v12696_v18   ;;  %v12700_v33 = vpop.eup %9971 }
0x1100   :  { %v12702_v8 = vpop.eup %9973 }
0x1101   :  { %v12706_v44 = vpop.eup %9975 }
0x1102   :  { %5276 = vperm.xlu1 %9867, %v12700_v33   ;;  %v12708_v12 = vpop.eup %9977 }
0x1103   :  { %5279 = vperm.xlu0 %9868, %v12702_v8   ;;  %v12712_v48 = vpop.eup %9979 }
0x1104   :  { %v12714_v61 = vpop.eup %9981 }
0x1106   :  { %5282 = vperm.xlu1 %9867, %v12706_v44  }
0x1107   :  { %5285 = vperm.xlu0 %9868, %v12708_v12  }
0x110a   :  { %5288 = vperm.xlu1 %9867, %v12712_v48  }
0x110b   :  { %5291 = vperm.xlu0 %9868, %v12714_v61  }
0x116d   :  { %v5247_v41 = vpop.permute.xlu1 %5246 }
0x116e   :  { %v5250_v2 = vpop.permute.xlu0 %5249  ;;  %v5296_v43 = vrot.slane %v5247_v41, %v11245_v31 }
0x116f   :  { %v5300_v45 = vrot.slane %v5250_v2, %v11245_v31 }
0x1171   :  { %v5253_v54 = vpop.permute.xlu1 %5252  ;;  %v5357_v34 = vsel %vm2142_vm14, %v5300_v45, %v5296_v43 }
0x1172   :  { %v5256_v11 = vpop.permute.xlu0 %5255  ;;  %v5304_v14 = vrot.slane %v5253_v54, %v11245_v31 }
0x1173   :  { %v5308_v27 = vrot.slane %v5256_v11, %v11245_v31 }
0x1174   :  { %v5358_v21 = vsel %vm2144_vm15, %v5304_v14, %v5357_v34 }
0x1175   :  { %v5259_v62 = vpop.permute.xlu1 %5258  ;;  %v5359_v10 = vsel %vm2146_vm2, %v5308_v27, %v5358_v21 }
0x1176   :  { %v5262_v25 = vpop.permute.xlu0 %5261  ;;  %v5312_v37 = vrot.slane %v5259_v62, %v11245_v31 }
0x1177   :  { %v5316_v26 = vrot.slane %v5262_v25, %v11245_v31 }
0x1178   :  { %v5360_v55 = vsel %vm2148_vm3, %v5312_v37, %v5359_v10 }
0x1179   :  { %v5265_v36 = vpop.permute.xlu1 %5264  ;;  %v5361_v43 = vsel %vm2150_vm4, %v5316_v26, %v5360_v55 }
0x117a   :  { %v5268_v41 = vpop.permute.xlu0 %5267  ;;  %v5320_v2 = vrot.slane %v5265_v36, %v11245_v31 }
0x117b   :  { %v5324_v45 = vrot.slane %v5268_v41, %v11245_v31 }
0x117c   :  { %v5362_v54 = vsel %vm2152_vm5, %v5320_v2, %v5361_v43 }
0x117d   :  { %v5271_v11 = vpop.permute.xlu1 %5270  ;;  %v5363_v14 = vsel %vm2154_vm7, %v5324_v45, %v5362_v54 }
0x117e   :  { %v5274_v34 = vpop.permute.xlu0 %5273  ;;  %v5373_v62 = vsel %vm1243_vm6, %v5363_v14, 0.0  ;;  %v5328_v21 = vrot.slane %v5271_v11, %v11245_v31 }
0x117f   :  { %v5332_v27 = vrot.slane %v5274_v34, %v11245_v31  ;;  %5374 = vadd.xlane.f32.xlu1 %v5373_v62 }
0x1181   :  { %v5277_v25 = vpop.permute.xlu1 %5276  ;;  %v5364_v36 = vsel %vm2142_vm14, %v5332_v27, %v5328_v21 }
0x1182   :  { %v5280_v37 = vpop.permute.xlu0 %5279  ;;  %v5336_v10 = vrot.slane %v5277_v25, %v11245_v31 }
0x1183   :  { %v5340_v26 = vrot.slane %v5280_v37, %v11245_v31 }
0x1184   :  { %v5365_v55 = vsel %vm2144_vm15, %v5336_v10, %v5364_v36 }
0x1185   :  { %v5283_v41 = vpop.permute.xlu1 %5282  ;;  %v5366_v54 = vsel %vm2146_vm2, %v5340_v26, %v5365_v55 }
0x1186   :  { %v5286_v2 = vpop.permute.xlu0 %5285  ;;  %v5344_v45 = vrot.slane %v5283_v41, %v11245_v31 }
0x1187   :  { %v5348_v43 = vrot.slane %v5286_v2, %v11245_v31 }
0x1188   :  { %v5367_v11 = vsel %vm2148_vm3, %v5344_v45, %v5366_v54 }
0x1189   :  { %v5289_v14 = vpop.permute.xlu1 %5288  ;;  %v5368_v21 = vsel %vm2150_vm4, %v5348_v43, %v5367_v11 }
0x118a   :  { %v5292_v34 = vpop.permute.xlu0 %5291  ;;  %v5352_v62 = vrot.slane %v5289_v14, %v11245_v31 }
0x118b   :  { %v5356_v27 = vrot.slane %v5292_v34, %v11245_v31 }
0x118c   :  { %v5369_v25 = vsel %vm2152_vm5, %v5352_v62, %v5368_v21 }
0x118d   :  { %v5370_v37 = vsel %vm2154_vm7, %v5356_v27, %v5369_v25 }
0x118e   :  { %v5376_v10 = vsel %vm1243_vm6, %v5370_v37, 0.0 }
0x118f   :  { %5377 = vadd.xlane.f32.xlu0 %v5376_v10 }
0x11c6   :  { %v9597_v36 = vpop.f32.mrb[68].mxu1 }
0x11c7   :  { %v5718_v41 = vpop.f32.mrb[69].mxu1  ;;  %9604 = vmatpush3.msra.mxu0 %v9597_v36 }
0x11c8   :  { %9599 = vmatpush3.msra.mxu1 %v5718_v41 }
0x120c   :  { %v5375_v26 = vpop.xlane.xlu1 %5374 }
0x120d   :  { %v5388_v55 = vrot.slane %v5375_v26, %v10898_v58  ;;  %v5384_v2 = vrot.slane %v5375_v26, %v10164_v15  ;;  %v5392_v45 = vrot.slane %v5375_v26, %v10901_v3  ;;  %v5396_v43 = vrot.slane %v5375_v26, %v10908_v9 }
0x120e   :  { %v5400_v54 = vrot.slane %v5375_v26, %v10911_v32  ;;  %v5404_v11 = vrot.slane %v5375_v26, %v10918_v23  ;;  %v5408_v14 = vrot.slane %v5375_v26, %v11136_v56  ;;  %v5412_v34 = vrot.slane %v5375_v26, %v11141_v6 }
0x120f   :  { %9983 = vrcp.f32 %v5388_v55 }
0x1210   :  { %9985 = vrcp.f32 %v5384_v2 }
0x1211   :  { %9987 = vrcp.f32 %v5392_v45 }
0x1212   :  { %9989 = vrcp.f32 %v5396_v43 }
0x1213   :  { %9991 = vrcp.f32 %v5400_v54 }
0x1214   :  { %9993 = vrcp.f32 %v5404_v11 }
0x1215   :  { %9995 = vrcp.f32 %v5408_v14 }
0x1216   :  { %9997 = vrcp.f32 %v5412_v34 }
0x1219   :  { %v9984_v62 = vpop.eup %9983 }
0x121a   :  { %v9986_v27 = vpop.eup %9985  ;;  %v5464_v21 = vmul.f32 %v9984_v62, %v12646_v17 }
0x121b   :  { %v9988_v25 = vpop.eup %9987  ;;  %v5462_v37 = vmul.f32 %v9986_v27, %v12640_v59 }
0x121c   :  { %v9990_v10 = vpop.eup %9989  ;;  %v5378_v36 = vpop.xlane.xlu0 %5377  ;;  %5513 = vperm.xlu1 %9867, %v5464_v21   ;;  %v5466_v26 = vmul.f32 %v9988_v25, %v12656_v13 }
0x121d   :  { %5510 = vperm.xlu0 %9868, %v5462_v37   ;;  %v5416_v41 = vrot.slane %v5378_v36, %v10164_v15  ;;  %v5420_v55 = vrot.slane %v5378_v36, %v10898_v58  ;;  %v5424_v2 = vrot.slane %v5378_v36, %v10901_v3  ;;  %v5428_v45 = vrot.slane %v5378_v36, %v10908_v9  ;;  %v9992_v43 = vpop.eup %9991 }
0x121e   :  { %v5468_v17 = vmul.f32 %v9990_v10, %v12662_v50  ;;  %v9994_v54 = vpop.eup %9993  ;;  %v5432_v59 = vrot.slane %v5378_v36, %v10911_v32  ;;  %v5470_v11 = vmul.f32 %v9992_v43, %v12680_v19  ;;  %v5436_v14 = vrot.slane %v5378_v36, %v10918_v23 }
0x121f   :  { %9999 = vrcp.f32 %v5416_v41  ;;  %v9996_v34 = vpop.eup %9995  ;;  %v5472_v13 = vmul.f32 %v9994_v54, %v12682_v28  ;;  %v5440_v50 = vrot.slane %v5378_v36, %v11136_v56  ;;  %v5444_v21 = vrot.slane %v5378_v36, %v11141_v6 }
0x1220   :  { %5516 = vperm.xlu1 %9867, %v5466_v26   ;;  %10001 = vrcp.f32 %v5420_v55  ;;  %v9998_v62 = vpop.eup %9997  ;;  %v5474_v27 = vmul.f32 %v9996_v34, %v12687_v20 }
0x1221   :  { %5519 = vperm.xlu0 %9868, %v5468_v17   ;;  %10003 = vrcp.f32 %v5424_v2  ;;  %v5476_v25 = vmul.f32 %v9998_v62, %v12690_v52 }
0x1222   :  { %10005 = vrcp.f32 %v5428_v45 }
0x1223   :  { %10007 = vrcp.f32 %v5432_v59 }
0x1224   :  { %5522 = vperm.xlu1 %9867, %v5470_v11   ;;  %10009 = vrcp.f32 %v5436_v14 }
0x1225   :  { %5525 = vperm.xlu0 %9868, %v5472_v13   ;;  %10011 = vrcp.f32 %v5440_v50 }
0x1226   :  { %10013 = vrcp.f32 %v5444_v21 }
0x1228   :  { %5528 = vperm.xlu1 %9867, %v5474_v27   ;;  %v14161_v27 = vld [vmem:[#allocation10_spill] sm:$0xff] }
0x1229   :  { %v10000_v19 = vpop.eup %9999  ;;  %5531 = vperm.xlu0 %9868, %v5476_v25  }
0x122a   :  { %v10002_v37 = vpop.eup %10001  ;;  %v5478_v28 = vmul.f32 %v10000_v19, %v12694_v51 }
0x122b   :  { %v10004_v10 = vpop.eup %10003  ;;  %v5480_v41 = vmul.f32 %v10002_v37, %v12696_v18 }
0x122c   :  { %v10006_v55 = vpop.eup %10005  ;;  %5534 = vperm.xlu1 %9867, %v5478_v28   ;;  %v5482_v20 = vmul.f32 %v10004_v10, %v12700_v33 }
0x122d   :  { %5537 = vperm.xlu0 %9868, %v5480_v41   ;;  %v10008_v2 = vpop.eup %10007  ;;  %v5484_v36 = vmul.f32 %v10006_v55, %v12702_v8 }
0x122e   :  { %v10010_v52 = vpop.eup %10009  ;;  %v5486_v26 = vmul.f32 %v10008_v2, %v12706_v44 }
0x122f   :  { %v10012_v45 = vpop.eup %10011  ;;  %v5488_v51 = vmul.f32 %v10010_v52, %v12708_v12 }
0x1230   :  { %5540 = vperm.xlu1 %9867, %v5482_v20   ;;  %v10014_v43 = vpop.eup %10013  ;;  %v5490_v18 = vmul.f32 %v10012_v45, %v12712_v48 }
0x1231   :  { %5543 = vperm.xlu0 %9868, %v5484_v36   ;;  %v5492_v17 = vmul.f32 %v10014_v43, %v12714_v61 }
0x1234   :  { %5546 = vperm.xlu1 %9867, %v5486_v26  }
0x1235   :  { %5549 = vperm.xlu0 %9868, %v5488_v51  }
0x1238   :  { %5552 = vperm.xlu1 %9867, %v5490_v18  }
0x1239   :  { %5555 = vperm.xlu0 %9868, %v5492_v17  }
0x123c   :  { %6103 = vrot.lane.b32.xlu1 %v11568_v38, %s10119_s16  ;;  %v14158_v38 = vld [vmem:[#allocation12_spill] sm:$0xff] }
0x123d   :  { %6105 = vrot.lane.b32.xlu0 %v11575_v42, %s10119_s16  ;;  %v14159_v42 = vld [vmem:[#allocation13_spill] sm:$0xff] }
0x1240   :  { %6107 = vrot.lane.b32.xlu1 %v11578_v1, %s10119_s16  ;;  %v14160_v1 = vld [vmem:[#allocation14_spill] sm:$0xff] }
0x1241   :  { %6109 = vrot.lane.b32.xlu0 %v11587_v63, %s10119_s16 }
0x1244   :  { %6111 = vrot.lane.b32.xlu1 %v11591_v60, %s10119_s16 }
0x1245   :  { %6113 = vrot.lane.b32.xlu0 %v11604_v46, %s10119_s16 }
0x1248   :  { %6115 = vrot.lane.b32.xlu1 %v11607_v35, %s10119_s16 }
0x1249   :  { %6117 = vrot.lane.b32.xlu0 %v11619_v53, %s10119_s16 }
0x124c   :  { %6119 = vrot.lane.b32.xlu1 %v11635_v30, %s10119_s16 }
0x124d   :  { %6121 = vrot.lane.b32.xlu0 %v11642_v40, %s10119_s16 }
0x1250   :  { %6123 = vrot.lane.b32.xlu1 %v11645_v57, %s10119_s16 }
0x1251   :  { %6125 = vrot.lane.b32.xlu0 %v11654_v24, %s10119_s16 }
0x1254   :  { %6127 = vrot.lane.b32.xlu1 %v11658_v39, %s10119_s16 }
0x1255   :  { %6129 = vrot.lane.b32.xlu0 %v14158_v38, %s10119_s16 }
0x1258   :  { %6131 = vrot.lane.b32.xlu1 %v14159_v42, %s10119_s16 }
0x1259   :  { %6133 = vrot.lane.b32.xlu0 %v14160_v1, %s10119_s16 }
0x129b   :  { %v5514_v63 = vpop.permute.xlu1 %5513 }
0x129c   :  { %v5511_v60 = vpop.permute.xlu0 %5510  ;;  %v5564_v46 = vrot.slane %v5514_v63, %v11245_v31 }
0x129d   :  { %v5560_v35 = vrot.slane %v5511_v60, %v11245_v31 }
0x129f   :  { %v5517_v53 = vpop.permute.xlu1 %5516  ;;  %v5621_v57 = vsel %vm2142_vm14, %v5564_v46, %v5560_v35  ;;  %v14162_v46 = vld [vmem:[#allocation11_spill] sm:$0xff] }
0x12a0   :  { %v5568_v30 = vrot.slane %v5517_v53, %v11245_v31  ;;  %v5520_v40 = vpop.permute.xlu0 %5519  ;;  %v6167_v53 = vld [vmem:[%s14102_s1 + $0x1e0] sm:$0xff] }
0x12a1   :  { %v5572_v24 = vrot.slane %v5520_v40, %v11245_v31  ;;  %v6169_v40 = vld [vmem:[%s14102_s1 + $0x1f0] sm:$0xff] }
0x12a2   :  { %v5622_v39 = vsel %vm2144_vm15, %v5568_v30, %v5621_v57  ;;  %v6168_v30 = vld [vmem:[%s14102_s1 + $0x1e8] sm:$0xff] }
0x12a3   :  { %v5523_v33 = vpop.permute.xlu1 %5522  ;;  %v5623_v12 = vsel %vm2146_vm2, %v5572_v24, %v5622_v39  ;;  %v9815_v57 = vpack.c.bf16 %v6168_v30, %v6167_v53  ;;  %v6170_v24 = vld [vmem:[%s14102_s1 + $0x1f8] sm:$0xff] }
0x12a4   :  { %v5576_v8 = vrot.slane %v5523_v33, %v11245_v31  ;;  %v5526_v44 = vpop.permute.xlu0 %5525  ;;  %v9819_v39 = vpack.c.bf16 %v6170_v24, %v6169_v40  ;;  %v6171_v33 = vld [vmem:[%s14102_s1 + $0x200] sm:$0xff] }
0x12a5   :  { %v5580_v48 = vrot.slane %v5526_v44, %v11245_v31  ;;  %9816 = vmatprep.subr.bf16.mxu1 %v9815_v57 }
0x12a6   :  { %v5624_v61 = vsel %vm2148_vm3, %v5576_v8, %v5623_v12  ;;  %v6172_v8 = vld [vmem:[%s14102_s1 + $0x208] sm:$0xff]  ;;  %v6173_v12 = vld [vmem:[%s14102_s1 + $0x210] sm:$0xff] }
0x12a7   :  { %v5529_v54 = vpop.permute.xlu1 %5528  ;;  %v5625_v14 = vsel %vm2150_vm4, %v5580_v48, %v5624_v61  ;;  %v9823_v44 = vpack.c.bf16 %v6172_v8, %v6171_v33  ;;  %v6174_v48 = vld [vmem:[%s14102_s1 + $0x218] sm:$0xff] }
0x12a8   :  { %v5584_v59 = vrot.slane %v5529_v54, %v11245_v31  ;;  %v5532_v11 = vpop.permute.xlu0 %5531  ;;  %v9827_v61 = vpack.c.bf16 %v6174_v48, %v6173_v12  ;;  %v8988_v54 = vld [vmem:[%s14102_s1 + $0x1d8] ss:$0 sm:$0xff] }
0x12a9   :  { %v5588_v34 = vrot.slane %v5532_v11, %v11245_v31 }
0x12aa   :  { %v5626_v13 = vsel %vm2152_vm5, %v5584_v59, %v5625_v14 }
0x12ab   :  { %v5627_v62 = vsel %vm2154_vm7, %v5588_v34, %v5626_v13  ;;  %v5535_v50 = vpop.permute.xlu1 %5534 }
0x12ac   :  { %v12830_v21 = vsub.f32 %v14161_v27, %v5627_v62  ;;  %v5538_v25 = vpop.permute.xlu0 %5537  ;;  %v5592_v19 = vrot.slane %v5535_v50, %v11245_v31 }
0x12ad   :  { %v5596_v37 = vrot.slane %v5538_v25, %v11245_v31  ;;  %v14163_v25 = vld [vmem:[#allocation5_spill] sm:$0xff] }
0x12ae   :  { %9601 = vmatmul.mubr.msk.f32.vlgmr.msra.gmra.mrb[70].mxu1 %vm1243_vm6, %v12830_v21 }
0x12af   :  { %v5541_v28 = vpop.permute.xlu1 %5540  ;;  %v5628_v55 = vsel %vm2142_vm14, %v5596_v37, %v5592_v19  ;;  %9818 = vmatpush3.bf16.msra.mxu1 %v9815_v57 }
0x12b0   :  { %v5600_v10 = vrot.slane %v5541_v28, %v11245_v31  ;;  %v5544_v41 = vpop.permute.xlu0 %5543  ;;  %9820 = vmatprep.subr.bf16.mxu1 %v9819_v39 }
0x12b1   :  { %v5604_v20 = vrot.slane %v5544_v41, %v11245_v31 }
0x12b2   :  { %v5629_v2 = vsel %vm2144_vm15, %v5600_v10, %v5628_v55 }
0x12b3   :  { %v5547_v36 = vpop.permute.xlu1 %5546  ;;  %v5630_v45 = vsel %vm2146_vm2, %v5604_v20, %v5629_v2  ;;  %9822 = vmatpush3.bf16.msra.mxu1 %v9819_v39 }
0x12b4   :  { %v5608_v52 = vrot.slane %v5547_v36, %v11245_v31  ;;  %v5550_v26 = vpop.permute.xlu0 %5549  ;;  %9824 = vmatprep.subr.bf16.mxu1 %v9823_v44 }
0x12b5   :  { %v5612_v51 = vrot.slane %v5550_v26, %v11245_v31 }
0x12b6   :  { %v5631_v43 = vsel %vm2148_vm3, %v5608_v52, %v5630_v45 }
0x12b7   :  { %v5553_v18 = vpop.permute.xlu1 %5552  ;;  %v5632_v42 = vsel %vm2150_vm4, %v5612_v51, %v5631_v43  ;;  %9826 = vmatpush3.bf16.msra.mxu1 %v9823_v44 }
0x12b8   :  { %v5616_v17 = vrot.slane %v5553_v18, %v11245_v31  ;;  %v5556_v38 = vpop.permute.xlu0 %5555  ;;  %9828 = vmatprep.subr.bf16.mxu1 %v9827_v61 }
0x12b9   :  { %v5620_v1 = vrot.slane %v5556_v38, %v11245_v31 }
0x12ba   :  { %v5633_v63 = vsel %vm2152_vm5, %v5616_v17, %v5632_v42 }
0x12bb   :  { %v5634_v60 = vsel %vm2154_vm7, %v5620_v1, %v5633_v63  ;;  %9830 = vmatpush3.bf16.msra.mxu1 %v9827_v61  ;;  %v6104_v59 = vpop.permute.xlu1 %6103 }
0x12bc   :  { %v12850_v35 = vsub.f32 %v14162_v46, %v5634_v60  ;;  %v6106_v13 = vpop.permute.xlu0 %6105 }
0x12be   :  { %9606 = vmatmul.mubr.msk.f32.vlgmr.msra.gmra.mrb[66].mxu0 %vm1243_vm6, %v12850_v35 }
0x12bf   :  { %v6108_v27 = vpop.permute.xlu1 %6107 }
0x12c0   :  { %v6110_v55 = vpop.permute.xlu0 %6109 }
0x12c3   :  { %v6112_v45 = vpop.permute.xlu1 %6111 }
0x12c4   :  { %v6114_v30 = vpop.permute.xlu0 %6113 }
0x1381   :  { %v5800_v11 = vpop.f32.mrb[70].mxu1 }
0x1382   :  { %v5801_v14 = vadd.f32 %v8988_v54, %v5800_v11  ;;  %v9602_v34 = vpop.f32.mrb[71].mxu1 }
0x1383   :  { %v6116_v34 = vpop.permute.xlu1 %6115 }
0x1384   :  { %vm5877_vm9 = vcmp.gt.f32.partialorder %v5801_v14, 0.0  ;;  %v5879_v62 = vmul.f32 0.01, %v5801_v14 }
0x1386   :  { %v12881_v50 = vsel %vm5877_vm9, %v5801_v14, %v5879_v62 }
0x1387   :  { %v5900_v19 = vrot.slane %v12881_v50, %v14163_v25  ;;  %v5893_v37 = vcombine.high %v12881_v50, %v12881_v50 }
0x1389   :  { %v5908_v28 = vcombine.high %v5900_v19, %v5900_v19  ;;  %v5916_v10 = vrot.slane %v5900_v19, %v14163_v25  ;;  %v5907_v41 = vrot.slane %v5893_v37, %v14163_v25 }
0x138b   :  { %v5994_v20 = vrot.slane %v5916_v10, %v10164_v15  ;;  %v5930_v2 = vrot.slane %v5908_v28, %v14163_v25  ;;  %v5938_v36 = vcombine.high %v5916_v10, %v5916_v10  ;;  %v5923_v52 = vrot.slane %v5907_v41, %v14163_v25 }
0x138c   :  { %v5909_v26 = vcombine.high %v5907_v41, %v5907_v41  ;;  %v6118_v41 = vpop.permute.xlu0 %6117 }
0x138d   :  { %v6071_v51 = vsub.f32 %v5994_v20, %v12881_v50  ;;  %v5998_v43 = vrot.slane %v5930_v2, %v10164_v15  ;;  %v6002_v18 = vrot.slane %v5938_v36, %v10164_v15  ;;  %v5940_v17 = vcombine.high %v5930_v2, %v5930_v2 }
0x138e   :  { %v6010_v38 = vrot.slane %v5923_v52, %v10164_v15  ;;  %v5937_v42 = vrot.slane %v5909_v26, %v14163_v25  ;;  %v5939_v1 = vcombine.high %v5923_v52, %v5923_v52 }
0x138f   :  { %v6087_v63 = vand.u32 2147483647, %v6071_v51  ;;  %v6072_v60 = vsub.f32 %v5998_v43, %v12881_v50  ;;  %v6073_v46 = vsub.f32 %v6002_v18, %v12881_v50  ;;  %v6006_v53 = vrot.slane %v5940_v17, %v10164_v15  ;;  %v6120_v43 = vpop.permute.xlu1 %6119 }
0x1390   :  { %v6075_v40 = vsub.f32 %v6010_v38, %v12881_v50  ;;  %v6014_v57 = vrot.slane %v5937_v42, %v10164_v15  ;;  %v6018_v24 = vrot.slane %v5939_v1, %v10164_v15  ;;  %v5941_v39 = vcombine.high %v5937_v42, %v5937_v42 }
0x1391   :  { %v5873_v33 = vpop.f32.mrb[66].mxu0  ;;  %v6151_v8 = vsel %vm439_vm1, %v6087_v63, %v6104_v59  ;;  %v6088_v44 = vand.u32 2147483647, %v6072_v60  ;;  %v6089_v12 = vand.u32 2147483647, %v6073_v46  ;;  %v6074_v48 = vsub.f32 %v6006_v53, %v12881_v50 }
0x1392   :  { %v5874_v61 = vadd.f32 %v8988_v54, %v5873_v33  ;;  %v9607_v11 = vpop.f32.mrb[67].mxu0  ;;  %9624 = vmatprep.mubr.msk.f32.mxu1 %vm14133_vm13, %v6151_v8  ;;  %v6076_v14 = vsub.f32 %v6014_v57, %v12881_v50  ;;  %v6022_v28 = vrot.slane %v5941_v39, %v10164_v15  ;;  %v6091_v10 = vand.u32 2147483647, %v6075_v40 }
0x1393   :  { %v6152_v62 = vsel %vm439_vm1, %v6088_v44, %v6106_v13  ;;  %v6153_v19 = vsel %vm439_vm1, %v6089_v12, %v6108_v27  ;;  %v6090_v37 = vand.u32 2147483647, %v6074_v48  ;;  %v6077_v54 = vsub.f32 %v6018_v24, %v12881_v50  ;;  %v6124_v48 = vpop.permute.xlu1 %6123 }
0x1394   :  { %vm5878_vm8 = vcmp.gt.f32.partialorder %v5874_v61, 0.0  ;;  %v5880_v59 = vmul.f32 0.01, %v5874_v61  ;;  %9625 = vmatmul.mubr.msk.f32.vlgmr.msra.gmra.mrb[72].mxu1 %vm14133_vm13, %v6152_v62  ;;  %v6092_v2 = vand.u32 2147483647, %v6076_v14  ;;  %v6078_v13 = vsub.f32 %v6022_v28, %v12881_v50 }
0x1395   :  { %9627 = vmatprep.mubr.msk.f32.mxu1 %vm14133_vm13, %v6153_v19  ;;  %v6154_v27 = vsel %vm439_vm1, %v6090_v37, %v6110_v55  ;;  %v6155_v26 = vsel %vm439_vm1, %v6091_v10, %v6112_v45  ;;  %v6093_v51 = vand.u32 2147483647, %v6077_v54  ;;  %v6122_v45 = vpop.permute.xlu0 %6121 }
0x1396   :  { %v12913_v20 = vsel %vm5878_vm8, %v5874_v61, %v5880_v59  ;;  %v6156_v55 = vsel %vm439_vm1, %v6092_v2, %v6114_v30  ;;  %v6094_v42 = vand.u32 2147483647, %v6078_v13 }
0x1397   :  { %v5949_v36 = vrot.slane %v12913_v20, %v14163_v25  ;;  %v5942_v52 = vcombine.high %v12913_v20, %v12913_v20  ;;  %v6157_v53 = vsel %vm439_vm1, %v6093_v51, %v6116_v34 }
0x1398   :  { %9628 = vmatmul.mubr.msk.f32.gmra.mrb[74].mxu1 %vm14133_vm13, %v6154_v27  ;;  %v6158_v33 = vsel %vm439_vm1, %v6094_v42, %v6118_v41 }
0x1399   :  { %9630 = vmatprep.mubr.msk.f32.mxu1 %vm14133_vm13, %v6155_v26  ;;  %v5965_v18 = vrot.slane %v5949_v36, %v14163_v25  ;;  %v5957_v17 = vcombine.high %v5949_v36, %v5949_v36  ;;  %v5956_v38 = vrot.slane %v5942_v52, %v14163_v25  ;;  %v6126_v41 = vpop.permute.xlu0 %6125 }
0x139b   :  { %v6026_v1 = vrot.slane %v5965_v18, %v10164_v15  ;;  %v5979_v63 = vrot.slane %v5957_v17, %v14163_v25  ;;  %v5987_v60 = vcombine.high %v5965_v18, %v5965_v18  ;;  %v5972_v46 = vrot.slane %v5956_v38, %v14163_v25 }
0x139c   :  { %9631 = vmatmul.mubr.msk.f32.gmra.mrb[76].mxu1 %vm14133_vm13, %v6156_v55  ;;  %v5958_v40 = vcombine.high %v5956_v38, %v5956_v38 }
0x139d   :  { %9633 = vmatprep.mubr.msk.f32.mxu1 %vm14133_vm13, %v6157_v53  ;;  %v6079_v57 = vsub.f32 %v6026_v1, %v12913_v20  ;;  %v6030_v30 = vrot.slane %v5979_v63, %v10164_v15  ;;  %v6034_v24 = vrot.slane %v5987_v60, %v10164_v15  ;;  %v5989_v39 = vcombine.high %v5979_v63, %v5979_v63  ;;  %v6130_v55 = vpop.permute.xlu0 %6129 }
0x139e   :  { %v6042_v8 = vrot.slane %v5972_v46, %v10164_v15  ;;  %v5986_v44 = vrot.slane %v5958_v40, %v14163_v25  ;;  %v5988_v12 = vcombine.high %v5972_v46, %v5972_v46 }
0x139f   :  { %v6095_v61 = vand.u32 2147483647, %v6079_v57  ;;  %v6080_v11 = vsub.f32 %v6030_v30, %v12913_v20  ;;  %v6081_v14 = vsub.f32 %v6034_v24, %v12913_v20  ;;  %v6038_v34 = vrot.slane %v5989_v39, %v10164_v15  ;;  %v6575_v57 = vld [vmem:[%s14102_s1 + $0x238] sm:$0xff]  ;;  %v6576_v30 = vld [vmem:[%s14102_s1 + $0x240] sm:$0xff] }
0x13a0   :  { %9634 = vmatmul.mubr.msk.f32.gmra.mrb[78].mxu1 %vm14133_vm13, %v6158_v33  ;;  %v6083_v62 = vsub.f32 %v6042_v8, %v12913_v20  ;;  %v6046_v19 = vrot.slane %v5986_v44, %v10164_v15  ;;  %v6050_v37 = vrot.slane %v5988_v12, %v10164_v15  ;;  %v5990_v28 = vcombine.high %v5986_v44, %v5986_v44  ;;  %v8991_v39 = vld [vmem:[%s14102_s1 + $0x220] ss:$0 sm:$0xff] }
0x13a1   :  { %v6159_v25 = vsel %vm439_vm1, %v6095_v61, %v6120_v43  ;;  %v6096_v59 = vand.u32 2147483647, %v6080_v11  ;;  %v6097_v10 = vand.u32 2147483647, %v6081_v14  ;;  %v6082_v54 = vsub.f32 %v6038_v34, %v12913_v20  ;;  %v6128_v43 = vpop.permute.xlu1 %6127  ;;  %v6134_v53 = vpop.permute.xlu0 %6133 }
0x13a2   :  { %9636 = vmatprep.mubr.msk.f32.mxu1 %vm14133_vm13, %v6159_v25  ;;  %v6084_v2 = vsub.f32 %v6046_v19, %v12913_v20  ;;  %v6054_v52 = vrot.slane %v5990_v28, %v10164_v15  ;;  %v6099_v26 = vand.u32 2147483647, %v6083_v62  ;;  %v6085_v51 = vsub.f32 %v6050_v37, %v12913_v20 }
0x13a3   :  { %v6160_v13 = vsel %vm439_vm1, %v6096_v59, %v6122_v45  ;;  %v6161_v27 = vsel %vm439_vm1, %v6097_v10, %v6124_v48  ;;  %v6098_v36 = vand.u32 2147483647, %v6082_v54  ;;  %v9831_v24 = vpack.c.bf16 %v6576_v30, %v6575_v57 }
0x13a4   :  { %9637 = vmatmul.mubr.msk.f32.gmra.mrb[80].mxu1 %vm14133_vm13, %v6160_v13  ;;  %v6100_v17 = vand.u32 2147483647, %v6084_v2  ;;  %v6086_v38 = vsub.f32 %v6054_v52, %v12913_v20  ;;  %v6163_v42 = vsel %vm439_vm1, %v6099_v26, %v6128_v43  ;;  %v6101_v1 = vand.u32 2147483647, %v6085_v51 }
0x13a5   :  { %9639 = vmatprep.mubr.msk.f32.mxu1 %vm14133_vm13, %v6161_v27  ;;  %v6162_v18 = vsel %vm439_vm1, %v6098_v36, %v6126_v41  ;;  %v6132_v63 = vpop.permute.xlu1 %6131  ;;  %9832 = vmatprep.subr.bf16.mxu0 %v9831_v24 }
0x13a6   :  { %v6164_v60 = vsel %vm439_vm1, %v6100_v17, %v6130_v55  ;;  %v6102_v46 = vand.u32 2147483647, %v6086_v38  ;;  %v6165_v45 = vsel %vm439_vm1, %v6101_v1, %v6132_v63  ;;  %9834 = vmatpush3.bf16.msra.mxu0 %v9831_v24 }
0x13a8   :  { %9640 = vmatmul.mubr.msk.f32.gmra.mrb[82].mxu1 %vm14133_vm13, %v6162_v18  ;;  %v6166_v40 = vsel %vm439_vm1, %v6102_v46, %v6134_v53 }
0x13a9   :  { %9642 = vmatprep.mubr.msk.f32.mxu1 %vm14133_vm13, %v6163_v42 }
0x13ac   :  { %9643 = vmatmul.mubr.msk.f32.gmra.mrb[84].mxu1 %vm14133_vm13, %v6164_v60 }
0x13ad   :  { %9645 = vmatprep.mubr.msk.f32.mxu1 %vm14133_vm13, %v6165_v45 }
0x13b0   :  { %9646 = vmatmul.mubr.msk.f32.gmra.mrb[86].mxu1 %vm14133_vm13, %v6166_v40 }
0x1467   :  { %v9626_v33 = vpop.f32.mrb[72].mxu1 }
0x1468   :  { %v12976_v8 = vadd.f32 %v9626_v33, %v8991_v39  ;;  %v6297_v44 = vpop.f32.mrb[73].mxu1 }
0x1469   :  { %v12978_v12 = vadd.f32 %v8991_v39, %v6297_v44 }
0x146a   :  { %v6377_v48 = vsel %vm439_vm1, %v12976_v8, 0.0 }
0x146b   :  { %v6376_v61 = vsel %vm439_vm1, %v12978_v12, 0.0  ;;  %v9629_v11 = vpop.f32.mrb[74].mxu1 }
0x146c   :  { %v6378_v14 = vadd.f32 %v6377_v48, %v6376_v61  ;;  %v6307_v34 = vpop.f32.mrb[75].mxu1  ;;  %v12984_v62 = vadd.f32 %v9629_v11, %v8991_v39 }
0x146d   :  { %v6308_v19 = vadd.f32 %v8991_v39, %v6307_v34 }
0x146e   :  { %v6381_v10 = vsel %vm439_vm1, %v12984_v62, 0.0 }
0x146f   :  { %v6379_v37 = vsel %vm439_vm1, %v6308_v19, 0.0  ;;  %v9632_v28 = vpop.f32.mrb[76].mxu1 }
0x1470   :  { %v6380_v25 = vadd.f32 %v6379_v37, %v6378_v14  ;;  %v6317_v59 = vpop.f32.mrb[77].mxu1  ;;  %v6323_v54 = vadd.f32 %v9632_v28, %v8991_v39 }
0x1471   :  { %v6318_v41 = vadd.f32 %v8991_v39, %v6317_v59 }
0x1472   :  { %v6382_v2 = vadd.f32 %v6381_v10, %v6380_v25  ;;  %v6385_v26 = vsel %vm439_vm1, %v6323_v54, 0.0 }
0x1473   :  { %v6383_v13 = vsel %vm439_vm1, %v6318_v41, 0.0  ;;  %v9635_v27 = vpop.f32.mrb[78].mxu1 }
0x1474   :  { %v6384_v36 = vadd.f32 %v6383_v13, %v6382_v2  ;;  %v6327_v52 = vpop.f32.mrb[79].mxu1  ;;  %v6333_v51 = vadd.f32 %v9635_v27, %v8991_v39 }
0x1475   :  { %v6328_v43 = vadd.f32 %v8991_v39, %v6327_v52 }
0x1476   :  { %v6386_v18 = vadd.f32 %v6385_v26, %v6384_v36  ;;  %v6389_v1 = vsel %vm439_vm1, %v6333_v51, 0.0 }
0x1477   :  { %v6387_v17 = vsel %vm439_vm1, %v6328_v43, 0.0  ;;  %v9638_v38 = vpop.f32.mrb[80].mxu1 }
0x1478   :  { %v6388_v55 = vadd.f32 %v6387_v17, %v6386_v18  ;;  %v6337_v42 = vpop.f32.mrb[81].mxu1  ;;  %v6343_v63 = vadd.f32 %v9638_v38, %v8991_v39 }
0x1479   :  { %v6338_v60 = vadd.f32 %v8991_v39, %v6337_v42 }
0x147a   :  { %v6390_v46 = vadd.f32 %v6389_v1, %v6388_v55  ;;  %v6393_v30 = vsel %vm439_vm1, %v6343_v63, 0.0 }
0x147b   :  { %v6391_v45 = vsel %vm439_vm1, %v6338_v60, 0.0  ;;  %v9641_v53 = vpop.f32.mrb[82].mxu1 }
0x147c   :  { %v6392_v40 = vadd.f32 %v6391_v45, %v6390_v46  ;;  %v6347_v57 = vpop.f32.mrb[83].mxu1  ;;  %v6353_v24 = vadd.f32 %v9641_v53, %v8991_v39 }
0x147d   :  { %v6348_v33 = vadd.f32 %v8991_v39, %v6347_v57 }
0x147e   :  { %v6394_v44 = vadd.f32 %v6393_v30, %v6392_v40  ;;  %v6397_v34 = vsel %vm439_vm1, %v6353_v24, 0.0 }
0x147f   :  { %v6395_v48 = vsel %vm439_vm1, %v6348_v33, 0.0  ;;  %v9644_v61 = vpop.f32.mrb[84].mxu1 }
0x1480   :  { %v6396_v11 = vadd.f32 %v6395_v48, %v6394_v44  ;;  %v6357_v14 = vpop.f32.mrb[85].mxu1  ;;  %v6363_v37 = vadd.f32 %v9644_v61, %v8991_v39 }
0x1481   :  { %v6358_v28 = vadd.f32 %v8991_v39, %v6357_v14 }
0x1482   :  { %v6398_v25 = vadd.f32 %v6397_v34, %v6396_v11  ;;  %v6401_v27 = vsel %vm439_vm1, %v6363_v37, 0.0 }
0x1483   :  { %v6399_v59 = vsel %vm439_vm1, %v6358_v28, 0.0  ;;  %v9647_v10 = vpop.f32.mrb[86].mxu1 }
0x1484   :  { %v6400_v2 = vadd.f32 %v6399_v59, %v6398_v25  ;;  %v6367_v13 = vpop.f32.mrb[87].mxu1  ;;  %v6373_v36 = vadd.f32 %v9647_v10, %v8991_v39 }
0x1485   :  { %v6368_v52 = vadd.f32 %v8991_v39, %v6367_v13 }
0x1486   :  { %v6402_v26 = vadd.f32 %v6401_v27, %v6400_v2  ;;  %v6405_v38 = vsel %vm439_vm1, %v6373_v36, 0.0 }
0x1487   :  { %v6403_v18 = vsel %vm439_vm1, %v6368_v52, 0.0 }
0x1488   :  { %v6404_v17 = vadd.f32 %v6403_v18, %v6402_v26 }
0x148a   :  { %v6406_v55 = vadd.f32 %v6405_v38, %v6404_v17 }
0x148c   :  { %v6407_v42 = vrot.slane %v6406_v55, 4 }
0x148e   :  { %v6408_v1 = vadd.f32 %v6407_v42, %v6406_v55 }
0x1490   :  { %v6409_v46 = vrot.slane %v6408_v1, 2 }
0x1492   :  { %v6410_v45 = vadd.f32 %v6409_v46, %v6408_v1 }
0x1494   :  { %v6411_v53 = vrot.slane %v6410_v45, 1 }
0x1496   :  { %v6412_v40 = vadd.f32 %v6411_v53, %v6410_v45 }
0x1498   :  { %v6413_v57 = vmul.f32 0.0078125, %v6412_v40 }
0x149a   :  { %v13002_v30 = vsub.f32 %v12978_v12, %v6413_v57  ;;  %v13005_v44 = vsub.f32 %v12976_v8, %v6413_v57  ;;  %v13007_v39 = vsub.f32 %v6308_v19, %v6413_v57  ;;  %v13010_v48 = vsub.f32 %v12984_v62, %v6413_v57 }
0x149b   :  { %v13012_v61 = vsub.f32 %v6318_v41, %v6413_v57  ;;  %v13014_v11 = vsub.f32 %v6323_v54, %v6413_v57  ;;  %v13016_v14 = vsub.f32 %v6328_v43, %v6413_v57  ;;  %v13018_v34 = vsub.f32 %v6333_v51, %v6413_v57 }
0x149c   :  { %v13020_v25 = vsub.f32 %v6338_v60, %v6413_v57  ;;  %v13022_v12 = vsub.f32 %v6343_v63, %v6413_v57  ;;  %v13024_v59 = vsub.f32 %v6348_v33, %v6413_v57  ;;  %v13026_v8 = vsub.f32 %v6353_v24, %v6413_v57 }
0x149d   :  { %v13028_v19 = vsub.f32 %v6358_v28, %v6413_v57  ;;  %v13030_v62 = vsub.f32 %v6363_v37, %v6413_v57  ;;  %v13032_v41 = vsub.f32 %v6368_v52, %v6413_v57  ;;  %v13034_v54 = vsub.f32 %v6373_v36, %v6413_v57 }
0x149e   :  { %v6430_v51 = vmul.f32 %v13002_v30, %v13002_v30  ;;  %v6431_v43 = vmul.f32 %v13005_v44, %v13005_v44  ;;  %v6432_v63 = vmul.f32 %v13007_v39, %v13007_v39  ;;  %v6433_v60 = vmul.f32 %v13010_v48, %v13010_v48 }
0x149f   :  { %v6434_v28 = vmul.f32 %v13012_v61, %v13012_v61  ;;  %v6435_v13 = vmul.f32 %v13014_v11, %v13014_v11  ;;  %v6436_v52 = vmul.f32 %v13016_v14, %v13016_v14  ;;  %v6437_v17 = vmul.f32 %v13018_v34, %v13018_v34 }
0x14a0   :  { %v6446_v24 = vsel %vm439_vm1, %v6430_v51, 0.0  ;;  %v6447_v33 = vsel %vm439_vm1, %v6431_v43, 0.0  ;;  %v6449_v10 = vsel %vm439_vm1, %v6432_v63, 0.0  ;;  %v6451_v27 = vsel %vm439_vm1, %v6433_v60, 0.0 }
0x14a1   :  { %v6448_v37 = vadd.f32 %v6447_v33, %v6446_v24  ;;  %v6453_v26 = vsel %vm439_vm1, %v6434_v28, 0.0  ;;  %v6455_v38 = vsel %vm439_vm1, %v6435_v13, 0.0  ;;  %v6438_v42 = vmul.f32 %v13020_v25, %v13020_v25 }
0x14a2   :  { %v6457_v1 = vsel %vm439_vm1, %v6436_v52, 0.0  ;;  %v6439_v45 = vmul.f32 %v13022_v12, %v13022_v12  ;;  %v6459_v53 = vsel %vm439_vm1, %v6437_v17, 0.0  ;;  %v6440_v57 = vmul.f32 %v13024_v59, %v13024_v59 }
0x14a3   :  { %v6450_v2 = vadd.f32 %v6449_v10, %v6448_v37  ;;  %v6461_v51 = vsel %vm439_vm1, %v6438_v42, 0.0  ;;  %v6441_v63 = vmul.f32 %v13026_v8, %v13026_v8  ;;  %v6442_v33 = vmul.f32 %v13028_v19, %v13028_v19 }
0x14a4   :  { %v6463_v60 = vsel %vm439_vm1, %v6439_v45, 0.0  ;;  %v6465_v37 = vsel %vm439_vm1, %v6440_v57, 0.0  ;;  %v6443_v10 = vmul.f32 %v13030_v62, %v13030_v62 }
0x14a5   :  { %v6452_v36 = vadd.f32 %v6451_v27, %v6450_v2  ;;  %v6467_v2 = vsel %vm439_vm1, %v6441_v63, 0.0  ;;  %v6444_v27 = vmul.f32 %v13032_v41, %v13032_v41 }
0x14a7   :  { %v6454_v18 = vadd.f32 %v6453_v26, %v6452_v36  ;;  %v6469_v36 = vsel %vm439_vm1, %v6442_v33, 0.0  ;;  %v6445_v26 = vmul.f32 %v13034_v54, %v13034_v54 }
0x14a9   :  { %v6456_v55 = vadd.f32 %v6455_v38, %v6454_v18  ;;  %v6471_v18 = vsel %vm439_vm1, %v6443_v10, 0.0  ;;  %v6473_v38 = vsel %vm439_vm1, %v6444_v27, 0.0  ;;  %v6475_v42 = vsel %vm439_vm1, %v6445_v26, 0.0 }
0x14ab   :  { %v6458_v46 = vadd.f32 %v6457_v1, %v6456_v55 }
0x14ad   :  { %v6460_v40 = vadd.f32 %v6459_v53, %v6458_v46 }
0x14af   :  { %v6462_v43 = vadd.f32 %v6461_v51, %v6460_v40 }
0x14b1   :  { %v6464_v24 = vadd.f32 %v6463_v60, %v6462_v43  ;;  %v6176_v60 = vld [vmem:[%s14102_s1 + $0x228] sm:$0x1] }
0x14b3   :  { %v6466_v28 = vadd.f32 %v6465_v37, %v6464_v24 }
0x14b5   :  { %v6468_v13 = vadd.f32 %v6467_v2, %v6466_v28  ;;  %v13093_v28 = vld [vmem:[%s14102_s1 + $0x230] ss:$0 sm:$0xff] }
0x14b7   :  { %v6470_v52 = vadd.f32 %v6469_v36, %v6468_v13 }
0x14b9   :  { %v6472_v17 = vadd.f32 %v6471_v18, %v6470_v52 }
0x14bb   :  { %v6474_v55 = vadd.f32 %v6473_v38, %v6472_v17 }
0x14bd   :  { %v6476_v1 = vadd.f32 %v6475_v42, %v6474_v55 }
0x14bf   :  { %v6477_v46 = vrot.slane %v6476_v1, 4 }
0x14c1   :  { %v6478_v45 = vadd.f32 %v6477_v46, %v6476_v1 }
0x14c3   :  { %v6479_v53 = vrot.slane %v6478_v45, 2 }
0x14c5   :  { %v6480_v40 = vadd.f32 %v6479_v53, %v6478_v45 }
0x14c7   :  { %v6481_v57 = vrot.slane %v6480_v40, 1 }
0x14c9   :  { %v6482_v51 = vadd.f32 %v6481_v57, %v6480_v40 }
0x14cb   :  { %v6483_v43 = vmul.f32 0.0078125, %v6482_v51 }
0x14cd   :  { %v6484_v63 = vadd.f32 1e-05, %v6483_v43 }
0x14cf   :  { %10015 = vrsqrt.f32 %v6484_v63 }
0x14d9   :  { %v10016_v24 = vpop.eup %10015 }
0x14da   :  { %v6486_v33 = vmul.f32 %v10016_v24, %v6176_v60 }
0x14dc   :  { %v13088_v37 = vrot.slane %v6486_v33, %v10164_v15 }
0x14de   :  { %v13097_v10 = vmul.f32 %v13088_v37, %v13032_v41  ;;  %v6491_v2 = vmul.f32 %v13088_v37, %v13002_v30  ;;  %v6492_v13 = vmul.f32 %v13088_v37, %v13005_v44  ;;  %v6493_v27 = vmul.f32 %v13088_v37, %v13007_v39 }
0x14df   :  { %v6494_v36 = vmul.f32 %v13088_v37, %v13010_v48  ;;  %v6495_v52 = vmul.f32 %v13088_v37, %v13012_v61  ;;  %v6497_v26 = vmul.f32 %v13088_v37, %v13016_v14  ;;  %v6496_v39 = vmul.f32 %v13088_v37, %v13014_v11 }
0x14e0   :  { %v6511_v41 = vadd.f32 %v13093_v28, %v6491_v2  ;;  %v6512_v18 = vadd.f32 %v13093_v28, %v6492_v13  ;;  %v6513_v30 = vadd.f32 %v13093_v28, %v6493_v27  ;;  %v6498_v53 = vmul.f32 %v13088_v37, %v13018_v34 }
0x14e1   :  { %v6514_v44 = vadd.f32 %v13093_v28, %v6494_v36  ;;  %v6515_v17 = vadd.f32 %v13093_v28, %v6495_v52  ;;  %v6516_v1 = vadd.f32 %v13093_v28, %v6496_v39  ;;  %v6517_v46 = vadd.f32 %v13093_v28, %v6497_v26 }
0x14e2   :  { %vm6527_vm0 = vcmp.gt.f32.partialorder %v6511_v41, 0.0  ;;  %v6543_v48 = vmul.f32 0.01, %v6511_v41  ;;  %vm6528_vm10 = vcmp.gt.f32.partialorder %v6512_v18, 0.0  ;;  %v6544_v61 = vmul.f32 0.01, %v6512_v18 }
0x14e3   :  { %vm6529_vm11 = vcmp.gt.f32.partialorder %v6513_v30, 0.0  ;;  %v6545_v38 = vmul.f32 0.01, %v6513_v30  ;;  %v6546_v42 = vmul.f32 0.01, %v6514_v44  ;;  %vm6530_vm9 = vcmp.gt.f32.partialorder %v6514_v44, 0.0 }
0x14e4   :  { %v6559_v14 = vsel %vm6527_vm0, %v6511_v41, %v6543_v48  ;;  %v6560_v55 = vsel %vm6528_vm10, %v6512_v18, %v6544_v61  ;;  %v6547_v11 = vmul.f32 0.01, %v6515_v17  ;;  %vm6531_vm8 = vcmp.gt.f32.partialorder %v6515_v17, 0.0 }
0x14e5   :  { %9652 = vmatprep.mubr.msk.f32.mxu0 %vm439_vm1, %v6559_v14  ;;  %v6561_v45 = vsel %vm6529_vm11, %v6513_v30, %v6545_v38  ;;  %v6499_v40 = vmul.f32 %v13088_v37, %v13020_v25  ;;  %v6501_v57 = vmul.f32 %v13088_v37, %v13024_v59  ;;  %v6503_v51 = vmul.f32 %v13088_v37, %v13028_v19 }
0x14e6   :  { %9653 = vmatmul.mubr.msk.f32.vlgmr.msra.gmra.mrb[68].mxu0 %vm439_vm1, %v6560_v55  ;;  %v6562_v43 = vsel %vm6530_vm9, %v6514_v44, %v6546_v42  ;;  %v6548_v63 = vmul.f32 0.01, %v6516_v1  ;;  %v6518_v60 = vadd.f32 %v13093_v28, %v6498_v53  ;;  %v6500_v24 = vmul.f32 %v13088_v37, %v13022_v12  ;;  %v6977_v53 = vld [vmem:[%s14102_s1 + $0x268] sm:$0xff] }
0x14e7   :  { %9655 = vmatprep.mubr.msk.f32.mxu0 %vm439_vm1, %v6561_v45  ;;  %v6563_v34 = vsel %vm6531_vm8, %v6515_v17, %v6547_v11  ;;  %vm6532_vm0 = vcmp.gt.f32.partialorder %v6516_v1, 0.0  ;;  %v6549_v33 = vmul.f32 0.01, %v6517_v46  ;;  %v6519_v25 = vadd.f32 %v13093_v28, %v6499_v40 }
0x14e8   :  { %vm6533_vm10 = vcmp.gt.f32.partialorder %v6517_v46, 0.0  ;;  %v6564_v59 = vsel %vm6532_vm0, %v6516_v1, %v6548_v63  ;;  %v6550_v2 = vmul.f32 0.01, %v6518_v60  ;;  %v6520_v19 = vadd.f32 %v13093_v28, %v6500_v24 }
0x14e9   :  { %v6502_v13 = vmul.f32 %v13088_v37, %v13026_v8  ;;  %v6565_v12 = vsel %vm6533_vm10, %v6517_v46, %v6549_v33  ;;  %vm6534_vm11 = vcmp.gt.f32.partialorder %v6518_v60, 0.0  ;;  %v6551_v27 = vmul.f32 0.01, %v6519_v25 }
0x14ea   :  { %9656 = vmatmul.mubr.msk.f32.gmra.mrb[70].mxu0 %vm439_vm1, %v6562_v43  ;;  %v6521_v36 = vadd.f32 %v13093_v28, %v6501_v57  ;;  %vm6535_vm9 = vcmp.gt.f32.partialorder %v6519_v25, 0.0  ;;  %v6566_v52 = vsel %vm6534_vm11, %v6518_v60, %v6550_v2  ;;  %v6552_v26 = vmul.f32 0.01, %v6520_v19  ;;  %v9009_v57 = vld [vmem:[%s14102_s1 + $0x248] ss:$0 sm:$0xff] }
0x14eb   :  { %9658 = vmatprep.mubr.msk.f32.mxu0 %vm439_vm1, %v6563_v34  ;;  %v6522_v41 = vadd.f32 %v13093_v28, %v6502_v13  ;;  %v6504_v18 = vmul.f32 %v13088_v37, %v13030_v62  ;;  %v6567_v8 = vsel %vm6535_vm9, %v6519_v25, %v6551_v27  ;;  %vm6536_vm8 = vcmp.gt.f32.partialorder %v6520_v19, 0.0 }
0x14ec   :  { %v6553_v30 = vmul.f32 0.01, %v6521_v36  ;;  %v6523_v44 = vadd.f32 %v13093_v28, %v6503_v51  ;;  %vm6537_vm0 = vcmp.gt.f32.partialorder %v6521_v36, 0.0  ;;  %v6568_v17 = vsel %vm6536_vm8, %v6520_v19, %v6552_v26 }
0x14ed   :  { %v6554_v39 = vmul.f32 0.01, %v6522_v41  ;;  %v6524_v48 = vadd.f32 %v13093_v28, %v6504_v18  ;;  %v6506_v61 = vmul.f32 %v13088_v37, %v13034_v54  ;;  %v6525_v62 = vadd.f32 %v13093_v28, %v13097_v10 }
0x14ee   :  { %9659 = vmatmul.mubr.msk.f32.gmra.mrb[72].mxu0 %vm439_vm1, %v6564_v59  ;;  %v6569_v38 = vsel %vm6537_vm0, %v6521_v36, %v6553_v30  ;;  %vm6538_vm10 = vcmp.gt.f32.partialorder %v6522_v41, 0.0  ;;  %v6555_v14 = vmul.f32 0.01, %v6523_v44  ;;  %vm6539_vm11 = vcmp.gt.f32.partialorder %v6523_v44, 0.0 }
0x14ef   :  { %9661 = vmatprep.mubr.msk.f32.mxu0 %vm439_vm1, %v6565_v12  ;;  %v6570_v55 = vsel %vm6538_vm10, %v6522_v41, %v6554_v39  ;;  %v6556_v42 = vmul.f32 0.01, %v6524_v48  ;;  %v6526_v1 = vadd.f32 %v13093_v28, %v6506_v61  ;;  %vm6540_vm9 = vcmp.gt.f32.partialorder %v6524_v48, 0.0  ;;  %v6976_v28 = vld [vmem:[%s14102_s1 + $0x260] sm:$0xff] }
0x14f0   :  { %v6571_v46 = vsel %vm6539_vm11, %v6523_v44, %v6555_v14  ;;  %v6557_v54 = vmul.f32 0.01, %v6525_v62  ;;  %vm6541_vm8 = vcmp.gt.f32.partialorder %v6525_v62, 0.0  ;;  %v9835_v40 = vpack.c.bf16 %v6977_v53, %v6976_v28 }
0x14f1   :  { %v6572_v37 = vsel %vm6540_vm9, %v6524_v48, %v6556_v42  ;;  %v6558_v10 = vmul.f32 0.01, %v6526_v1  ;;  %vm6542_vm0 = vcmp.gt.f32.partialorder %v6526_v1, 0.0 }
0x14f2   :  { %9662 = vmatmul.mubr.msk.f32.gmra.mrb[74].mxu0 %vm439_vm1, %v6566_v52  ;;  %v6573_v45 = vsel %vm6541_vm8, %v6525_v62, %v6557_v54  ;;  %9836 = vmatprep.subr.bf16.mxu0 %v9835_v40 }
0x14f3   :  { %9664 = vmatprep.mubr.msk.f32.mxu0 %vm439_vm1, %v6567_v8  ;;  %v6574_v11 = vsel %vm6542_vm0, %v6526_v1, %v6558_v10  ;;  %9838 = vmatpush3.bf16.msra.mxu0 %v9835_v40 }
0x14f6   :  { %9665 = vmatmul.mubr.msk.f32.gmra.mrb[76].mxu0 %vm439_vm1, %v6568_v17 }
0x14f7   :  { %9667 = vmatprep.mubr.msk.f32.mxu0 %vm439_vm1, %v6569_v38 }
0x14fa   :  { %9668 = vmatmul.mubr.msk.f32.gmra.mrb[78].mxu0 %vm439_vm1, %v6570_v55 }
0x14fb   :  { %9670 = vmatprep.mubr.msk.f32.mxu0 %vm439_vm1, %v6571_v46 }
0x14fe   :  { %9671 = vmatmul.mubr.msk.f32.gmra.mrb[80].mxu0 %vm439_vm1, %v6572_v37 }
0x14ff   :  { %9673 = vmatprep.mubr.msk.f32.mxu0 %vm439_vm1, %v6573_v45 }
0x1502   :  { %9674 = vmatmul.mubr.msk.f32.gmra.mrb[82].mxu0 %vm439_vm1, %v6574_v11 }
0x15b9   :  { %v9654_v51 = vpop.f32.mrb[68].mxu0 }
0x15ba   :  { %v13171_v43 = vadd.f32 %v9654_v51, %v9009_v57  ;;  %v6698_v63 = vpop.f32.mrb[69].mxu0 }
0x15bb   :  { %v13173_v60 = vadd.f32 %v9009_v57, %v6698_v63 }
0x15bc   :  { %v6778_v24 = vsel %vm439_vm1, %v13171_v43, 0.0 }
0x15bd   :  { %v6777_v34 = vsel %vm439_vm1, %v13173_v60, 0.0  ;;  %v9657_v33 = vpop.f32.mrb[70].mxu0 }
0x15be   :  { %v6779_v25 = vadd.f32 %v6778_v24, %v6777_v34  ;;  %v6708_v59 = vpop.f32.mrb[71].mxu0  ;;  %v13179_v2 = vadd.f32 %v9657_v33, %v9009_v57 }
0x15bf   :  { %v6709_v19 = vadd.f32 %v9009_v57, %v6708_v59 }
0x15c0   :  { %v6782_v52 = vsel %vm439_vm1, %v13179_v2, 0.0 }
0x15c1   :  { %v6780_v13 = vsel %vm439_vm1, %v6709_v19, 0.0  ;;  %v9660_v12 = vpop.f32.mrb[72].mxu0 }
0x15c2   :  { %v6781_v27 = vadd.f32 %v6780_v13, %v6779_v25  ;;  %v6718_v36 = vpop.f32.mrb[73].mxu0  ;;  %v6724_v26 = vadd.f32 %v9660_v12, %v9009_v57 }
0x15c3   :  { %v6719_v41 = vadd.f32 %v9009_v57, %v6718_v36 }
0x15c4   :  { %v6783_v18 = vadd.f32 %v6782_v52, %v6781_v27  ;;  %v6786_v39 = vsel %vm439_vm1, %v6724_v26, 0.0 }
0x15c5   :  { %v6784_v8 = vsel %vm439_vm1, %v6719_v41, 0.0  ;;  %v9663_v30 = vpop.f32.mrb[74].mxu0 }
0x15c6   :  { %v6785_v44 = vadd.f32 %v6784_v8, %v6783_v18  ;;  %v6728_v17 = vpop.f32.mrb[75].mxu0  ;;  %v6734_v48 = vadd.f32 %v9663_v30, %v9009_v57 }
0x15c7   :  { %v6729_v61 = vadd.f32 %v9009_v57, %v6728_v17 }
0x15c8   :  { %v6787_v62 = vadd.f32 %v6786_v39, %v6785_v44  ;;  %v6790_v1 = vsel %vm439_vm1, %v6734_v48, 0.0 }
0x15c9   :  { %v6788_v38 = vsel %vm439_vm1, %v6729_v61, 0.0  ;;  %v9666_v14 = vpop.f32.mrb[76].mxu0 }
0x15ca   :  { %v6789_v55 = vadd.f32 %v6788_v38, %v6787_v62  ;;  %v6738_v42 = vpop.f32.mrb[77].mxu0  ;;  %v6744_v46 = vadd.f32 %v9666_v14, %v9009_v57 }
0x15cb   :  { %v6739_v54 = vadd.f32 %v9009_v57, %v6738_v42 }
0x15cc   :  { %v6791_v37 = vadd.f32 %v6790_v1, %v6789_v55  ;;  %v6794_v53 = vsel %vm439_vm1, %v6744_v46, 0.0 }
0x15cd   :  { %v6792_v10 = vsel %vm439_vm1, %v6739_v54, 0.0  ;;  %v9669_v45 = vpop.f32.mrb[78].mxu0 }
0x15ce   :  { %v6793_v11 = vadd.f32 %v6792_v10, %v6791_v37  ;;  %v6748_v28 = vpop.f32.mrb[79].mxu0  ;;  %v6754_v40 = vadd.f32 %v9669_v45, %v9009_v57 }
0x15cf   :  { %v6749_v51 = vadd.f32 %v9009_v57, %v6748_v28 }
0x15d0   :  { %v6795_v63 = vadd.f32 %v6794_v53, %v6793_v11  ;;  %v6798_v59 = vsel %vm439_vm1, %v6754_v40, 0.0 }
0x15d1   :  { %v6796_v24 = vsel %vm439_vm1, %v6749_v51, 0.0  ;;  %v9672_v34 = vpop.f32.mrb[80].mxu0 }
0x15d2   :  { %v6797_v33 = vadd.f32 %v6796_v24, %v6795_v63  ;;  %v6758_v25 = vpop.f32.mrb[81].mxu0  ;;  %v6764_v13 = vadd.f32 %v9672_v34, %v9009_v57 }
0x15d3   :  { %v6759_v12 = vadd.f32 %v9009_v57, %v6758_v25 }
0x15d4   :  { %v6799_v27 = vadd.f32 %v6798_v59, %v6797_v33  ;;  %v6802_v30 = vsel %vm439_vm1, %v6764_v13, 0.0 }
0x15d5   :  { %v6800_v36 = vsel %vm439_vm1, %v6759_v12, 0.0  ;;  %v9675_v52 = vpop.f32.mrb[82].mxu0 }
0x15d6   :  { %v6801_v18 = vadd.f32 %v6800_v36, %v6799_v27  ;;  %v6768_v8 = vpop.f32.mrb[83].mxu0  ;;  %v6774_v44 = vadd.f32 %v9675_v52, %v9009_v57 }
0x15d7   :  { %v6769_v17 = vadd.f32 %v9009_v57, %v6768_v8 }
0x15d8   :  { %v6803_v39 = vadd.f32 %v6802_v30, %v6801_v18  ;;  %v6806_v14 = vsel %vm439_vm1, %v6774_v44, 0.0 }
0x15d9   :  { %v6804_v62 = vsel %vm439_vm1, %v6769_v17, 0.0 }
0x15da   :  { %v6805_v38 = vadd.f32 %v6804_v62, %v6803_v39 }
0x15dc   :  { %v6807_v55 = vadd.f32 %v6806_v14, %v6805_v38 }
0x15de   :  { %v6808_v42 = vrot.slane %v6807_v55, 4 }
0x15e0   :  { %v6809_v1 = vadd.f32 %v6808_v42, %v6807_v55 }
0x15e2   :  { %v6810_v37 = vrot.slane %v6809_v1, 2 }
0x15e4   :  { %v6811_v10 = vadd.f32 %v6810_v37, %v6809_v1 }
0x15e6   :  { %v6812_v45 = vrot.slane %v6811_v10, 1 }
0x15e8   :  { %v6813_v11 = vadd.f32 %v6812_v45, %v6811_v10 }
0x15ea   :  { %v6814_v28 = vmul.f32 0.0078125, %v6813_v11 }
0x15ec   :  { %v13197_v53 = vsub.f32 %v13173_v60, %v6814_v28  ;;  %v13200_v63 = vsub.f32 %v13171_v43, %v6814_v28  ;;  %v13202_v57 = vsub.f32 %v6709_v19, %v6814_v28  ;;  %v13205_v24 = vsub.f32 %v13179_v2, %v6814_v28 }
0x15ed   :  { %v13207_v34 = vsub.f32 %v6719_v41, %v6814_v28  ;;  %v13209_v33 = vsub.f32 %v6724_v26, %v6814_v28  ;;  %v13211_v25 = vsub.f32 %v6729_v61, %v6814_v28  ;;  %v13213_v59 = vsub.f32 %v6734_v48, %v6814_v28 }
0x15ee   :  { %v13215_v27 = vsub.f32 %v6739_v54, %v6814_v28  ;;  %v13217_v60 = vsub.f32 %v6744_v46, %v6814_v28  ;;  %v13219_v36 = vsub.f32 %v6749_v51, %v6814_v28  ;;  %v13221_v43 = vsub.f32 %v6754_v40, %v6814_v28 }
0x15ef   :  { %v13223_v19 = vsub.f32 %v6759_v12, %v6814_v28  ;;  %v13225_v2 = vsub.f32 %v6764_v13, %v6814_v28  ;;  %v13227_v41 = vsub.f32 %v6769_v17, %v6814_v28  ;;  %v13229_v26 = vsub.f32 %v6774_v44, %v6814_v28 }
0x15f0   :  { %v6831_v48 = vmul.f32 %v13197_v53, %v13197_v53  ;;  %v6832_v61 = vmul.f32 %v13200_v63, %v13200_v63  ;;  %v6833_v46 = vmul.f32 %v13202_v57, %v13202_v57  ;;  %v6834_v54 = vmul.f32 %v13205_v24, %v13205_v24 }
0x15f1   :  { %v6835_v12 = vmul.f32 %v13207_v34, %v13207_v34  ;;  %v6836_v8 = vmul.f32 %v13209_v33, %v13209_v33  ;;  %v6837_v17 = vmul.f32 %v13211_v25, %v13211_v25  ;;  %v6838_v38 = vmul.f32 %v13213_v59, %v13213_v59 }
0x15f2   :  { %v6847_v40 = vsel %vm439_vm1, %v6831_v48, 0.0  ;;  %v6848_v51 = vsel %vm439_vm1, %v6832_v61, 0.0  ;;  %v6850_v52 = vsel %vm439_vm1, %v6833_v46, 0.0  ;;  %v6852_v30 = vsel %vm439_vm1, %v6834_v54, 0.0 }
0x15f3   :  { %v6849_v13 = vadd.f32 %v6848_v51, %v6847_v40  ;;  %v6854_v39 = vsel %vm439_vm1, %v6835_v12, 0.0  ;;  %v6856_v14 = vsel %vm439_vm1, %v6836_v8, 0.0  ;;  %v6839_v42 = vmul.f32 %v13215_v27, %v13215_v27 }
0x15f4   :  { %v6858_v1 = vsel %vm439_vm1, %v6837_v17, 0.0  ;;  %v6840_v10 = vmul.f32 %v13217_v60, %v13217_v60  ;;  %v6860_v45 = vsel %vm439_vm1, %v6838_v38, 0.0  ;;  %v6841_v28 = vmul.f32 %v13219_v36, %v13219_v36 }
0x15f5   :  { %v6851_v18 = vadd.f32 %v6850_v52, %v6849_v13  ;;  %v6862_v48 = vsel %vm439_vm1, %v6839_v42, 0.0  ;;  %v6842_v46 = vmul.f32 %v13221_v43, %v13221_v43  ;;  %v6843_v51 = vmul.f32 %v13223_v19, %v13223_v19 }
0x15f6   :  { %v6864_v54 = vsel %vm439_vm1, %v6840_v10, 0.0  ;;  %v6866_v13 = vsel %vm439_vm1, %v6841_v28, 0.0  ;;  %v6844_v52 = vmul.f32 %v13225_v2, %v13225_v2 }
0x15f7   :  { %v6853_v44 = vadd.f32 %v6852_v30, %v6851_v18  ;;  %v6868_v18 = vsel %vm439_vm1, %v6842_v46, 0.0  ;;  %v6845_v30 = vmul.f32 %v13227_v41, %v13227_v41 }
0x15f9   :  { %v6855_v62 = vadd.f32 %v6854_v39, %v6853_v44  ;;  %v6870_v44 = vsel %vm439_vm1, %v6843_v51, 0.0  ;;  %v6846_v39 = vmul.f32 %v13229_v26, %v13229_v26 }
0x15fb   :  { %v6857_v55 = vadd.f32 %v6856_v14, %v6855_v62  ;;  %v6872_v62 = vsel %vm439_vm1, %v6844_v52, 0.0  ;;  %v6874_v14 = vsel %vm439_vm1, %v6845_v30, 0.0  ;;  %v6876_v42 = vsel %vm439_vm1, %v6846_v39, 0.0 }
0x15fd   :  { %v6859_v37 = vadd.f32 %v6858_v1, %v6857_v55 }
0x15ff   :  { %v6861_v11 = vadd.f32 %v6860_v45, %v6859_v37 }
0x1601   :  { %v6863_v61 = vadd.f32 %v6862_v48, %v6861_v11 }
0x1603   :  { %v6865_v40 = vadd.f32 %v6864_v54, %v6863_v61  ;;  %v6578_v54 = vld [vmem:[%s14102_s1 + $0x250] sm:$0x1] }
0x1605   :  { %v6867_v12 = vadd.f32 %v6866_v13, %v6865_v40 }
0x1607   :  { %v6869_v8 = vadd.f32 %v6868_v18, %v6867_v12  ;;  %v13288_v12 = vld [vmem:[%s14102_s1 + $0x258] ss:$0 sm:$0xff] }
0x1609   :  { %v6871_v17 = vadd.f32 %v6870_v44, %v6869_v8 }
0x160b   :  { %v6873_v38 = vadd.f32 %v6872_v62, %v6871_v17 }
0x160d   :  { %v6875_v55 = vadd.f32 %v6874_v14, %v6873_v38 }
0x160f   :  { %v6877_v1 = vadd.f32 %v6876_v42, %v6875_v55 }
0x1611   :  { %v6878_v37 = vrot.slane %v6877_v1, 4 }
0x1613   :  { %v6879_v10 = vadd.f32 %v6878_v37, %v6877_v1 }
0x1615   :  { %v6880_v45 = vrot.slane %v6879_v10, 2 }
0x1617   :  { %v6881_v11 = vadd.f32 %v6880_v45, %v6879_v10 }
0x1619   :  { %v6882_v28 = vrot.slane %v6881_v11, 1 }
0x161b   :  { %v6883_v48 = vadd.f32 %v6882_v28, %v6881_v11 }
0x161d   :  { %v6884_v61 = vmul.f32 0.0078125, %v6883_v48 }
0x161f   :  { %v6885_v46 = vadd.f32 1e-05, %v6884_v61 }
0x1621   :  { %10017 = vrsqrt.f32 %v6885_v46 }
0x162b   :  { %v10018_v40 = vpop.eup %10017 }
0x162c   :  { %v6887_v51 = vmul.f32 %v10018_v40, %v6578_v54 }
0x162e   :  { %v13283_v13 = vrot.slane %v6887_v51, %v10164_v15 }
0x1630   :  { %v13292_v52 = vmul.f32 %v13283_v13, %v13227_v41  ;;  %v6892_v18 = vmul.f32 %v13283_v13, %v13197_v53  ;;  %v6893_v8 = vmul.f32 %v13283_v13, %v13200_v63  ;;  %v6894_v30 = vmul.f32 %v13283_v13, %v13202_v57 }
0x1631   :  { %v6895_v44 = vmul.f32 %v13283_v13, %v13205_v24  ;;  %v6896_v17 = vmul.f32 %v13283_v13, %v13207_v34  ;;  %v6898_v39 = vmul.f32 %v13283_v13, %v13211_v25  ;;  %v6897_v57 = vmul.f32 %v13283_v13, %v13209_v33 }
0x1632   :  { %v6912_v41 = vadd.f32 %v13288_v12, %v6892_v18  ;;  %v6913_v62 = vadd.f32 %v13288_v12, %v6893_v8  ;;  %v6914_v53 = vadd.f32 %v13288_v12, %v6894_v30  ;;  %v6899_v45 = vmul.f32 %v13283_v13, %v13213_v59 }
0x1633   :  { %v6915_v63 = vadd.f32 %v13288_v12, %v6895_v44  ;;  %v6916_v38 = vadd.f32 %v13288_v12, %v6896_v17  ;;  %v6917_v1 = vadd.f32 %v13288_v12, %v6897_v57  ;;  %v6918_v37 = vadd.f32 %v13288_v12, %v6898_v39 }
0x1634   :  { %vm6928_vm10 = vcmp.gt.f32.partialorder %v6912_v41, 0.0  ;;  %v6944_v24 = vmul.f32 0.01, %v6912_v41  ;;  %vm6929_vm11 = vcmp.gt.f32.partialorder %v6913_v62, 0.0  ;;  %v6945_v34 = vmul.f32 0.01, %v6913_v62 }
0x1635   :  { %vm6930_vm9 = vcmp.gt.f32.partialorder %v6914_v53, 0.0  ;;  %v6946_v14 = vmul.f32 0.01, %v6914_v53  ;;  %v6947_v42 = vmul.f32 0.01, %v6915_v63  ;;  %vm6931_vm8 = vcmp.gt.f32.partialorder %v6915_v63, 0.0 }
0x1636   :  { %v6960_v25 = vsel %vm6928_vm10, %v6912_v41, %v6944_v24  ;;  %v6961_v55 = vsel %vm6929_vm11, %v6913_v62, %v6945_v34  ;;  %v6948_v33 = vmul.f32 0.01, %v6916_v38  ;;  %vm6932_vm0 = vcmp.gt.f32.partialorder %v6916_v38, 0.0 }
0x1637   :  { %9680 = vmatprep.mubr.msk.f32.mxu0 %vm439_vm1, %v6960_v25  ;;  %v6962_v10 = vsel %vm6930_vm9, %v6914_v53, %v6946_v14  ;;  %v6900_v11 = vmul.f32 %v13283_v13, %v13215_v27  ;;  %v6902_v28 = vmul.f32 %v13283_v13, %v13219_v36  ;;  %v6904_v48 = vmul.f32 %v13283_v13, %v13223_v19 }
0x1638   :  { %9681 = vmatmul.mubr.msk.f32.vlgmr.msra.gmra.mrb[84].mxu0 %vm439_vm1, %v6961_v55  ;;  %v6963_v61 = vsel %vm6931_vm8, %v6915_v63, %v6947_v42  ;;  %v6949_v46 = vmul.f32 0.01, %v6917_v1  ;;  %v6919_v54 = vadd.f32 %v13288_v12, %v6899_v45  ;;  %v6901_v40 = vmul.f32 %v13283_v13, %v13217_v60  ;;  %v9027_v45 = vld [vmem:[%s14102_s1 + $0x270] ss:$0 sm:$0xff] }
0x1639   :  { %9683 = vmatprep.mubr.msk.f32.mxu0 %vm439_vm1, %v6962_v10  ;;  %v6964_v59 = vsel %vm6932_vm0, %v6916_v38, %v6948_v33  ;;  %vm6933_vm10 = vcmp.gt.f32.partialorder %v6917_v1, 0.0  ;;  %v6950_v51 = vmul.f32 0.01, %v6918_v37  ;;  %v6920_v27 = vadd.f32 %v13288_v12, %v6900_v11 }
0x163a   :  { %vm6934_vm11 = vcmp.gt.f32.partialorder %v6918_v37, 0.0  ;;  %v6965_v36 = vsel %vm6933_vm10, %v6917_v1, %v6949_v46  ;;  %v6951_v18 = vmul.f32 0.01, %v6919_v54  ;;  %v6921_v19 = vadd.f32 %v13288_v12, %v6901_v40 }
0x163b   :  { %v6903_v8 = vmul.f32 %v13283_v13, %v13221_v43  ;;  %v6966_v60 = vsel %vm6934_vm11, %v6918_v37, %v6950_v51  ;;  %vm6935_vm9 = vcmp.gt.f32.partialorder %v6919_v54, 0.0  ;;  %v6952_v30 = vmul.f32 0.01, %v6920_v27 }
0x163c   :  { %9684 = vmatmul.mubr.msk.f32.gmra.mrb[86].mxu0 %vm439_vm1, %v6963_v61  ;;  %v6922_v44 = vadd.f32 %v13288_v12, %v6902_v28  ;;  %vm6936_vm8 = vcmp.gt.f32.partialorder %v6920_v27, 0.0  ;;  %v6967_v17 = vsel %vm6935_vm9, %v6919_v54, %v6951_v18  ;;  %v6953_v39 = vmul.f32 0.01, %v6921_v19 }
0x163d   :  { %9686 = vmatprep.mubr.msk.f32.mxu0 %vm439_vm1, %v6964_v59  ;;  %v6923_v41 = vadd.f32 %v13288_v12, %v6903_v8  ;;  %v6905_v62 = vmul.f32 %v13283_v13, %v13225_v2  ;;  %v6968_v43 = vsel %vm6936_vm8, %v6920_v27, %v6952_v30  ;;  %vm6937_vm0 = vcmp.gt.f32.partialorder %v6921_v19, 0.0 }
0x163e   :  { %v6954_v53 = vmul.f32 0.01, %v6922_v44  ;;  %v6924_v63 = vadd.f32 %v13288_v12, %v6904_v48  ;;  %vm6938_vm10 = vcmp.gt.f32.partialorder %v6922_v44, 0.0  ;;  %v6969_v38 = vsel %vm6937_vm0, %v6921_v19, %v6953_v39 }
0x163f   :  { %v6955_v57 = vmul.f32 0.01, %v6923_v41  ;;  %v6925_v24 = vadd.f32 %v13288_v12, %v6905_v62  ;;  %v6907_v34 = vmul.f32 %v13283_v13, %v13229_v26  ;;  %v6926_v2 = vadd.f32 %v13288_v12, %v13292_v52 }
0x1640   :  { %9687 = vmatmul.mubr.msk.f32.gmra.mrb[88].mxu0 %vm439_vm1, %v6965_v36  ;;  %v6970_v14 = vsel %vm6938_vm10, %v6922_v44, %v6954_v53  ;;  %vm6939_vm11 = vcmp.gt.f32.partialorder %v6923_v41, 0.0  ;;  %v6956_v25 = vmul.f32 0.01, %v6924_v63  ;;  %vm6940_vm9 = vcmp.gt.f32.partialorder %v6924_v63, 0.0 }
0x1641   :  { %9689 = vmatprep.mubr.msk.f32.mxu0 %vm439_vm1, %v6966_v60  ;;  %v6971_v55 = vsel %vm6939_vm11, %v6923_v41, %v6955_v57  ;;  %v6957_v42 = vmul.f32 0.01, %v6925_v24  ;;  %v6927_v1 = vadd.f32 %v13288_v12, %v6907_v34  ;;  %vm6941_vm8 = vcmp.gt.f32.partialorder %v6925_v24, 0.0  ;;  %v7377_v12 = vld [vmem:[%s14102_s1 + $0x288] sm:$0xff] }
0x1642   :  { %v6972_v37 = vsel %vm6940_vm9, %v6924_v63, %v6956_v25  ;;  %v6958_v26 = vmul.f32 0.01, %v6926_v2  ;;  %vm6942_vm0 = vcmp.gt.f32.partialorder %v6926_v2, 0.0  ;;  %9704 = vmatprep.subr.mxu1 %v7377_v12 }
0x1643   :  { %v6973_v13 = vsel %vm6941_vm8, %v6925_v24, %v6957_v42  ;;  %v6959_v52 = vmul.f32 0.01, %v6927_v1  ;;  %vm6943_vm10 = vcmp.gt.f32.partialorder %v6927_v1, 0.0  ;;  %9705 = vmatpush3.msra.mxu1 %v7377_v12 }
0x1644   :  { %9690 = vmatmul.mubr.msk.f32.gmra.mrb[90].mxu0 %vm439_vm1, %v6967_v17  ;;  %v6974_v10 = vsel %vm6942_vm0, %v6926_v2, %v6958_v26 }
0x1645   :  { %9692 = vmatprep.mubr.msk.f32.mxu0 %vm439_vm1, %v6968_v43  ;;  %v6975_v33 = vsel %vm6943_vm10, %v6927_v1, %v6959_v52 }
0x1648   :  { %9693 = vmatmul.mubr.msk.f32.gmra.mrb[92].mxu0 %vm439_vm1, %v6969_v38 }
0x1649   :  { %9695 = vmatprep.mubr.msk.f32.mxu0 %vm439_vm1, %v6970_v14 }
0x164c   :  { %9696 = vmatmul.mubr.msk.f32.gmra.mrb[94].mxu0 %vm439_vm1, %v6971_v55 }
0x164d   :  { %9698 = vmatprep.mubr.msk.f32.mxu0 %vm439_vm1, %v6972_v37 }
0x1650   :  { %9699 = vmatmul.mubr.msk.f32.gmra.mrb[96].mxu0 %vm439_vm1, %v6973_v13 }
0x1651   :  { %9701 = vmatprep.mubr.msk.f32.mxu0 %vm439_vm1, %v6974_v10 }
0x1654   :  { %9702 = vmatmul.mubr.msk.f32.gmra.mrb[98].mxu0 %vm439_vm1, %v6975_v33 }
0x170b   :  { %v9682_v11 = vpop.f32.mrb[84].mxu0 }
0x170c   :  { %v13363_v28 = vadd.f32 %v9682_v11, %v9027_v45  ;;  %v7099_v48 = vpop.f32.mrb[85].mxu0 }
0x170d   :  { %v13365_v61 = vadd.f32 %v9027_v45, %v7099_v48 }
0x170e   :  { %v7179_v46 = vsel %vm1243_vm6, %v13363_v28, 0.0 }
0x170f   :  { %v7178_v54 = vsel %vm1243_vm6, %v13365_v61, 0.0  ;;  %v9685_v40 = vpop.f32.mrb[86].mxu0 }
0x1710   :  { %v7180_v59 = vadd.f32 %v7179_v46, %v7178_v54  ;;  %v7109_v51 = vpop.f32.mrb[87].mxu0  ;;  %v13371_v27 = vadd.f32 %v9685_v40, %v9027_v45 }
0x1711   :  { %v7110_v36 = vadd.f32 %v9027_v45, %v7109_v51 }
0x1712   :  { %v7183_v30 = vsel %vm1243_vm6, %v13371_v27, 0.0 }
0x1713   :  { %v7181_v18 = vsel %vm1243_vm6, %v7110_v36, 0.0  ;;  %v9688_v19 = vpop.f32.mrb[88].mxu0 }
0x1714   :  { %v7182_v8 = vadd.f32 %v7181_v18, %v7180_v59  ;;  %v7119_v60 = vpop.f32.mrb[89].mxu0  ;;  %v7125_v44 = vadd.f32 %v9688_v19, %v9027_v45 }
0x1715   :  { %v7120_v17 = vadd.f32 %v9027_v45, %v7119_v60 }
0x1716   :  { %v7184_v39 = vadd.f32 %v7183_v30, %v7182_v8  ;;  %v7187_v63 = vsel %vm1243_vm6, %v7125_v44, 0.0 }
0x1717   :  { %v7185_v41 = vsel %vm1243_vm6, %v7120_v17, 0.0  ;;  %v9691_v62 = vpop.f32.mrb[90].mxu0 }
0x1718   :  { %v7186_v43 = vadd.f32 %v7185_v41, %v7184_v39  ;;  %v7129_v53 = vpop.f32.mrb[91].mxu0  ;;  %v7135_v38 = vadd.f32 %v9691_v62, %v9027_v45 }
0x1719   :  { %v7130_v57 = vadd.f32 %v9027_v45, %v7129_v53 }
0x171a   :  { %v7188_v24 = vadd.f32 %v7187_v63, %v7186_v43  ;;  %v7191_v55 = vsel %vm1243_vm6, %v7135_v38, 0.0 }
0x171b   :  { %v7189_v34 = vsel %vm1243_vm6, %v7130_v57, 0.0  ;;  %v9694_v2 = vpop.f32.mrb[92].mxu0 }
0x171c   :  { %v7190_v14 = vadd.f32 %v7189_v34, %v7188_v24  ;;  %v7139_v25 = vpop.f32.mrb[93].mxu0  ;;  %v7145_v42 = vadd.f32 %v9694_v2, %v9027_v45 }
0x171d   :  { %v7140_v1 = vadd.f32 %v9027_v45, %v7139_v25 }
0x171e   :  { %v7192_v37 = vadd.f32 %v7191_v55, %v7190_v14  ;;  %v7195_v33 = vsel %vm1243_vm6, %v7145_v42, 0.0 }
0x171f   :  { %v7193_v26 = vsel %vm1243_vm6, %v7140_v1, 0.0  ;;  %v9697_v13 = vpop.f32.mrb[94].mxu0 }
0x1720   :  { %v7194_v52 = vadd.f32 %v7193_v26, %v7192_v37  ;;  %v7149_v10 = vpop.f32.mrb[95].mxu0  ;;  %v7155_v12 = vadd.f32 %v9697_v13, %v9027_v45 }
0x1721   :  { %v7150_v11 = vadd.f32 %v9027_v45, %v7149_v10 }
0x1722   :  { %v7196_v48 = vadd.f32 %v7195_v33, %v7194_v52  ;;  %v7199_v51 = vsel %vm1243_vm6, %v7155_v12, 0.0 }
0x1723   :  { %v7197_v46 = vsel %vm1243_vm6, %v7150_v11, 0.0  ;;  %v9700_v54 = vpop.f32.mrb[96].mxu0 }
0x1724   :  { %v7198_v40 = vadd.f32 %v7197_v46, %v7196_v48  ;;  %v7159_v59 = vpop.f32.mrb[97].mxu0  ;;  %v7165_v18 = vadd.f32 %v9700_v54, %v9027_v45 }
0x1725   :  { %v7160_v19 = vadd.f32 %v9027_v45, %v7159_v59 }
0x1726   :  { %v7200_v8 = vadd.f32 %v7199_v51, %v7198_v40  ;;  %v7203_v62 = vsel %vm1243_vm6, %v7165_v18, 0.0 }
0x1727   :  { %v7201_v60 = vsel %vm1243_vm6, %v7160_v19, 0.0  ;;  %v9703_v30 = vpop.f32.mrb[98].mxu0 }
0x1728   :  { %v7202_v39 = vadd.f32 %v7201_v60, %v7200_v8  ;;  %v7169_v41 = vpop.f32.mrb[99].mxu0  ;;  %v7175_v43 = vadd.f32 %v9703_v30, %v9027_v45 }
0x1729   :  { %v7170_v53 = vadd.f32 %v9027_v45, %v7169_v41 }
0x172a   :  { %v7204_v63 = vadd.f32 %v7203_v62, %v7202_v39  ;;  %v7207_v2 = vsel %vm1243_vm6, %v7175_v43, 0.0 }
0x172b   :  { %v7205_v24 = vsel %vm1243_vm6, %v7170_v53, 0.0 }
0x172c   :  { %v7206_v34 = vadd.f32 %v7205_v24, %v7204_v63 }
0x172e   :  { %v7208_v14 = vadd.f32 %v7207_v2, %v7206_v34 }
0x1730   :  { %v7209_v25 = vrot.slane %v7208_v14, 4 }
0x1732   :  { %v7210_v55 = vadd.f32 %v7209_v25, %v7208_v14 }
0x1734   :  { %v7211_v37 = vrot.slane %v7210_v55, 2 }
0x1736   :  { %v7212_v26 = vadd.f32 %v7211_v37, %v7210_v55 }
0x1738   :  { %v7213_v13 = vrot.slane %v7212_v26, 1 }
0x173a   :  { %v7214_v52 = vadd.f32 %v7213_v13, %v7212_v26 }
0x173c   :  { %v7215_v10 = vmul.f32 0.0078125, %v7214_v52 }
0x173e   :  { %v13389_v33 = vsub.f32 %v13365_v61, %v7215_v10  ;;  %v13392_v48 = vsub.f32 %v13363_v28, %v7215_v10  ;;  %v13394_v45 = vsub.f32 %v7110_v36, %v7215_v10  ;;  %v13397_v46 = vsub.f32 %v13371_v27, %v7215_v10 }
0x173f   :  { %v13399_v54 = vsub.f32 %v7120_v17, %v7215_v10  ;;  %v13401_v40 = vsub.f32 %v7125_v44, %v7215_v10  ;;  %v13403_v59 = vsub.f32 %v7130_v57, %v7215_v10  ;;  %v13405_v51 = vsub.f32 %v7135_v38, %v7215_v10 }
0x1740   :  { %v13407_v8 = vsub.f32 %v7140_v1, %v7215_v10  ;;  %v13409_v61 = vsub.f32 %v7145_v42, %v7215_v10  ;;  %v13411_v60 = vsub.f32 %v7150_v11, %v7215_v10  ;;  %v13413_v28 = vsub.f32 %v7155_v12, %v7215_v10 }
0x1741   :  { %v13415_v36 = vsub.f32 %v7160_v19, %v7215_v10  ;;  %v13417_v27 = vsub.f32 %v7165_v18, %v7215_v10  ;;  %v13419_v17 = vsub.f32 %v7170_v53, %v7215_v10  ;;  %v13421_v44 = vsub.f32 %v7175_v43, %v7215_v10 }
0x1742   :  { %v7232_v38 = vmul.f32 %v13389_v33, %v13389_v33  ;;  %v7233_v57 = vmul.f32 %v13392_v48, %v13392_v48  ;;  %v7234_v42 = vmul.f32 %v13394_v45, %v13394_v45  ;;  %v7235_v1 = vmul.f32 %v13397_v46, %v13397_v46 }
0x1743   :  { %v7236_v19 = vmul.f32 %v13399_v54, %v13399_v54  ;;  %v7237_v41 = vmul.f32 %v13401_v40, %v13401_v40  ;;  %v7238_v53 = vmul.f32 %v13403_v59, %v13403_v59  ;;  %v7239_v34 = vmul.f32 %v13405_v51, %v13405_v51 }
0x1744   :  { %v7248_v12 = vsel %vm1243_vm6, %v7232_v38, 0.0  ;;  %v7249_v11 = vsel %vm1243_vm6, %v7233_v57, 0.0  ;;  %v7251_v30 = vsel %vm1243_vm6, %v7234_v42, 0.0  ;;  %v7253_v62 = vsel %vm1243_vm6, %v7235_v1, 0.0 }
0x1745   :  { %v7250_v18 = vadd.f32 %v7249_v11, %v7248_v12  ;;  %v7255_v63 = vsel %vm1243_vm6, %v7236_v19, 0.0  ;;  %v7257_v2 = vsel %vm1243_vm6, %v7237_v41, 0.0  ;;  %v7240_v25 = vmul.f32 %v13407_v8, %v13407_v8 }
0x1746   :  { %v7259_v55 = vsel %vm1243_vm6, %v7238_v53, 0.0  ;;  %v7241_v26 = vmul.f32 %v13409_v61, %v13409_v61  ;;  %v7261_v13 = vsel %vm1243_vm6, %v7239_v34, 0.0  ;;  %v7242_v10 = vmul.f32 %v13411_v60, %v13411_v60 }
0x1747   :  { %v7252_v39 = vadd.f32 %v7251_v30, %v7250_v18  ;;  %v7263_v38 = vsel %vm1243_vm6, %v7240_v25, 0.0  ;;  %v7243_v42 = vmul.f32 %v13413_v28, %v13413_v28  ;;  %v7244_v11 = vmul.f32 %v13415_v36, %v13415_v36 }
0x1748   :  { %v7265_v1 = vsel %vm1243_vm6, %v7241_v26, 0.0  ;;  %v7267_v18 = vsel %vm1243_vm6, %v7242_v10, 0.0  ;;  %v7245_v30 = vmul.f32 %v13417_v27, %v13417_v27 }
0x1749   :  { %v7254_v43 = vadd.f32 %v7253_v62, %v7252_v39  ;;  %v7269_v39 = vsel %vm1243_vm6, %v7243_v42, 0.0  ;;  %v7246_v62 = vmul.f32 %v13419_v17, %v13419_v17 }
0x174b   :  { %v7256_v24 = vadd.f32 %v7255_v63, %v7254_v43  ;;  %v7271_v43 = vsel %vm1243_vm6, %v7244_v11, 0.0  ;;  %v7247_v63 = vmul.f32 %v13421_v44, %v13421_v44 }
0x174d   :  { %v7258_v14 = vadd.f32 %v7257_v2, %v7256_v24  ;;  %v7273_v24 = vsel %vm1243_vm6, %v7245_v30, 0.0  ;;  %v7275_v2 = vsel %vm1243_vm6, %v7246_v62, 0.0  ;;  %v7277_v25 = vsel %vm1243_vm6, %v7247_v63, 0.0 }
0x174f   :  { %v7260_v37 = vadd.f32 %v7259_v55, %v7258_v14 }
0x1751   :  { %v7262_v52 = vadd.f32 %v7261_v13, %v7260_v37 }
0x1753   :  { %v7264_v57 = vadd.f32 %v7263_v38, %v7262_v52 }
0x1755   :  { %v7266_v12 = vadd.f32 %v7265_v1, %v7264_v57  ;;  %v6979_v1 = vld [vmem:[%s14102_s1 + $0x278] sm:$0x1] }
0x1757   :  { %v7268_v19 = vadd.f32 %v7267_v18, %v7266_v12 }
0x1759   :  { %v7270_v41 = vadd.f32 %v7269_v39, %v7268_v19  ;;  %v13480_v19 = vld [vmem:[%s14102_s1 + $0x280] ss:$0 sm:$0xff] }
0x175b   :  { %v7272_v53 = vadd.f32 %v7271_v43, %v7270_v41 }
0x175d   :  { %v7274_v34 = vadd.f32 %v7273_v24, %v7272_v53 }
0x175f   :  { %v7276_v14 = vadd.f32 %v7275_v2, %v7274_v34 }
0x1761   :  { %v7278_v55 = vadd.f32 %v7277_v25, %v7276_v14 }
0x1763   :  { %v7279_v37 = vrot.slane %v7278_v55, 4 }
0x1765   :  { %v7280_v26 = vadd.f32 %v7279_v37, %v7278_v55 }
0x1767   :  { %v7281_v13 = vrot.slane %v7280_v26, 2 }
0x1769   :  { %v7282_v52 = vadd.f32 %v7281_v13, %v7280_v26 }
0x176b   :  { %v7283_v10 = vrot.slane %v7282_v52, 1 }
0x176d   :  { %v7284_v38 = vadd.f32 %v7283_v10, %v7282_v52 }
0x176f   :  { %v7285_v57 = vmul.f32 0.0078125, %v7284_v38 }
0x1771   :  { %v7286_v42 = vadd.f32 1e-05, %v7285_v57 }
0x1773   :  { %10019 = vrsqrt.f32 %v7286_v42 }
0x177d   :  { %v10020_v12 = vpop.eup %10019 }
0x177e   :  { %v7288_v11 = vmul.f32 %v10020_v12, %v6979_v1 }
0x1780   :  { %v13475_v18 = vrot.slane %v7288_v11, %v10164_v15 }
0x1782   :  { %v13484_v30 = vmul.f32 %v13475_v18, %v13419_v17  ;;  %v7293_v39 = vmul.f32 %v13475_v18, %v13389_v33  ;;  %v7294_v41 = vmul.f32 %v13475_v18, %v13392_v48  ;;  %v7295_v62 = vmul.f32 %v13475_v18, %v13394_v45 }
0x1783   :  { %v7296_v43 = vmul.f32 %v13475_v18, %v13397_v46  ;;  %v7297_v53 = vmul.f32 %v13475_v18, %v13399_v54  ;;  %v7299_v63 = vmul.f32 %v13475_v18, %v13403_v59  ;;  %v7298_v45 = vmul.f32 %v13475_v18, %v13401_v40 }
0x1784   :  { %v7313_v17 = vadd.f32 %v13480_v19, %v7293_v39  ;;  %v7314_v24 = vadd.f32 %v13480_v19, %v7294_v41  ;;  %v7315_v33 = vadd.f32 %v13480_v19, %v7295_v62  ;;  %v7300_v13 = vmul.f32 %v13475_v18, %v13405_v51 }
0x1785   :  { %v7316_v48 = vadd.f32 %v13480_v19, %v7296_v43  ;;  %v7317_v34 = vadd.f32 %v13480_v19, %v7297_v53  ;;  %v7318_v55 = vadd.f32 %v13480_v19, %v7298_v45  ;;  %v7319_v37 = vadd.f32 %v13480_v19, %v7299_v63 }
0x1786   :  { %vm7329_vm11 = vcmp.gt.f32.partialorder %v7313_v17, 0.0  ;;  %v7345_v46 = vmul.f32 0.01, %v7313_v17  ;;  %vm7330_vm9 = vcmp.gt.f32.partialorder %v7314_v24, 0.0  ;;  %v7346_v54 = vmul.f32 0.01, %v7314_v24 }
0x1787   :  { %vm7331_vm8 = vcmp.gt.f32.partialorder %v7315_v33, 0.0  ;;  %v7347_v2 = vmul.f32 0.01, %v7315_v33  ;;  %v7348_v25 = vmul.f32 0.01, %v7316_v48  ;;  %vm7332_vm0 = vcmp.gt.f32.partialorder %v7316_v48, 0.0 }
0x1788   :  { %v7361_v59 = vsel %vm7329_vm11, %v7313_v17, %v7345_v46  ;;  %v7362_v14 = vsel %vm7330_vm9, %v7314_v24, %v7346_v54  ;;  %v7349_v40 = vmul.f32 0.01, %v7317_v34  ;;  %vm7333_vm10 = vcmp.gt.f32.partialorder %v7317_v34, 0.0 }
0x1789   :  { %9706 = vmatprep.mubr.msk.f32.mxu1 %vm1243_vm6, %v7361_v59  ;;  %v7363_v26 = vsel %vm7331_vm8, %v7315_v33, %v7347_v2  ;;  %v7301_v52 = vmul.f32 %v13475_v18, %v13407_v8  ;;  %v7303_v10 = vmul.f32 %v13475_v18, %v13411_v60  ;;  %v7305_v38 = vmul.f32 %v13475_v18, %v13415_v36 }
0x178a   :  { %9707 = vmatmul.mubr.msk.f32.vlgmr.msra.gmra.mrb[88].mxu1 %vm1243_vm6, %v7362_v14  ;;  %v7364_v57 = vsel %vm7332_vm0, %v7316_v48, %v7348_v25  ;;  %v7350_v42 = vmul.f32 0.01, %v7318_v55  ;;  %v7320_v1 = vadd.f32 %v13480_v19, %v7300_v13  ;;  %v7302_v12 = vmul.f32 %v13475_v18, %v13409_v61 }
0x178b   :  { %9709 = vmatprep.mubr.msk.f32.mxu1 %vm1243_vm6, %v7363_v26  ;;  %v7365_v51 = vsel %vm7333_vm10, %v7317_v34, %v7349_v40  ;;  %vm7334_vm11 = vcmp.gt.f32.partialorder %v7318_v55, 0.0  ;;  %v7351_v11 = vmul.f32 0.01, %v7319_v37  ;;  %v7321_v8 = vadd.f32 %v13480_v19, %v7301_v52 }
0x178c   :  { %vm7335_vm9 = vcmp.gt.f32.partialorder %v7319_v37, 0.0  ;;  %v7366_v60 = vsel %vm7334_vm11, %v7318_v55, %v7350_v42  ;;  %v7352_v39 = vmul.f32 0.01, %v7320_v1  ;;  %v7322_v36 = vadd.f32 %v13480_v19, %v7302_v12 }
0x178d   :  { %v7304_v41 = vmul.f32 %v13475_v18, %v13413_v28  ;;  %v7367_v61 = vsel %vm7335_vm9, %v7319_v37, %v7351_v11  ;;  %vm7336_vm8 = vcmp.gt.f32.partialorder %v7320_v1, 0.0  ;;  %v7353_v62 = vmul.f32 0.01, %v7321_v8 }
0x178e   :  { %9710 = vmatmul.mubr.msk.f32.gmra.mrb[90].mxu1 %vm1243_vm6, %v7364_v57  ;;  %v7323_v43 = vadd.f32 %v13480_v19, %v7303_v10  ;;  %vm7337_vm0 = vcmp.gt.f32.partialorder %v7321_v8, 0.0  ;;  %v7368_v53 = vsel %vm7336_vm8, %v7320_v1, %v7352_v39  ;;  %v7354_v63 = vmul.f32 0.01, %v7322_v36 }
0x178f   :  { %9712 = vmatprep.mubr.msk.f32.mxu1 %vm1243_vm6, %v7365_v51  ;;  %v7324_v17 = vadd.f32 %v13480_v19, %v7304_v41  ;;  %v7306_v24 = vmul.f32 %v13475_v18, %v13417_v27  ;;  %v7369_v28 = vsel %vm7337_vm0, %v7321_v8, %v7353_v62  ;;  %vm7338_vm10 = vcmp.gt.f32.partialorder %v7322_v36, 0.0 }
0x1790   :  { %v7355_v33 = vmul.f32 0.01, %v7323_v43  ;;  %v7325_v48 = vadd.f32 %v13480_v19, %v7305_v38  ;;  %vm7339_vm11 = vcmp.gt.f32.partialorder %v7323_v43, 0.0  ;;  %v7370_v34 = vsel %vm7338_vm10, %v7322_v36, %v7354_v63 }
0x1791   :  { %v7356_v45 = vmul.f32 0.01, %v7324_v17  ;;  %v7326_v46 = vadd.f32 %v13480_v19, %v7306_v24  ;;  %v7308_v54 = vmul.f32 %v13475_v18, %v13421_v44  ;;  %v7327_v27 = vadd.f32 %v13480_v19, %v13484_v30 }
0x1792   :  { %9713 = vmatmul.mubr.msk.f32.gmra.mrb[92].mxu1 %vm1243_vm6, %v7366_v60  ;;  %v7371_v2 = vsel %vm7339_vm11, %v7323_v43, %v7355_v33  ;;  %vm7340_vm9 = vcmp.gt.f32.partialorder %v7324_v17, 0.0  ;;  %v7357_v59 = vmul.f32 0.01, %v7325_v48  ;;  %vm7341_vm8 = vcmp.gt.f32.partialorder %v7325_v48, 0.0 }
0x1793   :  { %9715 = vmatprep.mubr.msk.f32.mxu1 %vm1243_vm6, %v7367_v61  ;;  %v7372_v14 = vsel %vm7340_vm9, %v7324_v17, %v7356_v45  ;;  %v7358_v25 = vmul.f32 0.01, %v7326_v46  ;;  %v7328_v55 = vadd.f32 %v13480_v19, %v7308_v54  ;;  %vm7342_vm0 = vcmp.gt.f32.partialorder %v7326_v46, 0.0  ;;  %v9045_v19 = vld [vmem:[%s14102_s1 + $0x290] ss:$0 sm:$0xff] }
0x1794   :  { %v7373_v37 = vsel %vm7341_vm8, %v7325_v48, %v7357_v59  ;;  %v7359_v44 = vmul.f32 0.01, %v7327_v27  ;;  %vm7343_vm10 = vcmp.gt.f32.partialorder %v7327_v27, 0.0 }
0x1795   :  { %v7374_v18 = vsel %vm7342_vm0, %v7326_v46, %v7358_v25  ;;  %v7360_v30 = vmul.f32 0.01, %v7328_v55  ;;  %vm7344_vm11 = vcmp.gt.f32.partialorder %v7328_v55, 0.0 }
0x1796   :  { %9716 = vmatmul.mubr.msk.f32.gmra.mrb[94].mxu1 %vm1243_vm6, %v7368_v53  ;;  %v7375_v26 = vsel %vm7343_vm10, %v7327_v27, %v7359_v44 }
0x1797   :  { %9718 = vmatprep.mubr.msk.f32.mxu1 %vm1243_vm6, %v7369_v28  ;;  %v7376_v40 = vsel %vm7344_vm11, %v7328_v55, %v7360_v30 }
0x179a   :  { %9719 = vmatmul.mubr.msk.f32.gmra.mrb[96].mxu1 %vm1243_vm6, %v7370_v34 }
0x179b   :  { %9721 = vmatprep.mubr.msk.f32.mxu1 %vm1243_vm6, %v7371_v2 }
0x179e   :  { %9722 = vmatmul.mubr.msk.f32.gmra.mrb[98].mxu1 %vm1243_vm6, %v7372_v14 }
0x179f   :  { %9724 = vmatprep.mubr.msk.f32.mxu1 %vm1243_vm6, %v7373_v37 }
0x17a2   :  { %9725 = vmatmul.mubr.msk.f32.gmra.mrb[100].mxu1 %vm1243_vm6, %v7374_v18 }
0x17a3   :  { %9727 = vmatprep.mubr.msk.f32.mxu1 %vm1243_vm6, %v7375_v26 }
0x17a6   :  { %9728 = vmatmul.mubr.msk.f32.gmra.mrb[102].mxu1 %vm1243_vm6, %v7376_v40 }
0x185d   :  { %v9708_v13 = vpop.f32.mrb[88].mxu1 }
0x185e   :  { %v13552_v52 = vadd.f32 %v9708_v13, %v9045_v19  ;;  %v7499_v10 = vpop.f32.mrb[89].mxu1 }
0x185f   :  { %v13554_v38 = vadd.f32 %v9045_v19, %v7499_v10 }
0x1860   :  { %v7579_v57 = vsel %vm1243_vm6, %v13552_v52, 0.0 }
0x1861   :  { %v7578_v42 = vsel %vm1243_vm6, %v13554_v38, 0.0  ;;  %v9711_v1 = vpop.f32.mrb[90].mxu1 }
0x1862   :  { %v7580_v12 = vadd.f32 %v7579_v57, %v7578_v42  ;;  %v7509_v51 = vpop.f32.mrb[91].mxu1  ;;  %v13560_v11 = vadd.f32 %v9711_v1, %v9045_v19 }
0x1863   :  { %v13562_v8 = vadd.f32 %v9045_v19, %v7509_v51 }
0x1864   :  { %v7583_v61 = vsel %vm1243_vm6, %v13560_v11, 0.0 }
0x1865   :  { %v7581_v60 = vsel %vm1243_vm6, %v13562_v8, 0.0  ;;  %v9714_v39 = vpop.f32.mrb[92].mxu1 }
0x1866   :  { %v7582_v36 = vadd.f32 %v7581_v60, %v7580_v12  ;;  %v7519_v41 = vpop.f32.mrb[93].mxu1  ;;  %v7525_v62 = vadd.f32 %v9714_v39, %v9045_v19 }
0x1867   :  { %v7520_v43 = vadd.f32 %v9045_v19, %v7519_v41 }
0x1868   :  { %v7584_v53 = vadd.f32 %v7583_v61, %v7582_v36  ;;  %v7587_v33 = vsel %vm1243_vm6, %v7525_v62, 0.0 }
0x1869   :  { %v7585_v63 = vsel %vm1243_vm6, %v7520_v43, 0.0  ;;  %v9717_v17 = vpop.f32.mrb[94].mxu1 }
0x186a   :  { %v7586_v24 = vadd.f32 %v7585_v63, %v7584_v53  ;;  %v7529_v28 = vpop.f32.mrb[95].mxu1  ;;  %v7535_v48 = vadd.f32 %v9717_v17, %v9045_v19 }
0x186b   :  { %v7530_v34 = vadd.f32 %v9045_v19, %v7529_v28 }
0x186c   :  { %v7588_v45 = vadd.f32 %v7587_v33, %v7586_v24  ;;  %v7591_v59 = vsel %vm1243_vm6, %v7535_v48, 0.0 }
0x186d   :  { %v7589_v46 = vsel %vm1243_vm6, %v7530_v34, 0.0  ;;  %v9720_v54 = vpop.f32.mrb[96].mxu1 }
0x186e   :  { %v7590_v27 = vadd.f32 %v7589_v46, %v7588_v45  ;;  %v7539_v2 = vpop.f32.mrb[97].mxu1  ;;  %v7545_v14 = vadd.f32 %v9720_v54, %v9045_v19 }
0x186f   :  { %v7540_v25 = vadd.f32 %v9045_v19, %v7539_v2  ;;  %v7778_v2 = vld [vmem:[%s14102_s1 + $0x2b0] sm:$0x1] }
0x1870   :  { %v7592_v55 = vadd.f32 %v7591_v59, %v7590_v27  ;;  %v7595_v26 = vsel %vm1243_vm6, %v7545_v14, 0.0  ;;  %9859 = vpush %v7778_v2 }
0x1871   :  { %v7593_v37 = vsel %vm1243_vm6, %v7540_v25, 0.0  ;;  %v9723_v44 = vpop.f32.mrb[98].mxu1 }
0x1872   :  { %v7594_v18 = vadd.f32 %v7593_v37, %v7592_v55  ;;  %v7549_v30 = vpop.f32.mrb[99].mxu1  ;;  %v7555_v40 = vadd.f32 %v9723_v44, %v9045_v19 }
0x1873   :  { %v7550_v13 = vadd.f32 %v9045_v19, %v7549_v30 }
0x1874   :  { %v7596_v10 = vadd.f32 %v7595_v26, %v7594_v18  ;;  %v7599_v51 = vsel %vm1243_vm6, %v7555_v40, 0.0 }
0x1875   :  { %v7597_v57 = vsel %vm1243_vm6, %v7550_v13, 0.0  ;;  %v9726_v42 = vpop.f32.mrb[100].mxu1 }
0x1876   :  { %v7598_v1 = vadd.f32 %v7597_v57, %v7596_v10  ;;  %v7559_v12 = vpop.f32.mrb[101].mxu1  ;;  %v7565_v60 = vadd.f32 %v9726_v42, %v9045_v19 }
0x1877   :  { %v7560_v39 = vadd.f32 %v9045_v19, %v7559_v12 }
0x1878   :  { %v7600_v36 = vadd.f32 %v7599_v51, %v7598_v1  ;;  %v7603_v17 = vsel %vm1243_vm6, %v7565_v60, 0.0 }
0x1879   :  { %v7601_v41 = vsel %vm1243_vm6, %v7560_v39, 0.0  ;;  %v9729_v61 = vpop.f32.mrb[102].mxu1 }
0x187a   :  { %v7602_v53 = vadd.f32 %v7601_v41, %v7600_v36  ;;  %v7569_v63 = vpop.f32.mrb[103].mxu1  ;;  %v7575_v24 = vadd.f32 %v9729_v61, %v9045_v19 }
0x187b   :  { %v7570_v28 = vadd.f32 %v9045_v19, %v7569_v63 }
0x187c   :  { %v7604_v33 = vadd.f32 %v7603_v17, %v7602_v53  ;;  %v7607_v54 = vsel %vm1243_vm6, %v7575_v24, 0.0 }
0x187d   :  { %v7605_v45 = vsel %vm1243_vm6, %v7570_v28, 0.0 }
0x187e   :  { %v7606_v46 = vadd.f32 %v7605_v45, %v7604_v33 }
0x1880   :  { %v7608_v27 = vadd.f32 %v7607_v54, %v7606_v46 }
0x1882   :  { %v7609_v59 = vrot.slane %v7608_v27, 4 }
0x1884   :  { %v7610_v55 = vadd.f32 %v7609_v59, %v7608_v27 }
0x1886   :  { %v7611_v37 = vrot.slane %v7610_v55, 2 }
0x1888   :  { %v7612_v44 = vadd.f32 %v7611_v37, %v7610_v55 }
0x188a   :  { %v7613_v18 = vrot.slane %v7612_v44, 1 }
0x188c   :  { %v7614_v30 = vadd.f32 %v7613_v18, %v7612_v44 }
0x188e   :  { %v7615_v26 = vmul.f32 0.0078125, %v7614_v30 }
0x1890   :  { %v13584_v19 = vsub.f32 %v13554_v38, %v7615_v26  ;;  %v13587_v10 = vsub.f32 %v13552_v52, %v7615_v26  ;;  %v13590_v57 = vsub.f32 %v13562_v8, %v7615_v26  ;;  %v13593_v42 = vsub.f32 %v13560_v11, %v7615_v26 }
0x1891   :  { %v13595_v1 = vsub.f32 %v7520_v43, %v7615_v26  ;;  %v13597_v12 = vsub.f32 %v7525_v62, %v7615_v26  ;;  %v13599_v51 = vsub.f32 %v7530_v34, %v7615_v26  ;;  %v13601_v36 = vsub.f32 %v7535_v48, %v7615_v26 }
0x1892   :  { %v13603_v41 = vsub.f32 %v7540_v25, %v7615_v26  ;;  %v13605_v38 = vsub.f32 %v7545_v14, %v7615_v26  ;;  %v13607_v52 = vsub.f32 %v7550_v13, %v7615_v26  ;;  %v13609_v61 = vsub.f32 %v7555_v40, %v7615_v26 }
0x1893   :  { %v13611_v8 = vsub.f32 %v7560_v39, %v7615_v26  ;;  %v13613_v11 = vsub.f32 %v7565_v60, %v7615_v26  ;;  %v13615_v43 = vsub.f32 %v7570_v28, %v7615_v26  ;;  %v13617_v62 = vsub.f32 %v7575_v24, %v7615_v26 }
0x1894   :  { %v7632_v48 = vmul.f32 %v13584_v19, %v13584_v19  ;;  %v7633_v34 = vmul.f32 %v13587_v10, %v13587_v10  ;;  %v7634_v14 = vmul.f32 %v13590_v57, %v13590_v57  ;;  %v7635_v25 = vmul.f32 %v13593_v42, %v13593_v42 }
0x1895   :  { %v7636_v39 = vmul.f32 %v13595_v1, %v13595_v1  ;;  %v7637_v17 = vmul.f32 %v13597_v12, %v13597_v12  ;;  %v7638_v33 = vmul.f32 %v13599_v51, %v13599_v51  ;;  %v7639_v54 = vmul.f32 %v13601_v36, %v13601_v36 }
0x1896   :  { %v7648_v40 = vsel %vm1243_vm6, %v7632_v48, 0.0  ;;  %v7649_v13 = vsel %vm1243_vm6, %v7633_v34, 0.0  ;;  %v7651_v53 = vsel %vm1243_vm6, %v7634_v14, 0.0  ;;  %v7653_v24 = vsel %vm1243_vm6, %v7635_v25, 0.0 }
0x1897   :  { %v7650_v60 = vadd.f32 %v7649_v13, %v7648_v40  ;;  %v7655_v45 = vsel %vm1243_vm6, %v7636_v39, 0.0  ;;  %v7657_v27 = vsel %vm1243_vm6, %v7637_v17, 0.0  ;;  %v7640_v59 = vmul.f32 %v13603_v41, %v13603_v41 }
0x1898   :  { %v7659_v55 = vsel %vm1243_vm6, %v7638_v33, 0.0  ;;  %v7641_v44 = vmul.f32 %v13605_v38, %v13605_v38  ;;  %v7661_v18 = vsel %vm1243_vm6, %v7639_v54, 0.0  ;;  %v7642_v26 = vmul.f32 %v13607_v52, %v13607_v52 }
0x1899   :  { %v7652_v63 = vadd.f32 %v7651_v53, %v7650_v60  ;;  %v7663_v48 = vsel %vm1243_vm6, %v7640_v59, 0.0  ;;  %v7643_v14 = vmul.f32 %v13609_v61, %v13609_v61  ;;  %v7644_v13 = vmul.f32 %v13611_v8, %v13611_v8 }
0x189a   :  { %v7665_v25 = vsel %vm1243_vm6, %v7641_v44, 0.0  ;;  %v7667_v60 = vsel %vm1243_vm6, %v7642_v26, 0.0  ;;  %v7645_v53 = vmul.f32 %v13613_v11, %v13613_v11 }
0x189b   :  { %v7654_v28 = vadd.f32 %v7653_v24, %v7652_v63  ;;  %v7669_v63 = vsel %vm1243_vm6, %v7643_v14, 0.0  ;;  %v7646_v24 = vmul.f32 %v13615_v43, %v13615_v43 }
0x189d   :  { %v7656_v46 = vadd.f32 %v7655_v45, %v7654_v28  ;;  %v7671_v28 = vsel %vm1243_vm6, %v7644_v13, 0.0  ;;  %v7647_v45 = vmul.f32 %v13617_v62, %v13617_v62 }
0x189f   :  { %v7658_v2 = vadd.f32 %v7657_v27, %v7656_v46  ;;  %v7673_v46 = vsel %vm1243_vm6, %v7645_v53, 0.0  ;;  %v7675_v27 = vsel %vm1243_vm6, %v7646_v24, 0.0  ;;  %v7677_v59 = vsel %vm1243_vm6, %v7647_v45, 0.0 }
0x18a1   :  { %v7660_v37 = vadd.f32 %v7659_v55, %v7658_v2  ;;  %s9860_s0 = spop %9859 }
0x18a3   :  { %v7662_v30 = vadd.f32 %v7661_v18, %v7660_v37 }
0x18a5   :  { %v7664_v34 = vadd.f32 %v7663_v48, %v7662_v30 }
0x18a7   :  { %v7666_v40 = vadd.f32 %v7665_v25, %v7664_v34  ;;  %v7379_v25 = vld [vmem:[%s14102_s1 + $0x298] sm:$0x1] }
0x18a9   :  { %v7668_v39 = vadd.f32 %v7667_v60, %v7666_v40 }
0x18ab   :  { %v7670_v17 = vadd.f32 %v7669_v63, %v7668_v39  ;;  %v13676_v39 = vld [vmem:[%s14102_s1 + $0x2a0] ss:$0 sm:$0xff] }
0x18ad   :  { %v7672_v33 = vadd.f32 %v7671_v28, %v7670_v17 }
0x18af   :  { %v7674_v54 = vadd.f32 %v7673_v46, %v7672_v33 }
0x18b1   :  { %v7676_v2 = vadd.f32 %v7675_v27, %v7674_v54 }
0x18b3   :  { %v7678_v55 = vadd.f32 %v7677_v59, %v7676_v2 }
0x18b5   :  { %v7679_v37 = vrot.slane %v7678_v55, 4 }
0x18b7   :  { %v7680_v44 = vadd.f32 %v7679_v37, %v7678_v55 }
0x18b9   :  { %v7681_v18 = vrot.slane %v7680_v44, 2 }
0x18bb   :  { %v7682_v30 = vadd.f32 %v7681_v18, %v7680_v44 }
0x18bd   :  { %v7683_v26 = vrot.slane %v7682_v30, 1 }
0x18bf   :  { %v7684_v48 = vadd.f32 %v7683_v26, %v7682_v30 }
0x18c1   :  { %v7685_v34 = vmul.f32 0.0078125, %v7684_v48 }
0x18c3   :  { %v7686_v14 = vadd.f32 1e-05, %v7685_v34 }
0x18c5   :  { %10021 = vrsqrt.f32 %v7686_v14 }
0x18cf   :  { %v10022_v40 = vpop.eup %10021 }
0x18d0   :  { %v7688_v13 = vmul.f32 %v10022_v40, %v7379_v25 }
0x18d2   :  { %v13671_v60 = vrot.slane %v7688_v13, %v10164_v15 }
0x18d4   :  { %v7707_v53 = vmul.f32 %v13671_v60, %v13615_v43  ;;  %v7694_v63 = vmul.f32 %v13671_v60, %v13587_v10  ;;  %v7693_v17 = vmul.f32 %v13671_v60, %v13584_v19  ;;  %v7695_v24 = vmul.f32 %v13671_v60, %v13590_v57  ;;  %v13700_v57 = vld [vmem:[%s14102_s1 + $0x2a8] ss:$0 sm:$0xff] }
0x18d5   :  { %v7697_v28 = vmul.f32 %v13671_v60, %v13595_v1  ;;  %v7696_v33 = vmul.f32 %v13671_v60, %v13593_v42  ;;  %v7701_v45 = vmul.f32 %v13671_v60, %v13603_v41  ;;  %v7698_v43 = vmul.f32 %v13671_v60, %v13597_v12 }
0x18d6   :  { %v7714_v10 = vadd.f32 %v13676_v39, %v7694_v63  ;;  %v7713_v46 = vadd.f32 %v13676_v39, %v7693_v17  ;;  %v7715_v19 = vadd.f32 %v13676_v39, %v7695_v24  ;;  %v13713_v17 = vadd.f32 %v13676_v39, %v7707_v53 }
0x18d7   :  { %v7717_v1 = vadd.f32 %v13676_v39, %v7697_v28  ;;  %v7716_v42 = vadd.f32 %v13676_v39, %v7696_v33  ;;  %v7721_v41 = vadd.f32 %v13676_v39, %v7701_v45  ;;  %v7718_v54 = vadd.f32 %v13676_v39, %v7698_v43 }
0x18d8   :  { %vm7730_vm9 = vcmp.gt.f32.partialorder %v7714_v10, 0.0  ;;  %v7746_v12 = vmul.f32 0.01, %v7714_v10  ;;  %vm7729_vm8 = vcmp.gt.f32.partialorder %v7713_v46, 0.0  ;;  %v7745_v27 = vmul.f32 0.01, %v7713_v46 }
0x18d9   :  { %vm7731_vm0 = vcmp.gt.f32.partialorder %v7715_v19, 0.0  ;;  %v7747_v2 = vmul.f32 0.01, %v7715_v19  ;;  %vm7733_vm10 = vcmp.gt.f32.partialorder %v7717_v1, 0.0  ;;  %v7749_v59 = vmul.f32 0.01, %v7717_v1 }
0x18da   :  { %v7762_v55 = vsel %vm7730_vm9, %v7714_v10, %v7746_v12  ;;  %v7761_v37 = vsel %vm7729_vm8, %v7713_v46, %v7745_v27  ;;  %vm7732_vm11 = vcmp.gt.f32.partialorder %v7716_v42, 0.0  ;;  %v7748_v44 = vmul.f32 0.01, %v7716_v42 }
0x18db   :  { %v7784_v18 = vmul.f32 %v13700_v57, %v7762_v55  ;;  %v7783_v30 = vmul.f32 %v13700_v57, %v7761_v37  ;;  %v7763_v26 = vsel %vm7731_vm0, %v7715_v19, %v7747_v2  ;;  %v7765_v48 = vsel %vm7733_vm10, %v7717_v1, %v7749_v59 }
0x18dc   :  { %v7785_v34 = vmul.f32 %v13700_v57, %v7763_v26  ;;  %v7764_v14 = vsel %vm7732_vm11, %v7716_v42, %v7748_v44  ;;  %vm7737_vm13 = vcmp.gt.f32.partialorder %v7721_v41, 0.0  ;;  %v7787_v13 = vmul.f32 %v13700_v57, %v7765_v48 }
0x18dd   :  { %v7802_v25 = vsel %vm1243_vm6, %v7784_v18, 0.0  ;;  %v7799_v40 = vsel %vm1243_vm6, %v7783_v30, 0.0  ;;  %v7753_v63 = vmul.f32 0.01, %v7721_v41  ;;  %v7786_v24 = vmul.f32 %v13700_v57, %v7764_v14 }
0x18de   :  { %7803 = vadd.xlane.f32.xlu0 %v7802_v25  ;;  %7800 = vadd.xlane.f32.xlu1 %v7799_v40  ;;  %vm7734_vm9 = vcmp.gt.f32.partialorder %v7718_v54, 0.0  ;;  %v7750_v28 = vmul.f32 0.01, %v7718_v54  ;;  %v7805_v33 = vsel %vm1243_vm6, %v7785_v34, 0.0  ;;  %v7699_v43 = vmul.f32 %v13671_v60, %v13599_v51 }
0x18df   :  { %v7769_v45 = vsel %vm7737_vm13, %v7721_v41, %v7753_v63  ;;  %v7702_v10 = vmul.f32 %v13671_v60, %v13605_v38  ;;  %v7700_v53 = vmul.f32 %v13671_v60, %v13601_v36  ;;  %v7703_v1 = vmul.f32 %v13671_v60, %v13607_v52 }
0x18e0   :  { %v7791_v46 = vmul.f32 %v13700_v57, %v7769_v45  ;;  %v7766_v19 = vsel %vm7734_vm9, %v7718_v54, %v7750_v28  ;;  %v7811_v42 = vsel %vm1243_vm6, %v7787_v13, 0.0  ;;  %v7719_v12 = vadd.f32 %v13676_v39, %v7699_v43 }
0x18e1   :  { %v7722_v41 = vadd.f32 %v13676_v39, %v7702_v10  ;;  %v7705_v51 = vmul.f32 %v13671_v60, %v13611_v8  ;;  %v7808_v38 = vsel %vm1243_vm6, %v7786_v24, 0.0  ;;  %v7720_v54 = vadd.f32 %v13676_v39, %v7700_v53 }
0x18e2   :  { %7806 = vadd.xlane.f32.xlu0 %v7805_v33  ;;  %7812 = vadd.xlane.f32.xlu1 %v7811_v42  ;;  %v7723_v36 = vadd.f32 %v13676_v39, %v7703_v1  ;;  %v7704_v52 = vmul.f32 %v13671_v60, %v13609_v61  ;;  %v7788_v27 = vmul.f32 %v13700_v57, %v7766_v19  ;;  %vm7735_vm13 = vcmp.gt.f32.partialorder %v7719_v12, 0.0 }
0x18e3   :  { %v7751_v2 = vmul.f32 0.01, %v7719_v12  ;;  %vm7738_vm8 = vcmp.gt.f32.partialorder %v7722_v41, 0.0  ;;  %v7823_v59 = vsel %vm1243_vm6, %v7791_v46, 0.0  ;;  %v7754_v55 = vmul.f32 0.01, %v7722_v41 }
0x18e4   :  { %vm7736_vm0 = vcmp.gt.f32.partialorder %v7720_v54, 0.0  ;;  %v7752_v8 = vmul.f32 0.01, %v7720_v54  ;;  %v7755_v44 = vmul.f32 0.01, %v7723_v36  ;;  %v7725_v18 = vadd.f32 %v13676_v39, %v7705_v51 }
0x18e5   :  { %v7767_v37 = vsel %vm7735_vm13, %v7719_v12, %v7751_v2  ;;  %v7724_v30 = vadd.f32 %v13676_v39, %v7704_v52  ;;  %v7770_v26 = vsel %vm7738_vm8, %v7722_v41, %v7754_v55  ;;  %vm7739_vm10 = vcmp.gt.f32.partialorder %v7723_v36, 0.0 }
0x18e6   :  { %7809 = vadd.xlane.f32.xlu0 %v7808_v38  ;;  %7824 = vadd.xlane.f32.xlu1 %v7823_v59  ;;  %v7789_v61 = vmul.f32 %v13700_v57, %v7767_v37  ;;  %v7768_v48 = vsel %vm7736_vm0, %v7720_v54, %v7752_v8  ;;  %vm7741_vm11 = vcmp.gt.f32.partialorder %v7725_v18, 0.0  ;;  %v7814_v34 = vsel %vm1243_vm6, %v7788_v27, 0.0 }
0x18e7   :  { %v7792_v14 = vmul.f32 %v13700_v57, %v7770_v26  ;;  %v7757_v25 = vmul.f32 0.01, %v7725_v18  ;;  %v7790_v13 = vmul.f32 %v13700_v57, %v7768_v48  ;;  %v7771_v63 = vsel %vm7739_vm10, %v7723_v36, %v7755_v44 }
0x18e8   :  { %v7817_v40 = vsel %vm1243_vm6, %v7789_v61, 0.0  ;;  %v7756_v24 = vmul.f32 0.01, %v7724_v30  ;;  %v7759_v33 = vmul.f32 0.01, %v13713_v17  ;;  %v7706_v45 = vmul.f32 %v13671_v60, %v13613_v11 }
0x18e9   :  { %v7773_v28 = vsel %vm7741_vm11, %v7725_v18, %v7757_v25  ;;  %v7708_v43 = vmul.f32 %v13671_v60, %v13617_v62  ;;  %vm7740_vm9 = vcmp.gt.f32.partialorder %v7724_v30, 0.0  ;;  %vm7743_vm13 = vcmp.gt.f32.partialorder %v13713_v17, 0.0 }
0x18ea   :  { %7815 = vadd.xlane.f32.xlu0 %v7814_v34  ;;  %7818 = vadd.xlane.f32.xlu1 %v7817_v40  ;;  %v7726_v10 = vadd.f32 %v13676_v39, %v7706_v45  ;;  %v7826_v46 = vsel %vm1243_vm6, %v7792_v14, 0.0  ;;  %v7820_v19 = vsel %vm1243_vm6, %v7790_v13, 0.0  ;;  %v7793_v53 = vmul.f32 %v13700_v57, %v7771_v63 }
0x18eb   :  { %v7795_v1 = vmul.f32 %v13700_v57, %v7773_v28  ;;  %v7772_v42 = vsel %vm7740_vm9, %v7724_v30, %v7756_v24  ;;  %v7775_v11 = vsel %vm7743_vm13, %v13713_v17, %v7759_v33  ;;  %v7728_v62 = vadd.f32 %v13676_v39, %v7708_v43 }
0x18ec   :  { %v7758_v12 = vmul.f32 0.01, %v7726_v10  ;;  %vm7742_vm8 = vcmp.gt.f32.partialorder %v7726_v10, 0.0  ;;  %v7829_v60 = vsel %vm1243_vm6, %v7793_v53, 0.0  ;;  %v7794_v51 = vmul.f32 %v13700_v57, %v7772_v42 }
0x18ed   :  { %v7835_v41 = vsel %vm1243_vm6, %v7795_v1, 0.0  ;;  %v7797_v38 = vmul.f32 %v13700_v57, %v7775_v11  ;;  %v7760_v36 = vmul.f32 0.01, %v7728_v62  ;;  %vm7744_vm0 = vcmp.gt.f32.partialorder %v7728_v62, 0.0 }
0x18ee   :  { %7827 = vadd.xlane.f32.xlu0 %v7826_v46  ;;  %7821 = vadd.xlane.f32.xlu1 %v7820_v19  ;;  %v7774_v54 = vsel %vm7742_vm8, %v7726_v10, %v7758_v12  ;;  %v7832_v52 = vsel %vm1243_vm6, %v7794_v51, 0.0  ;;  %v7849_v8 = vstv %s9860_s0  ;;  %v14164_v51 = vld [vmem:[#allocation8_spill] sm:$0xff]  ;;  %vm14166_vm10 = vcmask 523264  }
0x18ef   :  { %v7841_v17 = vsel %vm1243_vm6, %v7797_v38, 0.0  ;;  %v7796_v39 = vmul.f32 %v13700_v57, %v7774_v54  ;;  %v7776_v27 = vsel %vm7744_vm0, %v7728_v62, %v7760_v36  ;;  %vm14167_vm11 = vmmov %vm14166_vm10 }
0x18f0   :  { %v7798_v59 = vmul.f32 %v13700_v57, %v7776_v27 }
0x18f1   :  { %v7838_v2 = vsel %vm1243_vm6, %v7796_v39, 0.0 }
0x18f2   :  { %7830 = vadd.xlane.f32.xlu0 %v7829_v60  ;;  %7836 = vadd.xlane.f32.xlu1 %v7835_v41  ;;  %v7844_v55 = vsel %vm1243_vm6, %v7798_v59, 0.0 }
0x18f6   :  { %7833 = vadd.xlane.f32.xlu0 %v7832_v52  ;;  %7842 = vadd.xlane.f32.xlu1 %v7841_v17 }
0x18fa   :  { %7839 = vadd.xlane.f32.xlu0 %v7838_v2 }
0x18fe   :  { %7845 = vadd.xlane.f32.xlu0 %v7844_v55 }
0x196b   :  { %v7804_v37 = vpop.xlane.xlu0 %7803  ;;  %v7801_v44 = vpop.xlane.xlu1 %7800 }
0x196c   :  { %v7852_v18 = vadd.f32 %v7849_v8, %v7804_v37  ;;  %v7851_v30 = vadd.f32 %v7849_v8, %v7801_v44 }
0x196e   :  { %v13769_v61 = vsub.f32 %v7852_v18, %v11151_v4  ;;  %v13772_v26 = vsub.f32 %v7851_v30, %v11145_v0 }
0x196f   :  { %v7807_v48 = vpop.xlane.xlu0 %7806  ;;  %v7813_v34 = vpop.xlane.xlu1 %7812 }
0x1970   :  { %v7853_v14 = vadd.f32 %v7849_v8, %v7807_v48  ;;  %7903 = vperm.xlu0 %9868, %v13769_v61   ;;  %7900 = vperm.xlu1 %9867, %v13772_v26   ;;  %v7855_v63 = vadd.f32 %v7849_v8, %v7813_v34 }
0x1972   :  { %v13777_v57 = vsub.f32 %v7853_v14, %v11147_v5  ;;  %v13785_v43 = vsub.f32 %v7855_v63, %v14153_v49 }
0x1973   :  { %v7810_v25 = vpop.xlane.xlu0 %7809  ;;  %v7825_v40 = vpop.xlane.xlu1 %7824 }
0x1974   :  { %v7854_v13 = vadd.f32 %v7849_v8, %v7810_v25  ;;  %7906 = vperm.xlu1 %9867, %v13777_v57   ;;  %v7859_v10 = vadd.f32 %v7849_v8, %v7825_v40 }
0x1976   :  { %v13781_v24 = vsub.f32 %v7854_v13, %v11155_v7  ;;  %v13793_v42 = vsub.f32 %v7859_v10, %v11145_v0 }
0x1977   :  { %v7816_v28 = vpop.xlane.xlu0 %7815  ;;  %v7819_v33 = vpop.xlane.xlu1 %7818 }
0x1978   :  { %v7856_v45 = vadd.f32 %v7849_v8, %v7816_v28  ;;  %7909 = vperm.xlu1 %9867, %v13781_v24   ;;  %v7857_v11 = vadd.f32 %v7849_v8, %v7819_v33 }
0x197a   :  { %v13788_v46 = vsub.f32 %v7856_v45, %v14154_v22  ;;  %v13801_v38 = vsub.f32 %v7857_v11, %v14164_v51 }
0x197b   :  { %v7828_v19 = vpop.xlane.xlu0 %7827  ;;  %v7822_v53 = vpop.xlane.xlu1 %7821 }
0x197c   :  { %v7860_v1 = vadd.f32 %v7849_v8, %v7828_v19  ;;  %7915 = vperm.xlu0 %9868, %v13788_v46   ;;  %7912 = vperm.xlu1 %9867, %v13785_v43   ;;  %v7858_v54 = vadd.f32 %v7849_v8, %v7822_v53 }
0x197e   :  { %v13796_v12 = vsub.f32 %v7860_v1, %v11151_v4  ;;  %v14165_v4 = vld [vmem:[#allocation9_spill] sm:$0xff] }
0x197f   :  { %v7831_v62 = vpop.xlane.xlu0 %7830  ;;  %v7837_v41 = vpop.xlane.xlu1 %7836  ;;  %v13809_v17 = vsub.f32 %v7858_v54, %v14165_v4 }
0x1980   :  { %v7861_v60 = vadd.f32 %v7849_v8, %v7831_v62  ;;  %7927 = vperm.xlu0 %9868, %v13796_v12   ;;  %7924 = vperm.xlu1 %9867, %v13793_v42   ;;  %v7863_v39 = vadd.f32 %v7849_v8, %v7837_v41 }
0x1982   :  { %v13804_v36 = vsub.f32 %v7861_v60, %v11147_v5  ;;  %v13817_v5 = vsub.f32 %v7863_v39, %v14153_v49  ;;  %v8573_v49 = vld [vmem:[%s14102_s1 + $0x2b8] sm:$0xff] }
0x1983   :  { %v7834_v0 = vpop.xlane.xlu0 %7833  ;;  %v7843_v2 = vpop.xlane.xlu1 %7842 }
0x1984   :  { %v7862_v52 = vadd.f32 %v7849_v8, %v7834_v0  ;;  %7930 = vperm.xlu0 %9868, %v13804_v36   ;;  %7918 = vperm.xlu1 %9867, %v13801_v38   ;;  %v7865_v37 = vadd.f32 %v7849_v8, %v7843_v2 }
0x1986   :  { %v13812_v27 = vsub.f32 %v7862_v52, %v11155_v7  ;;  %v13825_v7 = vsub.f32 %v7865_v37, %v14164_v51 }
0x1987   :  { %v7840_v59 = vpop.xlane.xlu0 %7839 }
0x1988   :  { %v7864_v55 = vadd.f32 %v7849_v8, %v7840_v59  ;;  %7933 = vperm.xlu0 %9868, %v13812_v27   ;;  %7921 = vperm.xlu1 %9867, %v13809_v17  }
0x198a   :  { %v13820_v44 = vsub.f32 %v7864_v55, %v14154_v22  ;;  %v8574_v22 = vld [vmem:[%s14102_s1 + $0x2c0] sm:$0xff] }
0x198b   :  { %v7846_v18 = vpop.xlane.xlu0 %7845 }
0x198c   :  { %v7866_v30 = vadd.f32 %v7849_v8, %v7846_v18  ;;  %7939 = vperm.xlu0 %9868, %v13820_v44   ;;  %7936 = vperm.xlu1 %9867, %v13817_v5   ;;  %v9839_v8 = vpack.c.bf16 %v8574_v22, %v8573_v49 }
0x198e   :  { %v13828_v48 = vsub.f32 %v7866_v30, %v14165_v4  ;;  %9840 = vmatprep.subr.bf16.mxu0 %v9839_v8 }
0x198f   :  { %9842 = vmatpush3.bf16.msra.mxu0 %v9839_v8 }
0x1990   :  { %7945 = vperm.xlu0 %9868, %v13828_v48   ;;  %7942 = vperm.xlu1 %9867, %v13825_v7  }
0x19ef   :  { %v7901_v34 = vpop.permute.xlu1 %7900  ;;  %v7904_v25 = vpop.permute.xlu0 %7903 }
0x19f0   :  { %v7954_v28 = vrot.slane %v7904_v25, %v11245_v31  ;;  %v7950_v33 = vrot.slane %v7901_v34, %v11245_v31 }
0x19f2   :  { %v8011_v11 = vsel %vm2142_vm14, %v7954_v28, %v7950_v33 }
0x19f3   :  { %v7907_v14 = vpop.permute.xlu1 %7906 }
0x19f4   :  { %v7958_v45 = vrot.slane %v7907_v14, %v11245_v31 }
0x19f6   :  { %v8012_v62 = vsel %vm2144_vm15, %v7958_v45, %v8011_v11 }
0x19f7   :  { %v7910_v40 = vpop.permute.xlu1 %7909 }
0x19f8   :  { %v7962_v53 = vrot.slane %v7910_v40, %v11245_v31 }
0x19fa   :  { %v8013_v51 = vsel %vm2146_vm2, %v7962_v53, %v8012_v62 }
0x19fb   :  { %v7916_v13 = vpop.permute.xlu0 %7915  ;;  %v7913_v63 = vpop.permute.xlu1 %7912 }
0x19fc   :  { %v7966_v1 = vrot.slane %v7913_v63, %v11245_v31  ;;  %v7970_v54 = vrot.slane %v7916_v13, %v11245_v31 }
0x19fe   :  { %v8014_v0 = vsel %vm2148_vm3, %v7966_v1, %v8013_v51  ;;  %v8576_v51 = vld [vmem:[%s14102_s1 + $0x2d0] sm:$0xff] }
0x19ff   :  { %v7928_v10 = vpop.permute.xlu0 %7927  ;;  %v7925_v19 = vpop.permute.xlu1 %7924  ;;  %v8015_v18 = vsel %vm2150_vm4, %v7970_v54, %v8014_v0  ;;  %v8577_v54 = vld [vmem:[%s14102_s1 + $0x2d8] sm:$0xff] }
0x1a00   :  { %v7986_v4 = vrot.slane %v7928_v10, %v11245_v31  ;;  %v7982_v39 = vrot.slane %v7925_v19, %v11245_v31 }
0x1a02   :  { %v8018_v8 = vsel %vm2142_vm14, %v7986_v4, %v7982_v39  ;;  %v8580_v39 = vld [vmem:[%s14102_s1 + $0x2f0] sm:$0xff] }
0x1a03   :  { %v7931_v60 = vpop.permute.xlu0 %7930  ;;  %v7919_v41 = vpop.permute.xlu1 %7918 }
0x1a04   :  { %v7974_v52 = vrot.slane %v7919_v41, %v11245_v31  ;;  %v7990_v55 = vrot.slane %v7931_v60, %v11245_v31  ;;  %v8575_v41 = vld [vmem:[%s14102_s1 + $0x2c8] sm:$0xff] }
0x1a05   :  { %v9843_v0 = vpack.c.bf16 %v8576_v51, %v8575_v41 }
0x1a06   :  { %v8016_v49 = vsel %vm2152_vm5, %v7974_v52, %v8015_v18  ;;  %v8019_v40 = vsel %vm2144_vm15, %v7990_v55, %v8018_v8  ;;  %v8578_v52 = vld [vmem:[%s14102_s1 + $0x2e0] sm:$0xff] }
0x1a07   :  { %v7934_v2 = vpop.permute.xlu0 %7933  ;;  %v7922_v59 = vpop.permute.xlu1 %7921  ;;  %v9847_v4 = vpack.c.bf16 %v8578_v52, %v8577_v54  ;;  %9844 = vmatprep.subr.bf16.mxu0 %v9843_v0 }
0x1a08   :  { %v7978_v37 = vrot.slane %v7922_v59, %v11245_v31  ;;  %v7994_v30 = vrot.slane %v7934_v2, %v11245_v31  ;;  %9846 = vmatpush3.bf16.msra.mxu0 %v9843_v0 }
0x1a09   :  { %9848 = vmatprep.subr.bf16.mxu0 %v9847_v4 }
0x1a0a   :  { %v8017_v22 = vsel %vm2154_vm7, %v7978_v37, %v8016_v49  ;;  %v8020_v63 = vsel %vm2146_vm2, %v7994_v30, %v8019_v40 }
0x1a0b   :  { %v7940_v34 = vpop.permute.xlu0 %7939  ;;  %v7937_v14 = vpop.permute.xlu1 %7936  ;;  %v8027_v25 = vsel %vm1243_vm6, %v8017_v22, -inf }
0x1a0c   :  { %v7998_v13 = vrot.slane %v7937_v14, %v11245_v31  ;;  %8028 = vmax.xlane.f32.xlu1 %v8027_v25  ;;  %v8002_v28 = vrot.slane %v7940_v34, %v11245_v31  ;;  %9850 = vmatpush3.bf16.msra.mxu0 %v9847_v4 }
0x1a0e   :  { %v8021_v33 = vsel %vm2148_vm3, %v7998_v13, %v8020_v63 }
0x1a0f   :  { %v7946_v45 = vpop.permute.xlu0 %7945  ;;  %v7943_v10 = vpop.permute.xlu1 %7942  ;;  %v8022_v1 = vsel %vm2150_vm4, %v8002_v28, %v8021_v33 }
0x1a10   :  { %v8010_v19 = vrot.slane %v7946_v45, %v11245_v31  ;;  %v8006_v53 = vrot.slane %v7943_v10, %v11245_v31 }
0x1a12   :  { %v8023_v11 = vsel %vm2152_vm5, %v8006_v53, %v8022_v1 }
0x1a13   :  { %v8024_v62 = vsel %vm2154_vm7, %v8010_v19, %v8023_v11 }
0x1a14   :  { %v8030_v60 = vsel %vm1243_vm6, %v8024_v62, -inf }
0x1a15   :  { %8031 = vmax.xlane.f32.xlu0 %v8030_v60 }
0x1a1d   :  { %5885 = vrot.lane.b32.xlu1 %v12666_v47, %s10119_s16  ;;  %v8579_v47 = vld [vmem:[%s14102_s1 + $0x2e8] sm:$0xff] }
0x1a1e   :  { %v9851_v2 = vpack.c.bf16 %v8580_v39, %v8579_v47 }
0x1a20   :  { %9852 = vmatprep.subr.bf16.mxu0 %v9851_v2 }
0x1a21   :  { %9854 = vmatpush3.bf16.msra.mxu0 %v9851_v2 }
0x1a22   :  { %9749 = vmatprep.subr.mxu0 %v14139_v16 }
0x1a2b   :  { %5883 = vrot.lane.b32.xlu0 %v12660_v29, %s10119_s16 }
0x1a99   :  { %v8029_v59 = vpop.xlane.xlu1 %8028 }
0x1a9a   :  { %v8038_v55 = vrot.slane %v8029_v59, %v10164_v15  ;;  %v8042_v29 = vrot.slane %v8029_v59, %v10898_v58  ;;  %v8046_v37 = vrot.slane %v8029_v59, %v10901_v3  ;;  %v8050_v18 = vrot.slane %v8029_v59, %v10908_v9 }
0x1a9b   :  { %v8054_v30 = vrot.slane %v8029_v59, %v10911_v32  ;;  %v8058_v34 = vrot.slane %v8029_v59, %v10918_v23  ;;  %v8066_v1 = vrot.slane %v8029_v59, %v11141_v6 }
0x1a9c   :  { %v8115_v49 = vsub.f32 %v13772_v26, %v8038_v55  ;;  %v8116_v22 = vsub.f32 %v13769_v61, %v8042_v29  ;;  %v8117_v8 = vsub.f32 %v13777_v57, %v8046_v37  ;;  %v8118_v14 = vsub.f32 %v13781_v24, %v8050_v18 }
0x1a9d   :  { %v8119_v13 = vsub.f32 %v13785_v43, %v8054_v30  ;;  %v8120_v28 = vsub.f32 %v13788_v46, %v8058_v34  ;;  %v8062_v57 = vrot.slane %v8029_v59, %v11136_v56  ;;  %v5886_v11 = vpop.permute.xlu1 %5885 }
0x1a9e   :  { %v8131_v25 = vmul.f32 1.442695, %v8115_v49  ;;  %v8133_v40 = vmul.f32 1.442695, %v8116_v22  ;;  %v8135_v63 = vmul.f32 1.442695, %v8117_v8 }
0x1a9f   :  { %v8137_v33 = vmul.f32 1.442695, %v8118_v14  ;;  %v8139_v10 = vmul.f32 1.442695, %v8119_v13  ;;  %v8141_v24 = vmul.f32 1.442695, %v8120_v28  ;;  %v8121_v62 = vsub.f32 %v13801_v38, %v8062_v57 }
0x1aa0   :  { %10023 = vpow2.f32 %v8131_v25  ;;  %v8122_v38 = vsub.f32 %v13809_v17, %v8066_v1 }
0x1aa1   :  { %10025 = vpow2.f32 %v8133_v40 }
0x1aa2   :  { %v8032_v45 = vpop.xlane.xlu0 %8031  ;;  %10027 = vpow2.f32 %v8135_v63  ;;  %v8145_v17 = vmul.f32 1.442695, %v8122_v38 }
0x1aa3   :  { %v8070_v26 = vrot.slane %v8032_v45, %v10164_v15  ;;  %v8074_v61 = vrot.slane %v8032_v45, %v10898_v58  ;;  %10029 = vpow2.f32 %v8137_v33  ;;  %v8078_v19 = vrot.slane %v8032_v45, %v10901_v3 }
0x1aa4   :  { %10031 = vpow2.f32 %v8139_v10  ;;  %v8082_v60 = vrot.slane %v8032_v45, %v10908_v9  ;;  %v8086_v4 = vrot.slane %v8032_v45, %v10911_v32  ;;  %v8094_v59 = vrot.slane %v8032_v45, %v11136_v56 }
0x1aa5   :  { %v8123_v43 = vsub.f32 %v13793_v42, %v8070_v26  ;;  %v8124_v53 = vsub.f32 %v13796_v12, %v8074_v61  ;;  %10033 = vpow2.f32 %v8141_v24  ;;  %v8125_v51 = vsub.f32 %v13804_v36, %v8078_v19 }
0x1aa6   :  { %v5884_v46 = vpop.permute.xlu0 %5883  ;;  %v5890_v12 = vsel %vm439_vm1, %v12913_v20, %v5886_v11  ;;  %v8143_v36 = vmul.f32 1.442695, %v8121_v62  ;;  %v8126_v20 = vsub.f32 %v13812_v27, %v8082_v60  ;;  %v8127_v55 = vsub.f32 %v13817_v5, %v8086_v4 }
0x1aa7   :  { %v8147_v41 = vmul.f32 1.442695, %v8123_v43  ;;  %v8149_v54 = vmul.f32 1.442695, %v8124_v53  ;;  %v5889_v0 = vsel %vm439_vm1, %v12881_v50, %v5884_v46  ;;  %v8090_v50 = vrot.slane %v8032_v45, %v10918_v23 }
0x1aa8   :  { %9746 = vmatprep.mubr.msk.f32.mxu0 %vm14166_vm10, %v5889_v0  ;;  %v8151_v47 = vmul.f32 1.442695, %v8125_v51  ;;  %v8098_v29 = vrot.slane %v8032_v45, %v11141_v6  ;;  %v8153_v37 = vmul.f32 1.442695, %v8126_v20  ;;  %v8129_v49 = vsub.f32 %v13825_v7, %v8094_v59 }
0x1aa9   :  { %9747 = vmatmul.mubr.msk.f32.vlgmr.msra.gmra.mrb[100].mxu0 %vm14167_vm11, %v5890_v12  ;;  %10035 = vpow2.f32 %v8147_v41  ;;  %v8128_v27 = vsub.f32 %v13820_v44, %v8090_v50  ;;  %v8155_v22 = vmul.f32 1.442695, %v8127_v55  ;;  %vm8818_vm1 = vcmask 33792  }
0x1aaa   :  { %v13917_v42 = vpop.eup %10023  ;;  %9751 = vmatprep.mubr.msk.f32.mxu0 %vm14157_vm12, %v14139_v16  ;;  %10037 = vpow2.f32 %v8149_v54  ;;  %v8130_v5 = vsub.f32 %v13828_v48, %v8098_v29  ;;  %v8159_v14 = vmul.f32 1.442695, %v8129_v49 }
0x1aab   :  { %v13922_v52 = vpop.eup %10025  ;;  %8180 = vperm.xlu1 %9867, %v13917_v42   ;;  %10039 = vpow2.f32 %v8143_v36  ;;  %v8157_v8 = vmul.f32 1.442695, %v8128_v27 }
0x1aac   :  { %8183 = vperm.xlu0 %9868, %v13922_v52   ;;  %v13933_v39 = vpop.eup %10027  ;;  %10041 = vpow2.f32 %v8151_v47  ;;  %v8161_v25 = vmul.f32 1.442695, %v8130_v5 }
0x1aad   :  { %v13935_v2 = vpop.eup %10029  ;;  %10043 = vpow2.f32 %v8145_v17 }
0x1aae   :  { %v13943_v18 = vpop.eup %10031  ;;  %10045 = vpow2.f32 %v8153_v37 }
0x1aaf   :  { %8186 = vperm.xlu1 %9867, %v13933_v39   ;;  %v13945_v30 = vpop.eup %10033  ;;  %10047 = vpow2.f32 %v8155_v22 }
0x1ab0   :  { %8189 = vperm.xlu0 %9868, %v13935_v2   ;;  %10049 = vpow2.f32 %v8157_v8 }
0x1ab1   :  { %10051 = vpow2.f32 %v8159_v14 }
0x1ab2   :  { %10053 = vpow2.f32 %v8161_v25 }
0x1ab3   :  { %8192 = vperm.xlu1 %9867, %v13943_v18   ;;  %v13951_v34 = vpop.eup %10035 }
0x1ab4   :  { %8195 = vperm.xlu0 %9868, %v13945_v30   ;;  %v13953_v44 = vpop.eup %10037 }
0x1ab5   :  { %v13957_v7 = vpop.eup %10039 }
0x1ab6   :  { %v13959_v40 = vpop.eup %10041 }
0x1ab7   :  { %8204 = vperm.xlu1 %9867, %v13951_v34   ;;  %v13963_v48 = vpop.eup %10043 }
0x1ab8   :  { %8207 = vperm.xlu0 %9868, %v13953_v44   ;;  %v13965_v13 = vpop.eup %10045 }
0x1ab9   :  { %v13969_v63 = vpop.eup %10047 }
0x1aba   :  { %v13971_v28 = vpop.eup %10049 }
0x1abb   :  { %8198 = vperm.xlu1 %9867, %v13957_v7   ;;  %v13975_v33 = vpop.eup %10051 }
0x1abc   :  { %8210 = vperm.xlu0 %9868, %v13959_v40   ;;  %v13977_v45 = vpop.eup %10053 }
0x1abf   :  { %8201 = vperm.xlu1 %9867, %v13963_v48  }
0x1ac0   :  { %8213 = vperm.xlu0 %9868, %v13965_v13  }
0x1ac3   :  { %8216 = vperm.xlu1 %9867, %v13969_v63  }
0x1ac4   :  { %8219 = vperm.xlu0 %9868, %v13971_v28  }
0x1ac7   :  { %8222 = vperm.xlu1 %9867, %v13975_v33  }
0x1ac8   :  { %8225 = vperm.xlu0 %9868, %v13977_v45  }
0x1b2a   :  { %v8181_v26 = vpop.permute.xlu1 %8180 }
0x1b2b   :  { %v8184_v61 = vpop.permute.xlu0 %8183  ;;  %v8230_v43 = vrot.slane %v8181_v26, %v11245_v31 }
0x1b2c   :  { %v8234_v19 = vrot.slane %v8184_v61, %v11245_v31 }
0x1b2e   :  { %v8187_v57 = vpop.permute.xlu1 %8186  ;;  %v8291_v11 = vsel %vm2142_vm14, %v8234_v19, %v8230_v43 }
0x1b2f   :  { %v8190_v10 = vpop.permute.xlu0 %8189  ;;  %v8238_v46 = vrot.slane %v8187_v57, %v11245_v31 }
0x1b30   :  { %v8242_v62 = vrot.slane %v8190_v10, %v11245_v31 }
0x1b31   :  { %v8292_v41 = vsel %vm2144_vm15, %v8238_v46, %v8291_v11 }
0x1b32   :  { %v8193_v24 = vpop.permute.xlu1 %8192  ;;  %v8293_v12 = vsel %vm2146_vm2, %v8242_v62, %v8292_v41 }
0x1b33   :  { %v8196_v53 = vpop.permute.xlu0 %8195  ;;  %v8246_v51 = vrot.slane %v8193_v24, %v11245_v31 }
0x1b34   :  { %v8250_v0 = vrot.slane %v8196_v53, %v11245_v31 }
0x1b35   :  { %v8294_v36 = vsel %vm2148_vm3, %v8246_v51, %v8293_v12 }
0x1b36   :  { %v8205_v1 = vpop.permute.xlu1 %8204  ;;  %v8295_v29 = vsel %vm2150_vm4, %v8250_v0, %v8294_v36 }
0x1b37   :  { %v8208_v60 = vpop.permute.xlu0 %8207  ;;  %v8262_v20 = vrot.slane %v8205_v1, %v11245_v31 }
0x1b38   :  { %v8266_v50 = vrot.slane %v8208_v60, %v11245_v31 }
0x1b3a   :  { %v8199_v54 = vpop.permute.xlu1 %8198  ;;  %v8298_v22 = vsel %vm2142_vm14, %v8266_v50, %v8262_v20 }
0x1b3b   :  { %v8211_v38 = vpop.permute.xlu0 %8210  ;;  %v8254_v4 = vrot.slane %v8199_v54, %v11245_v31 }
0x1b3c   :  { %v8270_v17 = vrot.slane %v8211_v38, %v11245_v31 }
0x1b3d   :  { %v8296_v37 = vsel %vm2152_vm5, %v8254_v4, %v8295_v29 }
0x1b3e   :  { %v8202_v47 = vpop.permute.xlu1 %8201  ;;  %v8299_v14 = vsel %vm2144_vm15, %v8270_v17, %v8298_v22 }
0x1b3f   :  { %v8214_v59 = vpop.permute.xlu0 %8213  ;;  %v8258_v55 = vrot.slane %v8202_v47, %v11245_v31 }
0x1b40   :  { %v8274_v27 = vrot.slane %v8214_v59, %v11245_v31 }
0x1b41   :  { %v8297_v49 = vsel %vm2154_vm7, %v8258_v55, %v8296_v37 }
0x1b42   :  { %v8217_v5 = vpop.permute.xlu1 %8216  ;;  %v8307_v8 = vsel %vm1243_vm6, %v8297_v49, 0.0  ;;  %v8300_v61 = vsel %vm2146_vm2, %v8274_v27, %v8299_v14 }
0x1b43   :  { %v8220_v25 = vpop.permute.xlu0 %8219  ;;  %v8278_v26 = vrot.slane %v8217_v5, %v11245_v31  ;;  %8308 = vadd.xlane.f32.xlu1 %v8307_v8 }
0x1b44   :  { %v8282_v57 = vrot.slane %v8220_v25, %v11245_v31 }
0x1b45   :  { %v8301_v10 = vsel %vm2148_vm3, %v8278_v26, %v8300_v61 }
0x1b46   :  { %v8223_v24 = vpop.permute.xlu1 %8222  ;;  %v8302_v46 = vsel %vm2150_vm4, %v8282_v57, %v8301_v10 }
0x1b47   :  { %v8226_v19 = vpop.permute.xlu0 %8225  ;;  %v8286_v43 = vrot.slane %v8223_v24, %v11245_v31 }
0x1b48   :  { %v8290_v53 = vrot.slane %v8226_v19, %v11245_v31 }
0x1b49   :  { %v8303_v1 = vsel %vm2152_vm5, %v8286_v43, %v8302_v46 }
0x1b4a   :  { %v8304_v11 = vsel %vm2154_vm7, %v8290_v53, %v8303_v1 }
0x1b4b   :  { %v8310_v62 = vsel %vm1243_vm6, %v8304_v11, 0.0 }
0x1b4c   :  { %8311 = vadd.xlane.f32.xlu0 %v8310_v62 }
0x1b7c   :  { %v14013_v60 = vpop.f32.mrb[100].mxu0 }
0x1b7d   :  { %v8654_v41 = vpop.f32.mrb[101].mxu0 }
0x1b7e   :  { %9750 = vmatpush3.msra.mxu0 %v8654_v41 }
0x1b7f   :  { %9754 = vmatprep.subr.mxu0 %v14139_v16 }
0x1bd0   :  { %v8309_v51 = vpop.xlane.xlu1 %8308 }
0x1bd1   :  { %v8322_v54 = vrot.slane %v8309_v51, %v10898_v58  ;;  %v8318_v0 = vrot.slane %v8309_v51, %v10164_v15  ;;  %v8326_v12 = vrot.slane %v8309_v51, %v10901_v3  ;;  %v8330_v38 = vrot.slane %v8309_v51, %v10908_v9 }
0x1bd2   :  { %v8334_v36 = vrot.slane %v8309_v51, %v10911_v32  ;;  %v8338_v4 = vrot.slane %v8309_v51, %v10918_v23  ;;  %v8342_v59 = vrot.slane %v8309_v51, %v11136_v56 }
0x1bd3   :  { %10055 = vrcp.f32 %v8322_v54 }
0x1bd4   :  { %10057 = vrcp.f32 %v8318_v0 }
0x1bd5   :  { %10059 = vrcp.f32 %v8326_v12 }
0x1bd6   :  { %10061 = vrcp.f32 %v8330_v38 }
0x1bd7   :  { %10063 = vrcp.f32 %v8334_v36 }
0x1bd8   :  { %10065 = vrcp.f32 %v8338_v4 }
0x1bd9   :  { %v8312_v50 = vpop.xlane.xlu0 %8311 }
0x1bda   :  { %v8350_v20 = vrot.slane %v8312_v50, %v10164_v15  ;;  %v8354_v47 = vrot.slane %v8312_v50, %v10898_v58  ;;  %v8358_v27 = vrot.slane %v8312_v50, %v10901_v3  ;;  %v8346_v15 = vrot.slane %v8309_v51, %v11141_v6 }
0x1bdb   :  { %v8362_v5 = vrot.slane %v8312_v50, %v10908_v9  ;;  %v8366_v3 = vrot.slane %v8312_v50, %v10911_v32  ;;  %v8370_v25 = vrot.slane %v8312_v50, %v10918_v23  ;;  %v8374_v9 = vrot.slane %v8312_v50, %v11136_v56 }
0x1bdc   :  { %10067 = vrcp.f32 %v8350_v20  ;;  %v8378_v57 = vrot.slane %v8312_v50, %v11141_v6 }
0x1bdd   :  { %v10056_v17 = vpop.eup %10055  ;;  %10069 = vrcp.f32 %v8354_v47 }
0x1bde   :  { %v10058_v55 = vpop.eup %10057  ;;  %v8398_v29 = vmul.f32 %v10056_v17, %v13922_v52  ;;  %10071 = vrcp.f32 %v8342_v59 }
0x1bdf   :  { %v10060_v37 = vpop.eup %10059  ;;  %v8396_v49 = vmul.f32 %v10058_v55, %v13917_v42  ;;  %10073 = vrcp.f32 %v8358_v27 }
0x1be0   :  { %v10062_v22 = vpop.eup %10061  ;;  %8447 = vperm.xlu1 %9867, %v8398_v29   ;;  %v8400_v58 = vmul.f32 %v10060_v37, %v13933_v39  ;;  %10075 = vrcp.f32 %v8346_v15 }
0x1be1   :  { %8444 = vperm.xlu0 %9868, %v8396_v49   ;;  %v10064_v8 = vpop.eup %10063  ;;  %v8402_v52 = vmul.f32 %v10062_v22, %v13935_v2  ;;  %10077 = vrcp.f32 %v8362_v5 }
0x1be2   :  { %v10066_v14 = vpop.eup %10065  ;;  %v8404_v42 = vmul.f32 %v10064_v8, %v13943_v18  ;;  %10079 = vrcp.f32 %v8366_v3 }
0x1be3   :  { %v8406_v39 = vmul.f32 %v10066_v14, %v13945_v30  ;;  %10081 = vrcp.f32 %v8370_v25 }
0x1be4   :  { %8450 = vperm.xlu1 %9867, %v8400_v58   ;;  %10083 = vrcp.f32 %v8374_v9 }
0x1be5   :  { %8453 = vperm.xlu0 %9868, %v8402_v52   ;;  %10085 = vrcp.f32 %v8378_v57 }
0x1be6   :  { %v10068_v26 = vpop.eup %10067 }
0x1be7   :  { %v10070_v61 = vpop.eup %10069  ;;  %v8412_v2 = vmul.f32 %v10068_v26, %v13951_v34 }
0x1be8   :  { %8456 = vperm.xlu1 %9867, %v8404_v42   ;;  %v10072_v32 = vpop.eup %10071  ;;  %v8414_v18 = vmul.f32 %v10070_v61, %v13953_v44 }
0x1be9   :  { %8459 = vperm.xlu0 %9868, %v8406_v39   ;;  %v10074_v10 = vpop.eup %10073  ;;  %v8408_v23 = vmul.f32 %v10072_v32, %v13957_v7 }
0x1bea   :  { %v10076_v30 = vpop.eup %10075  ;;  %v8416_v24 = vmul.f32 %v10074_v10, %v13959_v40 }
0x1beb   :  { %v10078_v19 = vpop.eup %10077  ;;  %v8410_v56 = vmul.f32 %v10076_v30, %v13963_v48 }
0x1bec   :  { %8468 = vperm.xlu1 %9867, %v8412_v2   ;;  %v10080_v34 = vpop.eup %10079  ;;  %v8418_v6 = vmul.f32 %v10078_v19, %v13965_v13 }
0x1bed   :  { %8471 = vperm.xlu0 %9868, %v8414_v18   ;;  %v10082_v43 = vpop.eup %10081  ;;  %v8420_v44 = vmul.f32 %v10080_v34, %v13969_v63 }
0x1bee   :  { %v10084_v53 = vpop.eup %10083  ;;  %v8422_v7 = vmul.f32 %v10082_v43, %v13971_v28 }
0x1bef   :  { %v10086_v46 = vpop.eup %10085  ;;  %v8424_v40 = vmul.f32 %v10084_v53, %v13975_v33 }
0x1bf0   :  { %8462 = vperm.xlu1 %9867, %v8408_v23   ;;  %v8426_v1 = vmul.f32 %v10086_v46, %v13977_v45 }
0x1bf1   :  { %8474 = vperm.xlu0 %9868, %v8416_v24  }
0x1bf4   :  { %8465 = vperm.xlu1 %9867, %v8410_v56  }
0x1bf5   :  { %8477 = vperm.xlu0 %9868, %v8418_v6  }
0x1bf8   :  { %8480 = vperm.xlu1 %9867, %v8420_v44  }
0x1bf9   :  { %8483 = vperm.xlu0 %9868, %v8422_v7  }
0x1bfc   :  { %8486 = vperm.xlu1 %9867, %v8424_v40  }
0x1bfd   :  { %8489 = vperm.xlu0 %9868, %v8426_v1  }
0x1c5f   :  { %v8448_v48 = vpop.permute.xlu1 %8447 }
0x1c60   :  { %v8445_v11 = vpop.permute.xlu0 %8444  ;;  %v8498_v51 = vrot.slane %v8448_v48, %v11245_v31 }
0x1c61   :  { %v8494_v63 = vrot.slane %v8445_v11, %v11245_v31 }
0x1c63   :  { %v8451_v13 = vpop.permute.xlu1 %8450  ;;  %v8555_v12 = vsel %vm2142_vm14, %v8498_v51, %v8494_v63 }
0x1c64   :  { %v8454_v62 = vpop.permute.xlu0 %8453  ;;  %v8502_v28 = vrot.slane %v8451_v13, %v11245_v31 }
0x1c65   :  { %v8506_v33 = vrot.slane %v8454_v62, %v11245_v31 }
0x1c66   :  { %v8556_v38 = vsel %vm2144_vm15, %v8502_v28, %v8555_v12 }
0x1c67   :  { %v8457_v41 = vpop.permute.xlu1 %8456  ;;  %v8557_v50 = vsel %vm2146_vm2, %v8506_v33, %v8556_v38 }
0x1c68   :  { %v8460_v54 = vpop.permute.xlu0 %8459  ;;  %v8510_v36 = vrot.slane %v8457_v41, %v11245_v31 }
0x1c69   :  { %v8514_v20 = vrot.slane %v8460_v54, %v11245_v31 }
0x1c6a   :  { %v8558_v17 = vsel %vm2148_vm3, %v8510_v36, %v8557_v50 }
0x1c6b   :  { %v8469_v0 = vpop.permute.xlu1 %8468  ;;  %v8559_v37 = vsel %vm2150_vm4, %v8514_v20, %v8558_v17 }
0x1c6c   :  { %v8472_v45 = vpop.permute.xlu0 %8471  ;;  %v8526_v55 = vrot.slane %v8469_v0, %v11245_v31 }
0x1c6d   :  { %v8530_v29 = vrot.slane %v8472_v45, %v11245_v31 }
0x1c6f   :  { %v8463_v4 = vpop.permute.xlu1 %8462  ;;  %v8562_v52 = vsel %vm2142_vm14, %v8530_v29, %v8526_v55 }
0x1c70   :  { %v8475_v47 = vpop.permute.xlu0 %8474  ;;  %v8518_v59 = vrot.slane %v8463_v4, %v11245_v31 }
0x1c71   :  { %v8534_v49 = vrot.slane %v8475_v47, %v11245_v31 }
0x1c72   :  { %v8560_v58 = vsel %vm2152_vm5, %v8518_v59, %v8559_v37 }
0x1c73   :  { %v8466_v27 = vpop.permute.xlu1 %8465  ;;  %v8563_v42 = vsel %vm2144_vm15, %v8534_v49, %v8562_v52 }
0x1c74   :  { %v8522_v22 = vrot.slane %v8466_v27, %v11245_v31  ;;  %v8478_v15 = vpop.permute.xlu0 %8477 }
0x1c75   :  { %v8538_v5 = vrot.slane %v8478_v15, %v11245_v31 }
0x1c76   :  { %v8561_v8 = vsel %vm2154_vm7, %v8522_v22, %v8560_v58 }
0x1c77   :  { %v8571_v14 = vsub.f32 %v12830_v21, %v8561_v8  ;;  %v8481_v3 = vpop.permute.xlu1 %8480  ;;  %v8564_v39 = vsel %vm2146_vm2, %v8538_v5, %v8563_v42 }
0x1c78   :  { %v8542_v25 = vrot.slane %v8481_v3, %v11245_v31  ;;  %v8484_v26 = vpop.permute.xlu0 %8483 }
0x1c79   :  { %v8546_v61 = vrot.slane %v8484_v26, %v11245_v31  ;;  %9752 = vmatmul.mubr.msk.f32.vlgmr.msra.gmra.mrb[102].mxu0 %vm1243_vm6, %v8571_v14 }
0x1c7a   :  { %v8565_v9 = vsel %vm2148_vm3, %v8542_v25, %v8564_v39  ;;  %9755 = vmatpush3.msra.mxu0 %v14013_v60  ;;  %9756 = vmatprep.mubr.msk.f32.mxu0 %vm14157_vm12, %v14139_v16  ;;  %v9066_v16 = vld [vmem:[%s14102_s1 + $0x2f8] ss:$0 sm:$0xff] }
0x1c7b   :  { %v8487_v21 = vpop.permute.xlu1 %8486  ;;  %v8566_v32 = vsel %vm2150_vm4, %v8546_v61, %v8565_v9 }
0x1c7c   :  { %v8550_v2 = vrot.slane %v8487_v21, %v11245_v31  ;;  %v8490_v57 = vpop.permute.xlu0 %8489 }
0x1c7d   :  { %v8554_v18 = vrot.slane %v8490_v57, %v11245_v31 }
0x1c7e   :  { %v8567_v10 = vsel %vm2152_vm5, %v8550_v2, %v8566_v32 }
0x1c7f   :  { %v8568_v23 = vsel %vm2154_vm7, %v8554_v18, %v8567_v10 }
0x1c80   :  { %v8572_v30 = vsub.f32 %v12850_v35, %v8568_v23 }
0x1c82   :  { %9757 = vmatmul.mubr.msk.f32.vlgmr.msra.gmra.mrb[104].mxu0 %vm1243_vm6, %v8572_v30 }
0x1d4c   :  { %v8736_v60 = vpop.f32.mrb[102].mxu0 }
0x1d4d   :  { %v9753_v24 = vpop.f32.mrb[103].mxu0  ;;  %v8737_v31 = vadd.f32 %v9066_v16, %v8736_v60 }
0x1d55   :  { %v8809_v19 = vpop.f32.mrb[104].mxu0 }
0x1d56   :  { %v8810_v56 = vadd.f32 %v9066_v16, %v8809_v19  ;;  %v9758_v34 = vpop.f32.mrb[105].mxu0 }
0x1d58   :  { %v8815_v6 = vrot.slane %v8810_v56, 7 }
0x1d5a   :  { %v8816_v43 = vsel %vm2142_vm14, %v8815_v6, %v8737_v31 }
0x1d5b   :  { %8819 = vst.msk [vmem:[#allocation2] sm:$0x3] %vm8818_vm1, %v8816_v43 }
0x1d5c   :  { %10102 = shalt.err (!%p10099_p4)
}
0x1d5d   :  { %s10103_s26 = scalar_lea.hbm %s14103_s2, 32 }
0x1d5e   :  { %p10104_p5 = scmp.ne.s32.totalorder %s14103_s2, %s10103_s26  ;;  %p10107_p6 = scmp.lt.u32.totalorder %s10103_s26, %s14103_s2 }
0x1d60   :  { %p10109_p7 = pnand %p10107_p6, %p10104_p5 }
0x1d62   :  { %10112 = shalt.err (!%p10109_p7)
}
0x1d63   :  { %8829 = dma.vmem_to_hbm [thread:$0]  %s8827_s23, 32, %s14103_s2, [#allocation3]  }
0x1d64   :  { %10113 = dma.done.wait [#allocation3], 32  }
0x1d65   :  { %10114 = vsyncadd [#allocation3], 4294967264 }
0x1d66   :  { %8833 = vsyncpa [#allocation3], 1 }

</bundles_post_ra>
